<compile_context>
chip_gen: v6e
topology: v6e:2x2x1
jax: 0.10.0
libtpu: 0.0.40
codegen_flags: <defaults>
</compile_context>

<pallas_src>
import functools

import jax
import jax.numpy as jnp
from jax.experimental import pallas as pl
from jax.experimental.pallas import tpu as pltpu


_VMEM_LIMIT = 32 * 1024 * 1024   # safe on v5e/v6e (128 MiB phys) and v7x (64 MiB phys)
_MAX_TILE_M = 512                # rows per M tile (whole M fits at test sizes)


# --------------------------------------------------------------------------
# Fused conv(+diff) -> stats -> BN -> (ReLU) kernel: ONE pallas_call per layer
# --------------------------------------------------------------------------

def _fused_conv_bn_kernel(*refs, n_terms, tm, m_true, m_pad, eps, relu):
    """refs = (p_0, w_0, ..., p_{n-1}, w_{n-1}, bias, gamma, beta, out, stats)

      p_j   : [tm, K_j]       im2col patch tile for term j
      w_j   : [K_j, C]        weight (sign and channel placement folded in)
      bias  : [1, C]          summed signed bias
      gamma : [1, C], beta : [1, C]
      out   : [m_pad, C]      VMEM-resident output (constant index_map)
      stats : [2, C]          VMEM scratch: row0 = sum, row1 = sum of squares
    """
    i = pl.program_id(0)
    last = pl.num_programs(0) - 1

    bias_ref = refs[2 * n_terms]
    gamma_ref = refs[2 * n_terms + 1]
    beta_ref = refs[2 * n_terms + 2]
    out_ref = refs[2 * n_terms + 3]
    stats_ref = refs[2 * n_terms + 4]

    @pl.when(i == 0)
    def _init():
        stats_ref[...] = jnp.zeros_like(stats_ref)

    # ---- conv terms (MXU) + bias -------------------------------------------
    acc = jnp.dot(refs[0][...], refs[1][...], preferred_element_type=jnp.float32)
    for t in range(1, n_terms):
        acc = acc + jnp.dot(refs[2 * t][...], refs[2 * t + 1][...],
                            preferred_element_type=jnp.float32)
    y = acc + bias_ref[...]

    # ---- write pre-BN activation into the resident output block ------------
    if m_pad == tm:
        out_ref[...] = y
    else:
        start = pl.multiple_of(i * tm, tm)
        out_ref[pl.ds(start, tm), :] = y

    # ---- accumulate per-channel statistics (mask rows past true M) ---------
    if m_pad == m_true:
        yv = y
    else:
        row = jax.lax.broadcasted_iota(jnp.int32, (tm, 1), 0)
        valid = ((i * tm + row) < m_true).astype(jnp.float32)
        yv = y * valid
    stats_ref[0:1, :] = stats_ref[0:1, :] + jnp.sum(yv, axis=0, keepdims=True)
    stats_ref[1:2, :] = stats_ref[1:2, :] + jnp.sum(yv * yv, axis=0, keepdims=True)

    # ---- finalize: training-mode BatchNorm (+ReLU) in place ----------------
    @pl.when(i == last)
    def _finalize():
        inv_m = 1.0 / float(m_true)
        mean = stats_ref[0:1, :] * inv_m
        var = jnp.maximum(stats_ref[1:2, :] * inv_m - mean * mean, 0.0)
        scale = gamma_ref[...] * jax.lax.rsqrt(var + eps)
        shift = beta_ref[...] - mean * scale
        o = out_ref[...] * scale + shift
        if relu:
            o = jnp.maximum(o, 0.0)
        out_ref[...] = o


# --------------------------------------------------------------------------
# Wrapper: builds im2col patches + folded weights, launches one pallas_call
# --------------------------------------------------------------------------

def _choose_tiling(m):
    """Biggest tile that fits the budget; single tile whenever M <= 512."""
    if m <= _MAX_TILE_M:
        tm = max(8, ((m + 7) // 8) * 8)
        return tm, tm
    tm = _MAX_TILE_M
    m_pad = ((m + tm - 1) // tm) * tm
    return tm, m_pad


def _im2col_nhwc(x, kh, kw, stride, padding, dilation):
    """x: [N, H, W, C] -> patches [N*OH*OW, kh*kw*C] (row order n, oh, ow)."""
    n, h, w, c = x.shape
    oh = (h + 2 * padding - dilation * (kh - 1) - 1) // stride + 1
    ow = (w + 2 * padding - dilation * (kw - 1) - 1) // stride + 1
    xp = jnp.pad(x, ((0, 0), (padding, padding), (padding, padding), (0, 0)))
    cols = []
    for ih in range(kh):
        for iw in range(kw):
            h0 = ih * dilation
            w0 = iw * dilation
            cols.append(xp[:, h0:h0 + (oh - 1) * stride + 1:stride,
                           w0:w0 + (ow - 1) * stride + 1:stride, :])
    patches = jnp.concatenate(cols, axis=-1)            # [N, OH, OW, kh*kw*C]
    return patches.reshape(n * oh * ow, kh * kw * c), oh, ow


def fused_conv_bn_act(x, terms, gamma, beta, *, eps=1e-5, relu=True):
    """x: [N,H,W,Cin] (NHWC).

    terms: list of dicts {w:[Co,Cin,KH,KW] (OIHW), b:[Co] or None, padding,
           dilation, sign (+-1), out_offset (channel offset of this term)}.
    Computes  sum_j sign_j * conv_j(x)  placed at the given channel offsets,
    then training-mode BatchNorm(gamma, beta) and optional ReLU, all in a
    single fused Pallas call.  Returns [N, OH, OW, Cout] with Cout = len(gamma).
    """
    n = x.shape[0]
    cout = int(gamma.shape[0])
    cout_k = max(8, ((cout + 7) // 8) * 8)

    patches, w2ds = [], []
    bias = jnp.zeros((cout_k,), jnp.float32)
    oh = ow = None
    for t in terms:
        w = t['w'].astype(jnp.float32)
        co, cin, kh, kw = w.shape
        off = int(t.get('out_offset', 0))
        sign = float(t.get('sign', 1.0))
        assert off + co <= cout
        p, oh_i, ow_i = _im2col_nhwc(x, kh, kw, 1, t['padding'], t['dilation'])
        assert oh is None or (oh, ow) == (oh_i, ow_i)
        oh, ow = oh_i, ow_i
        w2d = jnp.transpose(w, (2, 3, 1, 0)).reshape(kh * kw * cin, co) * sign
        w2d = jnp.pad(w2d, ((0, 0), (off, cout_k - off - co)))
        patches.append(p)
        w2ds.append(w2d)
        if t.get('b') is not None:
            b = t['b'].astype(jnp.float32) * sign
            bias = bias + jnp.pad(b, (off, cout_k - off - co))

    m_true = n * oh * ow
    tm, m_pad = _choose_tiling(m_true)
    num_tiles = m_pad // tm
    if m_pad != m_true:
        patches = [jnp.pad(p, ((0, m_pad - m_true), (0, 0))) for p in patches]

    gamma_p = jnp.pad(gamma.astype(jnp.float32), (0, cout_k - cout)).reshape(1, cout_k)
    beta_p = jnp.pad(beta.astype(jnp.float32), (0, cout_k - cout)).reshape(1, cout_k)

    in_specs, args = [], []
    for p, w2d in zip(patches, w2ds):
        k = p.shape[1]
        in_specs.append(pl.BlockSpec((tm, k), lambda i: (i, 0)))
        in_specs.append(pl.BlockSpec((k, cout_k), lambda i: (0, 0)))
        args += [p, w2d]
    for v in (bias.reshape(1, cout_k), gamma_p, beta_p):
        in_specs.append(pl.BlockSpec((1, cout_k), lambda i: (0, 0)))
        args.append(v)

    flops = sum(2 * m_pad * p.shape[1] * cout_k for p in patches)
    bytes_accessed = (sum(p.size * 4 for p in patches)
                      + sum(w.size * 4 for w in w2ds)
                      + m_pad * cout_k * 4)
    cost = pl.CostEstimate(flops=flops, transcendentals=0,
                           bytes_accessed=bytes_accessed)

    out = pl.pallas_call(
        functools.partial(_fused_conv_bn_kernel, n_terms=len(terms), tm=tm,
                          m_true=m_true, m_pad=m_pad, eps=eps, relu=relu),
        out_shape=jax.ShapeDtypeStruct((m_pad, cout_k), jnp.float32),
        grid_spec=pltpu.PrefetchScalarGridSpec(
            num_scalar_prefetch=0,
            grid=(num_tiles,),
            in_specs=in_specs,
            # Output is VMEM-resident across the whole (serial) grid; one HBM
            # writeback happens after the last step.
            out_specs=pl.BlockSpec((m_pad, cout_k), lambda i: (0, 0)),
            scratch_shapes=[pltpu.VMEM((2, cout_k), jnp.float32)],
        ),
        compiler_params=pltpu.CompilerParams(
            dimension_semantics=("arbitrary",),
            vmem_limit_bytes=_VMEM_LIMIT),
        cost_estimate=cost,
    )(*args)

    out = out[:m_true, :cout].reshape(n, oh, ow, cout)
    return out


# --------------------------------------------------------------------------
# Pure-JAX reference for the same fused op (no Pallas) -- used for checking
# --------------------------------------------------------------------------

def ref_conv_bn_act(x, terms, gamma, beta, *, eps=1e-5, relu=True):
    cout = int(gamma.shape[0])
    y = None
    for t in terms:
        w = t['w'].astype(jnp.float32)
        co = w.shape[0]
        off = int(t.get('out_offset', 0))
        sign = float(t.get('sign', 1.0))
        conv = jax.lax.conv_general_dilated(
            x, jnp.transpose(w, (2, 3, 1, 0)),
            window_strides=(1, 1),
            padding=[(t['padding'], t['padding'])] * 2,
            rhs_dilation=(t['dilation'], t['dilation']),
            dimension_numbers=("NHWC", "HWIO", "NHWC"))
        if t.get('b') is not None:
            conv = conv + t['b'].reshape(1, 1, 1, -1)
        conv = conv * sign
        conv = jnp.pad(conv, ((0, 0), (0, 0), (0, 0), (off, cout - off - co)))
        y = conv if y is None else y + conv
    mean = jnp.mean(y, axis=(0, 1, 2), keepdims=True)
    var = jnp.mean((y - mean) ** 2, axis=(0, 1, 2), keepdims=True)
    out = gamma.reshape(1, 1, 1, -1) * (y - mean) * jax.lax.rsqrt(var + eps) \
        + beta.reshape(1, 1, 1, -1)
    if relu:
        out = jnp.maximum(out, 0.0)
    return out


# --------------------------------------------------------------------------
# Module forward (NHWC internally); conv_fn selects Pallas vs reference path.
# CBAM gates (pooling, tiny MLPs, 7x7 single-channel conv, sigmoid scaling)
# stay in plain jnp: they are pure launch overhead on the Pallas path.
# --------------------------------------------------------------------------

def channel_gate(x, p):
    pooled = jnp.mean(x, axis=(1, 2))                           # [N, C]
    h = jnp.maximum(pooled @ p['w1'].T + p['b1'], 0.0)
    att = h @ p['w2'].T + p['b2']
    return x * jax.nn.sigmoid(att)[:, None, None, :]


def spatial_gate(x, p, eps=1e-5):
    comp = jnp.mean(x, axis=3, keepdims=True)                   # [N, H, W, 1]
    w = p['conv']['w'].astype(jnp.float32)                      # [1, 1, 7, 7]
    s = jax.lax.conv_general_dilated(
        comp, jnp.transpose(w, (2, 3, 1, 0)),
        window_strides=(1, 1), padding=[(3, 3), (3, 3)],
        dimension_numbers=("NHWC", "HWIO", "NHWC"))
    mean = jnp.mean(s, axis=(0, 1, 2), keepdims=True)
    var = jnp.mean((s - mean) ** 2, axis=(0, 1, 2), keepdims=True)
    s = p['bn']['gamma'].reshape(1, 1, 1, -1) * (s - mean) * jax.lax.rsqrt(var + eps) \
        + p['bn']['beta'].reshape(1, 1, 1, -1)
    return x * jax.nn.sigmoid(s)


def cbam(x, p):
    x = channel_gate(x, p['channel'])
    return spatial_gate(x, p['spatial'])


def contrast_block(x, p, d1, d2, conv_fn):
    # ccl1 (channels 0:co) and ccl2 (channels co:2co) fused into ONE call:
    #  term A: shared 3x3/pad1/dil1 patches, weights of local_1|local_2 stacked
    #  term B: context_1 (dil d1), sign -1, placed at offset 0
    #  term C: context_2 (dil d2), sign -1, placed at offset co
    co = p['local_1']['w'].shape[0]
    w_local = jnp.concatenate([p['local_1']['w'], p['local_2']['w']], axis=0)
    b_local = jnp.concatenate([p['local_1']['b'], p['local_2']['b']], axis=0)
    terms = [
        {'w': w_local, 'b': b_local, 'padding': 1, 'dilation': 1,
         'sign': 1.0, 'out_offset': 0},
        {'w': p['context_1']['w'], 'b': p['context_1']['b'],
         'padding': d1, 'dilation': d1, 'sign': -1.0, 'out_offset': 0},
        {'w': p['context_2']['w'], 'b': p['context_2']['b'],
         'padding': d2, 'dilation': d2, 'sign': -1.0, 'out_offset': co},
    ]
    gamma = jnp.concatenate([p['bn1']['gamma'], p['bn2']['gamma']])
    beta = jnp.concatenate([p['bn1']['beta'], p['bn2']['beta']])
    ccl = conv_fn(x, terms, gamma, beta, relu=True)             # == cat(ccl1, ccl2)
    return cbam(ccl, p['cbam'])


def contrast_module_deep(x_nchw, params, d1, d2, conv_fn):
    x = jnp.transpose(x_nchw, (0, 2, 3, 1))                     # NCHW -> NHWC once
    c1 = conv_fn(x, [{'w': params['conv1']['w'], 'b': params['conv1']['b'],
                      'padding': 1, 'dilation': 1, 'sign': 1.0, 'out_offset': 0}],
                 params['conv1']['gamma'], params['conv1']['beta'], relu=True)
    c2 = conv_fn(c1, [{'w': params['conv2']['w'], 'b': params['conv2']['b'],
                       'padding': 1, 'dilation': 1, 'sign': 1.0, 'out_offset': 0}],
                 params['conv2']['gamma'], params['conv2']['beta'], relu=True)
    b1 = contrast_block(c2, params['block1'], d1, d2, conv_fn)
    b2 = contrast_block(b1, params['block2'], d1, d2, conv_fn)
    b3 = contrast_block(b2, params['block3'], d1, d2, conv_fn)
    b4 = contrast_block(b3, params['block4'], d1, d2, conv_fn)
    cat = jnp.concatenate([b1, b2, b3, b4], axis=-1)
    out = cbam(cat, params['cbam'])
    return jnp.transpose(out, (0, 3, 1, 2))                     # NHWC -> NCHW once


# --------------------------------------------------------------------------
# Deterministic synthetic parameters
# --------------------------------------------------------------------------

def make_params(key, planes):
    inpl, half, quarter = planes, planes // 2, planes // 4
    keys = list(jax.random.split(key, 128))
    kidx = [0]

    def nk():
        k = keys[kidx[0]]
        kidx[0] += 1
        return k

    def conv_p(cin, co, k=3, bias=True):
        fan = cin * k * k
        w = jax.random.normal(nk(), (co, cin, k, k), jnp.float32) / jnp.sqrt(fan)
        b = 0.05 * jax.random.normal(nk(), (co,), jnp.float32) if bias else None
        return {'w': w, 'b': b}

    def bn_p(co, tag):
        idx = jnp.arange(co, dtype=jnp.float32)
        return {'gamma': 1.0 + 0.05 * jnp.cos(idx + tag),
                'beta': 0.02 * jnp.sin(idx + tag)}

    def cbam_p(c):
        hid = max(c // 16, 1)
        return {'channel': {'w1': jax.random.normal(nk(), (hid, c), jnp.float32) / jnp.sqrt(c),
                            'b1': 0.01 * jax.random.normal(nk(), (hid,), jnp.float32),
                            'w2': jax.random.normal(nk(), (c, hid), jnp.float32) / jnp.sqrt(hid),
                            'b2': 0.01 * jax.random.normal(nk(), (c,), jnp.float32)},
                'spatial': {'conv': conv_p(1, 1, 7, bias=False),
                            'bn': bn_p(1, 7.0)}}

    def block_p(c):
        co = c // 2
        return {'local_1': conv_p(c, co), 'context_1': conv_p(c, co),
                'local_2': conv_p(c, co), 'context_2': conv_p(c, co),
                'bn1': bn_p(co, 1.0), 'bn2': bn_p(co, 2.0),
                'cbam': cbam_p(c)}

    return {'conv1': {**conv_p(inpl, half), **bn_p(half, 3.0)},
            'conv2': {**conv_p(half, quarter), **bn_p(quarter, 4.0)},
            'block1': block_p(quarter), 'block2': block_p(quarter),
            'block3': block_p(quarter), 'block4': block_p(quarter),
            'cbam': cbam_p(inpl)}


# --------------------------------------------------------------------------
# main
# --------------------------------------------------------------------------

if __name__ == "__main__":
    # Contrast_Module_Deep(planes=64, d1=2, d2=4); input [N, planes, H, W].
    # (planes must be >= 64 so the inner CBAM reduction 16 stays >= 1.)
    PLANES, D1, D2 = 64, 2, 4
    N, H, W = 2, 16, 16

    key = jax.random.PRNGKey(0)
    kx, kp = jax.random.split(key)
    x = jax.random.normal(kx, (N, PLANES, H, W), dtype=jnp.float32)
    params = make_params(kp, PLANES)

    pallas_fwd = jax.jit(functools.partial(
        contrast_module_deep, d1=D1, d2=D2, conv_fn=fused_conv_bn_act))
    ref_fwd = jax.jit(functools.partial(
        contrast_module_deep, d1=D1, d2=D2, conv_fn=ref_conv_bn_act))

    out = jax.block_until_ready(pallas_fwd(x, params))
    ref = jax.block_until_ready(ref_fwd(x, params))

    assert out.shape == (N, PLANES, H, W), out.shape
    assert bool(jnp.all(jnp.isfinite(out)))
    err = float(jnp.max(jnp.abs(out - ref)))
    assert err < 2e-2, err
    print("KERNEL_OK")
</pallas_src>

<mosaic_0001>
module attributes {stable_mosaic.version = 11 : i64} {
  func.func @_fused_conv_bn_kernel(%arg0: i32, %arg1: memref<512x576xf32, #tpu.memory_space<vmem>>, %arg2: memref<576x32xf32, #tpu.memory_space<vmem>>, %arg3: memref<1x32xf32, #tpu.memory_space<vmem>>, %arg4: memref<1x32xf32, #tpu.memory_space<vmem>>, %arg5: memref<1x32xf32, #tpu.memory_space<vmem>>, %arg6: memref<512x32xf32, #tpu.memory_space<vmem>>, %arg7: memref<2x32xf32, #tpu.memory_space<vmem>>) attributes {dimension_semantics = [#tpu.dimension_semantics<arbitrary>], iteration_bounds = array<i64: 1>, scalar_prefetch = 0 : i64, scratch_operands = 1 : i64, tpu.core_type = #tpu.core_type<tc>, window_params = [{transform_indices = @transform_0, window_bounds = array<i64: 512, 576>}, {pipeline_mode = #tpu.pipeline_mode<synchronous>, transform_indices = @transform_1, window_bounds = array<i64: 576, 32>}, {pipeline_mode = #tpu.pipeline_mode<synchronous>, transform_indices = @transform_2, window_bounds = array<i64: 1, 32>}, {pipeline_mode = #tpu.pipeline_mode<synchronous>, transform_indices = @transform_3, window_bounds = array<i64: 1, 32>}, {pipeline_mode = #tpu.pipeline_mode<synchronous>, transform_indices = @transform_4, window_bounds = array<i64: 1, 32>}, {pipeline_mode = #tpu.pipeline_mode<synchronous>, transform_indices = @transform_5, window_bounds = array<i64: 512, 32>}]} {
    %c0_i32 = arith.constant 0 : i32
    %0 = arith.cmpi eq, %arg0, %c0_i32 : i32
    %1 = arith.extui %0 : i1 to i32
    %c0_i32_0 = arith.constant 0 : i32
    %2 = arith.cmpi ne, %1, %c0_i32_0 : i32
    scf.if %2 {
      %cst_19 = arith.constant 0.000000e+00 : f32
      %24 = vector.broadcast %cst_19 : f32 to vector<2x32xf32>
      %c0_20 = arith.constant 0 : index
      %c0_21 = arith.constant 0 : index
      %25 = vector.load %arg7[%c0_20, %c0_21] : memref<2x32xf32, #tpu.memory_space<vmem>>, vector<2x32xf32>
      tpu.vector_store %arg7[%c0_20, %c0_21], %24 {strides = array<i32>} : memref<2x32xf32, #tpu.memory_space<vmem>>, vector<2x32xf32>,
    } else {
    }
    %c0 = arith.constant 0 : index
    %c0_1 = arith.constant 0 : index
    %3 = vector.load %arg1[%c0, %c0_1] : memref<512x576xf32, #tpu.memory_space<vmem>>, vector<512x576xf32>
    %c0_2 = arith.constant 0 : index
    %c0_3 = arith.constant 0 : index
    %4 = vector.load %arg2[%c0_2, %c0_3] : memref<576x32xf32, #tpu.memory_space<vmem>>, vector<576x32xf32>
    %cst = arith.constant dense<0.000000e+00> : vector<512x32xf32>
    %5 = tpu.matmul %3, %4, %cst {dimension_numbers = #tpu.dot_dimension_numbers<[1], [0], [0], [1], [0, 0, 1, 1], [], []>} : vector<512x576xf32>, vector<576x32xf32>, vector<512x32xf32> -> vector<512x32xf32>
    %c0_4 = arith.constant 0 : index
    %c0_5 = arith.constant 0 : index
    %6 = vector.load %arg3[%c0_4, %c0_5] : memref<1x32xf32, #tpu.memory_space<vmem>>, vector<1x32xf32>
    %7 = vector.broadcast %6 : vector<1x32xf32> to vector<512x32xf32>
    %8 = arith.addf %5, %7 : vector<512x32xf32>
    %c0_6 = arith.constant 0 : index
    %c0_7 = arith.constant 0 : index
    %9 = vector.load %arg6[%c0_6, %c0_7] : memref<512x32xf32, #tpu.memory_space<vmem>>, vector<512x32xf32>
    tpu.vector_store %arg6[%c0_6, %c0_7], %8 {strides = array<i32>} : memref<512x32xf32, #tpu.memory_space<vmem>>, vector<512x32xf32>,
    %c0_8 = arith.constant 0 : index
    %c0_9 = arith.constant 0 : index
    %10 = vector.load %arg7[%c0_8, %c0_9] : memref<2x32xf32, #tpu.memory_space<vmem>>, vector<1x32xf32>
    %cst_10 = arith.constant dense<0.000000e+00> : vector<32xf32>
    %11 = vector.multi_reduction <add>, %8, %cst_10 [0] : vector<512x32xf32> to vector<32xf32>
    %12 = vector.shape_cast %11 : vector<32xf32> to vector<1x32xf32>
    %13 = arith.addf %10, %12 : vector<1x32xf32>
    %c0_11 = arith.constant 0 : index
    %c0_12 = arith.constant 0 : index
    %14 = vector.load %arg7[%c0_11, %c0_12] : memref<2x32xf32, #tpu.memory_space<vmem>>, vector<1x32xf32>
    tpu.vector_store %arg7[%c0_11, %c0_12], %13 {strides = array<i32>} : memref<2x32xf32, #tpu.memory_space<vmem>>, vector<1x32xf32>,
    %c1 = arith.constant 1 : index
    %c0_13 = arith.constant 0 : index
    %15 = vector.load %arg7[%c1, %c0_13] : memref<2x32xf32, #tpu.memory_space<vmem>>, vector<1x32xf32>
    %16 = arith.mulf %8, %8 : vector<512x32xf32>
    %cst_14 = arith.constant dense<0.000000e+00> : vector<32xf32>
    %17 = vector.multi_reduction <add>, %16, %cst_14 [0] : vector<512x32xf32> to vector<32xf32>
    %18 = vector.shape_cast %17 : vector<32xf32> to vector<1x32xf32>
    %19 = arith.addf %15, %18 : vector<1x32xf32>
    %c1_15 = arith.constant 1 : index
    %c0_16 = arith.constant 0 : index
    %20 = vector.load %arg7[%c1_15, %c0_16] : memref<2x32xf32, #tpu.memory_space<vmem>>, vector<1x32xf32>
    tpu.vector_store %arg7[%c1_15, %c0_16], %19 {strides = array<i32>} : memref<2x32xf32, #tpu.memory_space<vmem>>, vector<1x32xf32>,
    %c0_i32_17 = arith.constant 0 : i32
    %21 = arith.cmpi eq, %arg0, %c0_i32_17 : i32
    %22 = arith.extui %21 : i1 to i32
    %c0_i32_18 = arith.constant 0 : i32
    %23 = arith.cmpi ne, %22, %c0_i32_18 : i32
    scf.if %23 {
      %c0_19 = arith.constant 0 : index
      %c0_20 = arith.constant 0 : index
      %24 = vector.load %arg7[%c0_19, %c0_20] : memref<2x32xf32, #tpu.memory_space<vmem>>, vector<1x32xf32>
      %cst_21 = arith.constant 0.001953125 : f32
      %25 = vector.broadcast %cst_21 : f32 to vector<1x32xf32>
      %26 = arith.mulf %24, %25 : vector<1x32xf32>
      %c1_22 = arith.constant 1 : index
      %c0_23 = arith.constant 0 : index
      %27 = vector.load %arg7[%c1_22, %c0_23] : memref<2x32xf32, #tpu.memory_space<vmem>>, vector<1x32xf32>
      %cst_24 = arith.constant 0.001953125 : f32
      %28 = vector.broadcast %cst_24 : f32 to vector<1x32xf32>
      %29 = arith.mulf %27, %28 : vector<1x32xf32>
      %30 = arith.mulf %26, %26 : vector<1x32xf32>
      %31 = arith.subf %29, %30 : vector<1x32xf32>
      %cst_25 = arith.constant 0.000000e+00 : f32
      %32 = vector.broadcast %cst_25 : f32 to vector<1x32xf32>
      %33 = arith.maximumf %31, %32 : vector<1x32xf32>
      %c0_26 = arith.constant 0 : index
      %c0_27 = arith.constant 0 : index
      %34 = vector.load %arg4[%c0_26, %c0_27] : memref<1x32xf32, #tpu.memory_space<vmem>>, vector<1x32xf32>
      %cst_28 = arith.constant 9.99999974E-6 : f32
      %35 = vector.broadcast %cst_28 : f32 to vector<1x32xf32>
      %36 = arith.addf %33, %35 : vector<1x32xf32>
      %37 = math.rsqrt %36 : vector<1x32xf32>
      %38 = arith.mulf %34, %37 : vector<1x32xf32>
      %c0_29 = arith.constant 0 : index
      %c0_30 = arith.constant 0 : index
      %39 = vector.load %arg5[%c0_29, %c0_30] : memref<1x32xf32, #tpu.memory_space<vmem>>, vector<1x32xf32>
      %40 = arith.mulf %26, %38 : vector<1x32xf32>
      %41 = arith.subf %39, %40 : vector<1x32xf32>
      %c0_31 = arith.constant 0 : index
      %c0_32 = arith.constant 0 : index
      %42 = vector.load %arg6[%c0_31, %c0_32] : memref<512x32xf32, #tpu.memory_space<vmem>>, vector<512x32xf32>
      %43 = vector.broadcast %38 : vector<1x32xf32> to vector<512x32xf32>
      %44 = arith.mulf %42, %43 : vector<512x32xf32>
      %45 = vector.broadcast %41 : vector<1x32xf32> to vector<512x32xf32>
      %46 = arith.addf %44, %45 : vector<512x32xf32>
      %cst_33 = arith.constant 0.000000e+00 : f32
      %47 = vector.broadcast %cst_33 : f32 to vector<512x32xf32>
      %48 = arith.maximumf %46, %47 : vector<512x32xf32>
      %c0_34 = arith.constant 0 : index
      %c0_35 = arith.constant 0 : index
      %49 = vector.load %arg6[%c0_34, %c0_35] : memref<512x32xf32, #tpu.memory_space<vmem>>, vector<512x32xf32>
      tpu.vector_store %arg6[%c0_34, %c0_35], %48 {strides = array<i32>} : memref<512x32xf32, #tpu.memory_space<vmem>>, vector<512x32xf32>,
    } else {
    }
    return
  }
  func.func @transform_0(%arg0: i32) -> (i32, i32) {
    %c0_i32 = arith.constant 0 : i32
    %c0_i32_0 = arith.constant 0 : i32
    return %arg0, %c0_i32 : i32, i32
  }
  func.func @transform_1(%arg0: i32) -> (i32, i32) {
    %c0_i32 = arith.constant 0 : i32
    %c0_i32_0 = arith.constant 0 : i32
    %c0_i32_1 = arith.constant 0 : i32
    return %c0_i32, %c0_i32_0 : i32, i32
  }
  func.func @transform_2(%arg0: i32) -> (i32, i32) {
    %c0_i32 = arith.constant 0 : i32
    %c0_i32_0 = arith.constant 0 : i32
    %c0_i32_1 = arith.constant 0 : i32
    return %c0_i32, %c0_i32_0 : i32, i32
  }
  func.func @transform_3(%arg0: i32) -> (i32, i32) {
    %c0_i32 = arith.constant 0 : i32
    %c0_i32_0 = arith.constant 0 : i32
    %c0_i32_1 = arith.constant 0 : i32
    return %c0_i32, %c0_i32_0 : i32, i32
  }
  func.func @transform_4(%arg0: i32) -> (i32, i32) {
    %c0_i32 = arith.constant 0 : i32
    %c0_i32_0 = arith.constant 0 : i32
    %c0_i32_1 = arith.constant 0 : i32
    return %c0_i32, %c0_i32_0 : i32, i32
  }
  func.func @transform_5(%arg0: i32) -> (i32, i32) {
    %c0_i32 = arith.constant 0 : i32
    %c0_i32_0 = arith.constant 0 : i32
    %c0_i32_1 = arith.constant 0 : i32
    return %c0_i32, %c0_i32_0 : i32, i32
  }
}

module attributes {stable_mosaic.version = 11 : i64} {
  func.func @_fused_conv_bn_kernel(%arg0: i32, %arg1: memref<512x288xf32, #tpu.memory_space<vmem>>, %arg2: memref<288x16xf32, #tpu.memory_space<vmem>>, %arg3: memref<1x16xf32, #tpu.memory_space<vmem>>, %arg4: memref<1x16xf32, #tpu.memory_space<vmem>>, %arg5: memref<1x16xf32, #tpu.memory_space<vmem>>, %arg6: memref<512x16xf32, #tpu.memory_space<vmem>>, %arg7: memref<2x16xf32, #tpu.memory_space<vmem>>) attributes {dimension_semantics = [#tpu.dimension_semantics<arbitrary>], iteration_bounds = array<i64: 1>, scalar_prefetch = 0 : i64, scratch_operands = 1 : i64, tpu.core_type = #tpu.core_type<tc>, window_params = [{transform_indices = @transform_0, window_bounds = array<i64: 512, 288>}, {pipeline_mode = #tpu.pipeline_mode<synchronous>, transform_indices = @transform_1, window_bounds = array<i64: 288, 16>}, {pipeline_mode = #tpu.pipeline_mode<synchronous>, transform_indices = @transform_2, window_bounds = array<i64: 1, 16>}, {pipeline_mode = #tpu.pipeline_mode<synchronous>, transform_indices = @transform_3, window_bounds = array<i64: 1, 16>}, {pipeline_mode = #tpu.pipeline_mode<synchronous>, transform_indices = @transform_4, window_bounds = array<i64: 1, 16>}, {pipeline_mode = #tpu.pipeline_mode<synchronous>, transform_indices = @transform_5, window_bounds = array<i64: 512, 16>}]} {
    %c0_i32 = arith.constant 0 : i32
    %0 = arith.cmpi eq, %arg0, %c0_i32 : i32
    %1 = arith.extui %0 : i1 to i32
    %c0_i32_0 = arith.constant 0 : i32
    %2 = arith.cmpi ne, %1, %c0_i32_0 : i32
    scf.if %2 {
      %cst_19 = arith.constant 0.000000e+00 : f32
      %24 = vector.broadcast %cst_19 : f32 to vector<2x16xf32>
      %c0_20 = arith.constant 0 : index
      %c0_21 = arith.constant 0 : index
      %25 = vector.load %arg7[%c0_20, %c0_21] : memref<2x16xf32, #tpu.memory_space<vmem>>, vector<2x16xf32>
      tpu.vector_store %arg7[%c0_20, %c0_21], %24 {strides = array<i32>} : memref<2x16xf32, #tpu.memory_space<vmem>>, vector<2x16xf32>,
    } else {
    }
    %c0 = arith.constant 0 : index
    %c0_1 = arith.constant 0 : index
    %3 = vector.load %arg1[%c0, %c0_1] : memref<512x288xf32, #tpu.memory_space<vmem>>, vector<512x288xf32>
    %c0_2 = arith.constant 0 : index
    %c0_3 = arith.constant 0 : index
    %4 = vector.load %arg2[%c0_2, %c0_3] : memref<288x16xf32, #tpu.memory_space<vmem>>, vector<288x16xf32>
    %cst = arith.constant dense<0.000000e+00> : vector<512x16xf32>
    %5 = tpu.matmul %3, %4, %cst {dimension_numbers = #tpu.dot_dimension_numbers<[1], [0], [0], [1], [0, 0, 1, 1], [], []>} : vector<512x288xf32>, vector<288x16xf32>, vector<512x16xf32> -> vector<512x16xf32>
    %c0_4 = arith.constant 0 : index
    %c0_5 = arith.constant 0 : index
    %6 = vector.load %arg3[%c0_4, %c0_5] : memref<1x16xf32, #tpu.memory_space<vmem>>, vector<1x16xf32>
    %7 = vector.broadcast %6 : vector<1x16xf32> to vector<512x16xf32>
    %8 = arith.addf %5, %7 : vector<512x16xf32>
    %c0_6 = arith.constant 0 : index
    %c0_7 = arith.constant 0 : index
    %9 = vector.load %arg6[%c0_6, %c0_7] : memref<512x16xf32, #tpu.memory_space<vmem>>, vector<512x16xf32>
    tpu.vector_store %arg6[%c0_6, %c0_7], %8 {strides = array<i32>} : memref<512x16xf32, #tpu.memory_space<vmem>>, vector<512x16xf32>,
    %c0_8 = arith.constant 0 : index
    %c0_9 = arith.constant 0 : index
    %10 = vector.load %arg7[%c0_8, %c0_9] : memref<2x16xf32, #tpu.memory_space<vmem>>, vector<1x16xf32>
    %cst_10 = arith.constant dense<0.000000e+00> : vector<16xf32>
    %11 = vector.multi_reduction <add>, %8, %cst_10 [0] : vector<512x16xf32> to vector<16xf32>
    %12 = vector.shape_cast %11 : vector<16xf32> to vector<1x16xf32>
    %13 = arith.addf %10, %12 : vector<1x16xf32>
    %c0_11 = arith.constant 0 : index
    %c0_12 = arith.constant 0 : index
    %14 = vector.load %arg7[%c0_11, %c0_12] : memref<2x16xf32, #tpu.memory_space<vmem>>, vector<1x16xf32>
    tpu.vector_store %arg7[%c0_11, %c0_12], %13 {strides = array<i32>} : memref<2x16xf32, #tpu.memory_space<vmem>>, vector<1x16xf32>,
    %c1 = arith.constant 1 : index
    %c0_13 = arith.constant 0 : index
    %15 = vector.load %arg7[%c1, %c0_13] : memref<2x16xf32, #tpu.memory_space<vmem>>, vector<1x16xf32>
    %16 = arith.mulf %8, %8 : vector<512x16xf32>
    %cst_14 = arith.constant dense<0.000000e+00> : vector<16xf32>
    %17 = vector.multi_reduction <add>, %16, %cst_14 [0] : vector<512x16xf32> to vector<16xf32>
    %18 = vector.shape_cast %17 : vector<16xf32> to vector<1x16xf32>
    %19 = arith.addf %15, %18 : vector<1x16xf32>
    %c1_15 = arith.constant 1 : index
    %c0_16 = arith.constant 0 : index
    %20 = vector.load %arg7[%c1_15, %c0_16] : memref<2x16xf32, #tpu.memory_space<vmem>>, vector<1x16xf32>
    tpu.vector_store %arg7[%c1_15, %c0_16], %19 {strides = array<i32>} : memref<2x16xf32, #tpu.memory_space<vmem>>, vector<1x16xf32>,
    %c0_i32_17 = arith.constant 0 : i32
    %21 = arith.cmpi eq, %arg0, %c0_i32_17 : i32
    %22 = arith.extui %21 : i1 to i32
    %c0_i32_18 = arith.constant 0 : i32
    %23 = arith.cmpi ne, %22, %c0_i32_18 : i32
    scf.if %23 {
      %c0_19 = arith.constant 0 : index
      %c0_20 = arith.constant 0 : index
      %24 = vector.load %arg7[%c0_19, %c0_20] : memref<2x16xf32, #tpu.memory_space<vmem>>, vector<1x16xf32>
      %cst_21 = arith.constant 0.001953125 : f32
      %25 = vector.broadcast %cst_21 : f32 to vector<1x16xf32>
      %26 = arith.mulf %24, %25 : vector<1x16xf32>
      %c1_22 = arith.constant 1 : index
      %c0_23 = arith.constant 0 : index
      %27 = vector.load %arg7[%c1_22, %c0_23] : memref<2x16xf32, #tpu.memory_space<vmem>>, vector<1x16xf32>
      %cst_24 = arith.constant 0.001953125 : f32
      %28 = vector.broadcast %cst_24 : f32 to vector<1x16xf32>
      %29 = arith.mulf %27, %28 : vector<1x16xf32>
      %30 = arith.mulf %26, %26 : vector<1x16xf32>
      %31 = arith.subf %29, %30 : vector<1x16xf32>
      %cst_25 = arith.constant 0.000000e+00 : f32
      %32 = vector.broadcast %cst_25 : f32 to vector<1x16xf32>
      %33 = arith.maximumf %31, %32 : vector<1x16xf32>
      %c0_26 = arith.constant 0 : index
      %c0_27 = arith.constant 0 : index
      %34 = vector.load %arg4[%c0_26, %c0_27] : memref<1x16xf32, #tpu.memory_space<vmem>>, vector<1x16xf32>
      %cst_28 = arith.constant 9.99999974E-6 : f32
      %35 = vector.broadcast %cst_28 : f32 to vector<1x16xf32>
      %36 = arith.addf %33, %35 : vector<1x16xf32>
      %37 = math.rsqrt %36 : vector<1x16xf32>
      %38 = arith.mulf %34, %37 : vector<1x16xf32>
      %c0_29 = arith.constant 0 : index
      %c0_30 = arith.constant 0 : index
      %39 = vector.load %arg5[%c0_29, %c0_30] : memref<1x16xf32, #tpu.memory_space<vmem>>, vector<1x16xf32>
      %40 = arith.mulf %26, %38 : vector<1x16xf32>
      %41 = arith.subf %39, %40 : vector<1x16xf32>
      %c0_31 = arith.constant 0 : index
      %c0_32 = arith.constant 0 : index
      %42 = vector.load %arg6[%c0_31, %c0_32] : memref<512x16xf32, #tpu.memory_space<vmem>>, vector<512x16xf32>
      %43 = vector.broadcast %38 : vector<1x16xf32> to vector<512x16xf32>
      %44 = arith.mulf %42, %43 : vector<512x16xf32>
      %45 = vector.broadcast %41 : vector<1x16xf32> to vector<512x16xf32>
      %46 = arith.addf %44, %45 : vector<512x16xf32>
      %cst_33 = arith.constant 0.000000e+00 : f32
      %47 = vector.broadcast %cst_33 : f32 to vector<512x16xf32>
      %48 = arith.maximumf %46, %47 : vector<512x16xf32>
      %c0_34 = arith.constant 0 : index
      %c0_35 = arith.constant 0 : index
      %49 = vector.load %arg6[%c0_34, %c0_35] : memref<512x16xf32, #tpu.memory_space<vmem>>, vector<512x16xf32>
      tpu.vector_store %arg6[%c0_34, %c0_35], %48 {strides = array<i32>} : memref<512x16xf32, #tpu.memory_space<vmem>>, vector<512x16xf32>,
    } else {
    }
    return
  }
  func.func @transform_0(%arg0: i32) -> (i32, i32) {
    %c0_i32 = arith.constant 0 : i32
    %c0_i32_0 = arith.constant 0 : i32
    return %arg0, %c0_i32 : i32, i32
  }
  func.func @transform_1(%arg0: i32) -> (i32, i32) {
    %c0_i32 = arith.constant 0 : i32
    %c0_i32_0 = arith.constant 0 : i32
    %c0_i32_1 = arith.constant 0 : i32
    return %c0_i32, %c0_i32_0 : i32, i32
  }
  func.func @transform_2(%arg0: i32) -> (i32, i32) {
    %c0_i32 = arith.constant 0 : i32
    %c0_i32_0 = arith.constant 0 : i32
    %c0_i32_1 = arith.constant 0 : i32
    return %c0_i32, %c0_i32_0 : i32, i32
  }
  func.func @transform_3(%arg0: i32) -> (i32, i32) {
    %c0_i32 = arith.constant 0 : i32
    %c0_i32_0 = arith.constant 0 : i32
    %c0_i32_1 = arith.constant 0 : i32
    return %c0_i32, %c0_i32_0 : i32, i32
  }
  func.func @transform_4(%arg0: i32) -> (i32, i32) {
    %c0_i32 = arith.constant 0 : i32
    %c0_i32_0 = arith.constant 0 : i32
    %c0_i32_1 = arith.constant 0 : i32
    return %c0_i32, %c0_i32_0 : i32, i32
  }
  func.func @transform_5(%arg0: i32) -> (i32, i32) {
    %c0_i32 = arith.constant 0 : i32
    %c0_i32_0 = arith.constant 0 : i32
    %c0_i32_1 = arith.constant 0 : i32
    return %c0_i32, %c0_i32_0 : i32, i32
  }
}

module attributes {stable_mosaic.version = 11 : i64} {
  func.func @_fused_conv_bn_kernel(%arg0: i32, %arg1: memref<512x144xf32, #tpu.memory_space<vmem>>, %arg2: memref<144x16xf32, #tpu.memory_space<vmem>>, %arg3: memref<512x144xf32, #tpu.memory_space<vmem>>, %arg4: memref<144x16xf32, #tpu.memory_space<vmem>>, %arg5: memref<512x144xf32, #tpu.memory_space<vmem>>, %arg6: memref<144x16xf32, #tpu.memory_space<vmem>>, %arg7: memref<1x16xf32, #tpu.memory_space<vmem>>, %arg8: memref<1x16xf32, #tpu.memory_space<vmem>>, %arg9: memref<1x16xf32, #tpu.memory_space<vmem>>, %arg10: memref<512x16xf32, #tpu.memory_space<vmem>>, %arg11: memref<2x16xf32, #tpu.memory_space<vmem>>) attributes {dimension_semantics = [#tpu.dimension_semantics<arbitrary>], iteration_bounds = array<i64: 1>, scalar_prefetch = 0 : i64, scratch_operands = 1 : i64, tpu.core_type = #tpu.core_type<tc>, window_params = [{transform_indices = @transform_0, window_bounds = array<i64: 512, 144>}, {pipeline_mode = #tpu.pipeline_mode<synchronous>, transform_indices = @transform_1, window_bounds = array<i64: 144, 16>}, {transform_indices = @transform_2, window_bounds = array<i64: 512, 144>}, {pipeline_mode = #tpu.pipeline_mode<synchronous>, transform_indices = @transform_3, window_bounds = array<i64: 144, 16>}, {transform_indices = @transform_4, window_bounds = array<i64: 512, 144>}, {pipeline_mode = #tpu.pipeline_mode<synchronous>, transform_indices = @transform_5, window_bounds = array<i64: 144, 16>}, {pipeline_mode = #tpu.pipeline_mode<synchronous>, transform_indices = @transform_6, window_bounds = array<i64: 1, 16>}, {pipeline_mode = #tpu.pipeline_mode<synchronous>, transform_indices = @transform_7, window_bounds = array<i64: 1, 16>}, {pipeline_mode = #tpu.pipeline_mode<synchronous>, transform_indices = @transform_8, window_bounds = array<i64: 1, 16>}, {pipeline_mode = #tpu.pipeline_mode<synchronous>, transform_indices = @transform_9, window_bounds = array<i64: 512, 16>}]} {
    %c0_i32 = arith.constant 0 : i32
    %0 = arith.cmpi eq, %arg0, %c0_i32 : i32
    %1 = arith.extui %0 : i1 to i32
    %c0_i32_0 = arith.constant 0 : i32
    %2 = arith.cmpi ne, %1, %c0_i32_0 : i32
    scf.if %2 {
      %cst_29 = arith.constant 0.000000e+00 : f32
      %32 = vector.broadcast %cst_29 : f32 to vector<2x16xf32>
      %c0_30 = arith.constant 0 : index
      %c0_31 = arith.constant 0 : index
      %33 = vector.load %arg11[%c0_30, %c0_31] : memref<2x16xf32, #tpu.memory_space<vmem>>, vector<2x16xf32>
      tpu.vector_store %arg11[%c0_30, %c0_31], %32 {strides = array<i32>} : memref<2x16xf32, #tpu.memory_space<vmem>>, vector<2x16xf32>,
    } else {
    }
    %c0 = arith.constant 0 : index
    %c0_1 = arith.constant 0 : index
    %3 = vector.load %arg1[%c0, %c0_1] : memref<512x144xf32, #tpu.memory_space<vmem>>, vector<512x144xf32>
    %c0_2 = arith.constant 0 : index
    %c0_3 = arith.constant 0 : index
    %4 = vector.load %arg2[%c0_2, %c0_3] : memref<144x16xf32, #tpu.memory_space<vmem>>, vector<144x16xf32>
    %cst = arith.constant dense<0.000000e+00> : vector<512x16xf32>
    %5 = tpu.matmul %3, %4, %cst {dimension_numbers = #tpu.dot_dimension_numbers<[1], [0], [0], [1], [0, 0, 1, 1], [], []>} : vector<512x144xf32>, vector<144x16xf32>, vector<512x16xf32> -> vector<512x16xf32>
    %c0_4 = arith.constant 0 : index
    %c0_5 = arith.constant 0 : index
    %6 = vector.load %arg3[%c0_4, %c0_5] : memref<512x144xf32, #tpu.memory_space<vmem>>, vector<512x144xf32>
    %c0_6 = arith.constant 0 : index
    %c0_7 = arith.constant 0 : index
    %7 = vector.load %arg4[%c0_6, %c0_7] : memref<144x16xf32, #tpu.memory_space<vmem>>, vector<144x16xf32>
    %cst_8 = arith.constant dense<0.000000e+00> : vector<512x16xf32>
    %8 = tpu.matmul %6, %7, %cst_8 {dimension_numbers = #tpu.dot_dimension_numbers<[1], [0], [0], [1], [0, 0, 1, 1], [], []>} : vector<512x144xf32>, vector<144x16xf32>, vector<512x16xf32> -> vector<512x16xf32>
    %9 = arith.addf %5, %8 : vector<512x16xf32>
    %c0_9 = arith.constant 0 : index
    %c0_10 = arith.constant 0 : index
    %10 = vector.load %arg5[%c0_9, %c0_10] : memref<512x144xf32, #tpu.memory_space<vmem>>, vector<512x144xf32>
    %c0_11 = arith.constant 0 : index
    %c0_12 = arith.constant 0 : index
    %11 = vector.load %arg6[%c0_11, %c0_12] : memref<144x16xf32, #tpu.memory_space<vmem>>, vector<144x16xf32>
    %cst_13 = arith.constant dense<0.000000e+00> : vector<512x16xf32>
    %12 = tpu.matmul %10, %11, %cst_13 {dimension_numbers = #tpu.dot_dimension_numbers<[1], [0], [0], [1], [0, 0, 1, 1], [], []>} : vector<512x144xf32>, vector<144x16xf32>, vector<512x16xf32> -> vector<512x16xf32>
    %13 = arith.addf %9, %12 : vector<512x16xf32>
    %c0_14 = arith.constant 0 : index
    %c0_15 = arith.constant 0 : index
    %14 = vector.load %arg7[%c0_14, %c0_15] : memref<1x16xf32, #tpu.memory_space<vmem>>, vector<1x16xf32>
    %15 = vector.broadcast %14 : vector<1x16xf32> to vector<512x16xf32>
    %16 = arith.addf %13, %15 : vector<512x16xf32>
    %c0_16 = arith.constant 0 : index
    %c0_17 = arith.constant 0 : index
    %17 = vector.load %arg10[%c0_16, %c0_17] : memref<512x16xf32, #tpu.memory_space<vmem>>, vector<512x16xf32>
    tpu.vector_store %arg10[%c0_16, %c0_17], %16 {strides = array<i32>} : memref<512x16xf32, #tpu.memory_space<vmem>>, vector<512x16xf32>,
    %c0_18 = arith.constant 0 : index
    %c0_19 = arith.constant 0 : index
    %18 = vector.load %arg11[%c0_18, %c0_19] : memref<2x16xf32, #tpu.memory_space<vmem>>, vector<1x16xf32>
    %cst_20 = arith.constant dense<0.000000e+00> : vector<16xf32>
    %19 = vector.multi_reduction <add>, %16, %cst_20 [0] : vector<512x16xf32> to vector<16xf32>
    %20 = vector.shape_cast %19 : vector<16xf32> to vector<1x16xf32>
    %21 = arith.addf %18, %20 : vector<1x16xf32>
    %c0_21 = arith.constant 0 : index
    %c0_22 = arith.constant 0 : index
    %22 = vector.load %arg11[%c0_21, %c0_22] : memref<2x16xf32, #tpu.memory_space<vmem>>, vector<1x16xf32>
    tpu.vector_store %arg11[%c0_21, %c0_22], %21 {strides = array<i32>} : memref<2x16xf32, #tpu.memory_space<vmem>>, vector<1x16xf32>,
    %c1 = arith.constant 1 : index
    %c0_23 = arith.constant 0 : index
    %23 = vector.load %arg11[%c1, %c0_23] : memref<2x16xf32, #tpu.memory_space<vmem>>, vector<1x16xf32>
    %24 = arith.mulf %16, %16 : vector<512x16xf32>
    %cst_24 = arith.constant dense<0.000000e+00> : vector<16xf32>
    %25 = vector.multi_reduction <add>, %24, %cst_24 [0] : vector<512x16xf32> to vector<16xf32>
    %26 = vector.shape_cast %25 : vector<16xf32> to vector<1x16xf32>
    %27 = arith.addf %23, %26 : vector<1x16xf32>
    %c1_25 = arith.constant 1 : index
    %c0_26 = arith.constant 0 : index
    %28 = vector.load %arg11[%c1_25, %c0_26] : memref<2x16xf32, #tpu.memory_space<vmem>>, vector<1x16xf32>
    tpu.vector_store %arg11[%c1_25, %c0_26], %27 {strides = array<i32>} : memref<2x16xf32, #tpu.memory_space<vmem>>, vector<1x16xf32>,
    %c0_i32_27 = arith.constant 0 : i32
    %29 = arith.cmpi eq, %arg0, %c0_i32_27 : i32
    %30 = arith.extui %29 : i1 to i32
    %c0_i32_28 = arith.constant 0 : i32
    %31 = arith.cmpi ne, %30, %c0_i32_28 : i32
    scf.if %31 {
      %c0_29 = arith.constant 0 : index
      %c0_30 = arith.constant 0 : index
      %32 = vector.load %arg11[%c0_29, %c0_30] : memref<2x16xf32, #tpu.memory_space<vmem>>, vector<1x16xf32>
      %cst_31 = arith.constant 0.001953125 : f32
      %33 = vector.broadcast %cst_31 : f32 to vector<1x16xf32>
      %34 = arith.mulf %32, %33 : vector<1x16xf32>
      %c1_32 = arith.constant 1 : index
      %c0_33 = arith.constant 0 : index
      %35 = vector.load %arg11[%c1_32, %c0_33] : memref<2x16xf32, #tpu.memory_space<vmem>>, vector<1x16xf32>
      %cst_34 = arith.constant 0.001953125 : f32
      %36 = vector.broadcast %cst_34 : f32 to vector<1x16xf32>
      %37 = arith.mulf %35, %36 : vector<1x16xf32>
      %38 = arith.mulf %34, %34 : vector<1x16xf32>
      %39 = arith.subf %37, %38 : vector<1x16xf32>
      %cst_35 = arith.constant 0.000000e+00 : f32
      %40 = vector.broadcast %cst_35 : f32 to vector<1x16xf32>
      %41 = arith.maximumf %39, %40 : vector<1x16xf32>
      %c0_36 = arith.constant 0 : index
      %c0_37 = arith.constant 0 : index
      %42 = vector.load %arg8[%c0_36, %c0_37] : memref<1x16xf32, #tpu.memory_space<vmem>>, vector<1x16xf32>
      %cst_38 = arith.constant 9.99999974E-6 : f32
      %43 = vector.broadcast %cst_38 : f32 to vector<1x16xf32>
      %44 = arith.addf %41, %43 : vector<1x16xf32>
      %45 = math.rsqrt %44 : vector<1x16xf32>
      %46 = arith.mulf %42, %45 : vector<1x16xf32>
      %c0_39 = arith.constant 0 : index
      %c0_40 = arith.constant 0 : index
      %47 = vector.load %arg9[%c0_39, %c0_40] : memref<1x16xf32, #tpu.memory_space<vmem>>, vector<1x16xf32>
      %48 = arith.mulf %34, %46 : vector<1x16xf32>
      %49 = arith.subf %47, %48 : vector<1x16xf32>
      %c0_41 = arith.constant 0 : index
      %c0_42 = arith.constant 0 : index
      %50 = vector.load %arg10[%c0_41, %c0_42] : memref<512x16xf32, #tpu.memory_space<vmem>>, vector<512x16xf32>
      %51 = vector.broadcast %46 : vector<1x16xf32> to vector<512x16xf32>
      %52 = arith.mulf %50, %51 : vector<512x16xf32>
      %53 = vector.broadcast %49 : vector<1x16xf32> to vector<512x16xf32>
      %54 = arith.addf %52, %53 : vector<512x16xf32>
      %cst_43 = arith.constant 0.000000e+00 : f32
      %55 = vector.broadcast %cst_43 : f32 to vector<512x16xf32>
      %56 = arith.maximumf %54, %55 : vector<512x16xf32>
      %c0_44 = arith.constant 0 : index
      %c0_45 = arith.constant 0 : index
      %57 = vector.load %arg10[%c0_44, %c0_45] : memref<512x16xf32, #tpu.memory_space<vmem>>, vector<512x16xf32>
      tpu.vector_store %arg10[%c0_44, %c0_45], %56 {strides = array<i32>} : memref<512x16xf32, #tpu.memory_space<vmem>>, vector<512x16xf32>,
    } else {
    }
    return
  }
  func.func @transform_0(%arg0: i32) -> (i32, i32) {
    %c0_i32 = arith.constant 0 : i32
    %c0_i32_0 = arith.constant 0 : i32
    return %arg0, %c0_i32 : i32, i32
  }
  func.func @transform_1(%arg0: i32) -> (i32, i32) {
    %c0_i32 = arith.constant 0 : i32
    %c0_i32_0 = arith.constant 0 : i32
    %c0_i32_1 = arith.constant 0 : i32
    return %c0_i32, %c0_i32_0 : i32, i32
  }
  func.func @transform_2(%arg0: i32) -> (i32, i32) {
    %c0_i32 = arith.constant 0 : i32
    %c0_i32_0 = arith.constant 0 : i32
    return %arg0, %c0_i32 : i32, i32
  }
  func.func @transform_3(%arg0: i32) -> (i32, i32) {
    %c0_i32 = arith.constant 0 : i32
    %c0_i32_0 = arith.constant 0 : i32
    %c0_i32_1 = arith.constant 0 : i32
    return %c0_i32, %c0_i32_0 : i32, i32
  }
  func.func @transform_4(%arg0: i32) -> (i32, i32) {
    %c0_i32 = arith.constant 0 : i32
    %c0_i32_0 = arith.constant 0 : i32
    return %arg0, %c0_i32 : i32, i32
  }
  func.func @transform_5(%arg0: i32) -> (i32, i32) {
    %c0_i32 = arith.constant 0 : i32
    %c0_i32_0 = arith.constant 0 : i32
    %c0_i32_1 = arith.constant 0 : i32
    return %c0_i32, %c0_i32_0 : i32, i32
  }
  func.func @transform_6(%arg0: i32) -> (i32, i32) {
    %c0_i32 = arith.constant 0 : i32
    %c0_i32_0 = arith.constant 0 : i32
    %c0_i32_1 = arith.constant 0 : i32
    return %c0_i32, %c0_i32_0 : i32, i32
  }
  func.func @transform_7(%arg0: i32) -> (i32, i32) {
    %c0_i32 = arith.constant 0 : i32
    %c0_i32_0 = arith.constant 0 : i32
    %c0_i32_1 = arith.constant 0 : i32
    return %c0_i32, %c0_i32_0 : i32, i32
  }
  func.func @transform_8(%arg0: i32) -> (i32, i32) {
    %c0_i32 = arith.constant 0 : i32
    %c0_i32_0 = arith.constant 0 : i32
    %c0_i32_1 = arith.constant 0 : i32
    return %c0_i32, %c0_i32_0 : i32, i32
  }
  func.func @transform_9(%arg0: i32) -> (i32, i32) {
    %c0_i32 = arith.constant 0 : i32
    %c0_i32_0 = arith.constant 0 : i32
    %c0_i32_1 = arith.constant 0 : i32
    return %c0_i32, %c0_i32_0 : i32, i32
  }
}

</mosaic_0001>

<bundles_post_ra>
// kernel: contrast_module_deep.6
= control target key start
LH: loop header
LB: loop body
LE: loop exit
PB: predicated region body
PF: predicated region fallthrough
CT: control target
= control target key end

     0   :  { %v6034_v0 = vmov 0.0   ;;  %vm425_vm0 = vcmask 523264   ;;  %vm1773_vm1 = vcmask 261120   ;;  %vm24_vm2 = vcmask 254976   ;;  %s6028_s1 = inlined_call_operand.vmem [shape: f32[576,32], index: 1, kind: input, shape index: {}]   ;;  %s6029_s0 = inlined_call_operand.vmem [shape: f32[512,576], index: 0, kind: input, shape index: {}]   ;;  %s6030_s2 = inlined_call_operand.vmem [shape: f32[1,32], index: 2, kind: input, shape index: {}]   ;;  %s6031_s5 = inlined_call_operand.vmem [shape: f32[512,32], index: 5, kind: output, shape index: {}]   ;;  %s6032_s3 = inlined_call_operand.vmem [shape: f32[1,32], index: 3, kind: input, shape index: {}]   ;;  %s6033_s4 = inlined_call_operand.vmem [shape: f32[1,32], index: 4, kind: input, shape index: {}]  }
   0x1   :  { %618 = vmatprep.subr.mxu0 %v6034_v0  ;;  %2777 = vmatprep.subr.mxu1 %v6034_v0  ;;  %v361_v1 = vld [vmem:[%s6028_s1 + $0x78] sm:$0xff]  ;;  %v360_v2 = vld [vmem:[%s6028_s1 + $0x70] sm:$0xff]  ;;  %v359_v3 = vld [vmem:[%s6028_s1 + $0x68] sm:$0xff]  ;;  %vm1973_vm3 = vcmask 253952  }
   0x2   :  { %619 = vmatpush1.msra.mxu0 %v361_v1  ;;  %2809 = vmatpush1.msra.mxu1 %v361_v1  ;;  %v358_v4 = vld [vmem:[%s6028_s1 + $0x60] sm:$0xff]  ;;  %v357_v5 = vld [vmem:[%s6028_s1 + $0x58] sm:$0xff]  ;;  %v356_v6 = vld [vmem:[%s6028_s1 + $0x50] sm:$0xff] }
   0x3   :  { %620 = vmatprep.subr.mxu0 %v6034_v0  ;;  %2778 = vmatprep.subr.mxu1 %v6034_v0  ;;  %v355_v7 = vld [vmem:[%s6028_s1 + $0x48] sm:$0xff]  ;;  %v354_v8 = vld [vmem:[%s6028_s1 + $0x40] sm:$0xff]  ;;  %v353_v9 = vld [vmem:[%s6028_s1 + $0x38] sm:$0xff] }
   0x4   :  { %621 = vmatpush1.msra.mxu0 %v360_v2  ;;  %2810 = vmatpush1.msra.mxu1 %v360_v2  ;;  %v352_v10 = vld [vmem:[%s6028_s1 + $0x30] sm:$0xff]  ;;  %v351_v11 = vld [vmem:[%s6028_s1 + $0x28] sm:$0xff]  ;;  %v350_v12 = vld [vmem:[%s6028_s1 + $0x20] sm:$0xff] }
   0x5   :  { %622 = vmatprep.subr.mxu0 %v6034_v0  ;;  %2779 = vmatprep.subr.mxu1 %v6034_v0  ;;  %v349_v13 = vld [vmem:[%s6028_s1 + $0x18] sm:$0xff]  ;;  %v348_v14 = vld [vmem:[%s6028_s1 + $0x10] sm:$0xff]  ;;  %v347_v15 = vld [vmem:[%s6028_s1 + $0x8] sm:$0xff] }
   0x6   :  { %623 = vmatpush1.msra.mxu0 %v359_v3  ;;  %2811 = vmatpush1.msra.mxu1 %v359_v3  ;;  %v346_v16 = vld [vmem:[%s6028_s1] sm:$0xff]  ;;  %v377_v17 = vld [vmem:[%s6028_s1 + $0xf8] sm:$0xff]  ;;  %v376_v18 = vld [vmem:[%s6028_s1 + $0xf0] sm:$0xff] }
   0x7   :  { %624 = vmatprep.subr.mxu0 %v6034_v0  ;;  %2780 = vmatprep.subr.mxu1 %v6034_v0  ;;  %v375_v19 = vld [vmem:[%s6028_s1 + $0xe8] sm:$0xff]  ;;  %v374_v20 = vld [vmem:[%s6028_s1 + $0xe0] sm:$0xff]  ;;  %v373_v21 = vld [vmem:[%s6028_s1 + $0xd8] sm:$0xff] }
   0x8   :  { %625 = vmatpush1.msra.mxu0 %v358_v4  ;;  %2812 = vmatpush1.msra.mxu1 %v358_v4  ;;  %v372_v22 = vld [vmem:[%s6028_s1 + $0xd0] sm:$0xff]  ;;  %v371_v23 = vld [vmem:[%s6028_s1 + $0xc8] sm:$0xff]  ;;  %v370_v24 = vld [vmem:[%s6028_s1 + $0xc0] sm:$0xff] }
   0x9   :  { %626 = vmatprep.subr.mxu0 %v6034_v0  ;;  %2781 = vmatprep.subr.mxu1 %v6034_v0  ;;  %v369_v25 = vld [vmem:[%s6028_s1 + $0xb8] sm:$0xff]  ;;  %v368_v26 = vld [vmem:[%s6028_s1 + $0xb0] sm:$0xff]  ;;  %v367_v27 = vld [vmem:[%s6028_s1 + $0xa8] sm:$0xff] }
   0xa   :  { %627 = vmatpush1.msra.mxu0 %v357_v5  ;;  %2813 = vmatpush1.msra.mxu1 %v357_v5  ;;  %v366_v28 = vld [vmem:[%s6028_s1 + $0xa0] sm:$0xff]  ;;  %v365_v29 = vld [vmem:[%s6028_s1 + $0x98] sm:$0xff]  ;;  %v364_v30 = vld [vmem:[%s6028_s1 + $0x90] sm:$0xff] }
   0xb   :  { %628 = vmatprep.subr.mxu0 %v6034_v0  ;;  %2782 = vmatprep.subr.mxu1 %v6034_v0  ;;  %v363_v31 = vld [vmem:[%s6028_s1 + $0x88] sm:$0xff]  ;;  %v362_v32 = vld [vmem:[%s6028_s1 + $0x80] sm:$0xff]  ;;  %v417_v37 = vld [vmem:[%s6028_s1 + $0x238] sm:$0xff] }
   0xc   :  { %629 = vmatpush1.msra.mxu0 %v356_v6  ;;  %2814 = vmatpush1.msra.mxu1 %v356_v6  ;;  %v27_v33 = vld [vmem:[%s6029_s0 + $0x8] sm:$0xff]  ;;  %v26_v35 = vld [vmem:[%s6029_s0] sm:$0xff]  ;;  %v393_v38 = vld [vmem:[%s6028_s1 + $0x178] sm:$0xff] }
   0xd   :  { %630 = vmatprep.subr.mxu0 %v6034_v0  ;;  %2783 = vmatprep.subr.mxu1 %v6034_v0  ;;  %v267_v34 = vld [vmem:[%s6029_s0 + $0x788] sm:$0xff]  ;;  %v266_v36 = vld [vmem:[%s6029_s0 + $0x780] sm:$0xff]  ;;  %v32_v39 = vld [vmem:[%s6029_s0 + $0x30] sm:$0xff] }
   0xe   :  { %631 = vmatpush1.msra.mxu0 %v355_v7  ;;  %2815 = vmatpush1.msra.mxu1 %v355_v7  ;;  %v272_v40 = vld [vmem:[%s6029_s0 + $0x7b0] sm:$0xff]  ;;  %v31_v42 = vld [vmem:[%s6029_s0 + $0x28] sm:$0xff]  ;;  %v37_v44 = vld [vmem:[%s6029_s0 + $0x58] sm:$0xff] }
   0xf   :  { %632 = vmatprep.subr.mxu0 %v6034_v0  ;;  %2784 = vmatprep.subr.mxu1 %v6034_v0  ;;  %v392_v41 = vld [vmem:[%s6028_s1 + $0x170] sm:$0xff]  ;;  %v271_v43 = vld [vmem:[%s6029_s0 + $0x7a8] sm:$0xff]  ;;  %v277_v46 = vld [vmem:[%s6029_s0 + $0x7d8] sm:$0xff] }
  0x10   :  { %633 = vmatpush1.msra.mxu0 %v354_v8  ;;  %2816 = vmatpush1.msra.mxu1 %v354_v8  ;;  %v391_v45 = vld [vmem:[%s6028_s1 + $0x168] sm:$0xff]  ;;  %v3083_v47 = vld [vmem:[%s6028_s1 + $0x230] sm:$0xff]  ;;  %v390_v48 = vld [vmem:[%s6028_s1 + $0x160] sm:$0xff] }
  0x11   :  { %634 = vmatprep.subr.mxu0 %v6034_v0  ;;  %2785 = vmatprep.subr.mxu1 %v6034_v0  ;;  %v36_v49 = vld [vmem:[%s6029_s0 + $0x50] sm:$0xff]  ;;  %v389_v51 = vld [vmem:[%s6028_s1 + $0x158] sm:$0xff]  ;;  %v42_v52 = vld [vmem:[%s6029_s0 + $0x80] sm:$0xff] }
  0x12   :  { %635 = vmatpush1.msra.mxu0 %v353_v9  ;;  %2817 = vmatpush1.msra.mxu1 %v353_v9  ;;  %v276_v50 = vld [vmem:[%s6029_s0 + $0x7d0] sm:$0xff]  ;;  %v282_v53 = vld [vmem:[%s6029_s0 + $0x800] sm:$0xff]  ;;  %v41_v55 = vld [vmem:[%s6029_s0 + $0x78] sm:$0xff] }
  0x13   :  { %636 = vmatprep.subr.mxu0 %v6034_v0  ;;  %2786 = vmatprep.subr.mxu1 %v6034_v0  ;;  %v388_v54 = vld [vmem:[%s6028_s1 + $0x150] sm:$0xff]  ;;  %v281_v56 = vld [vmem:[%s6029_s0 + $0x7f8] sm:$0xff]  ;;  %v387_v57 = vld [vmem:[%s6028_s1 + $0x148] sm:$0xff] }
  0x14   :  { %637 = vmatpush1.msra.mxu0 %v352_v10  ;;  %2818 = vmatpush1.msra.mxu1 %v352_v10  ;;  %v47_v58 = vld [vmem:[%s6029_s0 + $0xa8] sm:$0xff]  ;;  %v386_v60 = vld [vmem:[%s6028_s1 + $0x140] sm:$0xff]  ;;  %v385_v63 = vld [vmem:[%s6028_s1 + $0x138] sm:$0xff] }
  0x15   :  { %638 = vmatprep.subr.mxu0 %v6034_v0  ;;  %2787 = vmatprep.subr.mxu1 %v6034_v0  ;;  %v287_v59 = vld [vmem:[%s6029_s0 + $0x828] sm:$0xff]  ;;  %v46_v61 = vld [vmem:[%s6029_s0 + $0xa0] sm:$0xff]  ;;  %v52_v1 = vld [vmem:[%s6029_s0 + $0xd0] sm:$0xff] }
  0x16   :  { %639 = vmatpush1.msra.mxu0 %v351_v11  ;;  %2819 = vmatpush1.msra.mxu1 %v351_v11  ;;  %v286_v62 = vld [vmem:[%s6029_s0 + $0x820] sm:$0xff]  ;;  %v292_v2 = vld [vmem:[%s6029_s0 + $0x850] sm:$0xff]  ;;  %v51_v4 = vld [vmem:[%s6029_s0 + $0xc8] sm:$0xff] }
  0x17   :  { %640 = vmatprep.subr.mxu0 %v6034_v0  ;;  %2788 = vmatprep.subr.mxu1 %v6034_v0  ;;  %v384_v3 = vld [vmem:[%s6028_s1 + $0x130] sm:$0xff]  ;;  %v291_v5 = vld [vmem:[%s6029_s0 + $0x848] sm:$0xff]  ;;  %v57_v7 = vld [vmem:[%s6029_s0 + $0xf8] sm:$0xff] }
  0x18   :  { %641 = vmatpush1.msra.mxu0 %v350_v12  ;;  %2820 = vmatpush1.msra.mxu1 %v350_v12  ;;  %v383_v6 = vld [vmem:[%s6028_s1 + $0x128] sm:$0xff]  ;;  %v297_v8 = vld [vmem:[%s6029_s0 + $0x878] sm:$0xff]  ;;  %v382_v9 = vld [vmem:[%s6028_s1 + $0x120] sm:$0xff] }
  0x19   :  { %642 = vmatprep.subr.mxu0 %v6034_v0  ;;  %2789 = vmatprep.subr.mxu1 %v6034_v0  ;;  %v56_v10 = vld [vmem:[%s6029_s0 + $0xf0] sm:$0xff]  ;;  %v381_v12 = vld [vmem:[%s6028_s1 + $0x118] sm:$0xff] }
  0x1a   :  { %643 = vmatpush1.msra.mxu0 %v349_v13  ;;  %2821 = vmatpush1.msra.mxu1 %v349_v13  ;;  %v296_v11 = vld [vmem:[%s6029_s0 + $0x870] sm:$0xff]  ;;  %v62_v13 = vld [vmem:[%s6029_s0 + $0x120] sm:$0xff] }
  0x1b   :  { %644 = vmatprep.subr.mxu0 %v6034_v0  ;;  %2790 = vmatprep.subr.mxu1 %v6034_v0 }
  0x1c   :  { %645 = vmatpush1.msra.mxu0 %v348_v14  ;;  %2822 = vmatpush1.msra.mxu1 %v348_v14  ;;  %v302_v14 = vld [vmem:[%s6029_s0 + $0x8a0] sm:$0xff] }
  0x1d   :  { %646 = vmatprep.subr.mxu0 %v6034_v0  ;;  %2791 = vmatprep.subr.mxu1 %v6034_v0 }
  0x1e   :  { %647 = vmatpush1.msra.mxu0 %v347_v15  ;;  %2823 = vmatpush1.msra.mxu1 %v347_v15  ;;  %v380_v15 = vld [vmem:[%s6028_s1 + $0x110] sm:$0xff] }
  0x1f   :  { %648 = vmatprep.subr.mxu0 %v6034_v0  ;;  %2792 = vmatprep.subr.mxu1 %v6034_v0 }
  0x20   :  { %649 = vmatpush1.msra.mxu0 %v346_v16  ;;  %2824 = vmatpush1.msra.mxu1 %v346_v16  ;;  %v61_v16 = vld [vmem:[%s6029_s0 + $0x118] sm:$0xff] }
  0x21   :  { %650 = vmatprep.subr.mxu0 %v6034_v0  ;;  %2793 = vmatprep.subr.mxu1 %v6034_v0 }
  0x22   :  { %651 = vmatpush2.msra.mxu0 %v377_v17  ;;  %2825 = vmatpush2.msra.mxu1 %v377_v17  ;;  %v301_v17 = vld [vmem:[%s6029_s0 + $0x898] sm:$0xff] }
  0x23   :  { %652 = vmatprep.subr.mxu0 %v6034_v0  ;;  %2794 = vmatprep.subr.mxu1 %v6034_v0 }
  0x24   :  { %653 = vmatpush2.msra.mxu0 %v376_v18  ;;  %2826 = vmatpush2.msra.mxu1 %v376_v18  ;;  %v67_v18 = vld [vmem:[%s6029_s0 + $0x148] sm:$0xff] }
  0x25   :  { %654 = vmatprep.subr.mxu0 %v6034_v0  ;;  %2795 = vmatprep.subr.mxu1 %v6034_v0 }
  0x26   :  { %655 = vmatpush2.msra.mxu0 %v375_v19  ;;  %2827 = vmatpush2.msra.mxu1 %v375_v19  ;;  %v379_v19 = vld [vmem:[%s6028_s1 + $0x108] sm:$0xff] }
  0x27   :  { %656 = vmatprep.subr.mxu0 %v6034_v0  ;;  %2796 = vmatprep.subr.mxu1 %v6034_v0 }
  0x28   :  { %657 = vmatpush2.msra.mxu0 %v374_v20  ;;  %2828 = vmatpush2.msra.mxu1 %v374_v20  ;;  %v307_v20 = vld [vmem:[%s6029_s0 + $0x8c8] sm:$0xff] }
  0x29   :  { %658 = vmatprep.subr.mxu0 %v6034_v0  ;;  %2797 = vmatprep.subr.mxu1 %v6034_v0 }
  0x2a   :  { %659 = vmatpush2.msra.mxu0 %v373_v21  ;;  %2829 = vmatpush2.msra.mxu1 %v373_v21  ;;  %v3210_v21 = vld [vmem:[%s6028_s1 + $0x228] sm:$0xff] }
  0x2b   :  { %660 = vmatprep.subr.mxu0 %v6034_v0  ;;  %2798 = vmatprep.subr.mxu1 %v6034_v0 }
  0x2c   :  { %661 = vmatpush2.msra.mxu0 %v372_v22  ;;  %2830 = vmatpush2.msra.mxu1 %v372_v22  ;;  %v378_v22 = vld [vmem:[%s6028_s1 + $0x100] sm:$0xff] }
  0x2d   :  { %662 = vmatprep.subr.mxu0 %v6034_v0  ;;  %2799 = vmatprep.subr.mxu1 %v6034_v0 }
  0x2e   :  { %663 = vmatpush2.msra.mxu0 %v371_v23  ;;  %2831 = vmatpush2.msra.mxu1 %v371_v23  ;;  %v66_v23 = vld [vmem:[%s6029_s0 + $0x140] sm:$0xff] }
  0x2f   :  { %664 = vmatprep.subr.mxu0 %v6034_v0  ;;  %2800 = vmatprep.subr.mxu1 %v6034_v0 }
  0x30   :  { %665 = vmatpush2.msra.mxu0 %v370_v24  ;;  %2832 = vmatpush2.msra.mxu1 %v370_v24  ;;  %v306_v24 = vld [vmem:[%s6029_s0 + $0x8c0] sm:$0xff] }
  0x31   :  { %666 = vmatprep.subr.mxu0 %v6034_v0  ;;  %2801 = vmatprep.subr.mxu1 %v6034_v0 }
  0x32   :  { %667 = vmatpush2.msra.mxu0 %v369_v25  ;;  %2833 = vmatpush2.msra.mxu1 %v369_v25  ;;  %v409_v25 = vld [vmem:[%s6028_s1 + $0x1f8] sm:$0xff] }
  0x33   :  { %668 = vmatprep.subr.mxu0 %v6034_v0  ;;  %2802 = vmatprep.subr.mxu1 %v6034_v0 }
  0x34   :  { %669 = vmatpush2.msra.mxu0 %v368_v26  ;;  %2834 = vmatpush2.msra.mxu1 %v368_v26  ;;  %v72_v26 = vld [vmem:[%s6029_s0 + $0x170] sm:$0xff] }
  0x35   :  { %670 = vmatprep.subr.mxu0 %v6034_v0  ;;  %2803 = vmatprep.subr.mxu1 %v6034_v0 }
  0x36   :  { %671 = vmatpush2.msra.mxu0 %v367_v27  ;;  %2835 = vmatpush2.msra.mxu1 %v367_v27  ;;  %v312_v27 = vld [vmem:[%s6029_s0 + $0x8f0] sm:$0xff] }
  0x37   :  { %672 = vmatprep.subr.mxu0 %v6034_v0  ;;  %2804 = vmatprep.subr.mxu1 %v6034_v0 }
  0x38   :  { %673 = vmatpush2.msra.mxu0 %v366_v28  ;;  %2836 = vmatpush2.msra.mxu1 %v366_v28  ;;  %v408_v28 = vld [vmem:[%s6028_s1 + $0x1f0] sm:$0xff] }
  0x39   :  { %674 = vmatprep.subr.mxu0 %v6034_v0  ;;  %2805 = vmatprep.subr.mxu1 %v6034_v0 }
  0x3a   :  { %675 = vmatpush2.msra.mxu0 %v365_v29  ;;  %2837 = vmatpush2.msra.mxu1 %v365_v29  ;;  %v71_v29 = vld [vmem:[%s6029_s0 + $0x168] sm:$0xff] }
  0x3b   :  { %676 = vmatprep.subr.mxu0 %v6034_v0  ;;  %2806 = vmatprep.subr.mxu1 %v6034_v0 }
  0x3c   :  { %677 = vmatpush2.msra.mxu0 %v364_v30  ;;  %2838 = vmatpush2.msra.mxu1 %v364_v30  ;;  %v311_v30 = vld [vmem:[%s6029_s0 + $0x8e8] sm:$0xff] }
  0x3d   :  { %678 = vmatprep.subr.mxu0 %v6034_v0  ;;  %2807 = vmatprep.subr.mxu1 %v6034_v0 }
  0x3e   :  { %679 = vmatpush2.msra.mxu0 %v363_v31  ;;  %2839 = vmatpush2.msra.mxu1 %v363_v31  ;;  %v407_v31 = vld [vmem:[%s6028_s1 + $0x1e8] sm:$0xff] }
  0x3f   :  { %680 = vmatprep.subr.mxu0 %v6034_v0  ;;  %2808 = vmatprep.subr.mxu1 %v6034_v0 }
  0x40   :  { %681 = vmatpush2.msra.mxu0 %v362_v32  ;;  %2840 = vmatpush2.msra.mxu1 %v362_v32  ;;  %v77_v32 = vld [vmem:[%s6029_s0 + $0x198] sm:$0xff] }
  0x41   :  { %682 = vmatprep.mubr.f32.mxu0 %v27_v33  ;;  %922 = vmatprep.mubr.f32.mxu1 %v267_v34  ;;  %v317_v33 = vld [vmem:[%s6029_s0 + $0x918] sm:$0xff]  ;;  %v406_v34 = vld [vmem:[%s6028_s1 + $0x1e0] sm:$0xff] }
  0x42   :  { %683 = vmatmul.mubr.f32.vlgmr.msra.gmra.mxu0 %v26_v35  ;;  %923 = vmatmul.mubr.f32.vlgmr.msra.gmra.mxu1 %v266_v36  ;;  %v76_v35 = vld [vmem:[%s6029_s0 + $0x190] sm:$0xff] }
  0x43   :  { %1003 = vmatprep.subr.mxu1 %v6034_v0  ;;  %2665 = vmatprep.subr.mxu0 %v417_v37  ;;  %v316_v36 = vld [vmem:[%s6029_s0 + $0x910] sm:$0xff] }
  0x44   :  { %1004 = vmatpush1.msra.mxu1 %v393_v38  ;;  %2666 = vmatpush3.msra.mxu0 %v417_v37  ;;  %v405_v37 = vld [vmem:[%s6028_s1 + $0x1d8] sm:$0xff]  ;;  %v82_v38 = vld [vmem:[%s6029_s0 + $0x1c0] sm:$0xff] }
  0x45   :  { %1005 = vmatprep.subr.mxu1 %v6034_v0  ;;  %687 = vmatprep.mubr.f32.mxu0 %v32_v39  ;;  %v322_v39 = vld [vmem:[%s6029_s0 + $0x940] sm:$0xff] }
  0x46   :  { %927 = vmatprep.mubr.f32.mxu1 %v272_v40  ;;  %1006 = vmatpush1.msra.mxu1 %v392_v41  ;;  %v404_v40 = vld [vmem:[%s6028_s1 + $0x1d0] sm:$0xff]  ;;  %v81_v41 = vld [vmem:[%s6029_s0 + $0x1b8] sm:$0xff] }
  0x47   :  { %688 = vmatmul.mubr.f32.gmra.mxu0 %v31_v42  ;;  %928 = vmatmul.mubr.f32.gmra.mxu1 %v271_v43  ;;  %v321_v42 = vld [vmem:[%s6029_s0 + $0x938] sm:$0xff]  ;;  %v403_v43 = vld [vmem:[%s6028_s1 + $0x1c8] sm:$0xff] }
  0x48   :  { %1007 = vmatprep.subr.mxu1 %v6034_v0  ;;  %692 = vmatprep.mubr.f32.mxu0 %v37_v44  ;;  %v87_v44 = vld [vmem:[%s6029_s0 + $0x1e8] sm:$0xff] }
  0x49   :  { %1008 = vmatpush1.msra.mxu1 %v391_v45  ;;  %932 = vmatprep.mubr.f32.mxu1 %v277_v46  ;;  %v327_v45 = vld [vmem:[%s6029_s0 + $0x968] sm:$0xff]  ;;  %v402_v46 = vld [vmem:[%s6028_s1 + $0x1c0] sm:$0xff] }
  0x4a   :  { %1009 = vmatprep.subr.mxu1 %v6034_v0  ;;  %2667 = vmatprep.subr.mxu0 %v3083_v47 }
  0x4b   :  { %1010 = vmatpush1.msra.mxu1 %v390_v48  ;;  %693 = vmatmul.mubr.f32.gmra.mxu0 %v36_v49  ;;  %v326_v48 = vld [vmem:[%s6029_s0 + $0x960] sm:$0xff]  ;;  %v401_v49 = vld [vmem:[%s6028_s1 + $0x1b8] sm:$0xff] }
  0x4c   :  { %933 = vmatmul.mubr.f32.gmra.mxu1 %v276_v50  ;;  %1011 = vmatprep.subr.mxu1 %v6034_v0  ;;  %v92_v50 = vld [vmem:[%s6029_s0 + $0x210] sm:$0xff] }
  0x4d   :  { %1012 = vmatpush1.msra.mxu1 %v389_v51  ;;  %697 = vmatprep.mubr.f32.mxu0 %v42_v52  ;;  %v332_v51 = vld [vmem:[%s6029_s0 + $0x990] sm:$0xff] }
  0x4e   :  { %1013 = vmatprep.subr.mxu1 %v6034_v0  ;;  %937 = vmatprep.mubr.f32.mxu1 %v282_v53  ;;  %v400_v52 = vld [vmem:[%s6028_s1 + $0x1b0] sm:$0xff]  ;;  %v91_v53 = vld [vmem:[%s6029_s0 + $0x208] sm:$0xff] }
  0x4f   :  { %1014 = vmatpush1.msra.mxu1 %v388_v54  ;;  %698 = vmatmul.mubr.f32.gmra.mxu0 %v41_v55  ;;  %v331_v54 = vld [vmem:[%s6029_s0 + $0x988] sm:$0xff]  ;;  %v97_v55 = vld [vmem:[%s6029_s0 + $0x238] sm:$0xff] }
  0x50   :  { %938 = vmatmul.mubr.f32.gmra.mxu1 %v281_v56  ;;  %1015 = vmatprep.subr.mxu1 %v6034_v0  ;;  %v399_v56 = vld [vmem:[%s6028_s1 + $0x1a8] sm:$0xff] }
  0x51   :  { %1016 = vmatpush1.msra.mxu1 %v387_v57  ;;  %702 = vmatprep.mubr.f32.mxu0 %v47_v58  ;;  %v337_v57 = vld [vmem:[%s6029_s0 + $0x9b8] sm:$0xff]  ;;  %v414_v58 = vld [vmem:[%s6028_s1 + $0x220] sm:$0xff] }
  0x52   :  { %1017 = vmatprep.subr.mxu1 %v6034_v0  ;;  %942 = vmatprep.mubr.f32.mxu1 %v287_v59  ;;  %v398_v59 = vld [vmem:[%s6028_s1 + $0x1a0] sm:$0xff] }
  0x53   :  { %1018 = vmatpush1.msra.mxu1 %v386_v60  ;;  %703 = vmatmul.mubr.f32.gmra.mxu0 %v46_v61  ;;  %v96_v60 = vld [vmem:[%s6029_s0 + $0x230] sm:$0xff] }
  0x54   :  { %943 = vmatmul.mubr.f32.gmra.mxu1 %v286_v62  ;;  %1019 = vmatprep.subr.mxu1 %v6034_v0  ;;  %v336_v61 = vld [vmem:[%s6029_s0 + $0x9b0] sm:$0xff]  ;;  %v397_v62 = vld [vmem:[%s6028_s1 + $0x198] sm:$0xff] }
  0x55   :  { %1020 = vmatpush1.msra.mxu1 %v385_v63  ;;  %707 = vmatprep.mubr.f32.mxu0 %v52_v1  ;;  %v102_v63 = vld [vmem:[%s6029_s0 + $0x260] sm:$0xff] }
  0x56   :  { %1021 = vmatprep.subr.mxu1 %v6034_v0  ;;  %947 = vmatprep.mubr.f32.mxu1 %v292_v2  ;;  %v342_v1 = vld [vmem:[%s6029_s0 + $0x9e0] sm:$0xff]  ;;  %v396_v2 = vld [vmem:[%s6028_s1 + $0x190] sm:$0xff] }
  0x57   :  { %1022 = vmatpush1.msra.mxu1 %v384_v3  ;;  %708 = vmatmul.mubr.f32.gmra.mxu0 %v51_v4  ;;  %v101_v3 = vld [vmem:[%s6029_s0 + $0x258] sm:$0xff] }
  0x58   :  { %948 = vmatmul.mubr.f32.gmra.mxu1 %v291_v5  ;;  %1023 = vmatprep.subr.mxu1 %v6034_v0  ;;  %v341_v4 = vld [vmem:[%s6029_s0 + $0x9d8] sm:$0xff]  ;;  %v395_v5 = vld [vmem:[%s6028_s1 + $0x188] sm:$0xff] }
  0x59   :  { %1024 = vmatpush1.msra.mxu1 %v383_v6  ;;  %712 = vmatprep.mubr.f32.mxu0 %v57_v7  ;;  %v107_v6 = vld [vmem:[%s6029_s0 + $0x288] sm:$0xff]  ;;  %v29_v7 = vld [vmem:[%s6029_s0 + $0x18] sm:$0xff] }
  0x5a   :  { %1025 = vmatprep.subr.mxu1 %v6034_v0  ;;  %952 = vmatprep.mubr.f32.mxu1 %v297_v8  ;;  %v394_v8 = vld [vmem:[%s6028_s1 + $0x180] sm:$0xff] }
  0x5b   :  { %1026 = vmatpush1.msra.mxu1 %v382_v9  ;;  %713 = vmatmul.mubr.f32.gmra.mxu0 %v56_v10  ;;  %v106_v9 = vld [vmem:[%s6029_s0 + $0x280] sm:$0xff]  ;;  %v28_v10 = vld [vmem:[%s6029_s0 + $0x10] sm:$0xff] }
  0x5c   :  { %953 = vmatmul.mubr.f32.gmra.mxu1 %v296_v11  ;;  %1027 = vmatprep.subr.mxu1 %v6034_v0  ;;  %v112_v11 = vld [vmem:[%s6029_s0 + $0x2b0] sm:$0xff] }
  0x5d   :  { %1028 = vmatpush1.msra.mxu1 %v381_v12  ;;  %2668 = vmatpush3.msra.mxu0 %v3083_v47  ;;  %v86_v47 = vld [vmem:[%s6029_s0 + $0x1e0] sm:$0xff] }
  0x5e   :  { %1029 = vmatprep.subr.mxu1 %v6034_v0  ;;  %717 = vmatprep.mubr.f32.mxu0 %v62_v13  ;;  %v34_v12 = vld [vmem:[%s6029_s0 + $0x40] sm:$0xff]  ;;  %v413_v13 = vld [vmem:[%s6028_s1 + $0x218] sm:$0xff] }
  0x5f   :  { %957 = vmatprep.mubr.f32.mxu1 %v302_v14  ;;  %1030 = vmatpush1.msra.mxu1 %v380_v15  ;;  %v111_v14 = vld [vmem:[%s6029_s0 + $0x2a8] sm:$0xff]  ;;  %v33_v15 = vld [vmem:[%s6029_s0 + $0x38] sm:$0xff] }
  0x60   :  { %718 = vmatmul.mubr.f32.gmra.mxu0 %v61_v16  ;;  %958 = vmatmul.mubr.f32.gmra.mxu1 %v301_v17  ;;  %v117_v16 = vld [vmem:[%s6029_s0 + $0x2d8] sm:$0xff]  ;;  %v39_v17 = vld [vmem:[%s6029_s0 + $0x68] sm:$0xff] }
  0x61   :  { %1031 = vmatprep.subr.mxu1 %v6034_v0  ;;  %722 = vmatprep.mubr.f32.mxu0 %v67_v18  ;;  %v412_v18 = vld [vmem:[%s6028_s1 + $0x210] sm:$0xff] }
  0x62   :  { %1032 = vmatpush1.msra.mxu1 %v379_v19  ;;  %962 = vmatprep.mubr.f32.mxu1 %v307_v20  ;;  %v116_v19 = vld [vmem:[%s6029_s0 + $0x2d0] sm:$0xff]  ;;  %v38_v20 = vld [vmem:[%s6029_s0 + $0x60] sm:$0xff] }
  0x63   :  { %1033 = vmatprep.subr.mxu1 %v6034_v0  ;;  %2669 = vmatprep.subr.mxu0 %v3210_v21 }
  0x64   :  { %1034 = vmatpush1.msra.mxu1 %v378_v22  ;;  %723 = vmatmul.mubr.f32.gmra.mxu0 %v66_v23  ;;  %v44_v22 = vld [vmem:[%s6029_s0 + $0x90] sm:$0xff]  ;;  %v411_v23 = vld [vmem:[%s6028_s1 + $0x208] sm:$0xff] }
  0x65   :  { %963 = vmatmul.mubr.f32.gmra.mxu1 %v306_v24  ;;  %1035 = vmatprep.subr.mxu1 %v6034_v0  ;;  %v121_v24 = vld [vmem:[%s6029_s0 + $0x2f8] sm:$0xff] }
  0x66   :  { %1036 = vmatpush2.msra.mxu1 %v409_v25  ;;  %727 = vmatprep.mubr.f32.mxu0 %v72_v26  ;;  %v43_v25 = vld [vmem:[%s6029_s0 + $0x88] sm:$0xff] }
  0x67   :  { %1037 = vmatprep.subr.mxu1 %v6034_v0  ;;  %967 = vmatprep.mubr.f32.mxu1 %v312_v27  ;;  %v127_v26 = vld [vmem:[%s6029_s0 + $0x328] sm:$0xff]  ;;  %v49_v27 = vld [vmem:[%s6029_s0 + $0xb8] sm:$0xff] }
  0x68   :  { %1038 = vmatpush2.msra.mxu1 %v408_v28  ;;  %728 = vmatmul.mubr.f32.gmra.mxu0 %v71_v29  ;;  %v410_v28 = vld [vmem:[%s6028_s1 + $0x200] sm:$0xff] }
  0x69   :  { %968 = vmatmul.mubr.f32.gmra.mxu1 %v311_v30  ;;  %1039 = vmatprep.subr.mxu1 %v6034_v0  ;;  %v126_v29 = vld [vmem:[%s6029_s0 + $0x320] sm:$0xff]  ;;  %v48_v30 = vld [vmem:[%s6029_s0 + $0xb0] sm:$0xff] }
  0x6a   :  { %1040 = vmatpush2.msra.mxu1 %v407_v31  ;;  %732 = vmatprep.mubr.f32.mxu0 %v77_v32  ;;  %v132_v31 = vld [vmem:[%s6029_s0 + $0x350] sm:$0xff]  ;;  %v54_v32 = vld [vmem:[%s6029_s0 + $0xe0] sm:$0xff] }
  0x6b   :  { %1041 = vmatprep.subr.mxu1 %v6034_v0  ;;  %972 = vmatprep.mubr.f32.mxu1 %v317_v33  ;;  %v131_v33 = vld [vmem:[%s6029_s0 + $0x348] sm:$0xff] }
  0x6c   :  { %1042 = vmatpush2.msra.mxu1 %v406_v34  ;;  %733 = vmatmul.mubr.f32.gmra.mxu0 %v76_v35  ;;  %v53_v34 = vld [vmem:[%s6029_s0 + $0xd8] sm:$0xff] }
  0x6d   :  { %973 = vmatmul.mubr.f32.gmra.mxu1 %v316_v36  ;;  %1043 = vmatprep.subr.mxu1 %v6034_v0  ;;  %v137_v35 = vld [vmem:[%s6029_s0 + $0x378] sm:$0xff]  ;;  %v59_v36 = vld [vmem:[%s6029_s0 + $0x108] sm:$0xff] }
  0x6e   :  { %1044 = vmatpush2.msra.mxu1 %v405_v37  ;;  %737 = vmatprep.mubr.f32.mxu0 %v82_v38  ;;  %v136_v37 = vld [vmem:[%s6029_s0 + $0x370] sm:$0xff]  ;;  %v58_v38 = vld [vmem:[%s6029_s0 + $0x100] sm:$0xff] }
  0x6f   :  { %1045 = vmatprep.subr.mxu1 %v6034_v0  ;;  %977 = vmatprep.mubr.f32.mxu1 %v322_v39  ;;  %v142_v39 = vld [vmem:[%s6029_s0 + $0x3a0] sm:$0xff] }
  0x70   :  { %1046 = vmatpush2.msra.mxu1 %v404_v40  ;;  %738 = vmatmul.mubr.f32.gmra.mxu0 %v81_v41  ;;  %v64_v40 = vld [vmem:[%s6029_s0 + $0x130] sm:$0xff]  ;;  %v141_v41 = vld [vmem:[%s6029_s0 + $0x398] sm:$0xff] }
  0x71   :  { %978 = vmatmul.mubr.f32.gmra.mxu1 %v321_v42  ;;  %1047 = vmatprep.subr.mxu1 %v6034_v0  ;;  %v63_v42 = vld [vmem:[%s6029_s0 + $0x128] sm:$0xff] }
  0x72   :  { %1048 = vmatpush2.msra.mxu1 %v403_v43  ;;  %742 = vmatprep.mubr.f32.mxu0 %v87_v44  ;;  %v147_v43 = vld [vmem:[%s6029_s0 + $0x3c8] sm:$0xff]  ;;  %v69_v44 = vld [vmem:[%s6029_s0 + $0x158] sm:$0xff] }
  0x73   :  { %1049 = vmatprep.subr.mxu1 %v6034_v0  ;;  %982 = vmatprep.mubr.f32.mxu1 %v327_v45  ;;  %v146_v45 = vld [vmem:[%s6029_s0 + $0x3c0] sm:$0xff] }
  0x74   :  { %1050 = vmatpush2.msra.mxu1 %v402_v46  ;;  %743 = vmatmul.mubr.f32.gmra.mxu0 %v86_v47  ;;  %v68_v46 = vld [vmem:[%s6029_s0 + $0x150] sm:$0xff] }
  0x75   :  { %983 = vmatmul.mubr.f32.gmra.mxu1 %v326_v48  ;;  %1051 = vmatprep.subr.mxu1 %v6034_v0  ;;  %v152_v47 = vld [vmem:[%s6029_s0 + $0x3f0] sm:$0xff]  ;;  %v74_v48 = vld [vmem:[%s6029_s0 + $0x180] sm:$0xff] }
  0x76   :  { %1052 = vmatpush2.msra.mxu1 %v401_v49  ;;  %2670 = vmatpush3.msra.mxu0 %v3210_v21  ;;  %v122_v21 = vld [vmem:[%s6029_s0 + $0x300] sm:$0xff]  ;;  %v151_v49 = vld [vmem:[%s6029_s0 + $0x3e8] sm:$0xff] }
  0x77   :  { %1053 = vmatprep.subr.mxu1 %v6034_v0  ;;  %747 = vmatprep.mubr.f32.mxu0 %v92_v50  ;;  %v73_v50 = vld [vmem:[%s6029_s0 + $0x178] sm:$0xff] }
  0x78   :  { %987 = vmatprep.mubr.f32.mxu1 %v332_v51  ;;  %1054 = vmatpush2.msra.mxu1 %v400_v52  ;;  %v157_v51 = vld [vmem:[%s6029_s0 + $0x418] sm:$0xff]  ;;  %v79_v52 = vld [vmem:[%s6029_s0 + $0x1a8] sm:$0xff] }
  0x79   :  { %748 = vmatmul.mubr.f32.gmra.mxu0 %v91_v53  ;;  %988 = vmatmul.mubr.f32.gmra.mxu1 %v331_v54  ;;  %v156_v53 = vld [vmem:[%s6029_s0 + $0x410] sm:$0xff]  ;;  %v78_v54 = vld [vmem:[%s6029_s0 + $0x1a0] sm:$0xff] }
  0x7a   :  { %1055 = vmatprep.subr.mxu1 %v6034_v0  ;;  %752 = vmatprep.mubr.f32.mxu0 %v97_v55  ;;  %v162_v55 = vld [vmem:[%s6029_s0 + $0x440] sm:$0xff] }
  0x7b   :  { %1056 = vmatpush2.msra.mxu1 %v399_v56  ;;  %992 = vmatprep.mubr.f32.mxu1 %v337_v57  ;;  %v84_v56 = vld [vmem:[%s6029_s0 + $0x1d0] sm:$0xff]  ;;  %v161_v57 = vld [vmem:[%s6029_s0 + $0x438] sm:$0xff] }
  0x7c   :  { %1057 = vmatprep.subr.mxu1 %v6034_v0  ;;  %2671 = vmatprep.subr.mxu0 %v414_v58 }
  0x7d   :  { %1058 = vmatpush2.msra.mxu1 %v398_v59  ;;  %753 = vmatmul.mubr.f32.gmra.mxu0 %v96_v60  ;;  %v167_v59 = vld [vmem:[%s6029_s0 + $0x468] sm:$0xff]  ;;  %v89_v60 = vld [vmem:[%s6029_s0 + $0x1f8] sm:$0xff] }
  0x7e   :  { %993 = vmatmul.mubr.f32.gmra.mxu1 %v336_v61  ;;  %1059 = vmatprep.subr.mxu1 %v6034_v0  ;;  %v166_v61 = vld [vmem:[%s6029_s0 + $0x460] sm:$0xff] }
  0x7f   :  { %1060 = vmatpush2.msra.mxu1 %v397_v62  ;;  %757 = vmatprep.mubr.f32.mxu0 %v102_v63  ;;  %v88_v62 = vld [vmem:[%s6029_s0 + $0x1f0] sm:$0xff] }
  0x80   :  { %1061 = vmatprep.subr.mxu1 %v6034_v0  ;;  %997 = vmatprep.mubr.f32.mxu1 %v342_v1  ;;  %v172_v63 = vld [vmem:[%s6029_s0 + $0x490] sm:$0xff]  ;;  %v94_v1 = vld [vmem:[%s6029_s0 + $0x220] sm:$0xff] }
  0x81   :  { %1062 = vmatpush2.msra.mxu1 %v396_v2  ;;  %758 = vmatmul.mubr.f32.gmra.mxu0 %v101_v3  ;;  %v171_v2 = vld [vmem:[%s6029_s0 + $0x488] sm:$0xff]  ;;  %v93_v3 = vld [vmem:[%s6029_s0 + $0x218] sm:$0xff] }
  0x82   :  { %998 = vmatmul.mubr.f32.gmra.mxu1 %v341_v4  ;;  %1063 = vmatprep.subr.mxu1 %v6034_v0  ;;  %v177_v4 = vld [vmem:[%s6029_s0 + $0x4b8] sm:$0xff] }
  0x83   :  { %1064 = vmatpush2.msra.mxu1 %v395_v5  ;;  %762 = vmatprep.mubr.f32.mxu0 %v107_v6  ;;  %v99_v5 = vld [vmem:[%s6029_s0 + $0x248] sm:$0xff]  ;;  %v176_v6 = vld [vmem:[%s6029_s0 + $0x4b0] sm:$0xff] }
  0x84   :  { %1065 = vmatprep.subr.mxu1 %v6034_v0  ;;  %1067 = vmatprep.mubr.f32.mxu1 %v29_v7  ;;  %v98_v7 = vld [vmem:[%s6029_s0 + $0x240] sm:$0xff] }
  0x85   :  { %1066 = vmatpush2.msra.mxu1 %v394_v8  ;;  %763 = vmatmul.mubr.f32.gmra.mxu0 %v106_v9  ;;  %v182_v8 = vld [vmem:[%s6029_s0 + $0x4e0] sm:$0xff]  ;;  %v104_v9 = vld [vmem:[%s6029_s0 + $0x270] sm:$0xff] }
  0x86   :  { %1068 = vmatmul.mubr.f32.vlgmr.msra.gmra.mxu1 %v28_v10  ;;  %767 = vmatprep.mubr.f32.mxu0 %v112_v11  ;;  %v181_v10 = vld [vmem:[%s6029_s0 + $0x4d8] sm:$0xff]  ;;  %v103_v11 = vld [vmem:[%s6029_s0 + $0x268] sm:$0xff] }
  0x87   :  { %1072 = vmatprep.mubr.f32.mxu1 %v34_v12  ;;  %2672 = vmatpush3.msra.mxu0 %v414_v58  ;;  %v83_v58 = vld [vmem:[%s6029_s0 + $0x1c8] sm:$0xff] }
  0x88   :  { %2673 = vmatprep.subr.mxu0 %v413_v13  ;;  %v187_v12 = vld [vmem:[%s6029_s0 + $0x508] sm:$0xff] }
  0x89   :  { %768 = vmatmul.mubr.f32.gmra.mxu0 %v111_v14  ;;  %v186_v14 = vld [vmem:[%s6029_s0 + $0x500] sm:$0xff] }
  0x8a   :  { %1073 = vmatmul.mubr.f32.gmra.mxu1 %v33_v15  ;;  %772 = vmatprep.mubr.f32.mxu0 %v117_v16  ;;  %v108_v15 = vld [vmem:[%s6029_s0 + $0x290] sm:$0xff] }
  0x8b   :  { %1077 = vmatprep.mubr.f32.mxu1 %v39_v17  ;;  %2674 = vmatpush3.msra.mxu0 %v413_v13  ;;  %v109_v13 = vld [vmem:[%s6029_s0 + $0x298] sm:$0xff]  ;;  %v192_v16 = vld [vmem:[%s6029_s0 + $0x530] sm:$0xff]  ;;  %v114_v17 = vld [vmem:[%s6029_s0 + $0x2c0] sm:$0xff] }
  0x8c   :  { %2675 = vmatprep.subr.mxu0 %v412_v18 }
  0x8d   :  { %773 = vmatmul.mubr.f32.gmra.mxu0 %v116_v19  ;;  %v113_v19 = vld [vmem:[%s6029_s0 + $0x2b8] sm:$0xff] }
  0x8e   :  { %1078 = vmatmul.mubr.f32.gmra.mxu1 %v38_v20  ;;  %777 = vmatprep.mubr.f32.mxu0 %v122_v21  ;;  %v197_v20 = vld [vmem:[%s6029_s0 + $0x558] sm:$0xff]  ;;  %v119_v21 = vld [vmem:[%s6029_s0 + $0x2e8] sm:$0xff] }
  0x8f   :  { %1082 = vmatprep.mubr.f32.mxu1 %v44_v22  ;;  %2676 = vmatpush3.msra.mxu0 %v412_v18  ;;  %v191_v18 = vld [vmem:[%s6029_s0 + $0x528] sm:$0xff]  ;;  %v196_v22 = vld [vmem:[%s6029_s0 + $0x550] sm:$0xff] }
  0x90   :  { %2677 = vmatprep.subr.mxu0 %v411_v23 }
  0x91   :  { %778 = vmatmul.mubr.f32.gmra.mxu0 %v121_v24  ;;  %v202_v24 = vld [vmem:[%s6029_s0 + $0x580] sm:$0xff] }
  0x92   :  { %1083 = vmatmul.mubr.f32.gmra.mxu1 %v43_v25  ;;  %782 = vmatprep.mubr.f32.mxu0 %v127_v26  ;;  %v124_v25 = vld [vmem:[%s6029_s0 + $0x310] sm:$0xff]  ;;  %v201_v26 = vld [vmem:[%s6029_s0 + $0x578] sm:$0xff] }
  0x93   :  { %1087 = vmatprep.mubr.f32.mxu1 %v49_v27  ;;  %2678 = vmatpush3.msra.mxu0 %v411_v23  ;;  %v118_v23 = vld [vmem:[%s6029_s0 + $0x2e0] sm:$0xff]  ;;  %v123_v27 = vld [vmem:[%s6029_s0 + $0x308] sm:$0xff] }
  0x94   :  { %2679 = vmatprep.subr.mxu0 %v410_v28 }
  0x95   :  { %783 = vmatmul.mubr.f32.gmra.mxu0 %v126_v29  ;;  %v129_v29 = vld [vmem:[%s6029_s0 + $0x338] sm:$0xff] }
  0x96   :  { %1088 = vmatmul.mubr.f32.gmra.mxu1 %v48_v30  ;;  %787 = vmatprep.mubr.f32.mxu0 %v132_v31  ;;  %v206_v30 = vld [vmem:[%s6029_s0 + $0x5a0] sm:$0xff]  ;;  %v128_v31 = vld [vmem:[%s6029_s0 + $0x330] sm:$0xff] }
  0x97   :  { %1092 = vmatprep.mubr.f32.mxu1 %v54_v32  ;;  %2680 = vmatpush3.msra.mxu0 %v410_v28  ;;  %v207_v28 = vld [vmem:[%s6029_s0 + $0x5a8] sm:$0xff]  ;;  %v212_v32 = vld [vmem:[%s6029_s0 + $0x5d0] sm:$0xff] }
  0x99   :  { %788 = vmatmul.mubr.f32.gmra.mxu0 %v131_v33  ;;  %v134_v33 = vld [vmem:[%s6029_s0 + $0x360] sm:$0xff] }
  0x9a   :  { %1093 = vmatmul.mubr.f32.gmra.mxu1 %v53_v34  ;;  %792 = vmatprep.mubr.f32.mxu0 %v137_v35  ;;  %v211_v34 = vld [vmem:[%s6029_s0 + $0x5c8] sm:$0xff]  ;;  %v133_v35 = vld [vmem:[%s6029_s0 + $0x358] sm:$0xff] }
  0x9b   :  { %1097 = vmatprep.mubr.f32.mxu1 %v59_v36  ;;  %v217_v36 = vld [vmem:[%s6029_s0 + $0x5f8] sm:$0xff] }
  0x9d   :  { %793 = vmatmul.mubr.f32.gmra.mxu0 %v136_v37  ;;  %v139_v37 = vld [vmem:[%s6029_s0 + $0x388] sm:$0xff] }
  0x9e   :  { %1098 = vmatmul.mubr.f32.gmra.mxu1 %v58_v38  ;;  %797 = vmatprep.mubr.f32.mxu0 %v142_v39  ;;  %v216_v38 = vld [vmem:[%s6029_s0 + $0x5f0] sm:$0xff]  ;;  %v138_v39 = vld [vmem:[%s6029_s0 + $0x380] sm:$0xff] }
  0x9f   :  { %1102 = vmatprep.mubr.f32.mxu1 %v64_v40  ;;  %v222_v40 = vld [vmem:[%s6029_s0 + $0x620] sm:$0xff] }
  0xa1   :  { %798 = vmatmul.mubr.f32.gmra.mxu0 %v141_v41  ;;  %v144_v41 = vld [vmem:[%s6029_s0 + $0x3b0] sm:$0xff] }
  0xa2   :  { %1103 = vmatmul.mubr.f32.gmra.mxu1 %v63_v42  ;;  %802 = vmatprep.mubr.f32.mxu0 %v147_v43  ;;  %v221_v42 = vld [vmem:[%s6029_s0 + $0x618] sm:$0xff]  ;;  %v143_v43 = vld [vmem:[%s6029_s0 + $0x3a8] sm:$0xff] }
  0xa3   :  { %1107 = vmatprep.mubr.f32.mxu1 %v69_v44  ;;  %v227_v44 = vld [vmem:[%s6029_s0 + $0x648] sm:$0xff] }
  0xa5   :  { %803 = vmatmul.mubr.f32.gmra.mxu0 %v146_v45  ;;  %v149_v45 = vld [vmem:[%s6029_s0 + $0x3d8] sm:$0xff] }
  0xa6   :  { %1108 = vmatmul.mubr.f32.gmra.mxu1 %v68_v46  ;;  %807 = vmatprep.mubr.f32.mxu0 %v152_v47  ;;  %v226_v46 = vld [vmem:[%s6029_s0 + $0x640] sm:$0xff]  ;;  %v148_v47 = vld [vmem:[%s6029_s0 + $0x3d0] sm:$0xff] }
  0xa7   :  { %1112 = vmatprep.mubr.f32.mxu1 %v74_v48  ;;  %v232_v48 = vld [vmem:[%s6029_s0 + $0x670] sm:$0xff] }
  0xa9   :  { %808 = vmatmul.mubr.f32.gmra.mxu0 %v151_v49  ;;  %v154_v49 = vld [vmem:[%s6029_s0 + $0x400] sm:$0xff] }
  0xaa   :  { %1113 = vmatmul.mubr.f32.gmra.mxu1 %v73_v50  ;;  %812 = vmatprep.mubr.f32.mxu0 %v157_v51  ;;  %v231_v50 = vld [vmem:[%s6029_s0 + $0x668] sm:$0xff]  ;;  %v153_v51 = vld [vmem:[%s6029_s0 + $0x3f8] sm:$0xff] }
  0xab   :  { %1117 = vmatprep.mubr.f32.mxu1 %v79_v52  ;;  %v237_v52 = vld [vmem:[%s6029_s0 + $0x698] sm:$0xff] }
  0xad   :  { %813 = vmatmul.mubr.f32.gmra.mxu0 %v156_v53  ;;  %v159_v53 = vld [vmem:[%s6029_s0 + $0x428] sm:$0xff] }
  0xae   :  { %1118 = vmatmul.mubr.f32.gmra.mxu1 %v78_v54  ;;  %817 = vmatprep.mubr.f32.mxu0 %v162_v55  ;;  %v236_v54 = vld [vmem:[%s6029_s0 + $0x690] sm:$0xff]  ;;  %v158_v55 = vld [vmem:[%s6029_s0 + $0x420] sm:$0xff] }
  0xaf   :  { %1122 = vmatprep.mubr.f32.mxu1 %v84_v56  ;;  %v242_v56 = vld [vmem:[%s6029_s0 + $0x6c0] sm:$0xff] }
  0xb1   :  { %818 = vmatmul.mubr.f32.gmra.mxu0 %v161_v57  ;;  %v164_v57 = vld [vmem:[%s6029_s0 + $0x450] sm:$0xff] }
  0xb2   :  { %1123 = vmatmul.mubr.f32.gmra.mxu1 %v83_v58  ;;  %822 = vmatprep.mubr.f32.mxu0 %v167_v59  ;;  %v241_v58 = vld [vmem:[%s6029_s0 + $0x6b8] sm:$0xff]  ;;  %v163_v59 = vld [vmem:[%s6029_s0 + $0x448] sm:$0xff] }
  0xb3   :  { %1127 = vmatprep.mubr.f32.mxu1 %v89_v60  ;;  %v247_v60 = vld [vmem:[%s6029_s0 + $0x6e8] sm:$0xff] }
  0xb5   :  { %823 = vmatmul.mubr.f32.gmra.mxu0 %v166_v61  ;;  %v169_v61 = vld [vmem:[%s6029_s0 + $0x478] sm:$0xff] }
  0xb6   :  { %1128 = vmatmul.mubr.f32.gmra.mxu1 %v88_v62  ;;  %827 = vmatprep.mubr.f32.mxu0 %v172_v63  ;;  %v246_v62 = vld [vmem:[%s6029_s0 + $0x6e0] sm:$0xff]  ;;  %v168_v63 = vld [vmem:[%s6029_s0 + $0x470] sm:$0xff] }
  0xb7   :  { %1132 = vmatprep.mubr.f32.mxu1 %v94_v1  ;;  %v252_v1 = vld [vmem:[%s6029_s0 + $0x710] sm:$0xff] }
  0xb9   :  { %828 = vmatmul.mubr.f32.gmra.mxu0 %v171_v2  ;;  %v174_v2 = vld [vmem:[%s6029_s0 + $0x4a0] sm:$0xff] }
  0xba   :  { %1133 = vmatmul.mubr.f32.gmra.mxu1 %v93_v3  ;;  %832 = vmatprep.mubr.f32.mxu0 %v177_v4  ;;  %v251_v3 = vld [vmem:[%s6029_s0 + $0x708] sm:$0xff]  ;;  %v173_v4 = vld [vmem:[%s6029_s0 + $0x498] sm:$0xff] }
  0xbb   :  { %1137 = vmatprep.mubr.f32.mxu1 %v99_v5  ;;  %v257_v5 = vld [vmem:[%s6029_s0 + $0x738] sm:$0xff] }
  0xbd   :  { %833 = vmatmul.mubr.f32.gmra.mxu0 %v176_v6  ;;  %v179_v6 = vld [vmem:[%s6029_s0 + $0x4c8] sm:$0xff] }
  0xbe   :  { %1138 = vmatmul.mubr.f32.gmra.mxu1 %v98_v7  ;;  %837 = vmatprep.mubr.f32.mxu0 %v182_v8  ;;  %v256_v7 = vld [vmem:[%s6029_s0 + $0x730] sm:$0xff]  ;;  %v178_v8 = vld [vmem:[%s6029_s0 + $0x4c0] sm:$0xff] }
  0xbf   :  { %1142 = vmatprep.mubr.f32.mxu1 %v104_v9  ;;  %v262_v9 = vld [vmem:[%s6029_s0 + $0x760] sm:$0xff] }
  0xc1   :  { %838 = vmatmul.mubr.f32.gmra.mxu0 %v181_v10  ;;  %v184_v10 = vld [vmem:[%s6029_s0 + $0x4f0] sm:$0xff] }
  0xc2   :  { %1143 = vmatmul.mubr.f32.gmra.mxu1 %v103_v11  ;;  %842 = vmatprep.mubr.f32.mxu0 %v187_v12  ;;  %v261_v11 = vld [vmem:[%s6029_s0 + $0x758] sm:$0xff]  ;;  %v183_v12 = vld [vmem:[%s6029_s0 + $0x4e8] sm:$0xff] }
  0xc3   :  { %1147 = vmatprep.mubr.f32.mxu1 %v109_v13  ;;  %v30_v13 = vld [vmem:[%s6029_s0 + $0x20] sm:$0xff] }
  0xc5   :  { %843 = vmatmul.mubr.f32.gmra.mxu0 %v186_v14  ;;  %v189_v14 = vld [vmem:[%s6029_s0 + $0x518] sm:$0xff] }
  0xc6   :  { %1148 = vmatmul.mubr.f32.gmra.mxu1 %v108_v15  ;;  %847 = vmatprep.mubr.f32.mxu0 %v192_v16 }
  0xc7   :  { %1152 = vmatprep.mubr.f32.mxu1 %v114_v17  ;;  %v35_v17 = vld [vmem:[%s6029_s0 + $0x48] sm:$0xff] }
  0xc9   :  { %848 = vmatmul.mubr.f32.gmra.mxu0 %v191_v18  ;;  %v188_v18 = vld [vmem:[%s6029_s0 + $0x510] sm:$0xff] }
  0xca   :  { %1153 = vmatmul.mubr.f32.gmra.mxu1 %v113_v19  ;;  %852 = vmatprep.mubr.f32.mxu0 %v197_v20  ;;  %v40_v19 = vld [vmem:[%s6029_s0 + $0x70] sm:$0xff] }
  0xcb   :  { %1157 = vmatprep.mubr.f32.mxu1 %v119_v21 }
  0xcd   :  { %853 = vmatmul.mubr.f32.gmra.mxu0 %v196_v22  ;;  %v194_v22 = vld [vmem:[%s6029_s0 + $0x540] sm:$0xff] }
  0xce   :  { %1158 = vmatmul.mubr.f32.gmra.mxu1 %v118_v23  ;;  %857 = vmatprep.mubr.f32.mxu0 %v202_v24  ;;  %v45_v23 = vld [vmem:[%s6029_s0 + $0x98] sm:$0xff] }
  0xcf   :  { %1162 = vmatprep.mubr.f32.mxu1 %v124_v25 }
  0xd1   :  { %858 = vmatmul.mubr.f32.gmra.mxu0 %v201_v26  ;;  %v193_v26 = vld [vmem:[%s6029_s0 + $0x538] sm:$0xff] }
  0xd2   :  { %1163 = vmatmul.mubr.f32.gmra.mxu1 %v123_v27  ;;  %862 = vmatprep.mubr.f32.mxu0 %v207_v28  ;;  %v50_v27 = vld [vmem:[%s6029_s0 + $0xc0] sm:$0xff]  ;;  %v199_v28 = vld [vmem:[%s6029_s0 + $0x568] sm:$0xff] }
  0xd3   :  { %1167 = vmatprep.mubr.f32.mxu1 %v129_v29 }
  0xd5   :  { %863 = vmatmul.mubr.f32.gmra.mxu0 %v206_v30 }
  0xd6   :  { %1168 = vmatmul.mubr.f32.gmra.mxu1 %v128_v31  ;;  %867 = vmatprep.mubr.f32.mxu0 %v212_v32  ;;  %v55_v31 = vld [vmem:[%s6029_s0 + $0xe8] sm:$0xff] }
  0xd7   :  { %1172 = vmatprep.mubr.f32.mxu1 %v134_v33  ;;  %v198_v33 = vld [vmem:[%s6029_s0 + $0x560] sm:$0xff] }
  0xd9   :  { %868 = vmatmul.mubr.f32.gmra.mxu0 %v211_v34  ;;  %v60_v34 = vld [vmem:[%s6029_s0 + $0x110] sm:$0xff] }
  0xda   :  { %1173 = vmatmul.mubr.f32.gmra.mxu1 %v133_v35  ;;  %872 = vmatprep.mubr.f32.mxu0 %v217_v36  ;;  %v204_v36 = vld [vmem:[%s6029_s0 + $0x590] sm:$0xff] }
  0xdb   :  { %1177 = vmatprep.mubr.f32.mxu1 %v139_v37 }
  0xdd   :  { %873 = vmatmul.mubr.f32.gmra.mxu0 %v216_v38 }
  0xde   :  { %1178 = vmatmul.mubr.f32.gmra.mxu1 %v138_v39  ;;  %877 = vmatprep.mubr.f32.mxu0 %v222_v40  ;;  %v65_v39 = vld [vmem:[%s6029_s0 + $0x138] sm:$0xff] }
  0xdf   :  { %1182 = vmatprep.mubr.f32.mxu1 %v144_v41  ;;  %v203_v41 = vld [vmem:[%s6029_s0 + $0x588] sm:$0xff] }
  0xe1   :  { %878 = vmatmul.mubr.f32.gmra.mxu0 %v221_v42  ;;  %v70_v42 = vld [vmem:[%s6029_s0 + $0x160] sm:$0xff] }
  0xe2   :  { %1183 = vmatmul.mubr.f32.gmra.mxu1 %v143_v43  ;;  %882 = vmatprep.mubr.f32.mxu0 %v227_v44  ;;  %v209_v44 = vld [vmem:[%s6029_s0 + $0x5b8] sm:$0xff] }
  0xe3   :  { %1187 = vmatprep.mubr.f32.mxu1 %v149_v45 }
  0xe5   :  { %883 = vmatmul.mubr.f32.gmra.mxu0 %v226_v46 }
  0xe6   :  { %1188 = vmatmul.mubr.f32.gmra.mxu1 %v148_v47  ;;  %887 = vmatprep.mubr.f32.mxu0 %v232_v48  ;;  %v75_v47 = vld [vmem:[%s6029_s0 + $0x188] sm:$0xff] }
  0xe7   :  { %1192 = vmatprep.mubr.f32.mxu1 %v154_v49  ;;  %v208_v49 = vld [vmem:[%s6029_s0 + $0x5b0] sm:$0xff] }
  0xe9   :  { %888 = vmatmul.mubr.f32.gmra.mxu0 %v231_v50  ;;  %v80_v50 = vld [vmem:[%s6029_s0 + $0x1b0] sm:$0xff] }
  0xea   :  { %1193 = vmatmul.mubr.f32.gmra.mxu1 %v153_v51  ;;  %892 = vmatprep.mubr.f32.mxu0 %v237_v52  ;;  %v214_v52 = vld [vmem:[%s6029_s0 + $0x5e0] sm:$0xff] }
  0xeb   :  { %1197 = vmatprep.mubr.f32.mxu1 %v159_v53 }
  0xed   :  { %893 = vmatmul.mubr.f32.gmra.mxu0 %v236_v54 }
  0xee   :  { %1198 = vmatmul.mubr.f32.gmra.mxu1 %v158_v55  ;;  %897 = vmatprep.mubr.f32.mxu0 %v242_v56  ;;  %v85_v55 = vld [vmem:[%s6029_s0 + $0x1d8] sm:$0xff] }
  0xef   :  { %1202 = vmatprep.mubr.f32.mxu1 %v164_v57  ;;  %v213_v57 = vld [vmem:[%s6029_s0 + $0x5d8] sm:$0xff] }
  0xf1   :  { %898 = vmatmul.mubr.f32.gmra.mxu0 %v241_v58  ;;  %v90_v58 = vld [vmem:[%s6029_s0 + $0x200] sm:$0xff] }
  0xf2   :  { %1203 = vmatmul.mubr.f32.gmra.mxu1 %v163_v59  ;;  %902 = vmatprep.mubr.f32.mxu0 %v247_v60  ;;  %v219_v60 = vld [vmem:[%s6029_s0 + $0x608] sm:$0xff] }
  0xf3   :  { %1207 = vmatprep.mubr.f32.mxu1 %v169_v61 }
  0xf5   :  { %903 = vmatmul.mubr.f32.gmra.mxu0 %v246_v62 }
  0xf6   :  { %1208 = vmatmul.mubr.f32.gmra.mxu1 %v168_v63  ;;  %907 = vmatprep.mubr.f32.mxu0 %v252_v1  ;;  %v95_v63 = vld [vmem:[%s6029_s0 + $0x228] sm:$0xff] }
  0xf7   :  { %1212 = vmatprep.mubr.f32.mxu1 %v174_v2  ;;  %v218_v2 = vld [vmem:[%s6029_s0 + $0x600] sm:$0xff] }
  0xf9   :  { %908 = vmatmul.mubr.f32.gmra.mxu0 %v251_v3  ;;  %v100_v3 = vld [vmem:[%s6029_s0 + $0x250] sm:$0xff] }
  0xfa   :  { %1213 = vmatmul.mubr.f32.gmra.mxu1 %v173_v4  ;;  %912 = vmatprep.mubr.f32.mxu0 %v257_v5  ;;  %v224_v5 = vld [vmem:[%s6029_s0 + $0x630] sm:$0xff] }
  0xfb   :  { %1217 = vmatprep.mubr.f32.mxu1 %v179_v6 }
  0xfd   :  { %913 = vmatmul.mubr.f32.gmra.mxu0 %v256_v7 }
  0xfe   :  { %1218 = vmatmul.mubr.f32.gmra.mxu1 %v178_v8  ;;  %917 = vmatprep.mubr.f32.mxu0 %v262_v9  ;;  %v105_v8 = vld [vmem:[%s6029_s0 + $0x278] sm:$0xff]  ;;  %v223_v9 = vld [vmem:[%s6029_s0 + $0x628] sm:$0xff] }
  0xff   :  { %1222 = vmatprep.mubr.f32.mxu1 %v184_v10  ;;  %v110_v10 = vld [vmem:[%s6029_s0 + $0x2a0] sm:$0xff] }
 0x101   :  { %918 = vmatmul.mubr.f32.gmra.mxu0 %v261_v11 }
 0x102   :  { %1223 = vmatmul.mubr.f32.gmra.mxu1 %v183_v12  ;;  %2681 = vmatprep.mubr.msk.f32.mxu0 %vm425_vm0, %v30_v13  ;;  %v3779_v15 = vpop.f32.mrf.mxu0  ;;  %v3781_v16 = vpop.f32.mrf.mxu1  ;;  %v229_v13 = vld [vmem:[%s6029_s0 + $0x658] sm:$0xff] }
 0x103   :  { %6036 = vst [vmem:[#allocation3_spill] sm:$0xff] %v3781_v16  ;;  %1227 = vmatprep.mubr.f32.mxu1 %v189_v14 }
 0x104   :  { %v686_v20 = vpop.f32.mrf.mxu0  ;;  %v926_v21 = vpop.f32.mrf.mxu1 }
 0x105   :  { %2682 = vmatmul.mubr.msk.f32.vlgmr.msra.gmra.mxu0 %vm425_vm0, %v35_v17  ;;  %v120_v20 = vld [vmem:[%s6029_s0 + $0x2f0] sm:$0xff] }
 0x106   :  { %1228 = vmatmul.mubr.f32.gmra.mxu1 %v188_v18  ;;  %2684 = vmatprep.mubr.msk.f32.mxu0 %vm425_vm0, %v40_v19  ;;  %v115_v18 = vld [vmem:[%s6029_s0 + $0x2c8] sm:$0xff]  ;;  %v228_v19 = vld [vmem:[%s6029_s0 + $0x650] sm:$0xff] }
 0x107   :  { %1232 = vmatprep.mubr.f32.mxu1 %v194_v22  ;;  %v3800_v24 = vpop.f32.mrf.mxu0  ;;  %v3802_v25 = vpop.f32.mrf.mxu1  ;;  %v234_v22 = vld [vmem:[%s6029_s0 + $0x680] sm:$0xff] }
 0x108   :  { %6037 = vst [vmem:[#allocation4_spill] sm:$0xff] %v3802_v25 }
 0x109   :  { %2685 = vmatmul.mubr.msk.f32.gmra.mxu0 %vm425_vm0, %v45_v23  ;;  %v691_v29 = vpop.f32.mrf.mxu0  ;;  %v931_v30 = vpop.f32.mrf.mxu1 }
 0x10a   :  { %1233 = vmatmul.mubr.f32.gmra.mxu1 %v193_v26  ;;  %2687 = vmatprep.mubr.msk.f32.mxu0 %vm425_vm0, %v50_v27  ;;  %v125_v27 = vld [vmem:[%s6029_s0 + $0x318] sm:$0xff]  ;;  %v130_v30 = vld [vmem:[%s6029_s0 + $0x340] sm:$0xff] }
 0x10b   :  { %1237 = vmatprep.mubr.f32.mxu1 %v199_v28  ;;  %v3818_v32 = vpop.f32.mrf.mxu0  ;;  %v233_v29 = vld [vmem:[%s6029_s0 + $0x678] sm:$0xff] }
 0x10c   :  { %v3826_v35 = vpop.f32.mrf.mxu1 }
 0x10d   :  { %6038 = vst [vmem:[#allocation5_spill] sm:$0xff] %v3826_v35  ;;  %2688 = vmatmul.mubr.msk.f32.gmra.mxu0 %vm425_vm0, %v55_v31  ;;  %v696_v37 = vpop.f32.mrf.mxu0 }
 0x10e   :  { %1238 = vmatmul.mubr.f32.gmra.mxu1 %v198_v33  ;;  %v936_v38 = vpop.f32.mrf.mxu1  ;;  %2690 = vmatprep.mubr.msk.f32.mxu0 %vm425_vm0, %v60_v34  ;;  %v239_v33 = vld [vmem:[%s6029_s0 + $0x6a8] sm:$0xff] }
 0x10f   :  { %1242 = vmatprep.mubr.f32.mxu1 %v204_v36  ;;  %v3836_v40 = vpop.f32.mrf.mxu0  ;;  %v135_v37 = vld [vmem:[%s6029_s0 + $0x368] sm:$0xff] }
 0x110   :  { %v3844_v43 = vpop.f32.mrf.mxu1 }
 0x111   :  { %6039 = vst [vmem:[#allocation6_spill] sm:$0xff] %v3844_v43  ;;  %2691 = vmatmul.mubr.msk.f32.gmra.mxu0 %vm425_vm0, %v65_v39  ;;  %v701_v45 = vpop.f32.mrf.mxu0  ;;  %v238_v39 = vld [vmem:[%s6029_s0 + $0x6a0] sm:$0xff] }
 0x112   :  { %1243 = vmatmul.mubr.f32.gmra.mxu1 %v203_v41  ;;  %v941_v46 = vpop.f32.mrf.mxu1  ;;  %2693 = vmatprep.mubr.msk.f32.mxu0 %vm425_vm0, %v70_v42  ;;  %v140_v41 = vld [vmem:[%s6029_s0 + $0x390] sm:$0xff] }
 0x113   :  { %1247 = vmatprep.mubr.f32.mxu1 %v209_v44  ;;  %v3854_v48 = vpop.f32.mrf.mxu0  ;;  %v244_v44 = vld [vmem:[%s6029_s0 + $0x6d0] sm:$0xff] }
 0x114   :  { %v3862_v51 = vpop.f32.mrf.mxu1 }
 0x115   :  { %6040 = vst [vmem:[#allocation7_spill] sm:$0xff] %v3862_v51  ;;  %2694 = vmatmul.mubr.msk.f32.gmra.mxu0 %vm425_vm0, %v75_v47  ;;  %v706_v53 = vpop.f32.mrf.mxu0  ;;  %v145_v47 = vld [vmem:[%s6029_s0 + $0x3b8] sm:$0xff] }
 0x116   :  { %1248 = vmatmul.mubr.f32.gmra.mxu1 %v208_v49  ;;  %v946_v54 = vpop.f32.mrf.mxu1  ;;  %2696 = vmatprep.mubr.msk.f32.mxu0 %vm425_vm0, %v80_v50  ;;  %v243_v50 = vld [vmem:[%s6029_s0 + $0x6c8] sm:$0xff] }
 0x117   :  { %1252 = vmatprep.mubr.f32.mxu1 %v214_v52  ;;  %v3872_v56 = vpop.f32.mrf.mxu0  ;;  %v150_v52 = vld [vmem:[%s6029_s0 + $0x3e0] sm:$0xff]  ;;  %v249_v54 = vld [vmem:[%s6029_s0 + $0x6f8] sm:$0xff] }
 0x118   :  { %v3880_v59 = vpop.f32.mrf.mxu1 }
 0x119   :  { %6041 = vst [vmem:[#allocation8_spill] sm:$0xff] %v3880_v59  ;;  %2697 = vmatmul.mubr.msk.f32.gmra.mxu0 %vm425_vm0, %v85_v55  ;;  %v711_v61 = vpop.f32.mrf.mxu0 }
 0x11a   :  { %1253 = vmatmul.mubr.f32.gmra.mxu1 %v213_v57  ;;  %v951_v62 = vpop.f32.mrf.mxu1  ;;  %2699 = vmatprep.mubr.msk.f32.mxu0 %vm425_vm0, %v90_v58  ;;  %v155_v58 = vld [vmem:[%s6029_s0 + $0x408] sm:$0xff]  ;;  %v248_v61 = vld [vmem:[%s6029_s0 + $0x6f0] sm:$0xff] }
 0x11b   :  { %1257 = vmatprep.mubr.f32.mxu1 %v219_v60  ;;  %v3890_v1 = vpop.f32.mrf.mxu0  ;;  %v160_v62 = vld [vmem:[%s6029_s0 + $0x430] sm:$0xff] }
 0x11c   :  { %v3898_v4 = vpop.f32.mrf.mxu1 }
 0x11d   :  { %6042 = vst [vmem:[#allocation9_spill] sm:$0xff] %v3898_v4  ;;  %2700 = vmatmul.mubr.msk.f32.gmra.mxu0 %vm425_vm0, %v95_v63  ;;  %v716_v6 = vpop.f32.mrf.mxu0 }
 0x11e   :  { %1258 = vmatmul.mubr.f32.gmra.mxu1 %v218_v2  ;;  %v956_v7 = vpop.f32.mrf.mxu1  ;;  %2702 = vmatprep.mubr.msk.f32.mxu0 %vm425_vm0, %v100_v3  ;;  %v254_v2 = vld [vmem:[%s6029_s0 + $0x720] sm:$0xff]  ;;  %v165_v6 = vld [vmem:[%s6029_s0 + $0x458] sm:$0xff] }
 0x11f   :  { %1262 = vmatprep.mubr.f32.mxu1 %v224_v5 }
 0x120   :  { %v3914_v11 = vpop.f32.mrf.mxu0  ;;  %v3916_v12 = vpop.f32.mrf.mxu1 }
 0x121   :  { %6043 = vst [vmem:[#allocation10_spill] sm:$0xff] %v3916_v12  ;;  %2703 = vmatmul.mubr.msk.f32.gmra.mxu0 %vm425_vm0, %v105_v8  ;;  %v253_v8 = vld [vmem:[%s6029_s0 + $0x718] sm:$0xff] }
 0x122   :  { %1263 = vmatmul.mubr.f32.gmra.mxu1 %v223_v9  ;;  %v721_v14 = vpop.f32.mrf.mxu0  ;;  %v961_v17 = vpop.f32.mrf.mxu1  ;;  %2705 = vmatprep.mubr.msk.f32.mxu0 %vm425_vm0, %v110_v10  ;;  %v170_v9 = vld [vmem:[%s6029_s0 + $0x480] sm:$0xff]  ;;  %v259_v10 = vld [vmem:[%s6029_s0 + $0x748] sm:$0xff] }
 0x123   :  { %1267 = vmatprep.mubr.f32.mxu1 %v229_v13  ;;  %v175_v17 = vld [vmem:[%s6029_s0 + $0x4a8] sm:$0xff] }
 0x124   :  { %v3932_v21 = vpop.f32.mrf.mxu0 }
 0x125   :  { %v3937_v23 = vpop.f32.mrf.mxu1  ;;  %2706 = vmatmul.mubr.msk.f32.gmra.mxu0 %vm425_vm0, %v115_v18 }
 0x126   :  { %6044 = vst [vmem:[#allocation11_spill] sm:$0xff] %v3937_v23  ;;  %1268 = vmatmul.mubr.f32.gmra.mxu1 %v228_v19  ;;  %v726_v26 = vpop.f32.mrf.mxu0  ;;  %2708 = vmatprep.mubr.msk.f32.mxu0 %vm425_vm0, %v120_v20  ;;  %v258_v20 = vld [vmem:[%s6029_s0 + $0x740] sm:$0xff] }
 0x127   :  { %v966_v28 = vpop.f32.mrf.mxu1  ;;  %1272 = vmatprep.mubr.f32.mxu1 %v234_v22  ;;  %v180_v22 = vld [vmem:[%s6029_s0 + $0x4d0] sm:$0xff] }
 0x128   :  { %v3950_v31 = vpop.f32.mrf.mxu0  ;;  %v264_v26 = vld [vmem:[%s6029_s0 + $0x770] sm:$0xff] }
 0x129   :  { %v3955_v34 = vpop.f32.mrf.mxu1  ;;  %2709 = vmatmul.mubr.msk.f32.gmra.mxu0 %vm425_vm0, %v125_v27 }
 0x12a   :  { %6045 = vst [vmem:[#allocation12_spill] sm:$0xff] %v3955_v34  ;;  %1273 = vmatmul.mubr.f32.gmra.mxu1 %v233_v29  ;;  %v731_v36 = vpop.f32.mrf.mxu0  ;;  %2711 = vmatprep.mubr.msk.f32.mxu0 %vm425_vm0, %v130_v30  ;;  %v185_v29 = vld [vmem:[%s6029_s0 + $0x4f8] sm:$0xff] }
 0x12b   :  { %v971_v38 = vpop.f32.mrf.mxu1  ;;  %1277 = vmatprep.mubr.f32.mxu1 %v239_v33  ;;  %v263_v33 = vld [vmem:[%s6029_s0 + $0x768] sm:$0xff]  ;;  %v190_v36 = vld [vmem:[%s6029_s0 + $0x520] sm:$0xff] }
 0x12c   :  { %v3968_v42 = vpop.f32.mrf.mxu0  ;;  %v269_v38 = vld [vmem:[%s6029_s0 + $0x798] sm:$0xff] }
 0x12d   :  { %v3973_v45 = vpop.f32.mrf.mxu1  ;;  %2712 = vmatmul.mubr.msk.f32.gmra.mxu0 %vm425_vm0, %v135_v37 }
 0x12e   :  { %6046 = vst [vmem:[#allocation13_spill] sm:$0xff] %v3973_v45  ;;  %1278 = vmatmul.mubr.f32.gmra.mxu1 %v238_v39  ;;  %v736_v46 = vpop.f32.mrf.mxu0  ;;  %2714 = vmatprep.mubr.msk.f32.mxu0 %vm425_vm0, %v140_v41  ;;  %v4067_v41 = vld [vmem:[%s6030_s2] ss:$0 sm:$0xff] }
 0x12f   :  { %v976_v49 = vpop.f32.mrf.mxu1  ;;  %1282 = vmatprep.mubr.f32.mxu1 %v244_v44  ;;  %v195_v46 = vld [vmem:[%s6029_s0 + $0x548] sm:$0xff] }
 0x130   :  { %v3986_v53 = vpop.f32.mrf.mxu0  ;;  %v268_v49 = vld [vmem:[%s6029_s0 + $0x790] sm:$0xff] }
 0x131   :  { %v3991_v55 = vpop.f32.mrf.mxu1  ;;  %2715 = vmatmul.mubr.msk.f32.gmra.mxu0 %vm425_vm0, %v145_v47 }
 0x132   :  { %6047 = vst [vmem:[#allocation14_spill] sm:$0xff] %v3991_v55  ;;  %1283 = vmatmul.mubr.f32.gmra.mxu1 %v243_v50  ;;  %v741_v57 = vpop.f32.mrf.mxu0  ;;  %2717 = vmatprep.mubr.msk.f32.mxu0 %vm425_vm0, %v150_v52  ;;  %v200_v50 = vld [vmem:[%s6029_s0 + $0x570] sm:$0xff] }
 0x133   :  { %v981_v60 = vpop.f32.mrf.mxu1  ;;  %1287 = vmatprep.mubr.f32.mxu1 %v249_v54  ;;  %v274_v54 = vld [vmem:[%s6029_s0 + $0x7c0] sm:$0xff]  ;;  %v685_v57 = vadd.f32 %v4067_v41, %v3779_v15  ;;  %v273_v15 = vld [vmem:[%s6029_s0 + $0x7b8] sm:$0xff] }
 0x134   :  { %v4004_v63 = vpop.f32.mrf.mxu0 }
 0x135   :  { %v4009_v3 = vpop.f32.mrf.mxu1  ;;  %2718 = vmatmul.mubr.msk.f32.gmra.mxu0 %vm425_vm0, %v155_v58 }
 0x136   :  { %6048 = vst [vmem:[#allocation15_spill] sm:$0xff] %v4009_v3  ;;  %1288 = vmatmul.mubr.f32.gmra.mxu1 %v248_v61  ;;  %v746_v5 = vpop.f32.mrf.mxu0  ;;  %2720 = vmatprep.mubr.msk.f32.mxu0 %vm425_vm0, %v160_v62  ;;  %v205_v61 = vld [vmem:[%s6029_s0 + $0x598] sm:$0xff] }
 0x137   :  { %v986_v7 = vpop.f32.mrf.mxu1  ;;  %1292 = vmatprep.mubr.f32.mxu1 %v254_v2  ;;  %v210_v5 = vld [vmem:[%s6029_s0 + $0x5c0] sm:$0xff] }
 0x138   :  { %v279_v7 = vld [vmem:[%s6029_s0 + $0x7e8] sm:$0xff] }
 0x139   :  { %v4025_v13 = vpop.f32.mrf.mxu0  ;;  %v4027_v14 = vpop.f32.mrf.mxu1  ;;  %2721 = vmatmul.mubr.msk.f32.gmra.mxu0 %vm425_vm0, %v165_v6 }
 0x13a   :  { %6049 = vst [vmem:[#allocation16_spill] sm:$0xff] %v4027_v14  ;;  %1293 = vmatmul.mubr.f32.gmra.mxu1 %v253_v8  ;;  %2723 = vmatprep.mubr.msk.f32.mxu0 %vm425_vm0, %v170_v9  ;;  %v690_v8 = vadd.f32 %v4067_v41, %v3800_v24  ;;  %v278_v24 = vld [vmem:[%s6029_s0 + $0x7e0] sm:$0xff] }
 0x13b   :  { %v751_v18 = vpop.f32.mrf.mxu0  ;;  %v991_v19 = vpop.f32.mrf.mxu1  ;;  %1297 = vmatprep.mubr.f32.mxu1 %v259_v10 }
 0x13d   :  { %v4043_v27 = vpop.f32.mrf.mxu0  ;;  %2724 = vmatmul.mubr.msk.f32.gmra.mxu0 %vm425_vm0, %v175_v17  ;;  %v215_v17 = vld [vmem:[%s6029_s0 + $0x5e8] sm:$0xff] }
 0x13e   :  { %v4046_v28 = vpop.f32.mrf.mxu1  ;;  %1298 = vmatmul.mubr.f32.gmra.mxu1 %v258_v20  ;;  %2726 = vmatprep.mubr.msk.f32.mxu0 %vm425_vm0, %v180_v22  ;;  %v220_v20 = vld [vmem:[%s6029_s0 + $0x610] sm:$0xff] }
 0x13f   :  { %6050 = vst [vmem:[#allocation17_spill] sm:$0xff] %v4046_v28  ;;  %v756_v30 = vpop.f32.mrf.mxu0  ;;  %1302 = vmatprep.mubr.f32.mxu1 %v264_v26  ;;  %v284_v26 = vld [vmem:[%s6029_s0 + $0x810] sm:$0xff] }
 0x140   :  { %v996_v37 = vpop.f32.mrf.mxu1 }
 0x141   :  { %v4061_v39 = vpop.f32.mrf.mxu0  ;;  %2727 = vmatmul.mubr.msk.f32.gmra.mxu0 %vm425_vm0, %v185_v29  ;;  %v695_v29 = vadd.f32 %v4067_v41, %v3818_v32  ;;  %v283_v32 = vld [vmem:[%s6029_s0 + $0x808] sm:$0xff] }
 0x142   :  { %v4069_v44 = vpop.f32.mrf.mxu1  ;;  %1303 = vmatmul.mubr.f32.gmra.mxu1 %v263_v33  ;;  %2729 = vmatprep.mubr.msk.f32.mxu0 %vm425_vm0, %v190_v36  ;;  %v225_v36 = vld [vmem:[%s6029_s0 + $0x638] sm:$0xff] }
 0x143   :  { %6051 = vst [vmem:[#allocation18_spill] sm:$0xff] %v4069_v44  ;;  %v761_v47 = vpop.f32.mrf.mxu0  ;;  %1307 = vmatprep.mubr.f32.mxu1 %v269_v38 }
 0x144   :  { %v1001_v52 = vpop.f32.mrf.mxu1 }
 0x145   :  { %v4086_v58 = vpop.f32.mrf.mxu0  ;;  %2730 = vmatmul.mubr.msk.f32.gmra.mxu0 %vm425_vm0, %v195_v46  ;;  %v230_v46 = vld [vmem:[%s6029_s0 + $0x660] sm:$0xff] }
 0x146   :  { %v1069_v60 = vpop.f32.mrf.mxu1  ;;  %1308 = vmatmul.mubr.f32.gmra.mxu1 %v268_v49  ;;  %2732 = vmatprep.mubr.msk.f32.mxu0 %vm425_vm0, %v200_v50  ;;  %v289_v49 = vld [vmem:[%s6029_s0 + $0x838] sm:$0xff]  ;;  %v700_v50 = vadd.f32 %v4067_v41, %v3836_v40  ;;  %v288_v40 = vld [vmem:[%s6029_s0 + $0x830] sm:$0xff] }
 0x147   :  { %v4093_v62 = vadd.f32 %v1069_v60, %v685_v57  ;;  %v766_v2 = vpop.f32.mrf.mxu0  ;;  %1312 = vmatprep.mubr.f32.mxu1 %v274_v54  ;;  %v235_v57 = vld [vmem:[%s6029_s0 + $0x688] sm:$0xff] }
 0x148   :  { %v1071_v6 = vpop.f32.mrf.mxu1  ;;  %v240_v2 = vld [vmem:[%s6029_s0 + $0x6b0] sm:$0xff] }
 0x149   :  { %v4106_v9 = vpop.f32.mrf.mxu0  ;;  %2733 = vmatmul.mubr.msk.f32.gmra.mxu0 %vm425_vm0, %v205_v61  ;;  %v705_v6 = vadd.f32 %v4067_v41, %v3854_v48  ;;  %v293_v48 = vld [vmem:[%s6029_s0 + $0x858] sm:$0xff] }
 0x14a   :  { %v1074_v10 = vpop.f32.mrf.mxu1  ;;  %1313 = vmatmul.mubr.f32.gmra.mxu1 %v273_v15  ;;  %2735 = vmatprep.mubr.msk.f32.mxu0 %vm425_vm0, %v210_v5  ;;  %v294_v5 = vld [vmem:[%s6029_s0 + $0x860] sm:$0xff] }
 0x14b   :  { %v4113_v18 = vadd.f32 %v1074_v10, %v690_v8  ;;  %v771_v19 = vpop.f32.mrf.mxu0  ;;  %1317 = vmatprep.mubr.f32.mxu1 %v279_v7  ;;  %v245_v10 = vld [vmem:[%s6029_s0 + $0x6d8] sm:$0xff] }
 0x14c   :  { %v1076_v22 = vpop.f32.mrf.mxu1 }
 0x14d   :  { %v4126_v30 = vpop.f32.mrf.mxu0  ;;  %2736 = vmatmul.mubr.msk.f32.gmra.mxu0 %vm425_vm0, %v215_v17  ;;  %v299_v22 = vld [vmem:[%s6029_s0 + $0x888] sm:$0xff] }
 0x14e   :  { %v1079_v33 = vpop.f32.mrf.mxu1  ;;  %1318 = vmatmul.mubr.f32.gmra.mxu1 %v278_v24  ;;  %2738 = vmatprep.mubr.msk.f32.mxu0 %vm425_vm0, %v220_v20  ;;  %v250_v24 = vld [vmem:[%s6029_s0 + $0x700] sm:$0xff] }
 0x14f   :  { %v4133_v37 = vadd.f32 %v1079_v33, %v695_v29  ;;  %v776_v38 = vpop.f32.mrf.mxu0  ;;  %1322 = vmatprep.mubr.f32.mxu1 %v284_v26  ;;  %v710_v26 = vadd.f32 %v4067_v41, %v3872_v56  ;;  %v298_v56 = vld [vmem:[%s6029_s0 + $0x880] sm:$0xff] }
 0x150   :  { %v1081_v47 = vpop.f32.mrf.mxu1 }
 0x151   :  { %v4146_v52 = vpop.f32.mrf.mxu0  ;;  %2739 = vmatmul.mubr.msk.f32.gmra.mxu0 %vm425_vm0, %v225_v36  ;;  %v255_v36 = vld [vmem:[%s6029_s0 + $0x728] sm:$0xff] }
 0x152   :  { %v1084_v54 = vpop.f32.mrf.mxu1  ;;  %1323 = vmatmul.mubr.f32.gmra.mxu1 %v283_v32  ;;  %2741 = vmatprep.mubr.msk.f32.mxu0 %vm425_vm0, %v230_v46  ;;  %v260_v46 = vld [vmem:[%s6029_s0 + $0x750] sm:$0xff] }
 0x153   :  { %v4153_v60 = vadd.f32 %v1084_v54, %v700_v50  ;;  %v781_v61 = vpop.f32.mrf.mxu0  ;;  %1327 = vmatprep.mubr.f32.mxu1 %v289_v49  ;;  %v304_v49 = vld [vmem:[%s6029_s0 + $0x8b0] sm:$0xff]  ;;  %v715_v50 = vadd.f32 %v4067_v41, %v3890_v1  ;;  %v303_v1 = vld [vmem:[%s6029_s0 + $0x8a8] sm:$0xff] }
 0x154   :  { %v1086_v15 = vpop.f32.mrf.mxu1  ;;  %v265_v61 = vld [vmem:[%s6029_s0 + $0x778] sm:$0xff] }
 0x155   :  { %v4166_v7 = vpop.f32.mrf.mxu0  ;;  %2742 = vmatmul.mubr.msk.f32.gmra.mxu0 %vm425_vm0, %v235_v57  ;;  %v270_v15 = vld [vmem:[%s6029_s0 + $0x7a0] sm:$0xff] }
 0x156   :  { %v1089_v8 = vpop.f32.mrf.mxu1  ;;  %1328 = vmatmul.mubr.f32.gmra.mxu1 %v288_v40  ;;  %2744 = vmatprep.mubr.msk.f32.mxu0 %vm425_vm0, %v240_v2 }
 0x157   :  { %v4173_v17 = vadd.f32 %v1089_v8, %v705_v6  ;;  %v786_v19 = vpop.f32.mrf.mxu0  ;;  %1332 = vmatprep.mubr.f32.mxu1 %v294_v5  ;;  %v309_v6 = vld [vmem:[%s6029_s0 + $0x8d8] sm:$0xff]  ;;  %v720_v8 = vadd.f32 %v4067_v41, %v3914_v11  ;;  %v308_v11 = vld [vmem:[%s6029_s0 + $0x8d0] sm:$0xff] }
 0x158   :  { %v1091_v20 = vpop.f32.mrf.mxu1 }
 0x159   :  { %v4186_v29 = vpop.f32.mrf.mxu0  ;;  %2745 = vmatmul.mubr.msk.f32.gmra.mxu0 %vm425_vm0, %v245_v10 }
 0x15a   :  { %v1094_v33 = vpop.f32.mrf.mxu1  ;;  %1333 = vmatmul.mubr.f32.gmra.mxu1 %v293_v48  ;;  %2747 = vmatprep.mubr.msk.f32.mxu0 %vm425_vm0, %v250_v24  ;;  %v275_v48 = vld [vmem:[%s6029_s0 + $0x7c8] sm:$0xff] }
 0x15b   :  { %v4193_v38 = vadd.f32 %v1094_v33, %v710_v26  ;;  %v791_v32 = vpop.f32.mrf.mxu0  ;;  %1337 = vmatprep.mubr.f32.mxu1 %v299_v22  ;;  %v280_v22 = vld [vmem:[%s6029_s0 + $0x7f0] sm:$0xff]  ;;  %v314_v33 = vld [vmem:[%s6029_s0 + $0x900] sm:$0xff] }
 0x15c   :  { %v1096_v47 = vpop.f32.mrf.mxu1 }
 0x15d   :  { %v4206_v54 = vpop.f32.mrf.mxu0  ;;  %2748 = vmatmul.mubr.msk.f32.gmra.mxu0 %vm425_vm0, %v255_v36  ;;  %v725_v36 = vadd.f32 %v4067_v41, %v3932_v21  ;;  %v313_v21 = vld [vmem:[%s6029_s0 + $0x8f8] sm:$0xff] }
 0x15e   :  { %v1099_v57 = vpop.f32.mrf.mxu1  ;;  %1338 = vmatmul.mubr.f32.gmra.mxu1 %v298_v56  ;;  %2750 = vmatprep.mubr.msk.f32.mxu0 %vm425_vm0, %v260_v46  ;;  %v285_v46 = vld [vmem:[%s6029_s0 + $0x818] sm:$0xff] }
 0x15f   :  { %v4213_v40 = vadd.f32 %v1099_v57, %v715_v50  ;;  %v796_v2 = vpop.f32.mrf.mxu0  ;;  %1342 = vmatprep.mubr.f32.mxu1 %v304_v49  ;;  %v290_v50 = vld [vmem:[%s6029_s0 + $0x840] sm:$0xff] }
 0x160   :  { %v1101_v5 = vpop.f32.mrf.mxu1  ;;  %v730_v2 = vadd.f32 %v4067_v41, %v3950_v31  ;;  %v318_v31 = vld [vmem:[%s6029_s0 + $0x920] sm:$0xff] }
 0x161   :  { %v4226_v10 = vpop.f32.mrf.mxu0  ;;  %2751 = vmatmul.mubr.msk.f32.gmra.mxu0 %vm425_vm0, %v265_v61  ;;  %v319_v61 = vld [vmem:[%s6029_s0 + $0x928] sm:$0xff] }
 0x162   :  { %v1104_v19 = vpop.f32.mrf.mxu1  ;;  %1343 = vmatmul.mubr.f32.gmra.mxu1 %v303_v1  ;;  %2753 = vmatprep.mubr.msk.f32.mxu0 %vm425_vm0, %v270_v15  ;;  %v295_v5 = vld [vmem:[%s6029_s0 + $0x868] sm:$0xff] }
 0x163   :  { %v4233_v24 = vadd.f32 %v1104_v19, %v720_v8  ;;  %v801_v20 = vpop.f32.mrf.mxu0  ;;  %1347 = vmatprep.mubr.f32.mxu1 %v309_v6  ;;  %v300_v19 = vld [vmem:[%s6029_s0 + $0x890] sm:$0xff] }
 0x164   :  { %v1106_v26 = vpop.f32.mrf.mxu1  ;;  %v324_v20 = vld [vmem:[%s6029_s0 + $0x950] sm:$0xff] }
 0x165   :  { %v4246_v32 = vpop.f32.mrf.mxu0  ;;  %2754 = vmatmul.mubr.msk.f32.gmra.mxu0 %vm425_vm0, %v275_v48 }
 0x166   :  { %v1109_v56 = vpop.f32.mrf.mxu1  ;;  %1348 = vmatmul.mubr.f32.gmra.mxu1 %v308_v11  ;;  %2756 = vmatprep.mubr.msk.f32.mxu0 %vm425_vm0, %v280_v22  ;;  %v735_v11 = vadd.f32 %v4067_v41, %v3968_v42  ;;  %v323_v42 = vld [vmem:[%s6029_s0 + $0x948] sm:$0xff] }
 0x167   :  { %v4253_v47 = vadd.f32 %v1109_v56, %v725_v36  ;;  %v806_v49 = vpop.f32.mrf.mxu0  ;;  %1352 = vmatprep.mubr.f32.mxu1 %v314_v33  ;;  %v305_v33 = vld [vmem:[%s6029_s0 + $0x8b8] sm:$0xff] }
 0x168   :  { %v1111_v57 = vpop.f32.mrf.mxu1 }
 0x169   :  { %v4266_v1 = vpop.f32.mrf.mxu0  ;;  %2757 = vmatmul.mubr.msk.f32.gmra.mxu0 %vm425_vm0, %v285_v46  ;;  %v310_v46 = vld [vmem:[%s6029_s0 + $0x8e0] sm:$0xff] }
 0x16a   :  { %v1114_v15 = vpop.f32.mrf.mxu1  ;;  %1353 = vmatmul.mubr.f32.gmra.mxu1 %v313_v21  ;;  %2759 = vmatprep.mubr.msk.f32.mxu0 %vm425_vm0, %v290_v50  ;;  %v329_v21 = vld [vmem:[%s6029_s0 + $0x978] sm:$0xff]  ;;  %v740_v50 = vadd.f32 %v4067_v41, %v3986_v53  ;;  %v328_v53 = vld [vmem:[%s6029_s0 + $0x970] sm:$0xff] }
 0x16b   :  { %v4273_v6 = vadd.f32 %v1114_v15, %v730_v2  ;;  %v811_v8 = vpop.f32.mrf.mxu0  ;;  %1357 = vmatprep.mubr.f32.mxu1 %v319_v61  ;;  %v315_v2 = vld [vmem:[%s6029_s0 + $0x908] sm:$0xff] }
 0x16c   :  { %v1116_v48 = vpop.f32.mrf.mxu1  ;;  %v320_v8 = vld [vmem:[%s6029_s0 + $0x930] sm:$0xff] }
 0x16d   :  { %v4286_v22 = vpop.f32.mrf.mxu0  ;;  %2760 = vmatmul.mubr.msk.f32.gmra.mxu0 %vm425_vm0, %v295_v5  ;;  %v745_v48 = vadd.f32 %v4067_v41, %v4004_v63  ;;  %v333_v63 = vld [vmem:[%s6029_s0 + $0x998] sm:$0xff] }
 0x16e   :  { %v1119_v26 = vpop.f32.mrf.mxu1  ;;  %1358 = vmatmul.mubr.f32.gmra.mxu1 %v318_v31  ;;  %2762 = vmatprep.mubr.msk.f32.mxu0 %vm425_vm0, %v300_v19  ;;  %v334_v19 = vld [vmem:[%s6029_s0 + $0x9a0] sm:$0xff] }
 0x16f   :  { %v4293_v36 = vadd.f32 %v1119_v26, %v735_v11  ;;  %v816_v56 = vpop.f32.mrf.mxu0  ;;  %1362 = vmatprep.mubr.f32.mxu1 %v324_v20  ;;  %v325_v26 = vld [vmem:[%s6029_s0 + $0x958] sm:$0xff] }
 0x170   :  { %v1121_v49 = vpop.f32.mrf.mxu1 }
 0x171   :  { %v4306_v57 = vpop.f32.mrf.mxu0  ;;  %2763 = vmatmul.mubr.msk.f32.gmra.mxu0 %vm425_vm0, %v305_v33  ;;  %v339_v49 = vld [vmem:[%s6029_s0 + $0x9c8] sm:$0xff] }
 0x172   :  { %v1124_v61 = vpop.f32.mrf.mxu1  ;;  %1363 = vmatmul.mubr.f32.gmra.mxu1 %v323_v42  ;;  %2765 = vmatprep.mubr.msk.f32.mxu0 %vm425_vm0, %v310_v46  ;;  %v330_v42 = vld [vmem:[%s6029_s0 + $0x980] sm:$0xff] }
 0x173   :  { %v4313_v15 = vadd.f32 %v1124_v61, %v740_v50  ;;  %v821_v5 = vpop.f32.mrf.mxu0  ;;  %1367 = vmatprep.mubr.f32.mxu1 %v329_v21  ;;  %v750_v21 = vadd.f32 %v4067_v41, %v4025_v13  ;;  %v338_v13 = vld [vmem:[%s6029_s0 + $0x9c0] sm:$0xff] }
 0x174   :  { %v1126_v31 = vpop.f32.mrf.mxu1 }
 0x175   :  { %v4326_v20 = vpop.f32.mrf.mxu0  ;;  %2766 = vmatmul.mubr.msk.f32.gmra.mxu0 %vm425_vm0, %v315_v2  ;;  %v335_v2 = vld [vmem:[%s6029_s0 + $0x9a8] sm:$0xff] }
 0x176   :  { %v1129_v11 = vpop.f32.mrf.mxu1  ;;  %1368 = vmatmul.mubr.f32.gmra.mxu1 %v328_v53  ;;  %2768 = vmatprep.mubr.msk.f32.mxu0 %vm425_vm0, %v320_v8  ;;  %v340_v8 = vld [vmem:[%s6029_s0 + $0x9d0] sm:$0xff] }
 0x177   :  { %v4333_v33 = vadd.f32 %v1129_v11, %v745_v48  ;;  %v826_v56 = vpop.f32.mrf.mxu0  ;;  %1372 = vmatprep.mubr.f32.mxu1 %v334_v19  ;;  %v344_v19 = vld [vmem:[%s6029_s0 + $0x9f0] sm:$0xff]  ;;  %v755_v48 = vadd.f32 %v4067_v41, %v4043_v27  ;;  %v343_v27 = vld [vmem:[%s6029_s0 + $0x9e8] sm:$0xff] }
 0x178   :  { %v1131_v46 = vpop.f32.mrf.mxu1  ;;  %v345_v56 = vld [vmem:[%s6029_s0 + $0x9f8] sm:$0xff] }
 0x179   :  { %v4346_v50 = vpop.f32.mrf.mxu0  ;;  %2769 = vmatmul.mubr.msk.f32.gmra.mxu0 %vm425_vm0, %v325_v26 }
 0x17a   :  { %v1134_v61 = vpop.f32.mrf.mxu1  ;;  %1373 = vmatmul.mubr.f32.gmra.mxu1 %v333_v63  ;;  %2771 = vmatprep.mubr.msk.f32.mxu0 %vm425_vm0, %v330_v42 }
 0x17b   :  { %v4353_v5 = vadd.f32 %v1134_v61, %v750_v21  ;;  %v831_v53 = vpop.f32.mrf.mxu0  ;;  %1377 = vmatprep.mubr.f32.mxu1 %v339_v49  ;;  %v760_v49 = vadd.f32 %v4067_v41, %v4061_v39 }
 0x17c   :  { %v1136_v31 = vpop.f32.mrf.mxu1 }
 0x17d   :  { %v4366_v11 = vpop.f32.mrf.mxu0  ;;  %2772 = vmatmul.mubr.msk.f32.gmra.mxu0 %vm425_vm0, %v335_v2 }
 0x17e   :  { %v1139_v26 = vpop.f32.mrf.mxu1  ;;  %1378 = vmatmul.mubr.f32.gmra.mxu1 %v338_v13  ;;  %2774 = vmatprep.mubr.msk.f32.mxu0 %vm425_vm0, %v340_v8  ;;  %v765_v8 = vadd.f32 %v4067_v41, %v4086_v58  ;;  %v775_v58 = vadd.f32 %v4067_v41, %v4126_v30  ;;  %v785_v30 = vadd.f32 %v4067_v41, %v4166_v7 }
 0x17f   :  { %v4373_v63 = vadd.f32 %v1139_v26, %v755_v48  ;;  %v836_v42 = vpop.f32.mrf.mxu0  ;;  %1382 = vmatprep.mubr.f32.mxu1 %v344_v19  ;;  %v795_v7 = vadd.f32 %v4067_v41, %v4206_v54  ;;  %v805_v54 = vadd.f32 %v4067_v41, %v4246_v32  ;;  %v815_v32 = vadd.f32 %v4067_v41, %v4286_v22 }
 0x180   :  { %v1141_v46 = vpop.f32.mrf.mxu1  ;;  %v770_v42 = vadd.f32 %v4067_v41, %v4106_v9  ;;  %v780_v9 = vadd.f32 %v4067_v41, %v4146_v52  ;;  %v790_v52 = vadd.f32 %v4067_v41, %v4186_v29  ;;  %v800_v29 = vadd.f32 %v4067_v41, %v4226_v10 }
 0x181   :  { %v4380_v21 = vpop.f32.mrf.mxu0  ;;  %2775 = vmatmul.mubr.msk.f32.gmra.mxu0 %vm425_vm0, %v345_v56  ;;  %v810_v10 = vadd.f32 %v4067_v41, %v4266_v1  ;;  %v820_v1 = vadd.f32 %v4067_v41, %v4306_v57  ;;  %v825_v22 = vadd.f32 %v4067_v41, %v4326_v20  ;;  %v830_v57 = vadd.f32 %v4067_v41, %v4346_v50 }
 0x182   :  { %v1144_v61 = vpop.f32.mrf.mxu1  ;;  %1383 = vmatmul.mubr.f32.gmra.mxu1 %v343_v27  ;;  %v835_v20 = vadd.f32 %v4067_v41, %v4366_v11 }
 0x183   :  { %v4383_v2 = vadd.f32 %v1144_v61, %v760_v49  ;;  %v841_v53 = vpop.f32.mrf.mxu0 }
 0x184   :  { %v1146_v13 = vpop.f32.mrf.mxu1 }
 0x185   :  { %v4387_v31 = vpop.f32.mrf.mxu0 }
 0x186   :  { %v1149_v19 = vpop.f32.mrf.mxu1 }
 0x187   :  { %v4389_v48 = vadd.f32 %v1149_v19, %v765_v8  ;;  %v846_v26 = vpop.f32.mrf.mxu0 }
 0x188   :  { %v1151_v39 = vpop.f32.mrf.mxu1 }
 0x189   :  { %v4393_v56 = vpop.f32.mrf.mxu0 }
 0x18a   :  { %v1154_v27 = vpop.f32.mrf.mxu1 }
 0x18b   :  { %v4395_v46 = vadd.f32 %v1154_v27, %v770_v42  ;;  %v851_v49 = vpop.f32.mrf.mxu0 }
 0x18c   :  { %v1156_v61 = vpop.f32.mrf.mxu1 }
 0x18d   :  { %v4399_v53 = vpop.f32.mrf.mxu0 }
 0x18e   :  { %v1159_v13 = vpop.f32.mrf.mxu1 }
 0x18f   :  { %v4401_v8 = vadd.f32 %v1159_v13, %v775_v58  ;;  %v856_v19 = vpop.f32.mrf.mxu0 }
 0x190   :  { %v1161_v26 = vpop.f32.mrf.mxu1 }
 0x191   :  { %v4405_v39 = vpop.f32.mrf.mxu0 }
 0x192   :  { %v1164_v0 = vpop.f32.mrf.mxu1 }
 0x193   :  { %v4407_v42 = vadd.f32 %v1164_v0, %v780_v9  ;;  %v861_v27 = vpop.f32.mrf.mxu0 }
 0x194   :  { %v1166_v49 = vpop.f32.mrf.mxu1 }
 0x195   :  { %v4411_v61 = vpop.f32.mrf.mxu0 }
 0x196   :  { %v1169_v44 = vpop.f32.mrf.mxu1 }
 0x197   :  { %v4413_v58 = vadd.f32 %v1169_v44, %v785_v30  ;;  %v866_v13 = vpop.f32.mrf.mxu0 }
 0x198   :  { %v1171_v19 = vpop.f32.mrf.mxu1 }
 0x199   :  { %v4417_v26 = vpop.f32.mrf.mxu0 }
 0x19a   :  { %v1174_v28 = vpop.f32.mrf.mxu1 }
 0x19b   :  { %v4419_v0 = vadd.f32 %v1174_v28, %v790_v52  ;;  %v871_v9 = vpop.f32.mrf.mxu0 }
 0x19c   :  { %v1176_v27 = vpop.f32.mrf.mxu1 }
 0x19d   :  { %v4423_v49 = vpop.f32.mrf.mxu0 }
 0x19e   :  { %v1179_v3 = vpop.f32.mrf.mxu1 }
 0x19f   :  { %v4425_v44 = vadd.f32 %v1179_v3, %v795_v7  ;;  %v876_v30 = vpop.f32.mrf.mxu0 }
 0x1a0   :  { %v1181_v13 = vpop.f32.mrf.mxu1 }
 0x1a1   :  { %v4429_v19 = vpop.f32.mrf.mxu0 }
 0x1a2   :  { %v1184_v14 = vpop.f32.mrf.mxu1 }
 0x1a3   :  { %v4431_v28 = vadd.f32 %v1184_v14, %v800_v29  ;;  %v881_v52 = vpop.f32.mrf.mxu0 }
 0x1a4   :  { %v1186_v9 = vpop.f32.mrf.mxu1 }
 0x1a5   :  { %v4435_v27 = vpop.f32.mrf.mxu0 }
 0x1a6   :  { %v1189_v45 = vpop.f32.mrf.mxu1 }
 0x1a7   :  { %v4437_v3 = vadd.f32 %v1189_v45, %v805_v54  ;;  %v886_v7 = vpop.f32.mrf.mxu0 }
 0x1a8   :  { %v1191_v30 = vpop.f32.mrf.mxu1 }
 0x1a9   :  { %v4441_v13 = vpop.f32.mrf.mxu0 }
 0x1aa   :  { %v1194_v55 = vpop.f32.mrf.mxu1 }
 0x1ab   :  { %v4443_v14 = vadd.f32 %v1194_v55, %v810_v10  ;;  %v891_v29 = vpop.f32.mrf.mxu0 }
 0x1ac   :  { %v1196_v52 = vpop.f32.mrf.mxu1 }
 0x1ad   :  { %v4447_v9 = vpop.f32.mrf.mxu0 }
 0x1ae   :  { %v1199_v23 = vpop.f32.mrf.mxu1 }
 0x1af   :  { %v4449_v45 = vadd.f32 %v1199_v23, %v815_v32  ;;  %v896_v54 = vpop.f32.mrf.mxu0 }
 0x1b0   :  { %v1201_v7 = vpop.f32.mrf.mxu1 }
 0x1b1   :  { %v4453_v30 = vpop.f32.mrf.mxu0 }
 0x1b2   :  { %v1204_v34 = vpop.f32.mrf.mxu1 }
 0x1b3   :  { %v4455_v55 = vadd.f32 %v1204_v34, %v820_v1  ;;  %v901_v10 = vpop.f32.mrf.mxu0 }
 0x1b4   :  { %v1206_v29 = vpop.f32.mrf.mxu1 }
 0x1b5   :  { %v4459_v52 = vpop.f32.mrf.mxu0 }
 0x1b6   :  { %6052 = vst [vmem:[#allocation19_spill] sm:$0xff] %v4459_v52  ;;  %v1209_v4 = vpop.f32.mrf.mxu1 }
 0x1b7   :  { %v4461_v23 = vadd.f32 %v1209_v4, %v825_v22  ;;  %v906_v32 = vpop.f32.mrf.mxu0 }
 0x1b8   :  { %v1211_v54 = vpop.f32.mrf.mxu1 }
 0x1b9   :  { %v4465_v7 = vpop.f32.mrf.mxu0 }
 0x1ba   :  { %v1214_v12 = vpop.f32.mrf.mxu1 }
 0x1bb   :  { %v4467_v34 = vadd.f32 %v1214_v12, %v830_v57  ;;  %v911_v1 = vpop.f32.mrf.mxu0 }
 0x1bc   :  { %v1216_v10 = vpop.f32.mrf.mxu1 }
 0x1bd   :  { %v4471_v29 = vpop.f32.mrf.mxu0 }
 0x1be   :  { %6053 = vst [vmem:[#allocation20_spill] sm:$0xff] %v4471_v29  ;;  %v1219_v51 = vpop.f32.mrf.mxu1 }
 0x1bf   :  { %v4473_v4 = vadd.f32 %v1219_v51, %v835_v20  ;;  %v916_v22 = vpop.f32.mrf.mxu0 }
 0x1c0   :  { %v1221_v32 = vpop.f32.mrf.mxu1 }
 0x1c1   :  { %v4475_v54 = vpop.f32.mrf.mxu0 }
 0x1c2   :  { %6054 = vst [vmem:[#allocation21_spill] sm:$0xff] %v4475_v54  ;;  %v4477_v50 = vpop.f32.mrf.mxu1 }
 0x1c3   :  { %v921_v59 = vpop.f32.mrf.mxu0 }
 0x1c4   :  { %v1226_v35 = vpop.f32.mrf.mxu1 }
 0x1c5   :  { %v2683_v12 = vpop.f32.mrf.mxu0 }
 0x1c6   :  { %v4479_v57 = vpop.f32.mrf.mxu1  ;;  %v1460_v1 = vadd.f32 %v2683_v12, %v4113_v18 }
 0x1c7   :  { %v1454_v41 = vpop.f32.mrf.mxu0 }
 0x1c8   :  { %1775 = vst.msk [vmem:[%s6031_s5 + $0x8] sm:$0xff] %vm1773_vm1, %v1460_v1  ;;  %v1977_v51 = vmul.f32 %v1460_v1, %v1460_v1  ;;  %v1231_v11 = vpop.f32.mrf.mxu1  ;;  %v1455_v10 = vadd.f32 %v1454_v41, %v4093_v62  ;;  %v1840_v59 = vsel %vm1773_vm1, %v1460_v1, 0.0 }
 0x1c9   :  { %v2686_v20 = vpop.f32.mrf.mxu0 }
 0x1ca   :  { %1774 = vst.msk [vmem:[%s6031_s5] sm:$0xff] %vm1773_vm1, %v1455_v10  ;;  %v1839_v35 = vsel %vm1773_vm1, %v1455_v10, 0.0  ;;  %v1976_v18 = vmul.f32 %v1455_v10, %v1455_v10  ;;  %v4493_v22 = vpop.f32.mrf.mxu1  ;;  %v1470_v32 = vadd.f32 %v2686_v20, %v4153_v60  ;;  %v2041_v11 = vsel %vm1773_vm1, %v1977_v51, 0.0 }
 0x1cb   :  { %v1841_v12 = vadd.f32 %v1840_v59, %v1839_v35  ;;  %v1464_v43 = vpop.f32.mrf.mxu0 }
 0x1cc   :  { %v2040_v62 = vsel %vm1773_vm1, %v1976_v18, 0.0  ;;  %1777 = vst.msk [vmem:[%s6031_s5 + $0x18] sm:$0xff] %vm1773_vm1, %v1470_v32  ;;  %v1236_v1 = vpop.f32.mrf.mxu1  ;;  %v1465_v41 = vadd.f32 %v1464_v43, %v4133_v37  ;;  %v1979_v10 = vmul.f32 %v1470_v32, %v1470_v32  ;;  %v1844_v43 = vsel %vm1773_vm1, %v1470_v32, 0.0 }
 0x1cd   :  { %v2042_v16 = vadd.f32 %v2041_v11, %v2040_v62  ;;  %v2689_v29 = vpop.f32.mrf.mxu0  ;;  %v6055_v1 = vmov 0.0  }
 0x1ce   :  { %1776 = vst.msk [vmem:[%s6031_s5 + $0x10] sm:$0xff] %vm1773_vm1, %v1465_v41  ;;  %v1842_v60 = vsel %vm1773_vm1, %v1465_v41, 0.0  ;;  %v1978_v51 = vmul.f32 %v1465_v41, %v1465_v41  ;;  %v4508_v20 = vpop.f32.mrf.mxu1  ;;  %v1480_v59 = vadd.f32 %v2689_v29, %v4193_v38  ;;  %v2045_v41 = vsel %vm1773_vm1, %v1979_v10, 0.0 }
 0x1cf   :  { %v1843_v35 = vadd.f32 %v1842_v60, %v1841_v12  ;;  %v1474_v18 = vpop.f32.mrf.mxu0  ;;  %25 = vst.msk [vmem:[#allocation2] sm:$0x3] %vm24_vm2, %v6055_v1 }
 0x1d0   :  { %v2043_v37 = vsel %vm1773_vm1, %v1978_v51, 0.0  ;;  %1779 = vst.msk [vmem:[%s6031_s5 + $0x28] sm:$0xff] %vm1773_vm1, %v1480_v59  ;;  %v1241_v11 = vpop.f32.mrf.mxu1  ;;  %v1475_v62 = vadd.f32 %v1474_v18, %v4173_v17  ;;  %v1981_v60 = vmul.f32 %v1480_v59, %v1480_v59 }
 0x1d1   :  { %v2044_v38 = vadd.f32 %v2043_v37, %v2042_v16  ;;  %v1845_v29 = vadd.f32 %v1844_v43, %v1843_v35  ;;  %v2692_v12 = vpop.f32.mrf.mxu0  ;;  %v1848_v16 = vsel %vm1773_vm1, %v1480_v59, 0.0 }
 0x1d2   :  { %1778 = vst.msk [vmem:[%s6031_s5 + $0x20] sm:$0xff] %vm1773_vm1, %v1475_v62  ;;  %v1846_v32 = vsel %vm1773_vm1, %v1475_v62, 0.0  ;;  %v1980_v51 = vmul.f32 %v1475_v62, %v1475_v62  ;;  %v4525_v25 = vpop.f32.mrf.mxu1  ;;  %v1490_v17 = vadd.f32 %v2692_v12, %v4233_v24  ;;  %v2049_v24 = vsel %vm1773_vm1, %v1981_v60, 0.0 }
 0x1d3   :  { %v1847_v18 = vadd.f32 %v1846_v32, %v1845_v29  ;;  %v2046_v11 = vadd.f32 %v2045_v41, %v2044_v38  ;;  %v1484_v1 = vpop.f32.mrf.mxu0 }
 0x1d4   :  { %v2047_v10 = vsel %vm1773_vm1, %v1980_v51, 0.0  ;;  %1781 = vst.msk [vmem:[%s6031_s5 + $0x38] sm:$0xff] %vm1773_vm1, %v1490_v17  ;;  %v1246_v35 = vpop.f32.mrf.mxu1  ;;  %v1485_v43 = vadd.f32 %v1484_v1, %v4213_v40  ;;  %v1983_v62 = vmul.f32 %v1490_v17, %v1490_v17  ;;  %v1852_v51 = vsel %vm1773_vm1, %v1490_v17, 0.0 }
 0x1d5   :  { %v2048_v37 = vadd.f32 %v2047_v10, %v2046_v11  ;;  %v1849_v54 = vadd.f32 %v1848_v16, %v1847_v18  ;;  %v2695_v52 = vpop.f32.mrf.mxu0 }
 0x1d6   :  { %1780 = vst.msk [vmem:[%s6031_s5 + $0x30] sm:$0xff] %vm1773_vm1, %v1485_v43  ;;  %v1850_v59 = vsel %vm1773_vm1, %v1485_v43, 0.0  ;;  %v1982_v41 = vmul.f32 %v1485_v43, %v1485_v43  ;;  %v4541_v38 = vpop.f32.mrf.mxu1  ;;  %v1500_v29 = vadd.f32 %v2695_v52, %v4273_v6  ;;  %v2053_v1 = vsel %vm1773_vm1, %v1983_v62, 0.0 }
 0x1d7   :  { %v1851_v12 = vadd.f32 %v1850_v59, %v1849_v54  ;;  %v2050_v40 = vadd.f32 %v2049_v24, %v2048_v37  ;;  %v1494_v32 = vpop.f32.mrf.mxu0 }
 0x1d8   :  { %v2051_v18 = vsel %vm1773_vm1, %v1982_v41, 0.0  ;;  %1783 = vst.msk [vmem:[%s6031_s5 + $0x48] sm:$0xff] %vm1773_vm1, %v1500_v29  ;;  %v1251_v60 = vpop.f32.mrf.mxu1  ;;  %v1495_v11 = vadd.f32 %v1494_v32, %v4253_v47  ;;  %v1985_v52 = vmul.f32 %v1500_v29, %v1500_v29  ;;  %v1856_v62 = vsel %vm1773_vm1, %v1500_v29, 0.0 }
 0x1d9   :  { %v2052_v16 = vadd.f32 %v2051_v18, %v2050_v40  ;;  %v1853_v10 = vadd.f32 %v1852_v51, %v1851_v12  ;;  %v2698_v6 = vpop.f32.mrf.mxu0 }
 0x1da   :  { %1782 = vst.msk [vmem:[%s6031_s5 + $0x40] sm:$0xff] %vm1773_vm1, %v1495_v11  ;;  %v1854_v54 = vsel %vm1773_vm1, %v1495_v11, 0.0  ;;  %v1984_v17 = vmul.f32 %v1495_v11, %v1495_v11  ;;  %v4557_v35 = vpop.f32.mrf.mxu1  ;;  %v1510_v43 = vadd.f32 %v2698_v6, %v4313_v15  ;;  %v2057_v15 = vsel %vm1773_vm1, %v1985_v52, 0.0 }
 0x1db   :  { %v1855_v37 = vadd.f32 %v1854_v54, %v1853_v10  ;;  %v2054_v47 = vadd.f32 %v2053_v1, %v2052_v16  ;;  %v1504_v24 = vpop.f32.mrf.mxu0 }
 0x1dc   :  { %v2055_v59 = vsel %vm1773_vm1, %v1984_v17, 0.0  ;;  %1785 = vst.msk [vmem:[%s6031_s5 + $0x58] sm:$0xff] %vm1773_vm1, %v1510_v43  ;;  %v1256_v41 = vpop.f32.mrf.mxu1  ;;  %v1505_v12 = vadd.f32 %v1504_v24, %v4293_v36  ;;  %v1987_v32 = vmul.f32 %v1510_v43, %v1510_v43  ;;  %v1860_v6 = vsel %vm1773_vm1, %v1510_v43, 0.0 }
 0x1dd   :  { %v2056_v40 = vadd.f32 %v2055_v59, %v2054_v47  ;;  %v1857_v51 = vadd.f32 %v1856_v62, %v1855_v37  ;;  %v2701_v18 = vpop.f32.mrf.mxu0 }
 0x1de   :  { %1784 = vst.msk [vmem:[%s6031_s5 + $0x50] sm:$0xff] %vm1773_vm1, %v1505_v12  ;;  %v1858_v29 = vsel %vm1773_vm1, %v1505_v12, 0.0  ;;  %v1986_v60 = vmul.f32 %v1505_v12, %v1505_v12  ;;  %v4573_v11 = vpop.f32.mrf.mxu1  ;;  %v1520_v1 = vadd.f32 %v2701_v18, %v4353_v5  ;;  %v2061_v37 = vsel %vm1773_vm1, %v1987_v32, 0.0 }
 0x1df   :  { %v1859_v16 = vadd.f32 %v1858_v29, %v1857_v51  ;;  %v2058_v36 = vadd.f32 %v2057_v15, %v2056_v40  ;;  %v1514_v10 = vpop.f32.mrf.mxu0 }
 0x1e0   :  { %v2059_v54 = vsel %vm1773_vm1, %v1986_v60, 0.0  ;;  %1787 = vst.msk [vmem:[%s6031_s5 + $0x68] sm:$0xff] %vm1773_vm1, %v1520_v1  ;;  %v1261_v52 = vpop.f32.mrf.mxu1  ;;  %v1515_v17 = vadd.f32 %v1514_v10, %v4333_v33  ;;  %v1989_v62 = vmul.f32 %v1520_v1, %v1520_v1  ;;  %v1864_v32 = vsel %vm1773_vm1, %v1520_v1, 0.0 }
 0x1e1   :  { %v2060_v47 = vadd.f32 %v2059_v54, %v2058_v36  ;;  %v1861_v24 = vadd.f32 %v1860_v6, %v1859_v16  ;;  %v2704_v5 = vpop.f32.mrf.mxu0 }
 0x1e2   :  { %1786 = vst.msk [vmem:[%s6031_s5 + $0x60] sm:$0xff] %vm1773_vm1, %v1515_v17  ;;  %v1862_v43 = vsel %vm1773_vm1, %v1515_v17, 0.0  ;;  %v1988_v59 = vmul.f32 %v1515_v17, %v1515_v17  ;;  %v4589_v41 = vpop.f32.mrf.mxu1  ;;  %v1530_v12 = vadd.f32 %v2704_v5, %v4383_v2  ;;  %v2065_v2 = vsel %vm1773_vm1, %v1989_v62, 0.0 }
 0x1e3   :  { %v1863_v40 = vadd.f32 %v1862_v43, %v1861_v24  ;;  %v2062_v33 = vadd.f32 %v2061_v37, %v2060_v47  ;;  %v1524_v51 = vpop.f32.mrf.mxu0 }
 0x1e4   :  { %v2063_v18 = vsel %vm1773_vm1, %v1988_v59, 0.0  ;;  %1789 = vst.msk [vmem:[%s6031_s5 + $0x78] sm:$0xff] %vm1773_vm1, %v1530_v12  ;;  %v1266_v15 = vpop.f32.mrf.mxu1  ;;  %v1525_v29 = vadd.f32 %v1524_v51, %v4373_v63  ;;  %v1991_v16 = vmul.f32 %v1530_v12, %v1530_v12  ;;  %v1868_v47 = vsel %vm1773_vm1, %v1530_v12, 0.0 }
 0x1e5   :  { %v2064_v60 = vadd.f32 %v2063_v18, %v2062_v33  ;;  %v1865_v36 = vadd.f32 %v1864_v32, %v1863_v40  ;;  %v2707_v10 = vpop.f32.mrf.mxu0 }
 0x1e6   :  { %1788 = vst.msk [vmem:[%s6031_s5 + $0x70] sm:$0xff] %vm1773_vm1, %v1525_v29  ;;  %v1866_v1 = vsel %vm1773_vm1, %v1525_v29, 0.0  ;;  %v1990_v6 = vmul.f32 %v1525_v29, %v1525_v29  ;;  %v4605_v54 = vpop.f32.mrf.mxu1  ;;  %v1540_v52 = vadd.f32 %v2707_v10, %v4395_v46  ;;  %v2069_v43 = vsel %vm1773_vm1, %v1991_v16, 0.0 }
 0x1e7   :  { %v1867_v17 = vadd.f32 %v1866_v1, %v1865_v36  ;;  %v2066_v63 = vadd.f32 %v2065_v2, %v2064_v60  ;;  %v1534_v37 = vpop.f32.mrf.mxu0 }
 0x1e8   :  { %v2067_v24 = vsel %vm1773_vm1, %v1990_v6, 0.0  ;;  %1791 = vst.msk [vmem:[%s6031_s5 + $0x88] sm:$0xff] %vm1773_vm1, %v1540_v52  ;;  %v1271_v5 = vpop.f32.mrf.mxu1  ;;  %v1535_v62 = vadd.f32 %v1534_v37, %v4389_v48  ;;  %v1993_v33 = vmul.f32 %v1540_v52, %v1540_v52  ;;  %v1872_v60 = vsel %vm1773_vm1, %v1540_v52, 0.0 }
 0x1e9   :  { %v2068_v59 = vadd.f32 %v2067_v24, %v2066_v63  ;;  %v1869_v40 = vadd.f32 %v1868_v47, %v1867_v17  ;;  %v2710_v46 = vpop.f32.mrf.mxu0 }
 0x1ea   :  { %1790 = vst.msk [vmem:[%s6031_s5 + $0x80] sm:$0xff] %vm1773_vm1, %v1535_v62  ;;  %v1870_v12 = vsel %vm1773_vm1, %v1535_v62, 0.0  ;;  %v1992_v51 = vmul.f32 %v1535_v62, %v1535_v62  ;;  %v4621_v32 = vpop.f32.mrf.mxu1  ;;  %v1550_v18 = vadd.f32 %v2710_v46, %v4407_v42  ;;  %v2073_v42 = vsel %vm1773_vm1, %v1993_v33, 0.0 }
 0x1eb   :  { %v1871_v15 = vadd.f32 %v1870_v12, %v1869_v40  ;;  %v2070_v48 = vadd.f32 %v2069_v43, %v2068_v59  ;;  %v1544_v29 = vpop.f32.mrf.mxu0 }
 0x1ec   :  { %v2071_v16 = vsel %vm1773_vm1, %v1992_v51, 0.0  ;;  %1793 = vst.msk [vmem:[%s6031_s5 + $0x98] sm:$0xff] %vm1773_vm1, %v1550_v18  ;;  %v1276_v36 = vpop.f32.mrf.mxu1  ;;  %v1545_v10 = vadd.f32 %v1544_v29, %v4401_v8  ;;  %v1995_v1 = vmul.f32 %v1550_v18, %v1550_v18  ;;  %v1876_v62 = vsel %vm1773_vm1, %v1550_v18, 0.0 }
 0x1ed   :  { %v2072_v2 = vadd.f32 %v2071_v16, %v2070_v48  ;;  %v1873_v6 = vadd.f32 %v1872_v60, %v1871_v15  ;;  %v2713_v17 = vpop.f32.mrf.mxu0 }
 0x1ee   :  { %1792 = vst.msk [vmem:[%s6031_s5 + $0x90] sm:$0xff] %vm1773_vm1, %v1545_v10  ;;  %v1874_v52 = vsel %vm1773_vm1, %v1545_v10, 0.0  ;;  %v1994_v63 = vmul.f32 %v1545_v10, %v1545_v10  ;;  %v4637_v37 = vpop.f32.mrf.mxu1  ;;  %v1560_v47 = vadd.f32 %v2713_v17, %v4419_v0  ;;  %v2077_v46 = vsel %vm1773_vm1, %v1995_v1, 0.0 }
 0x1ef   :  { %v1875_v24 = vadd.f32 %v1874_v52, %v1873_v6  ;;  %v2074_v8 = vadd.f32 %v2073_v42, %v2072_v2  ;;  %v1554_v5 = vpop.f32.mrf.mxu0 }
 0x1f0   :  { %v2075_v43 = vsel %vm1773_vm1, %v1994_v63, 0.0  ;;  %1795 = vst.msk [vmem:[%s6031_s5 + $0xa8] sm:$0xff] %vm1773_vm1, %v1560_v47  ;;  %v1281_v59 = vpop.f32.mrf.mxu1  ;;  %v1555_v40 = vadd.f32 %v1554_v5, %v4413_v58  ;;  %v1997_v51 = vmul.f32 %v1560_v47, %v1560_v47  ;;  %v1880_v36 = vsel %vm1773_vm1, %v1560_v47, 0.0 }
 0x1f1   :  { %v2076_v33 = vadd.f32 %v2075_v43, %v2074_v8  ;;  %v1877_v12 = vadd.f32 %v1876_v62, %v1875_v24  ;;  %v2716_v0 = vpop.f32.mrf.mxu0 }
 0x1f2   :  { %1794 = vst.msk [vmem:[%s6031_s5 + $0xa0] sm:$0xff] %vm1773_vm1, %v1555_v40  ;;  %v1878_v18 = vsel %vm1773_vm1, %v1555_v40, 0.0  ;;  %v1996_v15 = vmul.f32 %v1555_v40, %v1555_v40  ;;  %v4653_v48 = vpop.f32.mrf.mxu1  ;;  %v1570_v29 = vadd.f32 %v2716_v0, %v4431_v28  ;;  %v2081_v28 = vsel %vm1773_vm1, %v1997_v51, 0.0 }
 0x1f3   :  { %v1879_v60 = vadd.f32 %v1878_v18, %v1877_v12  ;;  %v2078_v58 = vadd.f32 %v2077_v46, %v2076_v33  ;;  %v1564_v16 = vpop.f32.mrf.mxu0 }
 0x1f4   :  { %v2079_v10 = vsel %vm1773_vm1, %v1996_v15, 0.0  ;;  %1797 = vst.msk [vmem:[%s6031_s5 + $0xb8] sm:$0xff] %vm1773_vm1, %v1570_v29  ;;  %v1286_v2 = vpop.f32.mrf.mxu1  ;;  %v1565_v1 = vadd.f32 %v1564_v16, %v4425_v44  ;;  %v1999_v17 = vmul.f32 %v1570_v29, %v1570_v29  ;;  %v1884_v43 = vsel %vm1773_vm1, %v1570_v29, 0.0 }
 0x1f5   :  { %v2080_v6 = vadd.f32 %v2079_v10, %v2078_v58  ;;  %v1881_v42 = vadd.f32 %v1880_v36, %v1879_v60  ;;  %v2719_v52 = vpop.f32.mrf.mxu0 }
 0x1f6   :  { %1796 = vst.msk [vmem:[%s6031_s5 + $0xb0] sm:$0xff] %vm1773_vm1, %v1565_v1  ;;  %v1882_v63 = vsel %vm1773_vm1, %v1565_v1, 0.0  ;;  %v1998_v47 = vmul.f32 %v1565_v1, %v1565_v1  ;;  %v4669_v24 = vpop.f32.mrf.mxu1  ;;  %v1580_v8 = vadd.f32 %v2719_v52, %v4443_v14  ;;  %v2085_v33 = vsel %vm1773_vm1, %v1999_v17, 0.0 }
 0x1f7   :  { %v1883_v5 = vadd.f32 %v1882_v63, %v1881_v42  ;;  %v2082_v44 = vadd.f32 %v2081_v28, %v2080_v6  ;;  %v1574_v62 = vpop.f32.mrf.mxu0  ;;  %v4698_v6 = vld [vmem:[%s6030_s2] ss:$0 sm:$0xff] }
 0x1f8   :  { %v2083_v59 = vsel %vm1773_vm1, %v1998_v47, 0.0  ;;  %1799 = vst.msk [vmem:[%s6031_s5 + $0xc8] sm:$0xff] %vm1773_vm1, %v1580_v8  ;;  %v1291_v40 = vpop.f32.mrf.mxu1  ;;  %v1575_v46 = vadd.f32 %v1574_v62, %v4437_v3  ;;  %v2001_v51 = vmul.f32 %v1580_v8, %v1580_v8  ;;  %v1888_v36 = vsel %vm1773_vm1, %v1580_v8, 0.0 }
 0x1f9   :  { %v2084_v12 = vadd.f32 %v2083_v59, %v2082_v44  ;;  %v1885_v0 = vadd.f32 %v1884_v43, %v1883_v5  ;;  %v2722_v14 = vpop.f32.mrf.mxu0 }
 0x1fa   :  { %1798 = vst.msk [vmem:[%s6031_s5 + $0xc0] sm:$0xff] %vm1773_vm1, %v1575_v46  ;;  %v1886_v18 = vsel %vm1773_vm1, %v1575_v46, 0.0  ;;  %v2000_v15 = vmul.f32 %v1575_v46, %v1575_v46  ;;  %v4685_v29 = vpop.f32.mrf.mxu1  ;;  %v1590_v60 = vadd.f32 %v2722_v14, %v4455_v55  ;;  %v840_v55 = vadd.f32 %v4698_v6, %v4380_v21 }
 0x1fb   :  { %v1887_v58 = vadd.f32 %v1886_v18, %v1885_v0  ;;  %v2086_v3 = vadd.f32 %v2085_v33, %v2084_v12  ;;  %v1584_v16 = vpop.f32.mrf.mxu0  ;;  %v2089_v63 = vsel %vm1773_vm1, %v2001_v51, 0.0 }
 0x1fc   :  { %v2087_v10 = vsel %vm1773_vm1, %v2000_v15, 0.0  ;;  %1801 = vst.msk [vmem:[%s6031_s5 + $0xd8] sm:$0xff] %vm1773_vm1, %v1590_v60  ;;  %v1296_v2 = vpop.f32.mrf.mxu1  ;;  %v1585_v1 = vadd.f32 %v1584_v16, %v4449_v45  ;;  %v2003_v42 = vmul.f32 %v1590_v60, %v1590_v60  ;;  %v1225_v43 = vadd.f32 %v4477_v50, %v840_v55 }
 0x1fd   :  { %v2088_v17 = vadd.f32 %v2087_v10, %v2086_v3  ;;  %v1889_v52 = vadd.f32 %v1888_v36, %v1887_v58  ;;  %v2725_v28 = vpop.f32.mrf.mxu0  ;;  %v1892_v59 = vsel %vm1773_vm1, %v1590_v60, 0.0  ;;  %v860_v58 = vadd.f32 %v4698_v6, %v4405_v39 }
 0x1fe   :  { %1800 = vst.msk [vmem:[%s6031_s5 + $0xd0] sm:$0xff] %vm1773_vm1, %v1585_v1  ;;  %v1890_v45 = vsel %vm1773_vm1, %v1585_v1, 0.0  ;;  %v2002_v47 = vmul.f32 %v1585_v1, %v1585_v1  ;;  %v4708_v8 = vpop.f32.mrf.mxu1  ;;  %v1600_v5 = vadd.f32 %v2725_v28, %v4467_v34  ;;  %v850_v34 = vadd.f32 %v4698_v6, %v4393_v56 }
 0x1ff   :  { %v1891_v44 = vadd.f32 %v1890_v45, %v1889_v52  ;;  %v2090_v21 = vadd.f32 %v2089_v63, %v2088_v17  ;;  %v1594_v62 = vpop.f32.mrf.mxu0  ;;  %v2093_v12 = vsel %vm1773_vm1, %v2003_v42, 0.0  ;;  %v845_v56 = vadd.f32 %v4698_v6, %v4387_v31 }
 0x200   :  { %v2091_v40 = vsel %vm1773_vm1, %v2002_v47, 0.0  ;;  %1803 = vst.msk [vmem:[%s6031_s5 + $0xe8] sm:$0xff] %vm1773_vm1, %v1600_v5  ;;  %v1301_v46 = vpop.f32.mrf.mxu1  ;;  %v1595_v33 = vadd.f32 %v1594_v62, %v4461_v23  ;;  %v2005_v51 = vmul.f32 %v1600_v5, %v1600_v5  ;;  %v1235_v10 = vadd.f32 %v4493_v22, %v850_v34 }
 0x201   :  { %v2092_v0 = vadd.f32 %v2091_v40, %v2090_v21  ;;  %v1893_v14 = vadd.f32 %v1892_v59, %v1891_v44  ;;  %v2728_v50 = vpop.f32.mrf.mxu0  ;;  %v1896_v2 = vsel %vm1773_vm1, %v1600_v5, 0.0  ;;  %v1230_v17 = vadd.f32 %v4479_v57, %v845_v56 }
 0x202   :  { %1802 = vst.msk [vmem:[%s6031_s5 + $0xe0] sm:$0xff] %vm1773_vm1, %v1595_v33  ;;  %v1894_v18 = vsel %vm1773_vm1, %v1595_v33, 0.0  ;;  %v2004_v15 = vmul.f32 %v1595_v33, %v1595_v33  ;;  %v4727_v60 = vpop.f32.mrf.mxu1  ;;  %v1610_v23 = vadd.f32 %v2728_v50, %v1225_v43  ;;  %v2097_v22 = vsel %vm1773_vm1, %v2005_v51, 0.0 }
 0x203   :  { %v1895_v3 = vadd.f32 %v1894_v18, %v1893_v14  ;;  %v2094_v16 = vadd.f32 %v2093_v12, %v2092_v0  ;;  %v1604_v36 = vpop.f32.mrf.mxu0  ;;  %v870_v57 = vadd.f32 %v4698_v6, %v4417_v26  ;;  %v1245_v43 = vadd.f32 %v4525_v25, %v860_v58 }
 0x204   :  { %v2095_v1 = vsel %vm1773_vm1, %v2004_v15, 0.0  ;;  %1805 = vst.msk [vmem:[%s6031_s5 + $0xf8] sm:$0xff] %vm1773_vm1, %v1610_v23  ;;  %v1306_v55 = vpop.f32.mrf.mxu1  ;;  %v1605_v31 = vadd.f32 %v1604_v36, %v4473_v4  ;;  %v2007_v42 = vmul.f32 %v1610_v23, %v1610_v23  ;;  %v855_v4 = vadd.f32 %v4698_v6, %v4399_v53 }
 0x205   :  { %v2096_v39 = vadd.f32 %v2095_v1, %v2094_v16  ;;  %v1897_v52 = vadd.f32 %v1896_v2, %v1895_v3  ;;  %v2731_v28 = vpop.f32.mrf.mxu0  ;;  %v1900_v59 = vsel %vm1773_vm1, %v1610_v23, 0.0  ;;  %v880_v15 = vadd.f32 %v4698_v6, %v4429_v19 }
 0x206   :  { %1804 = vst.msk [vmem:[%s6031_s5 + $0xf0] sm:$0xff] %vm1773_vm1, %v1605_v31  ;;  %v1898_v63 = vsel %vm1773_vm1, %v1605_v31, 0.0  ;;  %v2006_v45 = vmul.f32 %v1605_v31, %v1605_v31  ;;  %v4748_v47 = vpop.f32.mrf.mxu1  ;;  %v1620_v5 = vadd.f32 %v2731_v28, %v1235_v10  ;;  %v1240_v53 = vadd.f32 %v4508_v20, %v855_v4 }
 0x207   :  { %v1899_v44 = vadd.f32 %v1898_v63, %v1897_v52  ;;  %v2098_v21 = vadd.f32 %v2097_v22, %v2096_v39  ;;  %v1614_v62 = vpop.f32.mrf.mxu0  ;;  %v2101_v26 = vsel %vm1773_vm1, %v2007_v42, 0.0  ;;  %v865_v20 = vadd.f32 %v4698_v6, %v4411_v61 }
 0x208   :  { %v2099_v40 = vsel %vm1773_vm1, %v2006_v45, 0.0  ;;  %1807 = vst.msk [vmem:[%s6031_s5 + $0x108] sm:$0xff] %vm1773_vm1, %v1620_v5  ;;  %v1311_v46 = vpop.f32.mrf.mxu1  ;;  %v1615_v33 = vadd.f32 %v1614_v62, %v1230_v17  ;;  %v2009_v14 = vmul.f32 %v1620_v5, %v1620_v5  ;;  %v1255_v3 = vadd.f32 %v4557_v35, %v870_v57 }
 0x209   :  { %v2100_v34 = vadd.f32 %v2099_v40, %v2098_v21  ;;  %v1901_v12 = vadd.f32 %v1900_v59, %v1899_v44  ;;  %v2734_v0 = vpop.f32.mrf.mxu0  ;;  %v1904_v16 = vsel %vm1773_vm1, %v1620_v5, 0.0  ;;  %v1250_v61 = vadd.f32 %v4541_v38, %v865_v20 }
 0x20a   :  { %1806 = vst.msk [vmem:[%s6031_s5 + $0x100] sm:$0xff] %vm1773_vm1, %v1615_v33  ;;  %v1902_v25 = vsel %vm1773_vm1, %v1615_v33, 0.0  ;;  %v2008_v50 = vmul.f32 %v1615_v33, %v1615_v33  ;;  %v4768_v51 = vpop.f32.mrf.mxu1  ;;  %v1630_v18 = vadd.f32 %v2734_v0, %v1245_v43  ;;  %v2105_v17 = vsel %vm1773_vm1, %v2009_v14, 0.0 }
 0x20b   :  { %v1903_v23 = vadd.f32 %v1902_v25, %v1901_v12  ;;  %v2102_v56 = vadd.f32 %v2101_v26, %v2100_v34  ;;  %v1624_v58 = vpop.f32.mrf.mxu0  ;;  %v875_v38 = vadd.f32 %v4698_v6, %v4423_v49  ;;  %v890_v28 = vadd.f32 %v4698_v6, %v4441_v13 }
 0x20c   :  { %v2103_v36 = vsel %vm1773_vm1, %v2008_v50, 0.0  ;;  %1809 = vst.msk [vmem:[%s6031_s5 + $0x118] sm:$0xff] %vm1773_vm1, %v1630_v18  ;;  %v1316_v10 = vpop.f32.mrf.mxu1  ;;  %v1625_v2 = vadd.f32 %v1624_v58, %v1240_v53  ;;  %v2011_v19 = vmul.f32 %v1630_v18, %v1630_v18  ;;  %v1265_v5 = vadd.f32 %v4589_v41, %v880_v15 }
 0x20d   :  { %v2104_v1 = vadd.f32 %v2103_v36, %v2102_v56  ;;  %v1905_v55 = vadd.f32 %v1904_v16, %v1903_v23  ;;  %v2737_v31 = vpop.f32.mrf.mxu0  ;;  %v1908_v4 = vsel %vm1773_vm1, %v1630_v18, 0.0  ;;  %v1260_v49 = vadd.f32 %v4573_v11, %v875_v38 }
 0x20e   :  { %1808 = vst.msk [vmem:[%s6031_s5 + $0x110] sm:$0xff] %vm1773_vm1, %v1625_v2  ;;  %v1906_v35 = vsel %vm1773_vm1, %v1625_v2, 0.0  ;;  %v2010_v39 = vmul.f32 %v1625_v2, %v1625_v2  ;;  %v4788_v42 = vpop.f32.mrf.mxu1  ;;  %v1640_v52 = vadd.f32 %v2737_v31, %v1255_v3  ;;  %v2109_v13 = vsel %vm1773_vm1, %v2011_v19, 0.0 }
 0x20f   :  { %v1907_v22 = vadd.f32 %v1906_v35, %v1905_v55  ;;  %v2106_v63 = vadd.f32 %v2105_v17, %v2104_v1  ;;  %v1634_v45 = vpop.f32.mrf.mxu0  ;;  %v885_v11 = vadd.f32 %v4698_v6, %v4435_v27  ;;  %v900_v26 = vadd.f32 %v4698_v6, %v4453_v30 }
 0x210   :  { %v2107_v57 = vsel %vm1773_vm1, %v2010_v39, 0.0  ;;  %1811 = vst.msk [vmem:[%s6031_s5 + $0x128] sm:$0xff] %vm1773_vm1, %v1640_v52  ;;  %v1321_v44 = vpop.f32.mrf.mxu1  ;;  %v1635_v21 = vadd.f32 %v1634_v45, %v1250_v61  ;;  %v2013_v40 = vmul.f32 %v1640_v52, %v1640_v52  ;;  %v1275_v14 = vadd.f32 %v4621_v32, %v890_v28 }
 0x211   :  { %v2108_v62 = vadd.f32 %v2107_v57, %v2106_v63  ;;  %v1909_v43 = vadd.f32 %v1908_v4, %v1907_v22  ;;  %v2740_v59 = vpop.f32.mrf.mxu0  ;;  %v1912_v25 = vsel %vm1773_vm1, %v1640_v52, 0.0  ;;  %v1270_v27 = vadd.f32 %v4605_v54, %v885_v11  ;;  %v6057_v4 = vld [vmem:[#allocation21_spill] sm:$0xff] }
 0x212   :  { %1810 = vst.msk [vmem:[%s6031_s5 + $0x120] sm:$0xff] %vm1773_vm1, %v1635_v21  ;;  %v1910_v41 = vsel %vm1773_vm1, %v1635_v21, 0.0  ;;  %v2012_v46 = vmul.f32 %v1635_v21, %v1635_v21  ;;  %v4808_v33 = vpop.f32.mrf.mxu1  ;;  %v1650_v53 = vadd.f32 %v2740_v59, %v1265_v5  ;;  %v2113_v58 = vsel %vm1773_vm1, %v2013_v40, 0.0  ;;  %v6056_v5 = vld [vmem:[#allocation19_spill] sm:$0xff] }
 0x213   :  { %v1911_v34 = vadd.f32 %v1910_v41, %v1909_v43  ;;  %v2110_v12 = vadd.f32 %v2109_v13, %v2108_v62  ;;  %v1644_v0 = vpop.f32.mrf.mxu0  ;;  %v895_v54 = vadd.f32 %v4698_v6, %v4447_v9  ;;  %v910_v10 = vadd.f32 %v4698_v6, %v4465_v7 }
 0x214   :  { %v2111_v50 = vsel %vm1773_vm1, %v2012_v46, 0.0  ;;  %1813 = vst.msk [vmem:[%s6031_s5 + $0x138] sm:$0xff] %vm1773_vm1, %v1650_v53  ;;  %v1326_v18 = vpop.f32.mrf.mxu1  ;;  %v1645_v20 = vadd.f32 %v1644_v0, %v1260_v49  ;;  %v2015_v30 = vmul.f32 %v1650_v53, %v1650_v53  ;;  %v1285_v19 = vadd.f32 %v4653_v48, %v900_v26 }
 0x215   :  { %v2112_v15 = vadd.f32 %v2111_v50, %v2110_v12  ;;  %v1913_v23 = vadd.f32 %v1912_v25, %v1911_v34  ;;  %v2743_v56 = vpop.f32.mrf.mxu0  ;;  %v1916_v55 = vsel %vm1773_vm1, %v1650_v53, 0.0  ;;  %v1280_v9 = vadd.f32 %v4637_v37, %v895_v54  ;;  %v6058_v25 = vld [vmem:[#allocation4_spill] sm:$0xff] }
 0x216   :  { %1812 = vst.msk [vmem:[%s6031_s5 + $0x130] sm:$0xff] %vm1773_vm1, %v1645_v20  ;;  %v1914_v32 = vsel %vm1773_vm1, %v1645_v20, 0.0  ;;  %v2014_v3 = vmul.f32 %v1645_v20, %v1645_v20  ;;  %v4828_v16 = vpop.f32.mrf.mxu1  ;;  %v1660_v36 = vadd.f32 %v2743_v56, %v1275_v14  ;;  %v2117_v7 = vsel %vm1773_vm1, %v2015_v30, 0.0  ;;  %v6059_v50 = vld [vmem:[#allocation20_spill] sm:$0xff] }
 0x217   :  { %v1915_v2 = vadd.f32 %v1914_v32, %v1913_v23  ;;  %v2114_v61 = vadd.f32 %v2113_v58, %v2112_v15  ;;  %v1654_v1 = vpop.f32.mrf.mxu0  ;;  %v905_v37 = vadd.f32 %v4698_v6, %v6056_v5  ;;  %v920_v57 = vadd.f32 %v4698_v6, %v6057_v4 }
 0x218   :  { %v2115_v31 = vsel %vm1773_vm1, %v2014_v3, 0.0  ;;  %1815 = vst.msk [vmem:[%s6031_s5 + $0x148] sm:$0xff] %vm1773_vm1, %v1660_v36  ;;  %v1331_v17 = vpop.f32.mrf.mxu1  ;;  %v1655_v35 = vadd.f32 %v1654_v1, %v1270_v27  ;;  %v2017_v28 = vmul.f32 %v1660_v36, %v1660_v36  ;;  %v1295_v13 = vadd.f32 %v4685_v29, %v910_v10 }
 0x219   :  { %v2116_v39 = vadd.f32 %v2115_v31, %v2114_v61  ;;  %v1917_v52 = vadd.f32 %v1916_v55, %v1915_v2  ;;  %v2746_v38 = vpop.f32.mrf.mxu0  ;;  %v1920_v62 = vsel %vm1773_vm1, %v1660_v36, 0.0  ;;  %v1290_v41 = vadd.f32 %v4669_v24, %v905_v37  ;;  %v6060_v31 = vld [vmem:[#allocation3_spill] sm:$0xff]  ;;  %v6061_v17 = vld [vmem:[#allocation6_spill] sm:$0xff] }
 0x21a   :  { %1814 = vst.msk [vmem:[%s6031_s5 + $0x140] sm:$0xff] %vm1773_vm1, %v1655_v35  ;;  %v1918_v48 = vsel %vm1773_vm1, %v1655_v35, 0.0  ;;  %v2016_v22 = vmul.f32 %v1655_v35, %v1655_v35  ;;  %v4848_v63 = vpop.f32.mrf.mxu1  ;;  %v1670_v45 = vadd.f32 %v2746_v38, %v1285_v19  ;;  %v2121_v34 = vsel %vm1773_vm1, %v2017_v28, 0.0 }
 0x21b   :  { %v1919_v44 = vadd.f32 %v1918_v48, %v1917_v52  ;;  %v2118_v21 = vadd.f32 %v2117_v7, %v2116_v39  ;;  %v1664_v49 = vpop.f32.mrf.mxu0  ;;  %v930_v24 = vadd.f32 %v4698_v6, %v6058_v25  ;;  %v915_v18 = vadd.f32 %v4698_v6, %v6059_v50 }
 0x21c   :  { %v2119_v43 = vsel %vm1773_vm1, %v2016_v22, 0.0  ;;  %1817 = vst.msk [vmem:[%s6031_s5 + $0x158] sm:$0xff] %vm1773_vm1, %v1670_v45  ;;  %v1336_v59 = vpop.f32.mrf.mxu1  ;;  %v1665_v40 = vadd.f32 %v1664_v49, %v1280_v9  ;;  %v2019_v53 = vmul.f32 %v1670_v45, %v1670_v45  ;;  %v1305_v30 = vadd.f32 %v4727_v60, %v920_v57 }
 0x21d   :  { %v2120_v46 = vadd.f32 %v2119_v43, %v2118_v21  ;;  %v1921_v11 = vadd.f32 %v1920_v62, %v1919_v44  ;;  %v2749_v26 = vpop.f32.mrf.mxu0  ;;  %v1924_v23 = vsel %vm1773_vm1, %v1670_v45, 0.0  ;;  %v1300_v3 = vadd.f32 %v4708_v8, %v915_v18  ;;  %v6062_v62 = vld [vmem:[#allocation5_spill] sm:$0xff]  ;;  %v6063_v43 = vld [vmem:[#allocation8_spill] sm:$0xff] }
 0x21e   :  { %1816 = vst.msk [vmem:[%s6031_s5 + $0x150] sm:$0xff] %vm1773_vm1, %v1665_v40  ;;  %v1922_v29 = vsel %vm1773_vm1, %v1665_v40, 0.0  ;;  %v2018_v12 = vmul.f32 %v1665_v40, %v1665_v40  ;;  %v4868_v0 = vpop.f32.mrf.mxu1  ;;  %v1680_v14 = vadd.f32 %v2749_v26, %v1295_v13  ;;  %v2125_v36 = vsel %vm1773_vm1, %v2019_v53, 0.0 }
 0x21f   :  { %v1923_v20 = vadd.f32 %v1922_v29, %v1921_v11  ;;  %v2122_v27 = vadd.f32 %v2121_v34, %v2120_v46  ;;  %v1674_v15 = vpop.f32.mrf.mxu0  ;;  %v925_v8 = vadd.f32 %v4698_v6, %v6060_v31  ;;  %v940_v35 = vadd.f32 %v4698_v6, %v6061_v17 }
 0x220   :  { %v2123_v56 = vsel %vm1773_vm1, %v2018_v12, 0.0  ;;  %1819 = vst.msk [vmem:[%s6031_s5 + $0x168] sm:$0xff] %vm1773_vm1, %v1680_v14  ;;  %v1341_v58 = vpop.f32.mrf.mxu1  ;;  %v1675_v32 = vadd.f32 %v1674_v15, %v1290_v41  ;;  %v2021_v61 = vmul.f32 %v1680_v14, %v1680_v14  ;;  %v1315_v52 = vadd.f32 %v4768_v51, %v930_v24 }
 0x221   :  { %v2124_v54 = vadd.f32 %v2123_v56, %v2122_v27  ;;  %v1925_v10 = vadd.f32 %v1924_v23, %v1923_v20  ;;  %v2752_v2 = vpop.f32.mrf.mxu0  ;;  %v1928_v38 = vsel %vm1773_vm1, %v1680_v14, 0.0  ;;  %v1310_v45 = vadd.f32 %v4748_v47, %v925_v8 }
 0x222   :  { %1818 = vst.msk [vmem:[%s6031_s5 + $0x160] sm:$0xff] %vm1773_vm1, %v1675_v32  ;;  %v1926_v60 = vsel %vm1773_vm1, %v1675_v32, 0.0  ;;  %v2020_v1 = vmul.f32 %v1675_v32, %v1675_v32  ;;  %v4888_v19 = vpop.f32.mrf.mxu1  ;;  %v1690_v55 = vadd.f32 %v2752_v2, %v1305_v30  ;;  %v2129_v44 = vsel %vm1773_vm1, %v2021_v61, 0.0  ;;  %v6064_v30 = vld [vmem:[#allocation7_spill] sm:$0xff] }
 0x223   :  { %v1927_v9 = vadd.f32 %v1926_v60, %v1925_v10  ;;  %v2126_v7 = vadd.f32 %v2125_v36, %v2124_v54  ;;  %v1684_v39 = vpop.f32.mrf.mxu0  ;;  %v935_v47 = vadd.f32 %v4698_v6, %v6062_v62  ;;  %v950_v59 = vadd.f32 %v4698_v6, %v6063_v43 }
 0x224   :  { %v2127_v28 = vsel %vm1773_vm1, %v2020_v1, 0.0  ;;  %1821 = vst.msk [vmem:[%s6031_s5 + $0x178] sm:$0xff] %vm1773_vm1, %v1690_v55  ;;  %v1346_v48 = vpop.f32.mrf.mxu1  ;;  %v1685_v22 = vadd.f32 %v1684_v39, %v1300_v3  ;;  %v2023_v37 = vmul.f32 %v1690_v55, %v1690_v55  ;;  %v1325_v53 = vadd.f32 %v4808_v33, %v940_v35  ;;  %v6066_v39 = vld [vmem:[#allocation9_spill] sm:$0xff] }
 0x225   :  { %v2128_v5 = vadd.f32 %v2127_v28, %v2126_v7  ;;  %v1929_v4 = vadd.f32 %v1928_v38, %v1927_v9  ;;  %v2755_v57 = vpop.f32.mrf.mxu0  ;;  %v1932_v11 = vsel %vm1773_vm1, %v1690_v55, 0.0  ;;  %v1320_v12 = vadd.f32 %v4788_v42, %v935_v47  ;;  %v6065_v42 = vld [vmem:[#allocation10_spill] sm:$0xff] }
 0x226   :  { %1820 = vst.msk [vmem:[%s6031_s5 + $0x170] sm:$0xff] %vm1773_vm1, %v1685_v22  ;;  %v1930_v51 = vsel %vm1773_vm1, %v1685_v22, 0.0  ;;  %v2022_v21 = vmul.f32 %v1685_v22, %v1685_v22  ;;  %v4908_v49 = vpop.f32.mrf.mxu1  ;;  %v1700_v13 = vadd.f32 %v2755_v57, %v1315_v52  ;;  %v2133_v14 = vsel %vm1773_vm1, %v2023_v37, 0.0 }
 0x227   :  { %v1931_v40 = vadd.f32 %v1930_v51, %v1929_v4  ;;  %v2130_v41 = vadd.f32 %v2129_v44, %v2128_v5  ;;  %v1694_v46 = vpop.f32.mrf.mxu0  ;;  %v945_v23 = vadd.f32 %v4698_v6, %v6064_v30  ;;  %v960_v56 = vadd.f32 %v4698_v6, %v6065_v42 }
 0x228   :  { %v2131_v26 = vsel %vm1773_vm1, %v2022_v21, 0.0  ;;  %1823 = vst.msk [vmem:[%s6031_s5 + $0x188] sm:$0xff] %vm1773_vm1, %v1700_v13  ;;  %v1351_v34 = vpop.f32.mrf.mxu1  ;;  %v1695_v29 = vadd.f32 %v1694_v46, %v1310_v45  ;;  %v2025_v18 = vmul.f32 %v1700_v13, %v1700_v13  ;;  %v1335_v36 = vadd.f32 %v4848_v63, %v950_v59 }
 0x229   :  { %v2132_v25 = vadd.f32 %v2131_v26, %v2130_v41  ;;  %v1933_v24 = vadd.f32 %v1932_v11, %v1931_v40  ;;  %v2758_v50 = vpop.f32.mrf.mxu0  ;;  %v1936_v54 = vsel %vm1773_vm1, %v1700_v13, 0.0  ;;  %v1330_v60 = vadd.f32 %v4828_v16, %v945_v23  ;;  %v6067_v16 = vld [vmem:[#allocation12_spill] sm:$0xff]  ;;  %v6068_v41 = vld [vmem:[#allocation11_spill] sm:$0xff] }
 0x22a   :  { %1822 = vst.msk [vmem:[%s6031_s5 + $0x180] sm:$0xff] %vm1773_vm1, %v1695_v29  ;;  %v1934_v33 = vsel %vm1773_vm1, %v1695_v29, 0.0  ;;  %v2024_v20 = vmul.f32 %v1695_v29, %v1695_v29  ;;  %v1354_v27 = vpop.f32.mrf.mxu1  ;;  %v1710_v15 = vadd.f32 %v2758_v50, %v1325_v53  ;;  %v2137_v17 = vsel %vm1773_vm1, %v2025_v18, 0.0 }
 0x22b   :  { %v1935_v58 = vadd.f32 %v1934_v33, %v1933_v24  ;;  %v2134_v32 = vadd.f32 %v2133_v14, %v2132_v25  ;;  %v1704_v3 = vpop.f32.mrf.mxu0  ;;  %v955_v52 = vadd.f32 %v4698_v6, %v6066_v39  ;;  %v970_v38 = vadd.f32 %v4698_v6, %v6067_v16 }
 0x22c   :  { %v2135_v10 = vsel %vm1773_vm1, %v2024_v20, 0.0  ;;  %1825 = vst.msk [vmem:[%s6031_s5 + $0x198] sm:$0xff] %vm1773_vm1, %v1710_v15  ;;  %v1356_v2 = vpop.f32.mrf.mxu1  ;;  %v1705_v61 = vadd.f32 %v1704_v3, %v1320_v12  ;;  %v2027_v55 = vmul.f32 %v1710_v15, %v1710_v15  ;;  %v1345_v45 = vadd.f32 %v4888_v19, %v960_v56 }
 0x22d   :  { %v2136_v1 = vadd.f32 %v2135_v10, %v2134_v32  ;;  %v1937_v31 = vadd.f32 %v1936_v54, %v1935_v58  ;;  %v2761_v8 = vpop.f32.mrf.mxu0  ;;  %v1940_v5 = vsel %vm1773_vm1, %v1710_v15, 0.0  ;;  %v1340_v44 = vadd.f32 %v4868_v0, %v955_v52  ;;  %v6069_v0 = vld [vmem:[#allocation14_spill] sm:$0xff]  ;;  %v6070_v58 = vld [vmem:[#allocation13_spill] sm:$0xff] }
 0x22e   :  { %1824 = vst.msk [vmem:[%s6031_s5 + $0x190] sm:$0xff] %vm1773_vm1, %v1705_v61  ;;  %v1938_v63 = vsel %vm1773_vm1, %v1705_v61, 0.0  ;;  %v2026_v35 = vmul.f32 %v1705_v61, %v1705_v61  ;;  %v1359_v9 = vpop.f32.mrf.mxu1  ;;  %v1720_v7 = vadd.f32 %v2761_v8, %v1335_v36  ;;  %v2141_v51 = vsel %vm1773_vm1, %v2027_v55, 0.0 }
 0x22f   :  { %v1939_v28 = vadd.f32 %v1938_v63, %v1937_v31  ;;  %v2138_v48 = vadd.f32 %v2137_v17, %v2136_v1  ;;  %v1714_v22 = vpop.f32.mrf.mxu0  ;;  %v965_v46 = vadd.f32 %v4698_v6, %v6068_v41  ;;  %v980_v53 = vadd.f32 %v4698_v6, %v6069_v0 }
 0x230   :  { %v2139_v37 = vsel %vm1773_vm1, %v2026_v35, 0.0  ;;  %1827 = vst.msk [vmem:[%s6031_s5 + $0x1a8] sm:$0xff] %vm1773_vm1, %v1720_v7  ;;  %v1361_v4 = vpop.f32.mrf.mxu1  ;;  %v1715_v57 = vadd.f32 %v1714_v22, %v1330_v60  ;;  %v2029_v47 = vmul.f32 %v1720_v7, %v1720_v7  ;;  %v1355_v29 = vadd.f32 %v1354_v27, %v970_v38 }
 0x231   :  { %v2140_v21 = vadd.f32 %v2139_v37, %v2138_v48  ;;  %v1941_v13 = vadd.f32 %v1940_v5, %v1939_v28  ;;  %v2764_v62 = vpop.f32.mrf.mxu0  ;;  %v1944_v12 = vsel %vm1773_vm1, %v1720_v7, 0.0  ;;  %v1350_v50 = vadd.f32 %v4908_v49, %v965_v46  ;;  %v6071_v49 = vld [vmem:[#allocation16_spill] sm:$0xff]  ;;  %v6072_v28 = vld [vmem:[#allocation15_spill] sm:$0xff] }
 0x232   :  { %1826 = vst.msk [vmem:[%s6031_s5 + $0x1a0] sm:$0xff] %vm1773_vm1, %v1715_v57  ;;  %v1942_v19 = vsel %vm1773_vm1, %v1715_v57, 0.0  ;;  %v2028_v43 = vmul.f32 %v1715_v57, %v1715_v57  ;;  %v1364_v59 = vpop.f32.mrf.mxu1  ;;  %v1730_v40 = vadd.f32 %v2764_v62, %v1345_v45  ;;  %v2145_v30 = vsel %vm1773_vm1, %v2029_v47, 0.0 }
 0x233   :  { %v1943_v11 = vadd.f32 %v1942_v19, %v1941_v13  ;;  %v2142_v26 = vadd.f32 %v2141_v51, %v2140_v21  ;;  %v1724_v34 = vpop.f32.mrf.mxu0  ;;  %v975_v32 = vadd.f32 %v4698_v6, %v6070_v58  ;;  %v990_v3 = vadd.f32 %v4698_v6, %v6071_v49 }
 0x234   :  { %v2143_v14 = vsel %vm1773_vm1, %v2028_v43, 0.0  ;;  %1829 = vst.msk [vmem:[%s6031_s5 + $0x1b8] sm:$0xff] %vm1773_vm1, %v1730_v40  ;;  %v1366_v25 = vpop.f32.mrf.mxu1  ;;  %v1725_v24 = vadd.f32 %v1724_v34, %v1340_v44  ;;  %v2031_v33 = vmul.f32 %v1730_v40, %v1730_v40  ;;  %v1365_v2 = vadd.f32 %v1364_v59, %v980_v53 }
 0x235   :  { %v2144_v18 = vadd.f32 %v2143_v14, %v2142_v26  ;;  %v1945_v20 = vadd.f32 %v1944_v12, %v1943_v11  ;;  %v2767_v15 = vpop.f32.mrf.mxu0  ;;  %v1948_v61 = vsel %vm1773_vm1, %v1730_v40, 0.0  ;;  %v1360_v31 = vadd.f32 %v1359_v9, %v975_v32  ;;  %v6073_v11 = vld [vmem:[#allocation17_spill] sm:$0xff]  ;;  %v6074_v25 = vld [vmem:[#allocation18_spill] sm:$0xff] }
 0x236   :  { %1828 = vst.msk [vmem:[%s6031_s5 + $0x1b0] sm:$0xff] %vm1773_vm1, %v1725_v24  ;;  %v1946_v27 = vsel %vm1773_vm1, %v1725_v24, 0.0  ;;  %v2030_v23 = vmul.f32 %v1725_v24, %v1725_v24  ;;  %v1369_v42 = vpop.f32.mrf.mxu1  ;;  %v1740_v56 = vadd.f32 %v2767_v15, %v1355_v29  ;;  %v2149_v8 = vsel %vm1773_vm1, %v2031_v33, 0.0 }
 0x237   :  { %v1947_v36 = vadd.f32 %v1946_v27, %v1945_v20  ;;  %v2146_v54 = vadd.f32 %v2145_v30, %v2144_v18  ;;  %v1734_v10 = vpop.f32.mrf.mxu0  ;;  %v985_v48 = vadd.f32 %v4698_v6, %v6072_v28  ;;  %v995_v26 = vadd.f32 %v4698_v6, %v6073_v11 }
 0x238   :  { %v2147_v60 = vsel %vm1773_vm1, %v2030_v23, 0.0  ;;  %1831 = vst.msk [vmem:[%s6031_s5 + $0x1c8] sm:$0xff] %vm1773_vm1, %v1740_v56  ;;  %v1371_v1 = vpop.f32.mrf.mxu1  ;;  %v1735_v55 = vadd.f32 %v1734_v10, %v1350_v50  ;;  %v2033_v7 = vmul.f32 %v1740_v56, %v1740_v56  ;;  %v1952_v5 = vsel %vm1773_vm1, %v1740_v56, 0.0 }
 0x239   :  { %v2148_v17 = vadd.f32 %v2147_v60, %v2146_v54  ;;  %v1949_v63 = vadd.f32 %v1948_v61, %v1947_v36  ;;  %v2770_v35 = vpop.f32.mrf.mxu0  ;;  %v1370_v51 = vadd.f32 %v1369_v42, %v985_v48  ;;  %v1000_v24 = vadd.f32 %v4698_v6, %v6074_v25  ;;  %v5051_v25 = vld [vmem:[%s6033_s4] sm:$0x1] }
 0x23a   :  { %1830 = vst.msk [vmem:[%s6031_s5 + $0x1c0] sm:$0xff] %vm1773_vm1, %v1735_v55  ;;  %v1950_v39 = vsel %vm1773_vm1, %v1735_v55, 0.0  ;;  %v2032_v52 = vmul.f32 %v1735_v55, %v1735_v55  ;;  %v1374_v16 = vpop.f32.mrf.mxu1  ;;  %v1750_v38 = vadd.f32 %v2770_v35, %v1365_v2  ;;  %v2153_v19 = vsel %vm1773_vm1, %v2033_v7, 0.0 }
 0x23b   :  { %v1951_v9 = vadd.f32 %v1950_v39, %v1949_v63  ;;  %v2150_v22 = vadd.f32 %v2149_v8, %v2148_v17  ;;  %v1744_v45 = vpop.f32.mrf.mxu0  ;;  %v1375_v4 = vadd.f32 %v1374_v16, %v990_v3  ;;  %v2257_v11 = vlaneseq }
 0x23c   :  { %v2151_v37 = vsel %vm1773_vm1, %v2032_v52, 0.0  ;;  %1833 = vst.msk [vmem:[%s6031_s5 + $0x1d8] sm:$0xff] %vm1773_vm1, %v1750_v38  ;;  %v1376_v57 = vpop.f32.mrf.mxu1  ;;  %v1745_v44 = vadd.f32 %v1744_v45, %v1360_v31  ;;  %v2035_v13 = vmul.f32 %v1750_v38, %v1750_v38  ;;  %v1956_v34 = vsel %vm1773_vm1, %v1750_v38, 0.0 }
 0x23d   :  { %v2152_v21 = vadd.f32 %v2151_v37, %v2150_v22  ;;  %v1953_v62 = vadd.f32 %v1952_v5, %v1951_v9  ;;  %v2773_v47 = vpop.f32.mrf.mxu0  ;;  %v1838_v57 = vld [vmem:[#allocation2] sm:$0x1] }
 0x23e   :  { %1832 = vst.msk [vmem:[%s6031_s5 + $0x1d0] sm:$0xff] %vm1773_vm1, %v1745_v44  ;;  %v1954_v43 = vsel %vm1773_vm1, %v1745_v44, 0.0  ;;  %v2034_v59 = vmul.f32 %v1745_v44, %v1745_v44  ;;  %v1379_v40 = vpop.f32.mrf.mxu1  ;;  %v1760_v41 = vadd.f32 %v2773_v47, %v1375_v4  ;;  %v2157_v50 = vsel %vm1773_vm1, %v2035_v13, 0.0 }
 0x23f   :  { %v1955_v46 = vadd.f32 %v1954_v43, %v1953_v62  ;;  %v2154_v0 = vadd.f32 %v2153_v19, %v2152_v21  ;;  %v1754_v53 = vpop.f32.mrf.mxu0  ;;  %v1380_v15 = vadd.f32 %v1379_v40, %v995_v26  ;;  %v1975_v21 = vld [vmem:[#allocation2 + $0x1] sm:$0x1]  ;;  %v5042_v26 = vshrl.u32 %v2257_v11, 7 }
 0x240   :  { %v2155_v29 = vsel %vm1773_vm1, %v2034_v59, 0.0  ;;  %1835 = vst.msk [vmem:[%s6031_s5 + $0x1e8] sm:$0xff] %vm1773_vm1, %v1760_v41  ;;  %v1381_v12 = vpop.f32.mrf.mxu1  ;;  %v1755_v14 = vadd.f32 %v1754_v53, %v1370_v51  ;;  %v2037_v30 = vmul.f32 %v1760_v41, %v1760_v41  ;;  %v1960_v49 = vsel %vm1773_vm1, %v1760_v41, 0.0  ;;  %v2224_v11 = vld [vmem:[%s6031_s5 + $0x100] sm:$0xff] }
 0x241   :  { %v2156_v18 = vadd.f32 %v2155_v29, %v2154_v0  ;;  %v1957_v33 = vadd.f32 %v1956_v34, %v1955_v46  ;;  %v2776_v20 = vpop.f32.mrf.mxu0  ;;  %v2185_v34 = vld [vmem:[%s6032_s3] sm:$0x1]  ;;  %v6035_v29 = vsub.s32 0, %v5042_v26 }
 0x242   :  { %1834 = vst.msk [vmem:[%s6031_s5 + $0x1e0] sm:$0xff] %vm1773_vm1, %v1755_v14  ;;  %v1958_v27 = vsel %vm1773_vm1, %v1755_v14, 0.0  ;;  %v2036_v23 = vmul.f32 %v1755_v14, %v1755_v14  ;;  %v1384_v42 = vpop.f32.mrf.mxu1  ;;  %v2161_v60 = vsel %vm1773_vm1, %v2037_v30, 0.0  ;;  %v2197_v30 = vld [vmem:[%s6031_s5 + $0x28] sm:$0xff] }
 0x243   :  { %v1959_v56 = vadd.f32 %v1958_v27, %v1957_v33  ;;  %v2158_v58 = vadd.f32 %v2157_v50, %v2156_v18  ;;  %v1385_v32 = vadd.f32 %v1384_v42, %v1000_v24  ;;  %v1764_v6 = vpop.f32.mrf.mxu0  ;;  %v2193_v18 = vld [vmem:[%s6031_s5 + $0x8] sm:$0xff]  ;;  %v2192_v33 = vld [vmem:[%s6031_s5] sm:$0xff]  ;;  %v2198_v42 = vld [vmem:[%s6031_s5 + $0x30] sm:$0xff] }
 0x244   :  { %v2159_v3 = vsel %vm1773_vm1, %v2036_v23, 0.0  ;;  %v1765_v36 = vadd.f32 %v1764_v6, %v1380_v15  ;;  %v1386_v54 = vpop.f32.mrf.mxu1  ;;  %v2194_v15 = vld [vmem:[%s6031_s5 + $0x10] sm:$0xff]  ;;  %v2196_v27 = vld [vmem:[%s6031_s5 + $0x20] sm:$0xff]  ;;  %v2199_v23 = vld [vmem:[%s6031_s5 + $0x38] sm:$0xff] }
 0x245   :  { %v2160_v10 = vadd.f32 %v2159_v3, %v2158_v58  ;;  %v1770_v2 = vadd.f32 %v2776_v20, %v1385_v32  ;;  %v1961_v61 = vadd.f32 %v1960_v49, %v1959_v56  ;;  %v2195_v20 = vld [vmem:[%s6031_s5 + $0x18] sm:$0xff]  ;;  %v2201_v56 = vld [vmem:[%s6031_s5 + $0x48] sm:$0xff]  ;;  %v2200_v58 = vld [vmem:[%s6031_s5 + $0x40] sm:$0xff] }
 0x246   :  { %1836 = vst.msk [vmem:[%s6031_s5 + $0x1f0] sm:$0xff] %vm1773_vm1, %v1765_v36  ;;  %v1962_v1 = vsel %vm1773_vm1, %v1765_v36, 0.0  ;;  %v2038_v55 = vmul.f32 %v1765_v36, %v1765_v36  ;;  %v2203_v32 = vld [vmem:[%s6031_s5 + $0x58] sm:$0xff]  ;;  %v2202_v6 = vld [vmem:[%s6031_s5 + $0x50] sm:$0xff]  ;;  %v2205_v36 = vld [vmem:[%s6031_s5 + $0x68] sm:$0xff] }
 0x247   :  { %1837 = vst.msk [vmem:[%s6031_s5 + $0x1f8] sm:$0xff] %vm1773_vm1, %v1770_v2  ;;  %v2039_v31 = vmul.f32 %v1770_v2, %v1770_v2  ;;  %v1963_v8 = vadd.f32 %v1962_v1, %v1961_v61  ;;  %v2162_v17 = vadd.f32 %v2161_v60, %v2160_v10  ;;  %v1964_v63 = vsel %vm1773_vm1, %v1770_v2, 0.0  ;;  %v2204_v54 = vld [vmem:[%s6031_s5 + $0x60] sm:$0xff]  ;;  %v2207_v10 = vld [vmem:[%s6031_s5 + $0x78] sm:$0xff]  ;;  %v2206_v2 = vld [vmem:[%s6031_s5 + $0x70] sm:$0xff] }
 0x248   :  { %v2163_v35 = vsel %vm1773_vm1, %v2038_v55, 0.0 }
 0x249   :  { %v1965_v7 = vadd.f32 %v1964_v63, %v1963_v8  ;;  %v2164_v39 = vadd.f32 %v2163_v35, %v2162_v17  ;;  %v2165_v52 = vsel %vm1773_vm1, %v2039_v31, 0.0  ;;  %v2209_v31 = vld [vmem:[%s6031_s5 + $0x88] sm:$0xff]  ;;  %v2208_v8 = vld [vmem:[%s6031_s5 + $0x80] sm:$0xff]  ;;  %v2211_v17 = vld [vmem:[%s6031_s5 + $0x98] sm:$0xff] }
 0x24a   :  { %v2210_v63 = vld [vmem:[%s6031_s5 + $0x90] sm:$0xff] }
 0x24b   :  { %v1966_v16 = vrot.slane %v1965_v7, 4  ;;  %v2166_v38 = vadd.f32 %v2165_v52, %v2164_v39 }
 0x24d   :  { %v1967_v28 = vadd.f32 %v1966_v16, %v1965_v7  ;;  %v2167_v48 = vrot.slane %v2166_v38, 4  ;;  %v2213_v16 = vld [vmem:[%s6031_s5 + $0xa8] sm:$0xff] }
 0x24f   :  { %v1968_v9 = vrot.slane %v1967_v28, 2  ;;  %v2168_v22 = vadd.f32 %v2167_v48, %v2166_v38  ;;  %v2212_v38 = vld [vmem:[%s6031_s5 + $0xa0] sm:$0xff]  ;;  %v2214_v48 = vld [vmem:[%s6031_s5 + $0xb0] sm:$0xff] }
 0x251   :  { %v1969_v45 = vadd.f32 %v1968_v9, %v1967_v28  ;;  %v2169_v5 = vrot.slane %v2168_v22, 2  ;;  %v2215_v28 = vld [vmem:[%s6031_s5 + $0xb8] sm:$0xff] }
 0x253   :  { %v1970_v37 = vrot.slane %v1969_v45, 1  ;;  %v2170_v4 = vadd.f32 %v2169_v5, %v2168_v22 }
 0x255   :  { %v1971_v44 = vadd.f32 %v1970_v37, %v1969_v45  ;;  %v2171_v51 = vrot.slane %v2170_v4, 1  ;;  %v2217_v37 = vld [vmem:[%s6031_s5 + $0xc8] sm:$0xff] }
 0x257   :  { %v1972_v13 = vadd.f32 %v1971_v44, %v1838_v57  ;;  %v2172_v62 = vadd.f32 %v2171_v51, %v2170_v4  ;;  %v2216_v4 = vld [vmem:[%s6031_s5 + $0xc0] sm:$0xff]  ;;  %v2219_v57 = vld [vmem:[%s6031_s5 + $0xd8] sm:$0xff]  ;;  %v2218_v44 = vld [vmem:[%s6031_s5 + $0xd0] sm:$0xff] }
 0x259   :  { %1974 = vst.msk [vmem:[#allocation2] sm:$0x1] %vm1973_vm3, %v1972_v13  ;;  %v2173_v47 = vadd.f32 %v2172_v62, %v1975_v21 }
 0x25b   :  { %2174 = vst.msk [vmem:[#allocation2 + $0x1] sm:$0x1] %vm1973_vm3, %v2173_v47  ;;  %v2221_v47 = vld [vmem:[%s6031_s5 + $0xe8] sm:$0xff] }
 0x260   :  { %v2178_v19 = vld [vmem:[#allocation2] sm:$0x1] }
 0x261   :  { %v2179_v43 = vmul.f32 0.001953125, %v2178_v19  ;;  %v2220_v19 = vld [vmem:[%s6031_s5 + $0xe0] sm:$0xff] }
 0x262   :  { %v2180_v59 = vld [vmem:[#allocation2 + $0x1] sm:$0x1] }
 0x263   :  { %v2181_v40 = vmul.f32 0.001953125, %v2180_v59  ;;  %v2182_v41 = vmul.f32 %v2179_v43, %v2179_v43  ;;  %v2222_v59 = vld [vmem:[%s6031_s5 + $0xf0] sm:$0xff] }
 0x265   :  { %v2183_v46 = vsub.f32 %v2181_v40, %v2182_v41 }
 0x267   :  { %v2184_v0 = vmax.f32 %v2183_v46, 0.0 }
 0x269   :  { %v2186_v53 = vadd.f32 1e-05, %v2184_v0 }
 0x26b   :  { %2842 = vrsqrt.f32 %v2186_v53  ;;  %v2225_v53 = vld [vmem:[%s6031_s5 + $0x108] sm:$0xff] }
 0x278   :  { %v2843_v12 = vpop.eup %2842 }
 0x279   :  { %v2188_v14 = vmul.f32 %v2843_v12, %v2185_v34  ;;  %v2227_v34 = vld [vmem:[%s6031_s5 + $0x118] sm:$0xff]  ;;  %v2226_v12 = vld [vmem:[%s6031_s5 + $0x110] sm:$0xff] }
 0x27b   :  { %v5053_v24 = vmul.f32 %v2188_v14, %v2179_v43  ;;  %v5057_v50 = vrot.slane %v2188_v14, %v6035_v29  ;;  %v2223_v43 = vld [vmem:[%s6031_s5 + $0xf8] sm:$0xff]  ;;  %v2246_v29 = vld [vmem:[%s6031_s5 + $0x1b0] sm:$0xff] }
 0x27d   :  { %v5098_v3 = vmul.f32 %v5057_v50, %v2192_v33  ;;  %v5113_v61 = vmul.f32 %v5057_v50, %v2193_v18  ;;  %v5116_v60 = vmul.f32 %v5057_v50, %v2194_v15  ;;  %v5119_v1 = vmul.f32 %v5057_v50, %v2195_v20  ;;  %v2229_v15 = vld [vmem:[%s6031_s5 + $0x128] sm:$0xff] }
 0x27e   :  { %v5122_v55 = vmul.f32 %v5057_v50, %v2196_v27  ;;  %v5137_v35 = vmul.f32 %v5057_v50, %v2197_v30  ;;  %v5140_v7 = vmul.f32 %v5057_v50, %v2198_v42  ;;  %v5143_v39 = vmul.f32 %v5057_v50, %v2199_v23  ;;  %v2228_v30 = vld [vmem:[%s6031_s5 + $0x120] sm:$0xff]  ;;  %v2231_v27 = vld [vmem:[%s6031_s5 + $0x138] sm:$0xff]  ;;  %v2230_v23 = vld [vmem:[%s6031_s5 + $0x130] sm:$0xff] }
 0x27f   :  { %v5146_v52 = vmul.f32 %v5057_v50, %v2200_v58  ;;  %v5161_v9 = vmul.f32 %v5057_v50, %v2201_v56  ;;  %v5164_v22 = vmul.f32 %v5057_v50, %v2202_v6  ;;  %v5167_v45 = vmul.f32 %v5057_v50, %v2203_v32  ;;  %v2233_v6 = vld [vmem:[%s6031_s5 + $0x148] sm:$0xff] }
 0x280   :  { %v5170_v5 = vmul.f32 %v5057_v50, %v2204_v54  ;;  %v5185_v51 = vmul.f32 %v5057_v50, %v2205_v36  ;;  %v5188_v21 = vmul.f32 %v5057_v50, %v2206_v2  ;;  %v5191_v13 = vmul.f32 %v5057_v50, %v2207_v10  ;;  %v2232_v36 = vld [vmem:[%s6031_s5 + $0x140] sm:$0xff]  ;;  %v2235_v54 = vld [vmem:[%s6031_s5 + $0x158] sm:$0xff] }
 0x281   :  { %v5194_v62 = vmul.f32 %v5057_v50, %v2208_v8  ;;  %v5209_v40 = vmul.f32 %v5057_v50, %v2209_v31  ;;  %v5212_v41 = vmul.f32 %v5057_v50, %v2210_v63  ;;  %v5215_v46 = vmul.f32 %v5057_v50, %v2211_v17  ;;  %v2234_v17 = vld [vmem:[%s6031_s5 + $0x150] sm:$0xff]  ;;  %v2237_v63 = vld [vmem:[%s6031_s5 + $0x168] sm:$0xff] }
 0x282   :  { %v5218_v0 = vmul.f32 %v5057_v50, %v2212_v38  ;;  %v5233_v14 = vmul.f32 %v5057_v50, %v2213_v16  ;;  %v5236_v18 = vmul.f32 %v5057_v50, %v2214_v48  ;;  %v5239_v33 = vmul.f32 %v5057_v50, %v2215_v28  ;;  %v2236_v16 = vld [vmem:[%s6031_s5 + $0x160] sm:$0xff] }
 0x283   :  { %v5242_v20 = vmul.f32 %v5057_v50, %v2216_v4  ;;  %v5257_v42 = vmul.f32 %v5057_v50, %v2217_v37  ;;  %v5260_v56 = vmul.f32 %v5057_v50, %v2218_v44  ;;  %v5263_v58 = vmul.f32 %v5057_v50, %v2219_v57  ;;  %v2239_v4 = vld [vmem:[%s6031_s5 + $0x178] sm:$0xff]  ;;  %v2238_v57 = vld [vmem:[%s6031_s5 + $0x170] sm:$0xff]  ;;  %v2241_v44 = vld [vmem:[%s6031_s5 + $0x188] sm:$0xff] }
 0x284   :  { %v5266_v32 = vmul.f32 %v5057_v50, %v2220_v19  ;;  %v5278_v10 = vmul.f32 %v5057_v50, %v2221_v47  ;;  %v5281_v2 = vmul.f32 %v5057_v50, %v2222_v59  ;;  %v5284_v31 = vmul.f32 %v5057_v50, %v2223_v43 }
 0x285   :  { %v5287_v8 = vmul.f32 %v5057_v50, %v2224_v11  ;;  %v5299_v38 = vmul.f32 %v5057_v50, %v2225_v53  ;;  %v5302_v28 = vmul.f32 %v5057_v50, %v2226_v12  ;;  %v5305_v48 = vmul.f32 %v5057_v50, %v2227_v34  ;;  %v2240_v53 = vld [vmem:[%s6031_s5 + $0x180] sm:$0xff]  ;;  %v2243_v11 = vld [vmem:[%s6031_s5 + $0x198] sm:$0xff]  ;;  %v2242_v34 = vld [vmem:[%s6031_s5 + $0x190] sm:$0xff] }
 0x286   :  { %v5308_v37 = vmul.f32 %v5057_v50, %v2228_v30  ;;  %v5320_v47 = vmul.f32 %v5057_v50, %v2229_v15  ;;  %v5323_v19 = vmul.f32 %v5057_v50, %v2230_v23  ;;  %v5326_v43 = vmul.f32 %v5057_v50, %v2231_v27  ;;  %v2245_v23 = vld [vmem:[%s6031_s5 + $0x1a8] sm:$0xff] }
 0x287   :  { %v5329_v59 = vmul.f32 %v5057_v50, %v2232_v36  ;;  %v5341_v12 = vmul.f32 %v5057_v50, %v2233_v6  ;;  %v5344_v15 = vmul.f32 %v5057_v50, %v2234_v17  ;;  %v5347_v30 = vmul.f32 %v5057_v50, %v2235_v54  ;;  %v2244_v36 = vld [vmem:[%s6031_s5 + $0x1a0] sm:$0xff]  ;;  %v2247_v6 = vld [vmem:[%s6031_s5 + $0x1b8] sm:$0xff] }
 0x288   :  { %v5350_v27 = vmul.f32 %v5057_v50, %v2236_v16  ;;  %v5362_v17 = vmul.f32 %v5057_v50, %v2237_v63  ;;  %v5365_v54 = vmul.f32 %v5057_v50, %v2238_v57  ;;  %v5368_v16 = vmul.f32 %v5057_v50, %v2239_v4  ;;  %v2248_v63 = vld [vmem:[%s6031_s5 + $0x1c0] sm:$0xff] }
 0x289   :  { %v5371_v49 = vmul.f32 %v5057_v50, %v2240_v53  ;;  %v5383_v57 = vmul.f32 %v5057_v50, %v2241_v44  ;;  %v5386_v4 = vmul.f32 %v5057_v50, %v2242_v34  ;;  %v5389_v53 = vmul.f32 %v5057_v50, %v2243_v11  ;;  %v2253_v44 = vld [vmem:[%s6031_s5 + $0x1e8] sm:$0xff] }
 0x28a   :  { %6075 = vst [vmem:[#allocation19_spill] sm:$0xff] %v5350_v27  ;;  %6076 = vst [vmem:[#allocation21_spill] sm:$0xff] %v5365_v54  ;;  %v2249_v27 = vld [vmem:[%s6031_s5 + $0x1c8] sm:$0xff]  ;;  %v2250_v54 = vld [vmem:[%s6031_s5 + $0x1d0] sm:$0xff]  ;;  %v5404_v34 = vmul.f32 %v5057_v50, %v2245_v23  ;;  %v5407_v11 = vmul.f32 %v5057_v50, %v2246_v29 }
 0x28b   :  { %6077 = vst [vmem:[#allocation4_spill] sm:$0xff] %v5368_v16  ;;  %6078 = vst [vmem:[#allocation20_spill] sm:$0xff] %v5371_v49  ;;  %v5392_v49 = vmul.f32 %v5057_v50, %v2244_v36  ;;  %v2251_v16 = vld [vmem:[%s6031_s5 + $0x1d8] sm:$0xff]  ;;  %v5410_v36 = vmul.f32 %v5057_v50, %v2247_v6  ;;  %v2254_v23 = vld [vmem:[%s6031_s5 + $0x1f0] sm:$0xff]  ;;  %v5425_v29 = vmul.f32 %v5057_v50, %v2249_v27 }
 0x28c   :  { %6079 = vst [vmem:[#allocation3_spill] sm:$0xff] %v5383_v57  ;;  %6080 = vst [vmem:[#allocation6_spill] sm:$0xff] %v5386_v4  ;;  %v2255_v4 = vld [vmem:[%s6031_s5 + $0x1f8] sm:$0xff]  ;;  %v5428_v6 = vmul.f32 %v5057_v50, %v2250_v54  ;;  %v5444_v57 = vmul.f32 %v5057_v50, %v2253_v44  ;;  %v5447_v27 = vmul.f32 %v5057_v50, %v2254_v23 }
 0x28d   :  { %6081 = vst [vmem:[#allocation5_spill] sm:$0xff] %v5389_v53  ;;  %6082 = vst [vmem:[#allocation8_spill] sm:$0xff] %v5392_v49  ;;  %v5413_v49 = vmul.f32 %v5057_v50, %v2248_v63  ;;  %v2252_v53 = vld [vmem:[%s6031_s5 + $0x1e0] sm:$0xff]  ;;  %v5431_v63 = vmul.f32 %v5057_v50, %v2251_v16  ;;  %v5450_v54 = vmul.f32 %v5057_v50, %v2255_v4 }
 0x28e   :  { %6083 = vst [vmem:[#allocation7_spill] sm:$0xff] %v5404_v34  ;;  %6084 = vst [vmem:[#allocation10_spill] sm:$0xff] %v5407_v11  ;;  %v5441_v34 = vmul.f32 %v5057_v50, %v2252_v53 }
 0x28f   :  { %6085 = vst [vmem:[#allocation9_spill] sm:$0xff] %v5410_v36  ;;  %6086 = vst [vmem:[#allocation12_spill] sm:$0xff] %v5413_v49  ;;  %v6087_v49 = vsub.s32 0, %v5042_v26  ;;  %v6088_v36 = vsub.f32 %v5051_v25, %v5053_v24 }
 0x291   :  { %v5438_v11 = vrot.slane %v6088_v36, %v6087_v49  ;;  %v6089_v16 = vld [vmem:[#allocation19_spill] sm:$0xff]  ;;  %v6091_v4 = vld [vmem:[#allocation21_spill] sm:$0xff] }
 0x292   :  { %v6093_v53 = vld [vmem:[#allocation4_spill] sm:$0xff] }
 0x293   :  { %v5454_v26 = vadd.f32 %v5438_v11, %v5098_v3  ;;  %v5458_v25 = vadd.f32 %v5438_v11, %v5113_v61  ;;  %v5462_v24 = vadd.f32 %v5438_v11, %v5116_v60  ;;  %v5466_v49 = vadd.f32 %v5438_v11, %v5119_v1  ;;  %v6095_v44 = vld [vmem:[#allocation20_spill] sm:$0xff]  ;;  %v6097_v36 = vld [vmem:[#allocation3_spill] sm:$0xff] }
 0x294   :  { %v5470_v50 = vadd.f32 %v5438_v11, %v5122_v55  ;;  %v5474_v3 = vadd.f32 %v5438_v11, %v5137_v35  ;;  %v5478_v61 = vadd.f32 %v5438_v11, %v5140_v7  ;;  %v5482_v60 = vadd.f32 %v5438_v11, %v5143_v39 }
 0x295   :  { %v5486_v1 = vadd.f32 %v5438_v11, %v5146_v52  ;;  %v5490_v55 = vadd.f32 %v5438_v11, %v5161_v9  ;;  %v5494_v35 = vadd.f32 %v5438_v11, %v5164_v22  ;;  %v5498_v7 = vadd.f32 %v5438_v11, %v5167_v45 }
 0x296   :  { %v5502_v39 = vadd.f32 %v5438_v11, %v5170_v5  ;;  %v5506_v52 = vadd.f32 %v5438_v11, %v5185_v51  ;;  %v5510_v9 = vadd.f32 %v5438_v11, %v5188_v21  ;;  %v5514_v22 = vadd.f32 %v5438_v11, %v5191_v13 }
 0x297   :  { %v5518_v45 = vadd.f32 %v5438_v11, %v5194_v62  ;;  %v5522_v5 = vadd.f32 %v5438_v11, %v5209_v40  ;;  %v5526_v51 = vadd.f32 %v5438_v11, %v5212_v41  ;;  %v5530_v21 = vadd.f32 %v5438_v11, %v5215_v46 }
 0x298   :  { %v5534_v13 = vadd.f32 %v5438_v11, %v5218_v0  ;;  %v5538_v62 = vadd.f32 %v5438_v11, %v5233_v14  ;;  %v5542_v40 = vadd.f32 %v5438_v11, %v5236_v18  ;;  %v5546_v41 = vadd.f32 %v5438_v11, %v5239_v33 }
 0x299   :  { %v5550_v46 = vadd.f32 %v5438_v11, %v5242_v20  ;;  %v5554_v0 = vadd.f32 %v5438_v11, %v5257_v42  ;;  %v5558_v14 = vadd.f32 %v5438_v11, %v5260_v56  ;;  %v5562_v18 = vadd.f32 %v5438_v11, %v5263_v58 }
 0x29a   :  { %v5566_v33 = vadd.f32 %v5438_v11, %v5266_v32  ;;  %v5570_v20 = vadd.f32 %v5438_v11, %v5278_v10  ;;  %v5574_v42 = vadd.f32 %v5438_v11, %v5281_v2  ;;  %v5578_v56 = vadd.f32 %v5438_v11, %v5284_v31 }
 0x29b   :  { %v5582_v58 = vadd.f32 %v5438_v11, %v5287_v8  ;;  %v5586_v32 = vadd.f32 %v5438_v11, %v5299_v38  ;;  %v5590_v10 = vadd.f32 %v5438_v11, %v5302_v28  ;;  %v5594_v2 = vadd.f32 %v5438_v11, %v5305_v48 }
 0x29c   :  { %v5598_v31 = vadd.f32 %v5438_v11, %v5308_v37  ;;  %v5602_v8 = vadd.f32 %v5438_v11, %v5320_v47  ;;  %v5606_v38 = vadd.f32 %v5438_v11, %v5323_v19  ;;  %v5610_v28 = vadd.f32 %v5438_v11, %v5326_v43 }
 0x29d   :  { %v5614_v48 = vadd.f32 %v5438_v11, %v5329_v59  ;;  %v5618_v37 = vadd.f32 %v5438_v11, %v5341_v12  ;;  %v5622_v47 = vadd.f32 %v5438_v11, %v5344_v15  ;;  %v5626_v19 = vadd.f32 %v5438_v11, %v5347_v30 }
 0x29e   :  { %v5630_v43 = vadd.f32 %v5438_v11, %v6089_v16  ;;  %v5634_v59 = vadd.f32 %v5438_v11, %v5362_v17  ;;  %v5638_v12 = vadd.f32 %v5438_v11, %v6091_v4  ;;  %v5642_v15 = vadd.f32 %v5438_v11, %v6093_v53  ;;  %v6099_v16 = vld [vmem:[#allocation6_spill] sm:$0xff] }
 0x29f   :  { %v5646_v30 = vadd.f32 %v5438_v11, %v6095_v44  ;;  %v5650_v23 = vadd.f32 %v5438_v11, %v6097_v36  ;;  %v5654_v17 = vadd.f32 %v5438_v11, %v6099_v16 }
 0x2a0   :  { %6090 = vst [vmem:[#allocation11_spill] sm:$0xff] %v5634_v59  ;;  %6092 = vst [vmem:[#allocation14_spill] sm:$0xff] %v5638_v12  ;;  %v6101_v59 = vld [vmem:[#allocation5_spill] sm:$0xff]  ;;  %v6102_v12 = vld [vmem:[#allocation8_spill] sm:$0xff] }
 0x2a1   :  { %6094 = vst [vmem:[#allocation13_spill] sm:$0xff] %v5642_v15  ;;  %6096 = vst [vmem:[#allocation16_spill] sm:$0xff] %v5646_v30  ;;  %v5658_v4 = vadd.f32 %v5438_v11, %v6101_v59  ;;  %v5662_v53 = vadd.f32 %v5438_v11, %v6102_v12  ;;  %v6103_v15 = vld [vmem:[#allocation7_spill] sm:$0xff]  ;;  %v6104_v30 = vld [vmem:[#allocation10_spill] sm:$0xff]  ;;  %v5682_v12 = vadd.f32 %v5438_v11, %v5425_v29 }
 0x2a2   :  { %6098 = vst [vmem:[#allocation15_spill] sm:$0xff] %v5650_v23  ;;  %6100 = vst [vmem:[#allocation17_spill] sm:$0xff] %v5654_v17  ;;  %v5666_v44 = vadd.f32 %v5438_v11, %v6103_v15  ;;  %v5670_v36 = vadd.f32 %v5438_v11, %v6104_v30  ;;  %v6105_v23 = vld [vmem:[#allocation9_spill] sm:$0xff]  ;;  %v6106_v17 = vld [vmem:[#allocation12_spill] sm:$0xff]  ;;  %v5686_v15 = vadd.f32 %v5438_v11, %v5428_v6 }
 0x2a3   :  { %v5674_v16 = vadd.f32 %v5438_v11, %v6105_v23  ;;  %v5678_v59 = vadd.f32 %v5438_v11, %v6106_v17  ;;  %v5690_v30 = vadd.f32 %v5438_v11, %v5431_v63  ;;  %v5694_v23 = vadd.f32 %v5438_v11, %v5441_v34 }
 0x2a4   :  { %6107 = vst [vmem:[#allocation18_spill] sm:$0xff] %v5686_v15  ;;  %v5698_v17 = vadd.f32 %v5438_v11, %v5444_v57  ;;  %v5702_v29 = vadd.f32 %v5438_v11, %v5447_v27  ;;  %v5706_v6 = vadd.f32 %v5438_v11, %v5450_v54  ;;  %v2396_v15 = vmax.f32 %v5454_v26, 0.0 }
 0x2a5   :  { %6108 = vst [vmem:[#allocation19_spill] sm:$0xff] %v5690_v30  ;;  %6109 = vst [vmem:[#allocation21_spill] sm:$0xff] %v5694_v23  ;;  %v2397_v63 = vmax.f32 %v5458_v25, 0.0  ;;  %v2398_v30 = vmax.f32 %v5462_v24, 0.0  ;;  %v2399_v34 = vmax.f32 %v5466_v49, 0.0  ;;  %v2400_v23 = vmax.f32 %v5470_v50, 0.0 }
 0x2a6   :  { %6110 = vst [vmem:[#allocation4_spill] sm:$0xff] %v5698_v17  ;;  %6111 = vst [vmem:[#allocation20_spill] sm:$0xff] %v5702_v29  ;;  %v2401_v57 = vmax.f32 %v5474_v3, 0.0  ;;  %v2402_v17 = vmax.f32 %v5478_v61, 0.0  ;;  %v2403_v27 = vmax.f32 %v5482_v60, 0.0  ;;  %v2404_v29 = vmax.f32 %v5486_v1, 0.0 }
 0x2a7   :  { %v2405_v11 = vmax.f32 %v5490_v55, 0.0  ;;  %v2406_v54 = vmax.f32 %v5494_v35, 0.0  ;;  %v2407_v26 = vmax.f32 %v5498_v7, 0.0  ;;  %2460 = vst.msk [vmem:[%s6031_s5] sm:$0xff] %vm1773_vm1, %v2396_v15  ;;  %2461 = vst.msk [vmem:[%s6031_s5 + $0x8] sm:$0xff] %vm1773_vm1, %v2397_v63  ;;  %v2408_v25 = vmax.f32 %v5502_v39, 0.0 }
 0x2a8   :  { %2462 = vst.msk [vmem:[%s6031_s5 + $0x10] sm:$0xff] %vm1773_vm1, %v2398_v30  ;;  %2463 = vst.msk [vmem:[%s6031_s5 + $0x18] sm:$0xff] %vm1773_vm1, %v2399_v34  ;;  %v2409_v24 = vmax.f32 %v5506_v52, 0.0  ;;  %v2410_v49 = vmax.f32 %v5510_v9, 0.0  ;;  %v2411_v50 = vmax.f32 %v5514_v22, 0.0  ;;  %v2412_v3 = vmax.f32 %v5518_v45, 0.0 }
 0x2a9   :  { %2464 = vst.msk [vmem:[%s6031_s5 + $0x20] sm:$0xff] %vm1773_vm1, %v2400_v23  ;;  %2465 = vst.msk [vmem:[%s6031_s5 + $0x28] sm:$0xff] %vm1773_vm1, %v2401_v57  ;;  %v2413_v61 = vmax.f32 %v5522_v5, 0.0  ;;  %v2414_v60 = vmax.f32 %v5526_v51, 0.0  ;;  %v2415_v1 = vmax.f32 %v5530_v21, 0.0  ;;  %v2416_v55 = vmax.f32 %v5534_v13, 0.0 }
 0x2aa   :  { %2466 = vst.msk [vmem:[%s6031_s5 + $0x30] sm:$0xff] %vm1773_vm1, %v2402_v17  ;;  %2467 = vst.msk [vmem:[%s6031_s5 + $0x38] sm:$0xff] %vm1773_vm1, %v2403_v27  ;;  %v2417_v35 = vmax.f32 %v5538_v62, 0.0  ;;  %v2418_v7 = vmax.f32 %v5542_v40, 0.0  ;;  %v2419_v39 = vmax.f32 %v5546_v41, 0.0  ;;  %v2420_v52 = vmax.f32 %v5550_v46, 0.0 }
 0x2ab   :  { %2468 = vst.msk [vmem:[%s6031_s5 + $0x40] sm:$0xff] %vm1773_vm1, %v2404_v29  ;;  %2469 = vst.msk [vmem:[%s6031_s5 + $0x48] sm:$0xff] %vm1773_vm1, %v2405_v11  ;;  %v2421_v9 = vmax.f32 %v5554_v0, 0.0  ;;  %v2422_v22 = vmax.f32 %v5558_v14, 0.0  ;;  %v2423_v45 = vmax.f32 %v5562_v18, 0.0  ;;  %v2424_v5 = vmax.f32 %v5566_v33, 0.0 }
 0x2ac   :  { %2470 = vst.msk [vmem:[%s6031_s5 + $0x50] sm:$0xff] %vm1773_vm1, %v2406_v54  ;;  %2471 = vst.msk [vmem:[%s6031_s5 + $0x58] sm:$0xff] %vm1773_vm1, %v2407_v26  ;;  %v2425_v51 = vmax.f32 %v5570_v20, 0.0  ;;  %v2426_v21 = vmax.f32 %v5574_v42, 0.0  ;;  %v2427_v13 = vmax.f32 %v5578_v56, 0.0  ;;  %v2428_v62 = vmax.f32 %v5582_v58, 0.0 }
 0x2ad   :  { %2472 = vst.msk [vmem:[%s6031_s5 + $0x60] sm:$0xff] %vm1773_vm1, %v2408_v25  ;;  %2473 = vst.msk [vmem:[%s6031_s5 + $0x68] sm:$0xff] %vm1773_vm1, %v2409_v24  ;;  %v2429_v40 = vmax.f32 %v5586_v32, 0.0  ;;  %v2430_v41 = vmax.f32 %v5590_v10, 0.0  ;;  %v2431_v46 = vmax.f32 %v5594_v2, 0.0  ;;  %v2432_v0 = vmax.f32 %v5598_v31, 0.0 }
 0x2ae   :  { %2474 = vst.msk [vmem:[%s6031_s5 + $0x70] sm:$0xff] %vm1773_vm1, %v2410_v49  ;;  %2475 = vst.msk [vmem:[%s6031_s5 + $0x78] sm:$0xff] %vm1773_vm1, %v2411_v50  ;;  %v2433_v14 = vmax.f32 %v5602_v8, 0.0  ;;  %v2434_v18 = vmax.f32 %v5606_v38, 0.0  ;;  %v2435_v33 = vmax.f32 %v5610_v28, 0.0  ;;  %v2436_v20 = vmax.f32 %v5614_v48, 0.0 }
 0x2af   :  { %2476 = vst.msk [vmem:[%s6031_s5 + $0x80] sm:$0xff] %vm1773_vm1, %v2412_v3  ;;  %2477 = vst.msk [vmem:[%s6031_s5 + $0x88] sm:$0xff] %vm1773_vm1, %v2413_v61  ;;  %v2437_v42 = vmax.f32 %v5618_v37, 0.0  ;;  %v2438_v56 = vmax.f32 %v5622_v47, 0.0  ;;  %v2439_v58 = vmax.f32 %v5626_v19, 0.0  ;;  %v2440_v32 = vmax.f32 %v5630_v43, 0.0 }
 0x2b0   :  { %2478 = vst.msk [vmem:[%s6031_s5 + $0x90] sm:$0xff] %vm1773_vm1, %v2414_v60  ;;  %2479 = vst.msk [vmem:[%s6031_s5 + $0x98] sm:$0xff] %vm1773_vm1, %v2415_v1  ;;  %v6112_v10 = vld [vmem:[#allocation11_spill] sm:$0xff]  ;;  %v6113_v31 = vld [vmem:[#allocation14_spill] sm:$0xff]  ;;  %v2447_v30 = vmax.f32 %v5658_v4, 0.0  ;;  %v2448_v4 = vmax.f32 %v5662_v53, 0.0 }
 0x2b1   :  { %2480 = vst.msk [vmem:[%s6031_s5 + $0xa0] sm:$0xff] %vm1773_vm1, %v2416_v55  ;;  %2481 = vst.msk [vmem:[%s6031_s5 + $0xa8] sm:$0xff] %vm1773_vm1, %v2417_v35  ;;  %v2441_v2 = vmax.f32 %v6112_v10, 0.0  ;;  %v2442_v8 = vmax.f32 %v6113_v31, 0.0  ;;  %v6114_v38 = vld [vmem:[#allocation13_spill] sm:$0xff]  ;;  %v6115_v48 = vld [vmem:[#allocation16_spill] sm:$0xff] }
 0x2b2   :  { %2482 = vst.msk [vmem:[%s6031_s5 + $0xb0] sm:$0xff] %vm1773_vm1, %v2418_v7  ;;  %2483 = vst.msk [vmem:[%s6031_s5 + $0xb8] sm:$0xff] %vm1773_vm1, %v2419_v39  ;;  %v2443_v28 = vmax.f32 %v6114_v38, 0.0  ;;  %v2444_v37 = vmax.f32 %v6115_v48, 0.0  ;;  %v6116_v47 = vld [vmem:[#allocation15_spill] sm:$0xff]  ;;  %v6117_v43 = vld [vmem:[#allocation17_spill] sm:$0xff] }
 0x2b3   :  { %2484 = vst.msk [vmem:[%s6031_s5 + $0xc0] sm:$0xff] %vm1773_vm1, %v2420_v52  ;;  %2485 = vst.msk [vmem:[%s6031_s5 + $0xc8] sm:$0xff] %vm1773_vm1, %v2421_v9  ;;  %v2445_v19 = vmax.f32 %v6116_v47, 0.0  ;;  %v2446_v15 = vmax.f32 %v6117_v43, 0.0  ;;  %v2449_v23 = vmax.f32 %v5666_v44, 0.0  ;;  %v2450_v17 = vmax.f32 %v5670_v36, 0.0 }
 0x2b4   :  { %2486 = vst.msk [vmem:[%s6031_s5 + $0xd0] sm:$0xff] %vm1773_vm1, %v2422_v22  ;;  %2487 = vst.msk [vmem:[%s6031_s5 + $0xd8] sm:$0xff] %vm1773_vm1, %v2423_v45  ;;  %v2451_v29 = vmax.f32 %v5674_v16, 0.0  ;;  %v2452_v53 = vmax.f32 %v5678_v59, 0.0  ;;  %v2453_v44 = vmax.f32 %v5682_v12, 0.0  ;;  %v6118_v36 = vld [vmem:[#allocation18_spill] sm:$0xff] }
 0x2b5   :  { %2488 = vst.msk [vmem:[%s6031_s5 + $0xe0] sm:$0xff] %vm1773_vm1, %v2424_v5  ;;  %2489 = vst.msk [vmem:[%s6031_s5 + $0xe8] sm:$0xff] %vm1773_vm1, %v2425_v51  ;;  %v2454_v16 = vmax.f32 %v6118_v36, 0.0  ;;  %v6119_v63 = vld [vmem:[#allocation19_spill] sm:$0xff]  ;;  %v6120_v59 = vld [vmem:[#allocation21_spill] sm:$0xff]  ;;  %v2459_v26 = vmax.f32 %v5706_v6, 0.0 }
 0x2b6   :  { %2490 = vst.msk [vmem:[%s6031_s5 + $0xf0] sm:$0xff] %vm1773_vm1, %v2426_v21  ;;  %2491 = vst.msk [vmem:[%s6031_s5 + $0xf8] sm:$0xff] %vm1773_vm1, %v2427_v13  ;;  %v2455_v34 = vmax.f32 %v6119_v63, 0.0  ;;  %v2456_v12 = vmax.f32 %v6120_v59, 0.0  ;;  %v6121_v57 = vld [vmem:[#allocation4_spill] sm:$0xff] }
 0x2b7   :  { %2492 = vst.msk [vmem:[%s6031_s5 + $0x100] sm:$0xff] %vm1773_vm1, %v2428_v62  ;;  %2493 = vst.msk [vmem:[%s6031_s5 + $0x108] sm:$0xff] %vm1773_vm1, %v2429_v40  ;;  %v2457_v27 = vmax.f32 %v6121_v57, 0.0  ;;  %v6122_v11 = vld [vmem:[#allocation20_spill] sm:$0xff] }
 0x2b8   :  { %2494 = vst.msk [vmem:[%s6031_s5 + $0x110] sm:$0xff] %vm1773_vm1, %v2430_v41  ;;  %2495 = vst.msk [vmem:[%s6031_s5 + $0x118] sm:$0xff] %vm1773_vm1, %v2431_v46  ;;  %v2458_v54 = vmax.f32 %v6122_v11, 0.0 }
 0x2b9   :  { %2496 = vst.msk [vmem:[%s6031_s5 + $0x120] sm:$0xff] %vm1773_vm1, %v2432_v0  ;;  %2497 = vst.msk [vmem:[%s6031_s5 + $0x128] sm:$0xff] %vm1773_vm1, %v2433_v14 }
 0x2ba   :  { %2498 = vst.msk [vmem:[%s6031_s5 + $0x130] sm:$0xff] %vm1773_vm1, %v2434_v18  ;;  %2499 = vst.msk [vmem:[%s6031_s5 + $0x138] sm:$0xff] %vm1773_vm1, %v2435_v33 }
 0x2bb   :  { %2500 = vst.msk [vmem:[%s6031_s5 + $0x140] sm:$0xff] %vm1773_vm1, %v2436_v20  ;;  %2501 = vst.msk [vmem:[%s6031_s5 + $0x148] sm:$0xff] %vm1773_vm1, %v2437_v42 }
 0x2bc   :  { %2502 = vst.msk [vmem:[%s6031_s5 + $0x150] sm:$0xff] %vm1773_vm1, %v2438_v56  ;;  %2503 = vst.msk [vmem:[%s6031_s5 + $0x158] sm:$0xff] %vm1773_vm1, %v2439_v58 }
 0x2bd   :  { %2504 = vst.msk [vmem:[%s6031_s5 + $0x160] sm:$0xff] %vm1773_vm1, %v2440_v32  ;;  %2505 = vst.msk [vmem:[%s6031_s5 + $0x168] sm:$0xff] %vm1773_vm1, %v2441_v2 }
 0x2be   :  { %2506 = vst.msk [vmem:[%s6031_s5 + $0x170] sm:$0xff] %vm1773_vm1, %v2442_v8  ;;  %2507 = vst.msk [vmem:[%s6031_s5 + $0x178] sm:$0xff] %vm1773_vm1, %v2443_v28 }
 0x2bf   :  { %2508 = vst.msk [vmem:[%s6031_s5 + $0x180] sm:$0xff] %vm1773_vm1, %v2444_v37  ;;  %2509 = vst.msk [vmem:[%s6031_s5 + $0x188] sm:$0xff] %vm1773_vm1, %v2445_v19 }
 0x2c0   :  { %2510 = vst.msk [vmem:[%s6031_s5 + $0x190] sm:$0xff] %vm1773_vm1, %v2446_v15  ;;  %2511 = vst.msk [vmem:[%s6031_s5 + $0x198] sm:$0xff] %vm1773_vm1, %v2447_v30 }
 0x2c1   :  { %2512 = vst.msk [vmem:[%s6031_s5 + $0x1a0] sm:$0xff] %vm1773_vm1, %v2448_v4  ;;  %2513 = vst.msk [vmem:[%s6031_s5 + $0x1a8] sm:$0xff] %vm1773_vm1, %v2449_v23 }
 0x2c2   :  { %2514 = vst.msk [vmem:[%s6031_s5 + $0x1b0] sm:$0xff] %vm1773_vm1, %v2450_v17  ;;  %2515 = vst.msk [vmem:[%s6031_s5 + $0x1b8] sm:$0xff] %vm1773_vm1, %v2451_v29 }
 0x2c3   :  { %2516 = vst.msk [vmem:[%s6031_s5 + $0x1c0] sm:$0xff] %vm1773_vm1, %v2452_v53  ;;  %2517 = vst.msk [vmem:[%s6031_s5 + $0x1c8] sm:$0xff] %vm1773_vm1, %v2453_v44 }
 0x2c4   :  { %2518 = vst.msk [vmem:[%s6031_s5 + $0x1d0] sm:$0xff] %vm1773_vm1, %v2454_v16  ;;  %2519 = vst.msk [vmem:[%s6031_s5 + $0x1d8] sm:$0xff] %vm1773_vm1, %v2455_v34 }
 0x2c5   :  { %2520 = vst.msk [vmem:[%s6031_s5 + $0x1e0] sm:$0xff] %vm1773_vm1, %v2456_v12  ;;  %2521 = vst.msk [vmem:[%s6031_s5 + $0x1e8] sm:$0xff] %vm1773_vm1, %v2457_v27 }
 0x2c6   :  { %2522 = vst.msk [vmem:[%s6031_s5 + $0x1f0] sm:$0xff] %vm1773_vm1, %v2458_v54  ;;  %2523 = vst.msk [vmem:[%s6031_s5 + $0x1f8] sm:$0xff] %vm1773_vm1, %v2459_v26 }

// kernel: contrast_module_deep.7
= control target key start
LH: loop header
LB: loop body
LE: loop exit
PB: predicated region body
PF: predicated region fallthrough
CT: control target
= control target key end

     0   :  { %v2284_v0 = vmov 0.0   ;;  %vm261_vm0 = vcmask 261120   ;;  %vm1224_vm1 = vcmask 130048   ;;  %vm24_vm2 = vcmask 123904   ;;  %s4891_s1 = inlined_call_operand.vmem [shape: f32[288,16], index: 1, kind: input, shape index: {}]   ;;  %s4892_s0 = inlined_call_operand.vmem [shape: f32[512,288], index: 0, kind: input, shape index: {}]   ;;  %s4893_s2 = inlined_call_operand.vmem [shape: f32[1,16], index: 2, kind: input, shape index: {}]   ;;  %s4894_s5 = inlined_call_operand.vmem [shape: f32[512,16], index: 5, kind: output, shape index: {}]   ;;  %s4895_s3 = inlined_call_operand.vmem [shape: f32[1,16], index: 3, kind: input, shape index: {}]   ;;  %s4896_s4 = inlined_call_operand.vmem [shape: f32[1,16], index: 4, kind: input, shape index: {}]  }
   0x1   :  { %454 = vmatprep.subr.mxu0 %v2284_v0  ;;  %2216 = vmatprep.subr.mxu1 %v2284_v0  ;;  %v233_v1 = vld [vmem:[%s4891_s1 + $0x78] sm:$0xff]  ;;  %v232_v2 = vld [vmem:[%s4891_s1 + $0x70] sm:$0xff]  ;;  %v231_v3 = vld [vmem:[%s4891_s1 + $0x68] sm:$0xff]  ;;  %25 = vst.msk [vmem:[#allocation2] sm:$0x3] %vm24_vm2, %v2284_v0  ;;  %vm1424_vm3 = vcmask 122880  }
   0x2   :  { %455 = vmatpush1.msra.mxu0 %v233_v1  ;;  %2248 = vmatpush1.msra.mxu1 %v233_v1  ;;  %v230_v4 = vld [vmem:[%s4891_s1 + $0x60] sm:$0xff]  ;;  %v229_v5 = vld [vmem:[%s4891_s1 + $0x58] sm:$0xff]  ;;  %v228_v6 = vld [vmem:[%s4891_s1 + $0x50] sm:$0xff] }
   0x3   :  { %456 = vmatprep.subr.mxu0 %v2284_v0  ;;  %2217 = vmatprep.subr.mxu1 %v2284_v0  ;;  %v227_v7 = vld [vmem:[%s4891_s1 + $0x48] sm:$0xff]  ;;  %v226_v8 = vld [vmem:[%s4891_s1 + $0x40] sm:$0xff]  ;;  %v225_v9 = vld [vmem:[%s4891_s1 + $0x38] sm:$0xff] }
   0x4   :  { %457 = vmatpush1.msra.mxu0 %v232_v2  ;;  %2249 = vmatpush1.msra.mxu1 %v232_v2  ;;  %v224_v10 = vld [vmem:[%s4891_s1 + $0x30] sm:$0xff]  ;;  %v223_v11 = vld [vmem:[%s4891_s1 + $0x28] sm:$0xff]  ;;  %v222_v12 = vld [vmem:[%s4891_s1 + $0x20] sm:$0xff] }
   0x5   :  { %458 = vmatprep.subr.mxu0 %v2284_v0  ;;  %2218 = vmatprep.subr.mxu1 %v2284_v0  ;;  %v221_v13 = vld [vmem:[%s4891_s1 + $0x18] sm:$0xff]  ;;  %v220_v14 = vld [vmem:[%s4891_s1 + $0x10] sm:$0xff]  ;;  %v219_v15 = vld [vmem:[%s4891_s1 + $0x8] sm:$0xff] }
   0x6   :  { %459 = vmatpush1.msra.mxu0 %v231_v3  ;;  %2250 = vmatpush1.msra.mxu1 %v231_v3  ;;  %v218_v16 = vld [vmem:[%s4891_s1] sm:$0xff]  ;;  %v249_v17 = vld [vmem:[%s4891_s1 + $0xf8] sm:$0xff]  ;;  %v248_v18 = vld [vmem:[%s4891_s1 + $0xf0] sm:$0xff] }
   0x7   :  { %460 = vmatprep.subr.mxu0 %v2284_v0  ;;  %2219 = vmatprep.subr.mxu1 %v2284_v0  ;;  %v247_v19 = vld [vmem:[%s4891_s1 + $0xe8] sm:$0xff]  ;;  %v246_v20 = vld [vmem:[%s4891_s1 + $0xe0] sm:$0xff]  ;;  %v245_v21 = vld [vmem:[%s4891_s1 + $0xd8] sm:$0xff] }
   0x8   :  { %461 = vmatpush1.msra.mxu0 %v230_v4  ;;  %2251 = vmatpush1.msra.mxu1 %v230_v4  ;;  %v244_v22 = vld [vmem:[%s4891_s1 + $0xd0] sm:$0xff]  ;;  %v243_v23 = vld [vmem:[%s4891_s1 + $0xc8] sm:$0xff]  ;;  %v242_v24 = vld [vmem:[%s4891_s1 + $0xc0] sm:$0xff] }
   0x9   :  { %462 = vmatprep.subr.mxu0 %v2284_v0  ;;  %2220 = vmatprep.subr.mxu1 %v2284_v0  ;;  %v241_v25 = vld [vmem:[%s4891_s1 + $0xb8] sm:$0xff]  ;;  %v240_v26 = vld [vmem:[%s4891_s1 + $0xb0] sm:$0xff]  ;;  %v239_v27 = vld [vmem:[%s4891_s1 + $0xa8] sm:$0xff] }
   0xa   :  { %463 = vmatpush1.msra.mxu0 %v229_v5  ;;  %2252 = vmatpush1.msra.mxu1 %v229_v5  ;;  %v238_v28 = vld [vmem:[%s4891_s1 + $0xa0] sm:$0xff]  ;;  %v237_v29 = vld [vmem:[%s4891_s1 + $0x98] sm:$0xff]  ;;  %v236_v30 = vld [vmem:[%s4891_s1 + $0x90] sm:$0xff] }
   0xb   :  { %464 = vmatprep.subr.mxu0 %v2284_v0  ;;  %2221 = vmatprep.subr.mxu1 %v2284_v0  ;;  %v235_v31 = vld [vmem:[%s4891_s1 + $0x88] sm:$0xff]  ;;  %v234_v32 = vld [vmem:[%s4891_s1 + $0x80] sm:$0xff]  ;;  %v253_v39 = vld [vmem:[%s4891_s1 + $0x118] sm:$0xff] }
   0xc   :  { %465 = vmatpush1.msra.mxu0 %v228_v6  ;;  %2253 = vmatpush1.msra.mxu1 %v228_v6  ;;  %v27_v33 = vld [vmem:[%s4892_s0 + $0x8] sm:$0xff]  ;;  %v26_v35 = vld [vmem:[%s4892_s0] sm:$0xff]  ;;  %v29_v40 = vld [vmem:[%s4892_s0 + $0x18] sm:$0xff] }
   0xd   :  { %466 = vmatprep.subr.mxu0 %v2284_v0  ;;  %2222 = vmatprep.subr.mxu1 %v2284_v0  ;;  %v171_v34 = vld [vmem:[%s4892_s0 + $0x488] sm:$0xff]  ;;  %v170_v36 = vld [vmem:[%s4892_s0 + $0x480] sm:$0xff]  ;;  %v173_v41 = vld [vmem:[%s4892_s0 + $0x498] sm:$0xff] }
   0xe   :  { %467 = vmatpush1.msra.mxu0 %v227_v7  ;;  %2254 = vmatpush1.msra.mxu1 %v227_v7  ;;  %v30_v37 = vld [vmem:[%s4892_s0 + $0x20] sm:$0xff]  ;;  %v33_v42 = vld [vmem:[%s4892_s0 + $0x38] sm:$0xff]  ;;  %v252_v44 = vld [vmem:[%s4891_s1 + $0x110] sm:$0xff] }
   0xf   :  { %468 = vmatprep.subr.mxu0 %v2284_v0  ;;  %2223 = vmatprep.subr.mxu1 %v2284_v0  ;;  %v174_v38 = vld [vmem:[%s4892_s0 + $0x4a0] sm:$0xff]  ;;  %v177_v43 = vld [vmem:[%s4892_s0 + $0x4b8] sm:$0xff]  ;;  %v32_v45 = vld [vmem:[%s4892_s0 + $0x30] sm:$0xff] }
  0x10   :  { %469 = vmatpush1.msra.mxu0 %v226_v8  ;;  %2255 = vmatpush1.msra.mxu1 %v226_v8  ;;  %v176_v46 = vld [vmem:[%s4892_s0 + $0x4b0] sm:$0xff]  ;;  %v251_v49 = vld [vmem:[%s4891_s1 + $0x108] sm:$0xff]  ;;  %v250_v54 = vld [vmem:[%s4891_s1 + $0x100] sm:$0xff] }
  0x11   :  { %470 = vmatprep.subr.mxu0 %v2284_v0  ;;  %2224 = vmatprep.subr.mxu1 %v2284_v0  ;;  %v36_v47 = vld [vmem:[%s4892_s0 + $0x50] sm:$0xff]  ;;  %v35_v50 = vld [vmem:[%s4892_s0 + $0x48] sm:$0xff]  ;;  %v38_v55 = vld [vmem:[%s4892_s0 + $0x60] sm:$0xff] }
  0x12   :  { %471 = vmatpush1.msra.mxu0 %v225_v9  ;;  %2256 = vmatpush1.msra.mxu1 %v225_v9  ;;  %v180_v48 = vld [vmem:[%s4892_s0 + $0x4d0] sm:$0xff]  ;;  %v179_v51 = vld [vmem:[%s4892_s0 + $0x4c8] sm:$0xff]  ;;  %v182_v56 = vld [vmem:[%s4892_s0 + $0x4e0] sm:$0xff] }
  0x13   :  { %472 = vmatprep.subr.mxu0 %v2284_v0  ;;  %2225 = vmatprep.subr.mxu1 %v2284_v0  ;;  %v39_v52 = vld [vmem:[%s4892_s0 + $0x68] sm:$0xff]  ;;  %v42_v57 = vld [vmem:[%s4892_s0 + $0x80] sm:$0xff]  ;;  %v41_v59 = vld [vmem:[%s4892_s0 + $0x78] sm:$0xff] }
  0x14   :  { %473 = vmatpush1.msra.mxu0 %v224_v10  ;;  %2257 = vmatpush1.msra.mxu1 %v224_v10  ;;  %v183_v53 = vld [vmem:[%s4892_s0 + $0x4e8] sm:$0xff]  ;;  %v186_v58 = vld [vmem:[%s4892_s0 + $0x500] sm:$0xff]  ;;  %v185_v60 = vld [vmem:[%s4892_s0 + $0x4f8] sm:$0xff] }
  0x15   :  { %474 = vmatprep.subr.mxu0 %v2284_v0  ;;  %2226 = vmatprep.subr.mxu1 %v2284_v0  ;;  %v45_v61 = vld [vmem:[%s4892_s0 + $0x98] sm:$0xff]  ;;  %v44_v63 = vld [vmem:[%s4892_s0 + $0x90] sm:$0xff]  ;;  %v47_v4 = vld [vmem:[%s4892_s0 + $0xa8] sm:$0xff] }
  0x16   :  { %475 = vmatpush1.msra.mxu0 %v223_v11  ;;  %2258 = vmatpush1.msra.mxu1 %v223_v11  ;;  %v189_v62 = vld [vmem:[%s4892_s0 + $0x518] sm:$0xff]  ;;  %v188_v1 = vld [vmem:[%s4892_s0 + $0x510] sm:$0xff]  ;;  %v191_v5 = vld [vmem:[%s4892_s0 + $0x528] sm:$0xff] }
  0x17   :  { %476 = vmatprep.subr.mxu0 %v2284_v0  ;;  %2227 = vmatprep.subr.mxu1 %v2284_v0  ;;  %v48_v2 = vld [vmem:[%s4892_s0 + $0xb0] sm:$0xff]  ;;  %v51_v6 = vld [vmem:[%s4892_s0 + $0xc8] sm:$0xff]  ;;  %v50_v8 = vld [vmem:[%s4892_s0 + $0xc0] sm:$0xff] }
  0x18   :  { %477 = vmatpush1.msra.mxu0 %v222_v12  ;;  %2259 = vmatpush1.msra.mxu1 %v222_v12  ;;  %v192_v3 = vld [vmem:[%s4892_s0 + $0x530] sm:$0xff]  ;;  %v195_v7 = vld [vmem:[%s4892_s0 + $0x548] sm:$0xff]  ;;  %v194_v9 = vld [vmem:[%s4892_s0 + $0x540] sm:$0xff] }
  0x19   :  { %478 = vmatprep.subr.mxu0 %v2284_v0  ;;  %2228 = vmatprep.subr.mxu1 %v2284_v0  ;;  %v54_v10 = vld [vmem:[%s4892_s0 + $0xe0] sm:$0xff]  ;;  %v53_v12 = vld [vmem:[%s4892_s0 + $0xd8] sm:$0xff] }
  0x1a   :  { %479 = vmatpush1.msra.mxu0 %v221_v13  ;;  %2260 = vmatpush1.msra.mxu1 %v221_v13  ;;  %v198_v11 = vld [vmem:[%s4892_s0 + $0x560] sm:$0xff]  ;;  %v197_v13 = vld [vmem:[%s4892_s0 + $0x558] sm:$0xff] }
  0x1b   :  { %480 = vmatprep.subr.mxu0 %v2284_v0  ;;  %2229 = vmatprep.subr.mxu1 %v2284_v0 }
  0x1c   :  { %481 = vmatpush1.msra.mxu0 %v220_v14  ;;  %2261 = vmatpush1.msra.mxu1 %v220_v14  ;;  %v57_v14 = vld [vmem:[%s4892_s0 + $0xf8] sm:$0xff] }
  0x1d   :  { %482 = vmatprep.subr.mxu0 %v2284_v0  ;;  %2230 = vmatprep.subr.mxu1 %v2284_v0 }
  0x1e   :  { %483 = vmatpush1.msra.mxu0 %v219_v15  ;;  %2262 = vmatpush1.msra.mxu1 %v219_v15  ;;  %v201_v15 = vld [vmem:[%s4892_s0 + $0x578] sm:$0xff] }
  0x1f   :  { %484 = vmatprep.subr.mxu0 %v2284_v0  ;;  %2231 = vmatprep.subr.mxu1 %v2284_v0 }
  0x20   :  { %485 = vmatpush1.msra.mxu0 %v218_v16  ;;  %2263 = vmatpush1.msra.mxu1 %v218_v16  ;;  %v56_v16 = vld [vmem:[%s4892_s0 + $0xf0] sm:$0xff] }
  0x21   :  { %486 = vmatprep.subr.mxu0 %v2284_v0  ;;  %2232 = vmatprep.subr.mxu1 %v2284_v0 }
  0x22   :  { %487 = vmatpush2.msra.mxu0 %v249_v17  ;;  %2264 = vmatpush2.msra.mxu1 %v249_v17  ;;  %v200_v17 = vld [vmem:[%s4892_s0 + $0x570] sm:$0xff] }
  0x23   :  { %488 = vmatprep.subr.mxu0 %v2284_v0  ;;  %2233 = vmatprep.subr.mxu1 %v2284_v0 }
  0x24   :  { %489 = vmatpush2.msra.mxu0 %v248_v18  ;;  %2265 = vmatpush2.msra.mxu1 %v248_v18  ;;  %v60_v18 = vld [vmem:[%s4892_s0 + $0x110] sm:$0xff] }
  0x25   :  { %490 = vmatprep.subr.mxu0 %v2284_v0  ;;  %2234 = vmatprep.subr.mxu1 %v2284_v0 }
  0x26   :  { %491 = vmatpush2.msra.mxu0 %v247_v19  ;;  %2266 = vmatpush2.msra.mxu1 %v247_v19  ;;  %v204_v19 = vld [vmem:[%s4892_s0 + $0x590] sm:$0xff] }
  0x27   :  { %492 = vmatprep.subr.mxu0 %v2284_v0  ;;  %2235 = vmatprep.subr.mxu1 %v2284_v0 }
  0x28   :  { %493 = vmatpush2.msra.mxu0 %v246_v20  ;;  %2267 = vmatpush2.msra.mxu1 %v246_v20  ;;  %v59_v20 = vld [vmem:[%s4892_s0 + $0x108] sm:$0xff] }
  0x29   :  { %494 = vmatprep.subr.mxu0 %v2284_v0  ;;  %2236 = vmatprep.subr.mxu1 %v2284_v0 }
  0x2a   :  { %495 = vmatpush2.msra.mxu0 %v245_v21  ;;  %2268 = vmatpush2.msra.mxu1 %v245_v21  ;;  %v203_v21 = vld [vmem:[%s4892_s0 + $0x588] sm:$0xff] }
  0x2b   :  { %496 = vmatprep.subr.mxu0 %v2284_v0  ;;  %2237 = vmatprep.subr.mxu1 %v2284_v0 }
  0x2c   :  { %497 = vmatpush2.msra.mxu0 %v244_v22  ;;  %2269 = vmatpush2.msra.mxu1 %v244_v22  ;;  %v63_v22 = vld [vmem:[%s4892_s0 + $0x128] sm:$0xff] }
  0x2d   :  { %498 = vmatprep.subr.mxu0 %v2284_v0  ;;  %2238 = vmatprep.subr.mxu1 %v2284_v0 }
  0x2e   :  { %499 = vmatpush2.msra.mxu0 %v243_v23  ;;  %2270 = vmatpush2.msra.mxu1 %v243_v23  ;;  %v207_v23 = vld [vmem:[%s4892_s0 + $0x5a8] sm:$0xff] }
  0x2f   :  { %500 = vmatprep.subr.mxu0 %v2284_v0  ;;  %2239 = vmatprep.subr.mxu1 %v2284_v0 }
  0x30   :  { %501 = vmatpush2.msra.mxu0 %v242_v24  ;;  %2271 = vmatpush2.msra.mxu1 %v242_v24  ;;  %v62_v24 = vld [vmem:[%s4892_s0 + $0x120] sm:$0xff] }
  0x31   :  { %502 = vmatprep.subr.mxu0 %v2284_v0  ;;  %2240 = vmatprep.subr.mxu1 %v2284_v0 }
  0x32   :  { %503 = vmatpush2.msra.mxu0 %v241_v25  ;;  %2272 = vmatpush2.msra.mxu1 %v241_v25  ;;  %v206_v25 = vld [vmem:[%s4892_s0 + $0x5a0] sm:$0xff] }
  0x33   :  { %504 = vmatprep.subr.mxu0 %v2284_v0  ;;  %2241 = vmatprep.subr.mxu1 %v2284_v0 }
  0x34   :  { %505 = vmatpush2.msra.mxu0 %v240_v26  ;;  %2273 = vmatpush2.msra.mxu1 %v240_v26  ;;  %v66_v26 = vld [vmem:[%s4892_s0 + $0x140] sm:$0xff] }
  0x35   :  { %506 = vmatprep.subr.mxu0 %v2284_v0  ;;  %2242 = vmatprep.subr.mxu1 %v2284_v0 }
  0x36   :  { %507 = vmatpush2.msra.mxu0 %v239_v27  ;;  %2274 = vmatpush2.msra.mxu1 %v239_v27  ;;  %v210_v27 = vld [vmem:[%s4892_s0 + $0x5c0] sm:$0xff] }
  0x37   :  { %508 = vmatprep.subr.mxu0 %v2284_v0  ;;  %2243 = vmatprep.subr.mxu1 %v2284_v0 }
  0x38   :  { %509 = vmatpush2.msra.mxu0 %v238_v28  ;;  %2275 = vmatpush2.msra.mxu1 %v238_v28  ;;  %v65_v28 = vld [vmem:[%s4892_s0 + $0x138] sm:$0xff] }
  0x39   :  { %510 = vmatprep.subr.mxu0 %v2284_v0  ;;  %2244 = vmatprep.subr.mxu1 %v2284_v0 }
  0x3a   :  { %511 = vmatpush2.msra.mxu0 %v237_v29  ;;  %2276 = vmatpush2.msra.mxu1 %v237_v29  ;;  %v209_v29 = vld [vmem:[%s4892_s0 + $0x5b8] sm:$0xff] }
  0x3b   :  { %512 = vmatprep.subr.mxu0 %v2284_v0  ;;  %2245 = vmatprep.subr.mxu1 %v2284_v0 }
  0x3c   :  { %513 = vmatpush2.msra.mxu0 %v236_v30  ;;  %2277 = vmatpush2.msra.mxu1 %v236_v30  ;;  %v69_v30 = vld [vmem:[%s4892_s0 + $0x158] sm:$0xff] }
  0x3d   :  { %514 = vmatprep.subr.mxu0 %v2284_v0  ;;  %2246 = vmatprep.subr.mxu1 %v2284_v0 }
  0x3e   :  { %515 = vmatpush2.msra.mxu0 %v235_v31  ;;  %2278 = vmatpush2.msra.mxu1 %v235_v31  ;;  %v213_v31 = vld [vmem:[%s4892_s0 + $0x5d8] sm:$0xff] }
  0x3f   :  { %516 = vmatprep.subr.mxu0 %v2284_v0  ;;  %2247 = vmatprep.subr.mxu1 %v2284_v0 }
  0x40   :  { %517 = vmatpush2.msra.mxu0 %v234_v32  ;;  %2279 = vmatpush2.msra.mxu1 %v234_v32  ;;  %v68_v32 = vld [vmem:[%s4892_s0 + $0x150] sm:$0xff] }
  0x41   :  { %518 = vmatprep.mubr.f32.mxu0 %v27_v33  ;;  %758 = vmatprep.mubr.f32.mxu1 %v171_v34  ;;  %v212_v33 = vld [vmem:[%s4892_s0 + $0x5d0] sm:$0xff] }
  0x42   :  { %519 = vmatmul.mubr.f32.vlgmr.msra.gmra.mxu0 %v26_v35  ;;  %759 = vmatmul.mubr.f32.vlgmr.msra.gmra.mxu1 %v170_v36  ;;  %v72_v34 = vld [vmem:[%s4892_s0 + $0x170] sm:$0xff]  ;;  %v71_v36 = vld [vmem:[%s4892_s0 + $0x168] sm:$0xff] }
  0x43   :  { %523 = vmatprep.mubr.f32.mxu0 %v30_v37  ;;  %763 = vmatprep.mubr.f32.mxu1 %v174_v38  ;;  %v216_v35 = vld [vmem:[%s4892_s0 + $0x5f0] sm:$0xff]  ;;  %v215_v37 = vld [vmem:[%s4892_s0 + $0x5e8] sm:$0xff] }
  0x44   :  { %2112 = vmatprep.subr.mxu1 %v253_v39  ;;  %v75_v38 = vld [vmem:[%s4892_s0 + $0x188] sm:$0xff] }
  0x45   :  { %2113 = vmatpush3.msra.mxu1 %v253_v39  ;;  %v28_v39 = vld [vmem:[%s4892_s0 + $0x10] sm:$0xff] }
  0x46   :  { %524 = vmatmul.mubr.f32.gmra.mxu0 %v29_v40  ;;  %764 = vmatmul.mubr.f32.gmra.mxu1 %v173_v41  ;;  %v74_v40 = vld [vmem:[%s4892_s0 + $0x180] sm:$0xff]  ;;  %v31_v41 = vld [vmem:[%s4892_s0 + $0x28] sm:$0xff] }
  0x47   :  { %528 = vmatprep.mubr.f32.mxu0 %v33_v42  ;;  %768 = vmatprep.mubr.f32.mxu1 %v177_v43  ;;  %v78_v42 = vld [vmem:[%s4892_s0 + $0x1a0] sm:$0xff] }
  0x48   :  { %2114 = vmatprep.subr.mxu1 %v252_v44  ;;  %v34_v43 = vld [vmem:[%s4892_s0 + $0x40] sm:$0xff] }
  0x49   :  { %2115 = vmatpush3.msra.mxu1 %v252_v44  ;;  %v77_v44 = vld [vmem:[%s4892_s0 + $0x198] sm:$0xff] }
  0x4a   :  { %529 = vmatmul.mubr.f32.gmra.mxu0 %v32_v45  ;;  %769 = vmatmul.mubr.f32.gmra.mxu1 %v176_v46  ;;  %v37_v45 = vld [vmem:[%s4892_s0 + $0x58] sm:$0xff] }
  0x4b   :  { %533 = vmatprep.mubr.f32.mxu0 %v36_v47  ;;  %773 = vmatprep.mubr.f32.mxu1 %v180_v48  ;;  %v81_v46 = vld [vmem:[%s4892_s0 + $0x1b8] sm:$0xff]  ;;  %v40_v47 = vld [vmem:[%s4892_s0 + $0x70] sm:$0xff] }
  0x4c   :  { %2116 = vmatprep.subr.mxu1 %v251_v49  ;;  %v80_v48 = vld [vmem:[%s4892_s0 + $0x1b0] sm:$0xff] }
  0x4d   :  { %2117 = vmatpush3.msra.mxu1 %v251_v49  ;;  %v43_v49 = vld [vmem:[%s4892_s0 + $0x88] sm:$0xff] }
  0x4e   :  { %534 = vmatmul.mubr.f32.gmra.mxu0 %v35_v50  ;;  %774 = vmatmul.mubr.f32.gmra.mxu1 %v179_v51  ;;  %v84_v50 = vld [vmem:[%s4892_s0 + $0x1d0] sm:$0xff]  ;;  %v46_v51 = vld [vmem:[%s4892_s0 + $0xa0] sm:$0xff] }
  0x4f   :  { %538 = vmatprep.mubr.f32.mxu0 %v39_v52  ;;  %778 = vmatprep.mubr.f32.mxu1 %v183_v53  ;;  %v83_v52 = vld [vmem:[%s4892_s0 + $0x1c8] sm:$0xff]  ;;  %v49_v53 = vld [vmem:[%s4892_s0 + $0xb8] sm:$0xff] }
  0x50   :  { %2118 = vmatprep.subr.mxu1 %v250_v54 }
  0x51   :  { %2119 = vmatpush3.msra.mxu1 %v250_v54  ;;  %v87_v54 = vld [vmem:[%s4892_s0 + $0x1e8] sm:$0xff] }
  0x52   :  { %539 = vmatmul.mubr.f32.gmra.mxu0 %v38_v55  ;;  %779 = vmatmul.mubr.f32.gmra.mxu1 %v182_v56  ;;  %v52_v55 = vld [vmem:[%s4892_s0 + $0xd0] sm:$0xff]  ;;  %v86_v56 = vld [vmem:[%s4892_s0 + $0x1e0] sm:$0xff] }
  0x53   :  { %543 = vmatprep.mubr.f32.mxu0 %v42_v57  ;;  %783 = vmatprep.mubr.f32.mxu1 %v186_v58  ;;  %v55_v57 = vld [vmem:[%s4892_s0 + $0xe8] sm:$0xff]  ;;  %v90_v58 = vld [vmem:[%s4892_s0 + $0x200] sm:$0xff] }
  0x56   :  { %544 = vmatmul.mubr.f32.gmra.mxu0 %v41_v59  ;;  %784 = vmatmul.mubr.f32.gmra.mxu1 %v185_v60  ;;  %v58_v59 = vld [vmem:[%s4892_s0 + $0x100] sm:$0xff]  ;;  %v89_v60 = vld [vmem:[%s4892_s0 + $0x1f8] sm:$0xff] }
  0x57   :  { %548 = vmatprep.mubr.f32.mxu0 %v45_v61  ;;  %788 = vmatprep.mubr.f32.mxu1 %v189_v62  ;;  %v61_v61 = vld [vmem:[%s4892_s0 + $0x118] sm:$0xff] }
  0x58   :  { %v93_v62 = vld [vmem:[%s4892_s0 + $0x218] sm:$0xff] }
  0x5a   :  { %549 = vmatmul.mubr.f32.gmra.mxu0 %v44_v63  ;;  %789 = vmatmul.mubr.f32.gmra.mxu1 %v188_v1  ;;  %v64_v63 = vld [vmem:[%s4892_s0 + $0x130] sm:$0xff] }
  0x5b   :  { %553 = vmatprep.mubr.f32.mxu0 %v48_v2  ;;  %793 = vmatprep.mubr.f32.mxu1 %v192_v3  ;;  %v92_v1 = vld [vmem:[%s4892_s0 + $0x210] sm:$0xff]  ;;  %v67_v2 = vld [vmem:[%s4892_s0 + $0x148] sm:$0xff] }
  0x5c   :  { %v96_v3 = vld [vmem:[%s4892_s0 + $0x230] sm:$0xff] }
  0x5e   :  { %554 = vmatmul.mubr.f32.gmra.mxu0 %v47_v4  ;;  %794 = vmatmul.mubr.f32.gmra.mxu1 %v191_v5  ;;  %v70_v4 = vld [vmem:[%s4892_s0 + $0x160] sm:$0xff]  ;;  %v95_v5 = vld [vmem:[%s4892_s0 + $0x228] sm:$0xff] }
  0x5f   :  { %558 = vmatprep.mubr.f32.mxu0 %v51_v6  ;;  %798 = vmatprep.mubr.f32.mxu1 %v195_v7  ;;  %v73_v6 = vld [vmem:[%s4892_s0 + $0x178] sm:$0xff]  ;;  %v99_v7 = vld [vmem:[%s4892_s0 + $0x248] sm:$0xff] }
  0x62   :  { %559 = vmatmul.mubr.f32.gmra.mxu0 %v50_v8  ;;  %799 = vmatmul.mubr.f32.gmra.mxu1 %v194_v9  ;;  %v76_v8 = vld [vmem:[%s4892_s0 + $0x190] sm:$0xff]  ;;  %v98_v9 = vld [vmem:[%s4892_s0 + $0x240] sm:$0xff] }
  0x63   :  { %563 = vmatprep.mubr.f32.mxu0 %v54_v10  ;;  %803 = vmatprep.mubr.f32.mxu1 %v198_v11  ;;  %v79_v10 = vld [vmem:[%s4892_s0 + $0x1a8] sm:$0xff]  ;;  %v102_v11 = vld [vmem:[%s4892_s0 + $0x260] sm:$0xff] }
  0x66   :  { %564 = vmatmul.mubr.f32.gmra.mxu0 %v53_v12  ;;  %804 = vmatmul.mubr.f32.gmra.mxu1 %v197_v13  ;;  %v82_v12 = vld [vmem:[%s4892_s0 + $0x1c0] sm:$0xff]  ;;  %v101_v13 = vld [vmem:[%s4892_s0 + $0x258] sm:$0xff] }
  0x67   :  { %568 = vmatprep.mubr.f32.mxu0 %v57_v14  ;;  %808 = vmatprep.mubr.f32.mxu1 %v201_v15  ;;  %v85_v14 = vld [vmem:[%s4892_s0 + $0x1d8] sm:$0xff] }
  0x68   :  { %v105_v15 = vld [vmem:[%s4892_s0 + $0x278] sm:$0xff] }
  0x6a   :  { %569 = vmatmul.mubr.f32.gmra.mxu0 %v56_v16  ;;  %809 = vmatmul.mubr.f32.gmra.mxu1 %v200_v17  ;;  %v88_v16 = vld [vmem:[%s4892_s0 + $0x1f0] sm:$0xff] }
  0x6b   :  { %573 = vmatprep.mubr.f32.mxu0 %v60_v18  ;;  %813 = vmatprep.mubr.f32.mxu1 %v204_v19  ;;  %v104_v17 = vld [vmem:[%s4892_s0 + $0x270] sm:$0xff]  ;;  %v91_v18 = vld [vmem:[%s4892_s0 + $0x208] sm:$0xff] }
  0x6c   :  { %v108_v19 = vld [vmem:[%s4892_s0 + $0x290] sm:$0xff] }
  0x6e   :  { %574 = vmatmul.mubr.f32.gmra.mxu0 %v59_v20  ;;  %814 = vmatmul.mubr.f32.gmra.mxu1 %v203_v21  ;;  %v94_v20 = vld [vmem:[%s4892_s0 + $0x220] sm:$0xff]  ;;  %v107_v21 = vld [vmem:[%s4892_s0 + $0x288] sm:$0xff] }
  0x6f   :  { %578 = vmatprep.mubr.f32.mxu0 %v63_v22  ;;  %818 = vmatprep.mubr.f32.mxu1 %v207_v23  ;;  %v97_v22 = vld [vmem:[%s4892_s0 + $0x238] sm:$0xff]  ;;  %v111_v23 = vld [vmem:[%s4892_s0 + $0x2a8] sm:$0xff] }
  0x72   :  { %579 = vmatmul.mubr.f32.gmra.mxu0 %v62_v24  ;;  %819 = vmatmul.mubr.f32.gmra.mxu1 %v206_v25  ;;  %v100_v24 = vld [vmem:[%s4892_s0 + $0x250] sm:$0xff]  ;;  %v110_v25 = vld [vmem:[%s4892_s0 + $0x2a0] sm:$0xff] }
  0x73   :  { %583 = vmatprep.mubr.f32.mxu0 %v66_v26  ;;  %823 = vmatprep.mubr.f32.mxu1 %v210_v27  ;;  %v103_v26 = vld [vmem:[%s4892_s0 + $0x268] sm:$0xff]  ;;  %v114_v27 = vld [vmem:[%s4892_s0 + $0x2c0] sm:$0xff] }
  0x76   :  { %584 = vmatmul.mubr.f32.gmra.mxu0 %v65_v28  ;;  %824 = vmatmul.mubr.f32.gmra.mxu1 %v209_v29  ;;  %v106_v28 = vld [vmem:[%s4892_s0 + $0x280] sm:$0xff]  ;;  %v113_v29 = vld [vmem:[%s4892_s0 + $0x2b8] sm:$0xff] }
  0x77   :  { %588 = vmatprep.mubr.f32.mxu0 %v69_v30  ;;  %828 = vmatprep.mubr.f32.mxu1 %v213_v31  ;;  %v109_v30 = vld [vmem:[%s4892_s0 + $0x298] sm:$0xff] }
  0x78   :  { %v117_v31 = vld [vmem:[%s4892_s0 + $0x2d8] sm:$0xff] }
  0x7a   :  { %589 = vmatmul.mubr.f32.gmra.mxu0 %v68_v32  ;;  %829 = vmatmul.mubr.f32.gmra.mxu1 %v212_v33  ;;  %v112_v32 = vld [vmem:[%s4892_s0 + $0x2b0] sm:$0xff] }
  0x7b   :  { %593 = vmatprep.mubr.f32.mxu0 %v72_v34  ;;  %833 = vmatprep.mubr.f32.mxu1 %v216_v35  ;;  %v116_v33 = vld [vmem:[%s4892_s0 + $0x2d0] sm:$0xff]  ;;  %v115_v34 = vld [vmem:[%s4892_s0 + $0x2c8] sm:$0xff] }
  0x7c   :  { %v120_v35 = vld [vmem:[%s4892_s0 + $0x2f0] sm:$0xff] }
  0x7e   :  { %594 = vmatmul.mubr.f32.gmra.mxu0 %v71_v36  ;;  %834 = vmatmul.mubr.f32.gmra.mxu1 %v215_v37  ;;  %v118_v36 = vld [vmem:[%s4892_s0 + $0x2e0] sm:$0xff]  ;;  %v119_v37 = vld [vmem:[%s4892_s0 + $0x2e8] sm:$0xff] }
  0x7f   :  { %598 = vmatprep.mubr.f32.mxu0 %v75_v38  ;;  %2120 = vmatprep.mubr.msk.f32.mxu1 %vm261_vm0, %v28_v39  ;;  %v121_v38 = vld [vmem:[%s4892_s0 + $0x2f8] sm:$0xff]  ;;  %v123_v39 = vld [vmem:[%s4892_s0 + $0x308] sm:$0xff] }
  0x82   :  { %599 = vmatmul.mubr.f32.gmra.mxu0 %v74_v40  ;;  %2121 = vmatmul.mubr.msk.f32.vlgmr.msra.gmra.mxu1 %vm261_vm0, %v31_v41  ;;  %v124_v40 = vld [vmem:[%s4892_s0 + $0x310] sm:$0xff]  ;;  %v122_v41 = vld [vmem:[%s4892_s0 + $0x300] sm:$0xff] }
  0x83   :  { %603 = vmatprep.mubr.f32.mxu0 %v78_v42  ;;  %2123 = vmatprep.mubr.msk.f32.mxu1 %vm261_vm0, %v34_v43  ;;  %v127_v42 = vld [vmem:[%s4892_s0 + $0x328] sm:$0xff]  ;;  %v126_v43 = vld [vmem:[%s4892_s0 + $0x320] sm:$0xff] }
  0x86   :  { %604 = vmatmul.mubr.f32.gmra.mxu0 %v77_v44  ;;  %2124 = vmatmul.mubr.msk.f32.gmra.mxu1 %vm261_vm0, %v37_v45  ;;  %v130_v44 = vld [vmem:[%s4892_s0 + $0x340] sm:$0xff]  ;;  %v125_v45 = vld [vmem:[%s4892_s0 + $0x318] sm:$0xff] }
  0x87   :  { %608 = vmatprep.mubr.f32.mxu0 %v81_v46  ;;  %2126 = vmatprep.mubr.msk.f32.mxu1 %vm261_vm0, %v40_v47  ;;  %v133_v46 = vld [vmem:[%s4892_s0 + $0x358] sm:$0xff] }
  0x88   :  { %v129_v47 = vld [vmem:[%s4892_s0 + $0x338] sm:$0xff] }
  0x8a   :  { %609 = vmatmul.mubr.f32.gmra.mxu0 %v80_v48  ;;  %2127 = vmatmul.mubr.msk.f32.gmra.mxu1 %vm261_vm0, %v43_v49  ;;  %v136_v48 = vld [vmem:[%s4892_s0 + $0x370] sm:$0xff] }
  0x8b   :  { %613 = vmatprep.mubr.f32.mxu0 %v84_v50  ;;  %2129 = vmatprep.mubr.msk.f32.mxu1 %vm261_vm0, %v46_v51  ;;  %v128_v49 = vld [vmem:[%s4892_s0 + $0x330] sm:$0xff]  ;;  %v139_v50 = vld [vmem:[%s4892_s0 + $0x388] sm:$0xff] }
  0x8c   :  { %v132_v51 = vld [vmem:[%s4892_s0 + $0x350] sm:$0xff] }
  0x8e   :  { %614 = vmatmul.mubr.f32.gmra.mxu0 %v83_v52  ;;  %2130 = vmatmul.mubr.msk.f32.gmra.mxu1 %vm261_vm0, %v49_v53  ;;  %v142_v52 = vld [vmem:[%s4892_s0 + $0x3a0] sm:$0xff]  ;;  %v131_v53 = vld [vmem:[%s4892_s0 + $0x348] sm:$0xff] }
  0x8f   :  { %618 = vmatprep.mubr.f32.mxu0 %v87_v54  ;;  %2132 = vmatprep.mubr.msk.f32.mxu1 %vm261_vm0, %v52_v55  ;;  %v145_v54 = vld [vmem:[%s4892_s0 + $0x3b8] sm:$0xff]  ;;  %v135_v55 = vld [vmem:[%s4892_s0 + $0x368] sm:$0xff] }
  0x92   :  { %619 = vmatmul.mubr.f32.gmra.mxu0 %v86_v56  ;;  %2133 = vmatmul.mubr.msk.f32.gmra.mxu1 %vm261_vm0, %v55_v57  ;;  %v148_v56 = vld [vmem:[%s4892_s0 + $0x3d0] sm:$0xff]  ;;  %v134_v57 = vld [vmem:[%s4892_s0 + $0x360] sm:$0xff] }
  0x93   :  { %623 = vmatprep.mubr.f32.mxu0 %v90_v58  ;;  %2135 = vmatprep.mubr.msk.f32.mxu1 %vm261_vm0, %v58_v59  ;;  %v151_v58 = vld [vmem:[%s4892_s0 + $0x3e8] sm:$0xff]  ;;  %v138_v59 = vld [vmem:[%s4892_s0 + $0x380] sm:$0xff] }
  0x96   :  { %624 = vmatmul.mubr.f32.gmra.mxu0 %v89_v60  ;;  %2136 = vmatmul.mubr.msk.f32.gmra.mxu1 %vm261_vm0, %v61_v61  ;;  %v154_v60 = vld [vmem:[%s4892_s0 + $0x400] sm:$0xff]  ;;  %v137_v61 = vld [vmem:[%s4892_s0 + $0x378] sm:$0xff] }
  0x97   :  { %628 = vmatprep.mubr.f32.mxu0 %v93_v62  ;;  %2138 = vmatprep.mubr.msk.f32.mxu1 %vm261_vm0, %v64_v63  ;;  %v157_v62 = vld [vmem:[%s4892_s0 + $0x418] sm:$0xff] }
  0x98   :  { %v141_v63 = vld [vmem:[%s4892_s0 + $0x398] sm:$0xff] }
  0x9a   :  { %629 = vmatmul.mubr.f32.gmra.mxu0 %v92_v1  ;;  %2139 = vmatmul.mubr.msk.f32.gmra.mxu1 %vm261_vm0, %v67_v2  ;;  %v160_v1 = vld [vmem:[%s4892_s0 + $0x430] sm:$0xff] }
  0x9b   :  { %633 = vmatprep.mubr.f32.mxu0 %v96_v3  ;;  %2141 = vmatprep.mubr.msk.f32.mxu1 %vm261_vm0, %v70_v4  ;;  %v140_v2 = vld [vmem:[%s4892_s0 + $0x390] sm:$0xff]  ;;  %v163_v3 = vld [vmem:[%s4892_s0 + $0x448] sm:$0xff] }
  0x9c   :  { %v144_v4 = vld [vmem:[%s4892_s0 + $0x3b0] sm:$0xff] }
  0x9e   :  { %634 = vmatmul.mubr.f32.gmra.mxu0 %v95_v5  ;;  %2142 = vmatmul.mubr.msk.f32.gmra.mxu1 %vm261_vm0, %v73_v6  ;;  %v166_v5 = vld [vmem:[%s4892_s0 + $0x460] sm:$0xff]  ;;  %v143_v6 = vld [vmem:[%s4892_s0 + $0x3a8] sm:$0xff] }
  0x9f   :  { %638 = vmatprep.mubr.f32.mxu0 %v99_v7  ;;  %2144 = vmatprep.mubr.msk.f32.mxu1 %vm261_vm0, %v76_v8  ;;  %v169_v7 = vld [vmem:[%s4892_s0 + $0x478] sm:$0xff]  ;;  %v147_v8 = vld [vmem:[%s4892_s0 + $0x3c8] sm:$0xff] }
  0xa2   :  { %639 = vmatmul.mubr.f32.gmra.mxu0 %v98_v9  ;;  %2145 = vmatmul.mubr.msk.f32.gmra.mxu1 %vm261_vm0, %v79_v10  ;;  %v172_v9 = vld [vmem:[%s4892_s0 + $0x490] sm:$0xff]  ;;  %v146_v10 = vld [vmem:[%s4892_s0 + $0x3c0] sm:$0xff] }
  0xa3   :  { %643 = vmatprep.mubr.f32.mxu0 %v102_v11  ;;  %2147 = vmatprep.mubr.msk.f32.mxu1 %vm261_vm0, %v82_v12  ;;  %v175_v11 = vld [vmem:[%s4892_s0 + $0x4a8] sm:$0xff]  ;;  %v150_v12 = vld [vmem:[%s4892_s0 + $0x3e0] sm:$0xff] }
  0xa6   :  { %644 = vmatmul.mubr.f32.gmra.mxu0 %v101_v13  ;;  %2148 = vmatmul.mubr.msk.f32.gmra.mxu1 %vm261_vm0, %v85_v14  ;;  %v178_v13 = vld [vmem:[%s4892_s0 + $0x4c0] sm:$0xff]  ;;  %v149_v14 = vld [vmem:[%s4892_s0 + $0x3d8] sm:$0xff] }
  0xa7   :  { %648 = vmatprep.mubr.f32.mxu0 %v105_v15  ;;  %2150 = vmatprep.mubr.msk.f32.mxu1 %vm261_vm0, %v88_v16  ;;  %v181_v15 = vld [vmem:[%s4892_s0 + $0x4d8] sm:$0xff] }
  0xa8   :  { %v153_v16 = vld [vmem:[%s4892_s0 + $0x3f8] sm:$0xff] }
  0xaa   :  { %649 = vmatmul.mubr.f32.gmra.mxu0 %v104_v17  ;;  %2151 = vmatmul.mubr.msk.f32.gmra.mxu1 %vm261_vm0, %v91_v18  ;;  %v184_v17 = vld [vmem:[%s4892_s0 + $0x4f0] sm:$0xff] }
  0xab   :  { %653 = vmatprep.mubr.f32.mxu0 %v108_v19  ;;  %2153 = vmatprep.mubr.msk.f32.mxu1 %vm261_vm0, %v94_v20  ;;  %v152_v18 = vld [vmem:[%s4892_s0 + $0x3f0] sm:$0xff]  ;;  %v187_v19 = vld [vmem:[%s4892_s0 + $0x508] sm:$0xff] }
  0xac   :  { %v156_v20 = vld [vmem:[%s4892_s0 + $0x410] sm:$0xff] }
  0xae   :  { %654 = vmatmul.mubr.f32.gmra.mxu0 %v107_v21  ;;  %2154 = vmatmul.mubr.msk.f32.gmra.mxu1 %vm261_vm0, %v97_v22  ;;  %v190_v21 = vld [vmem:[%s4892_s0 + $0x520] sm:$0xff]  ;;  %v155_v22 = vld [vmem:[%s4892_s0 + $0x408] sm:$0xff] }
  0xaf   :  { %658 = vmatprep.mubr.f32.mxu0 %v111_v23  ;;  %2156 = vmatprep.mubr.msk.f32.mxu1 %vm261_vm0, %v100_v24  ;;  %v193_v23 = vld [vmem:[%s4892_s0 + $0x538] sm:$0xff]  ;;  %v159_v24 = vld [vmem:[%s4892_s0 + $0x428] sm:$0xff] }
  0xb2   :  { %659 = vmatmul.mubr.f32.gmra.mxu0 %v110_v25  ;;  %2157 = vmatmul.mubr.msk.f32.gmra.mxu1 %vm261_vm0, %v103_v26  ;;  %v196_v25 = vld [vmem:[%s4892_s0 + $0x550] sm:$0xff]  ;;  %v158_v26 = vld [vmem:[%s4892_s0 + $0x420] sm:$0xff] }
  0xb3   :  { %663 = vmatprep.mubr.f32.mxu0 %v114_v27  ;;  %2159 = vmatprep.mubr.msk.f32.mxu1 %vm261_vm0, %v106_v28  ;;  %v199_v27 = vld [vmem:[%s4892_s0 + $0x568] sm:$0xff]  ;;  %v162_v28 = vld [vmem:[%s4892_s0 + $0x440] sm:$0xff] }
  0xb6   :  { %664 = vmatmul.mubr.f32.gmra.mxu0 %v113_v29  ;;  %2160 = vmatmul.mubr.msk.f32.gmra.mxu1 %vm261_vm0, %v109_v30  ;;  %v202_v29 = vld [vmem:[%s4892_s0 + $0x580] sm:$0xff]  ;;  %v161_v30 = vld [vmem:[%s4892_s0 + $0x438] sm:$0xff] }
  0xb7   :  { %668 = vmatprep.mubr.f32.mxu0 %v117_v31  ;;  %2162 = vmatprep.mubr.msk.f32.mxu1 %vm261_vm0, %v112_v32  ;;  %v205_v31 = vld [vmem:[%s4892_s0 + $0x598] sm:$0xff] }
  0xb8   :  { %v165_v32 = vld [vmem:[%s4892_s0 + $0x458] sm:$0xff] }
  0xba   :  { %669 = vmatmul.mubr.f32.gmra.mxu0 %v116_v33  ;;  %2163 = vmatmul.mubr.msk.f32.gmra.mxu1 %vm261_vm0, %v115_v34  ;;  %v208_v33 = vld [vmem:[%s4892_s0 + $0x5b0] sm:$0xff] }
  0xbb   :  { %673 = vmatprep.mubr.f32.mxu0 %v120_v35  ;;  %2165 = vmatprep.mubr.msk.f32.mxu1 %vm261_vm0, %v118_v36  ;;  %v164_v34 = vld [vmem:[%s4892_s0 + $0x450] sm:$0xff]  ;;  %v211_v35 = vld [vmem:[%s4892_s0 + $0x5c8] sm:$0xff] }
  0xbc   :  { %v168_v36 = vld [vmem:[%s4892_s0 + $0x470] sm:$0xff] }
  0xbe   :  { %674 = vmatmul.mubr.f32.gmra.mxu0 %v119_v37  ;;  %2166 = vmatmul.mubr.msk.f32.gmra.mxu1 %vm261_vm0, %v121_v38  ;;  %v214_v37 = vld [vmem:[%s4892_s0 + $0x5e0] sm:$0xff]  ;;  %v167_v38 = vld [vmem:[%s4892_s0 + $0x468] sm:$0xff] }
  0xbf   :  { %678 = vmatprep.mubr.f32.mxu0 %v123_v39  ;;  %2168 = vmatprep.mubr.msk.f32.mxu1 %vm261_vm0, %v124_v40  ;;  %v217_v39 = vld [vmem:[%s4892_s0 + $0x5f8] sm:$0xff] }
  0xc2   :  { %679 = vmatmul.mubr.f32.gmra.mxu0 %v122_v41  ;;  %2169 = vmatmul.mubr.msk.f32.gmra.mxu1 %vm261_vm0, %v127_v42 }
  0xc3   :  { %683 = vmatprep.mubr.f32.mxu0 %v126_v43  ;;  %2171 = vmatprep.mubr.msk.f32.mxu1 %vm261_vm0, %v130_v44 }
  0xc6   :  { %684 = vmatmul.mubr.f32.gmra.mxu0 %v125_v45  ;;  %2172 = vmatmul.mubr.msk.f32.gmra.mxu1 %vm261_vm0, %v133_v46 }
  0xc7   :  { %688 = vmatprep.mubr.f32.mxu0 %v129_v47  ;;  %2174 = vmatprep.mubr.msk.f32.mxu1 %vm261_vm0, %v136_v48 }
  0xca   :  { %689 = vmatmul.mubr.f32.gmra.mxu0 %v128_v49  ;;  %2175 = vmatmul.mubr.msk.f32.gmra.mxu1 %vm261_vm0, %v139_v50 }
  0xcb   :  { %693 = vmatprep.mubr.f32.mxu0 %v132_v51  ;;  %2177 = vmatprep.mubr.msk.f32.mxu1 %vm261_vm0, %v142_v52 }
  0xce   :  { %694 = vmatmul.mubr.f32.gmra.mxu0 %v131_v53  ;;  %2178 = vmatmul.mubr.msk.f32.gmra.mxu1 %vm261_vm0, %v145_v54 }
  0xcf   :  { %698 = vmatprep.mubr.f32.mxu0 %v135_v55  ;;  %2180 = vmatprep.mubr.msk.f32.mxu1 %vm261_vm0, %v148_v56 }
  0xd2   :  { %699 = vmatmul.mubr.f32.gmra.mxu0 %v134_v57  ;;  %2181 = vmatmul.mubr.msk.f32.gmra.mxu1 %vm261_vm0, %v151_v58 }
  0xd3   :  { %703 = vmatprep.mubr.f32.mxu0 %v138_v59  ;;  %2183 = vmatprep.mubr.msk.f32.mxu1 %vm261_vm0, %v154_v60 }
  0xd6   :  { %704 = vmatmul.mubr.f32.gmra.mxu0 %v137_v61  ;;  %2184 = vmatmul.mubr.msk.f32.gmra.mxu1 %vm261_vm0, %v157_v62 }
  0xd7   :  { %708 = vmatprep.mubr.f32.mxu0 %v141_v63  ;;  %2186 = vmatprep.mubr.msk.f32.mxu1 %vm261_vm0, %v160_v1 }
  0xda   :  { %709 = vmatmul.mubr.f32.gmra.mxu0 %v140_v2  ;;  %2187 = vmatmul.mubr.msk.f32.gmra.mxu1 %vm261_vm0, %v163_v3 }
  0xdb   :  { %713 = vmatprep.mubr.f32.mxu0 %v144_v4  ;;  %2189 = vmatprep.mubr.msk.f32.mxu1 %vm261_vm0, %v166_v5 }
  0xde   :  { %714 = vmatmul.mubr.f32.gmra.mxu0 %v143_v6  ;;  %2190 = vmatmul.mubr.msk.f32.gmra.mxu1 %vm261_vm0, %v169_v7 }
  0xdf   :  { %718 = vmatprep.mubr.f32.mxu0 %v147_v8  ;;  %2192 = vmatprep.mubr.msk.f32.mxu1 %vm261_vm0, %v172_v9 }
  0xe2   :  { %719 = vmatmul.mubr.f32.gmra.mxu0 %v146_v10  ;;  %2193 = vmatmul.mubr.msk.f32.gmra.mxu1 %vm261_vm0, %v175_v11 }
  0xe3   :  { %723 = vmatprep.mubr.f32.mxu0 %v150_v12  ;;  %2195 = vmatprep.mubr.msk.f32.mxu1 %vm261_vm0, %v178_v13 }
  0xe6   :  { %724 = vmatmul.mubr.f32.gmra.mxu0 %v149_v14  ;;  %2196 = vmatmul.mubr.msk.f32.gmra.mxu1 %vm261_vm0, %v181_v15 }
  0xe7   :  { %728 = vmatprep.mubr.f32.mxu0 %v153_v16  ;;  %2198 = vmatprep.mubr.msk.f32.mxu1 %vm261_vm0, %v184_v17 }
  0xea   :  { %729 = vmatmul.mubr.f32.gmra.mxu0 %v152_v18  ;;  %2199 = vmatmul.mubr.msk.f32.gmra.mxu1 %vm261_vm0, %v187_v19 }
  0xeb   :  { %733 = vmatprep.mubr.f32.mxu0 %v156_v20  ;;  %2201 = vmatprep.mubr.msk.f32.mxu1 %vm261_vm0, %v190_v21 }
  0xee   :  { %734 = vmatmul.mubr.f32.gmra.mxu0 %v155_v22  ;;  %2202 = vmatmul.mubr.msk.f32.gmra.mxu1 %vm261_vm0, %v193_v23 }
  0xef   :  { %738 = vmatprep.mubr.f32.mxu0 %v159_v24  ;;  %2204 = vmatprep.mubr.msk.f32.mxu1 %vm261_vm0, %v196_v25 }
  0xf2   :  { %739 = vmatmul.mubr.f32.gmra.mxu0 %v158_v26  ;;  %2205 = vmatmul.mubr.msk.f32.gmra.mxu1 %vm261_vm0, %v199_v27 }
  0xf3   :  { %743 = vmatprep.mubr.f32.mxu0 %v162_v28  ;;  %2207 = vmatprep.mubr.msk.f32.mxu1 %vm261_vm0, %v202_v29 }
  0xf6   :  { %744 = vmatmul.mubr.f32.gmra.mxu0 %v161_v30  ;;  %2208 = vmatmul.mubr.msk.f32.gmra.mxu1 %vm261_vm0, %v205_v31 }
  0xf7   :  { %748 = vmatprep.mubr.f32.mxu0 %v165_v32  ;;  %2210 = vmatprep.mubr.msk.f32.mxu1 %vm261_vm0, %v208_v33 }
  0xfa   :  { %749 = vmatmul.mubr.f32.gmra.mxu0 %v164_v34  ;;  %2211 = vmatmul.mubr.msk.f32.gmra.mxu1 %vm261_vm0, %v211_v35 }
  0xfb   :  { %753 = vmatprep.mubr.f32.mxu0 %v168_v36  ;;  %2213 = vmatprep.mubr.msk.f32.mxu1 %vm261_vm0, %v214_v37 }
  0xfe   :  { %754 = vmatmul.mubr.f32.gmra.mxu0 %v167_v38  ;;  %2214 = vmatmul.mubr.msk.f32.gmra.mxu1 %vm261_vm0, %v217_v39  ;;  %v3192_v39 = vld [vmem:[%s4893_s2] ss:$0 sm:$0xff] }
 0x102   :  { %v3127_v40 = vpop.f32.mrf.mxu0  ;;  %v3129_v41 = vpop.f32.mrf.mxu1 }
 0x104   :  { %v522_v42 = vpop.f32.mrf.mxu0  ;;  %v762_v43 = vpop.f32.mrf.mxu1 }
 0x106   :  { %v525_v44 = vpop.f32.mrf.mxu0  ;;  %v3131_v45 = vpop.f32.mrf.mxu1 }
 0x108   :  { %v527_v46 = vpop.f32.mrf.mxu0  ;;  %v767_v47 = vpop.f32.mrf.mxu1 }
 0x109   :  { %v526_v46 = vadd.f32 %v3192_v39, %v525_v44 }
 0x10a   :  { %v3133_v48 = vpop.f32.mrf.mxu0  ;;  %v3135_v49 = vpop.f32.mrf.mxu1 }
 0x10c   :  { %v532_v50 = vpop.f32.mrf.mxu0  ;;  %v772_v51 = vpop.f32.mrf.mxu1 }
 0x10d   :  { %v521_v51 = vadd.f32 %v3192_v39, %v3127_v40 }
 0x10e   :  { %v3137_v52 = vpop.f32.mrf.mxu0  ;;  %v3139_v53 = vpop.f32.mrf.mxu1 }
 0x110   :  { %v537_v54 = vpop.f32.mrf.mxu0  ;;  %v777_v55 = vpop.f32.mrf.mxu1 }
 0x112   :  { %v3141_v56 = vpop.f32.mrf.mxu0  ;;  %v3143_v57 = vpop.f32.mrf.mxu1 }
 0x114   :  { %v542_v58 = vpop.f32.mrf.mxu0  ;;  %v782_v59 = vpop.f32.mrf.mxu1 }
 0x116   :  { %v3145_v60 = vpop.f32.mrf.mxu0  ;;  %v3147_v61 = vpop.f32.mrf.mxu1 }
 0x118   :  { %v547_v62 = vpop.f32.mrf.mxu0  ;;  %v787_v63 = vpop.f32.mrf.mxu1 }
 0x119   :  { %v536_v62 = vadd.f32 %v3192_v39, %v3137_v52  ;;  %v546_v52 = vadd.f32 %v3192_v39, %v3145_v60 }
 0x11a   :  { %v3149_v1 = vpop.f32.mrf.mxu0  ;;  %v3151_v2 = vpop.f32.mrf.mxu1 }
 0x11c   :  { %v552_v3 = vpop.f32.mrf.mxu0  ;;  %v792_v4 = vpop.f32.mrf.mxu1 }
 0x11d   :  { %v531_v4 = vadd.f32 %v3192_v39, %v3133_v48  ;;  %v541_v48 = vadd.f32 %v3192_v39, %v3141_v56 }
 0x11e   :  { %v3153_v5 = vpop.f32.mrf.mxu0  ;;  %v3155_v6 = vpop.f32.mrf.mxu1 }
 0x120   :  { %v557_v7 = vpop.f32.mrf.mxu0  ;;  %v797_v8 = vpop.f32.mrf.mxu1 }
 0x122   :  { %v3157_v9 = vpop.f32.mrf.mxu0  ;;  %v3159_v10 = vpop.f32.mrf.mxu1 }
 0x124   :  { %v562_v11 = vpop.f32.mrf.mxu0  ;;  %v802_v12 = vpop.f32.mrf.mxu1 }
 0x126   :  { %v3161_v13 = vpop.f32.mrf.mxu0  ;;  %v3163_v14 = vpop.f32.mrf.mxu1 }
 0x128   :  { %v567_v15 = vpop.f32.mrf.mxu0  ;;  %v807_v16 = vpop.f32.mrf.mxu1 }
 0x12a   :  { %v3165_v17 = vpop.f32.mrf.mxu0  ;;  %v3167_v18 = vpop.f32.mrf.mxu1 }
 0x12c   :  { %v572_v19 = vpop.f32.mrf.mxu0  ;;  %v812_v20 = vpop.f32.mrf.mxu1 }
 0x12e   :  { %v3169_v21 = vpop.f32.mrf.mxu0  ;;  %v3171_v22 = vpop.f32.mrf.mxu1 }
 0x130   :  { %v577_v23 = vpop.f32.mrf.mxu0  ;;  %v817_v24 = vpop.f32.mrf.mxu1 }
 0x132   :  { %v3173_v25 = vpop.f32.mrf.mxu0  ;;  %v3175_v26 = vpop.f32.mrf.mxu1 }
 0x134   :  { %v582_v27 = vpop.f32.mrf.mxu0  ;;  %v822_v28 = vpop.f32.mrf.mxu1 }
 0x136   :  { %v3177_v29 = vpop.f32.mrf.mxu0  ;;  %v3179_v30 = vpop.f32.mrf.mxu1 }
 0x138   :  { %v587_v31 = vpop.f32.mrf.mxu0  ;;  %v827_v32 = vpop.f32.mrf.mxu1 }
 0x13a   :  { %v3181_v33 = vpop.f32.mrf.mxu0  ;;  %v3183_v34 = vpop.f32.mrf.mxu1 }
 0x13c   :  { %v592_v35 = vpop.f32.mrf.mxu0  ;;  %v832_v36 = vpop.f32.mrf.mxu1 }
 0x13e   :  { %v3185_v37 = vpop.f32.mrf.mxu0  ;;  %v3187_v38 = vpop.f32.mrf.mxu1 }
 0x140   :  { %v597_v42 = vpop.f32.mrf.mxu0  ;;  %v837_v43 = vpop.f32.mrf.mxu1 }
 0x142   :  { %v3195_v47 = vpop.f32.mrf.mxu0  ;;  %v2122_v50 = vpop.f32.mrf.mxu1 }
 0x143   :  { %v911_v54 = vadd.f32 %v2122_v50, %v526_v46 }
 0x144   :  { %v602_v55 = vpop.f32.mrf.mxu0  ;;  %v905_v58 = vpop.f32.mrf.mxu1 }
 0x145   :  { %1226 = vst.msk [vmem:[%s4894_s5 + $0x8] sm:$0xff] %vm1224_vm1, %v911_v54  ;;  %v906_v59 = vadd.f32 %v905_v58, %v521_v51  ;;  %v1428_v44 = vmul.f32 %v911_v54, %v911_v54  ;;  %v1291_v15 = vsel %vm1224_vm1, %v911_v54, 0.0  ;;  %v556_v51 = vadd.f32 %v3192_v39, %v3153_v5 }
 0x146   :  { %v3205_v63 = vpop.f32.mrf.mxu0  ;;  %v2125_v3 = vpop.f32.mrf.mxu1 }
 0x147   :  { %1225 = vst.msk [vmem:[%s4894_s5] sm:$0xff] %vm1224_vm1, %v906_v59  ;;  %v1290_v40 = vsel %vm1224_vm1, %v906_v59, 0.0  ;;  %v1427_v7 = vmul.f32 %v906_v59, %v906_v59  ;;  %v921_v8 = vadd.f32 %v2125_v3, %v536_v62  ;;  %v1492_v20 = vsel %vm1224_vm1, %v1428_v44, 0.0 }
 0x148   :  { %v607_v11 = vpop.f32.mrf.mxu0  ;;  %v915_v12 = vpop.f32.mrf.mxu1  ;;  %v1292_v23 = vadd.f32 %v1291_v15, %v1290_v40  ;;  %v551_v44 = vadd.f32 %v3192_v39, %v3149_v1 }
 0x149   :  { %v1491_v16 = vsel %vm1224_vm1, %v1427_v7, 0.0  ;;  %v916_v19 = vadd.f32 %v915_v12, %v531_v4  ;;  %1228 = vst.msk [vmem:[%s4894_s5 + $0x18] sm:$0xff] %vm1224_vm1, %v921_v8  ;;  %v1430_v60 = vmul.f32 %v921_v8, %v921_v8  ;;  %v1295_v43 = vsel %vm1224_vm1, %v921_v8, 0.0 }
 0x14a   :  { %v3225_v24 = vpop.f32.mrf.mxu0  ;;  %v2128_v27 = vpop.f32.mrf.mxu1  ;;  %v1493_v32 = vadd.f32 %v1492_v20, %v1491_v16 }
 0x14b   :  { %1227 = vst.msk [vmem:[%s4894_s5 + $0x10] sm:$0xff] %vm1224_vm1, %v916_v19  ;;  %v1293_v28 = vsel %vm1224_vm1, %v916_v19, 0.0  ;;  %v1429_v56 = vmul.f32 %v916_v19, %v916_v19  ;;  %v931_v31 = vadd.f32 %v2128_v27, %v546_v52  ;;  %v1496_v3 = vsel %vm1224_vm1, %v1430_v60, 0.0 }
 0x14c   :  { %v1294_v35 = vadd.f32 %v1293_v28, %v1292_v23  ;;  %v612_v36 = vpop.f32.mrf.mxu0  ;;  %v925_v42 = vpop.f32.mrf.mxu1  ;;  %v566_v52 = vadd.f32 %v3192_v39, %v3161_v13  ;;  %v561_v19 = vadd.f32 %v3192_v39, %v3157_v9 }
 0x14d   :  { %v1494_v46 = vsel %vm1224_vm1, %v1429_v56, 0.0  ;;  %1230 = vst.msk [vmem:[%s4894_s5 + $0x28] sm:$0xff] %vm1224_vm1, %v931_v31  ;;  %v926_v50 = vadd.f32 %v925_v42, %v541_v48  ;;  %v1432_v55 = vmul.f32 %v931_v31, %v931_v31  ;;  %v1299_v1 = vsel %vm1224_vm1, %v931_v31, 0.0 }
 0x14e   :  { %v1495_v54 = vadd.f32 %v1494_v46, %v1493_v32  ;;  %v1296_v58 = vadd.f32 %v1295_v43, %v1294_v35  ;;  %v3240_v59 = vpop.f32.mrf.mxu0  ;;  %v2131_v62 = vpop.f32.mrf.mxu1 }
 0x14f   :  { %1229 = vst.msk [vmem:[%s4894_s5 + $0x20] sm:$0xff] %vm1224_vm1, %v926_v50  ;;  %v1297_v4 = vsel %vm1224_vm1, %v926_v50, 0.0  ;;  %v1431_v40 = vmul.f32 %v926_v50, %v926_v50  ;;  %v941_v8 = vadd.f32 %v2131_v62, %v556_v51  ;;  %v1500_v48 = vsel %vm1224_vm1, %v1432_v55, 0.0 }
 0x150   :  { %v1298_v5 = vadd.f32 %v1297_v4, %v1296_v58  ;;  %v1497_v7 = vadd.f32 %v1496_v3, %v1495_v54  ;;  %v617_v11 = vpop.f32.mrf.mxu0  ;;  %v935_v12 = vpop.f32.mrf.mxu1  ;;  %v576_v50 = vadd.f32 %v3192_v39, %v3169_v21 }
 0x151   :  { %v1498_v15 = vsel %vm1224_vm1, %v1431_v40, 0.0  ;;  %v936_v16 = vadd.f32 %v935_v12, %v551_v44  ;;  %1232 = vst.msk [vmem:[%s4894_s5 + $0x38] sm:$0xff] %vm1224_vm1, %v941_v8  ;;  %v1434_v60 = vmul.f32 %v941_v8, %v941_v8  ;;  %v1303_v42 = vsel %vm1224_vm1, %v941_v8, 0.0 }
 0x152   :  { %v1499_v20 = vadd.f32 %v1498_v15, %v1497_v7  ;;  %v1300_v23 = vadd.f32 %v1299_v1, %v1298_v5  ;;  %v3261_v27 = vpop.f32.mrf.mxu0  ;;  %v2134_v13 = vpop.f32.mrf.mxu1  ;;  %v571_v44 = vadd.f32 %v3192_v39, %v3165_v17  ;;  %v586_v11 = vadd.f32 %v3192_v39, %v3177_v29 }
 0x153   :  { %1231 = vst.msk [vmem:[%s4894_s5 + $0x30] sm:$0xff] %vm1224_vm1, %v936_v16  ;;  %v1301_v9 = vsel %vm1224_vm1, %v936_v16, 0.0  ;;  %v1433_v28 = vmul.f32 %v936_v16, %v936_v16  ;;  %v951_v56 = vadd.f32 %v2134_v13, %v566_v52  ;;  %v1504_v3 = vsel %vm1224_vm1, %v1434_v60, 0.0 }
 0x154   :  { %v1302_v31 = vadd.f32 %v1301_v9, %v1300_v23  ;;  %v1501_v32 = vadd.f32 %v1500_v48, %v1499_v20  ;;  %v622_v35 = vpop.f32.mrf.mxu0  ;;  %v945_v36 = vpop.f32.mrf.mxu1  ;;  %v581_v1 = vadd.f32 %v3192_v39, %v3173_v25 }
 0x155   :  { %v1502_v43 = vsel %vm1224_vm1, %v1433_v28, 0.0  ;;  %1234 = vst.msk [vmem:[%s4894_s5 + $0x48] sm:$0xff] %vm1224_vm1, %v951_v56  ;;  %v946_v46 = vadd.f32 %v945_v36, %v561_v19  ;;  %v1436_v54 = vmul.f32 %v951_v56, %v951_v56  ;;  %v1307_v17 = vsel %vm1224_vm1, %v951_v56, 0.0 }
 0x156   :  { %v1503_v51 = vadd.f32 %v1502_v43, %v1501_v32  ;;  %v1304_v55 = vadd.f32 %v1303_v42, %v1302_v31  ;;  %v3277_v58 = vpop.f32.mrf.mxu0  ;;  %v2137_v62 = vpop.f32.mrf.mxu1  ;;  %v596_v36 = vadd.f32 %v3192_v39, %v3185_v37 }
 0x157   :  { %1233 = vst.msk [vmem:[%s4894_s5 + $0x40] sm:$0xff] %vm1224_vm1, %v946_v46  ;;  %v1305_v0 = vsel %vm1224_vm1, %v946_v46, 0.0  ;;  %v1435_v4 = vmul.f32 %v946_v46, %v946_v46  ;;  %v961_v5 = vadd.f32 %v2137_v62, %v576_v50  ;;  %v1508_v15 = vsel %vm1224_vm1, %v1436_v54, 0.0 }
 0x158   :  { %v1306_v21 = vadd.f32 %v1305_v0, %v1304_v55  ;;  %v1505_v40 = vadd.f32 %v1504_v3, %v1503_v51  ;;  %v627_v7 = vpop.f32.mrf.mxu0  ;;  %v955_v8 = vpop.f32.mrf.mxu1  ;;  %v591_v54 = vadd.f32 %v3192_v39, %v3181_v33 }
 0x159   :  { %v1506_v12 = vsel %vm1224_vm1, %v1435_v4, 0.0  ;;  %v956_v52 = vadd.f32 %v955_v8, %v571_v44  ;;  %1236 = vst.msk [vmem:[%s4894_s5 + $0x58] sm:$0xff] %vm1224_vm1, %v961_v5  ;;  %v1438_v20 = vmul.f32 %v961_v5, %v961_v5  ;;  %v1311_v31 = vsel %vm1224_vm1, %v961_v5, 0.0 }
 0x15a   :  { %v1507_v16 = vadd.f32 %v1506_v12, %v1505_v40  ;;  %v1308_v19 = vadd.f32 %v1307_v17, %v1306_v21  ;;  %v3298_v48 = vpop.f32.mrf.mxu0  ;;  %v2140_v29 = vpop.f32.mrf.mxu1  ;;  %v606_v40 = vadd.f32 %v3192_v39, %v3205_v63  ;;  %v601_v8 = vadd.f32 %v3192_v39, %v3195_v47 }
 0x15b   :  { %1235 = vst.msk [vmem:[%s4894_s5 + $0x50] sm:$0xff] %vm1224_vm1, %v956_v52  ;;  %v1309_v25 = vsel %vm1224_vm1, %v956_v52, 0.0  ;;  %v1437_v23 = vmul.f32 %v956_v52, %v956_v52  ;;  %v971_v13 = vadd.f32 %v2140_v29, %v586_v11  ;;  %v1512_v55 = vsel %vm1224_vm1, %v1438_v20, 0.0 }
 0x15c   :  { %v1310_v60 = vadd.f32 %v1309_v25, %v1308_v19  ;;  %v1509_v9 = vadd.f32 %v1508_v15, %v1507_v16  ;;  %v632_v28 = vpop.f32.mrf.mxu0  ;;  %v965_v56 = vpop.f32.mrf.mxu1 }
 0x15d   :  { %v1510_v32 = vsel %vm1224_vm1, %v1437_v23, 0.0  ;;  %1238 = vst.msk [vmem:[%s4894_s5 + $0x68] sm:$0xff] %vm1224_vm1, %v971_v13  ;;  %v966_v35 = vadd.f32 %v965_v56, %v581_v1  ;;  %v1440_v43 = vmul.f32 %v971_v13, %v971_v13  ;;  %v1315_v33 = vsel %vm1224_vm1, %v971_v13, 0.0 }
 0x15e   :  { %v1511_v42 = vadd.f32 %v1510_v32, %v1509_v9  ;;  %v1312_v46 = vadd.f32 %v1311_v31, %v1310_v60  ;;  %v3313_v50 = vpop.f32.mrf.mxu0  ;;  %v2143_v51 = vpop.f32.mrf.mxu1  ;;  %v611_v9 = vadd.f32 %v3192_v39, %v3225_v24  ;;  %v616_v28 = vadd.f32 %v3192_v39, %v3240_v59 }
 0x15f   :  { %1237 = vst.msk [vmem:[%s4894_s5 + $0x60] sm:$0xff] %vm1224_vm1, %v966_v35  ;;  %v1313_v62 = vsel %vm1224_vm1, %v966_v35, 0.0  ;;  %v1439_v44 = vmul.f32 %v966_v35, %v966_v35  ;;  %v981_v0 = vadd.f32 %v2143_v51, %v596_v36  ;;  %v1516_v11 = vsel %vm1224_vm1, %v1440_v43, 0.0 }
 0x160   :  { %v1314_v37 = vadd.f32 %v1313_v62, %v1312_v46  ;;  %v1513_v3 = vadd.f32 %v1512_v55, %v1511_v42  ;;  %v637_v4 = vpop.f32.mrf.mxu0  ;;  %v975_v21 = vpop.f32.mrf.mxu1  ;;  %v626_v62 = vadd.f32 %v3192_v39, %v3277_v58 }
 0x161   :  { %v1514_v5 = vsel %vm1224_vm1, %v1439_v44, 0.0  ;;  %v976_v7 = vadd.f32 %v975_v21, %v591_v54  ;;  %1240 = vst.msk [vmem:[%s4894_s5 + $0x78] sm:$0xff] %vm1224_vm1, %v981_v0  ;;  %v1442_v1 = vmul.f32 %v981_v0, %v981_v0  ;;  %v1319_v23 = vsel %vm1224_vm1, %v981_v0, 0.0 }
 0x162   :  { %v1515_v17 = vadd.f32 %v1514_v5, %v1513_v3  ;;  %v1316_v12 = vadd.f32 %v1315_v33, %v1314_v37  ;;  %v3334_v52 = vpop.f32.mrf.mxu0  ;;  %v2146_v63 = vpop.f32.mrf.mxu1  ;;  %v621_v0 = vadd.f32 %v3192_v39, %v3261_v27 }
 0x163   :  { %1239 = vst.msk [vmem:[%s4894_s5 + $0x70] sm:$0xff] %vm1224_vm1, %v976_v7  ;;  %v1317_v47 = vsel %vm1224_vm1, %v976_v7, 0.0  ;;  %v1441_v15 = vmul.f32 %v976_v7, %v976_v7  ;;  %v991_v16 = vadd.f32 %v2146_v63, %v606_v40  ;;  %v1520_v36 = vsel %vm1224_vm1, %v1442_v1, 0.0 }
 0x164   :  { %v1318_v19 = vadd.f32 %v1317_v47, %v1316_v12  ;;  %v1517_v29 = vadd.f32 %v1516_v11, %v1515_v17  ;;  %v642_v20 = vpop.f32.mrf.mxu0  ;;  %v985_v25 = vpop.f32.mrf.mxu1 }
 0x165   :  { %v1518_v13 = vsel %vm1224_vm1, %v1441_v15, 0.0  ;;  %1242 = vst.msk [vmem:[%s4894_s5 + $0x88] sm:$0xff] %vm1224_vm1, %v991_v16  ;;  %v986_v60 = vadd.f32 %v985_v25, %v601_v8  ;;  %v1444_v42 = vmul.f32 %v991_v16, %v991_v16  ;;  %v1323_v44 = vsel %vm1224_vm1, %v991_v16, 0.0 }
 0x166   :  { %v1519_v56 = vadd.f32 %v1518_v13, %v1517_v29  ;;  %v1320_v31 = vadd.f32 %v1319_v23, %v1318_v19  ;;  %v645_v32 = vpop.f32.mrf.mxu0  ;;  %v2149_v35 = vpop.f32.mrf.mxu1  ;;  %v636_v15 = vadd.f32 %v3192_v39, %v3313_v50  ;;  %v631_v20 = vadd.f32 %v3192_v39, %v3298_v48 }
 0x167   :  { %1241 = vst.msk [vmem:[%s4894_s5 + $0x80] sm:$0xff] %vm1224_vm1, %v986_v60  ;;  %v1321_v43 = vsel %vm1224_vm1, %v986_v60, 0.0  ;;  %v1443_v46 = vmul.f32 %v986_v60, %v986_v60  ;;  %v1001_v54 = vadd.f32 %v2149_v35, %v616_v28  ;;  %v1524_v5 = vsel %vm1224_vm1, %v1444_v42, 0.0 }
 0x168   :  { %v1322_v51 = vadd.f32 %v1321_v43, %v1320_v31  ;;  %v1521_v24 = vadd.f32 %v1520_v36, %v1519_v56  ;;  %v647_v55 = vpop.f32.mrf.mxu0  ;;  %v995_v59 = vpop.f32.mrf.mxu1  ;;  %v646_v50 = vadd.f32 %v3192_v39, %v645_v32  ;;  %v641_v43 = vadd.f32 %v3192_v39, %v3334_v52 }
 0x169   :  { %v1522_v37 = vsel %vm1224_vm1, %v1443_v46, 0.0  ;;  %v996_v3 = vadd.f32 %v995_v59, %v611_v9  ;;  %1244 = vst.msk [vmem:[%s4894_s5 + $0x98] sm:$0xff] %vm1224_vm1, %v1001_v54  ;;  %v1446_v63 = vmul.f32 %v1001_v54, %v1001_v54  ;;  %v1327_v25 = vsel %vm1224_vm1, %v1001_v54, 0.0 }
 0x16a   :  { %v1523_v4 = vadd.f32 %v1522_v37, %v1521_v24  ;;  %v1324_v21 = vadd.f32 %v1323_v44, %v1322_v51  ;;  %v650_v40 = vpop.f32.mrf.mxu0  ;;  %v2152_v33 = vpop.f32.mrf.mxu1 }
 0x16b   :  { %1243 = vst.msk [vmem:[%s4894_s5 + $0x90] sm:$0xff] %vm1224_vm1, %v996_v3  ;;  %v1325_v58 = vsel %vm1224_vm1, %v996_v3, 0.0  ;;  %v1445_v7 = vmul.f32 %v996_v3, %v996_v3  ;;  %v1011_v27 = vadd.f32 %v2152_v33, %v626_v62  ;;  %v1528_v56 = vsel %vm1224_vm1, %v1446_v63, 0.0 }
 0x16c   :  { %v1326_v8 = vadd.f32 %v1325_v58, %v1324_v21  ;;  %v1525_v11 = vadd.f32 %v1524_v5, %v1523_v4  ;;  %v652_v17 = vpop.f32.mrf.mxu0  ;;  %v1005_v12 = vpop.f32.mrf.mxu1  ;;  %v651_v3 = vadd.f32 %v3192_v39, %v650_v40 }
 0x16d   :  { %v1526_v1 = vsel %vm1224_vm1, %v1445_v7, 0.0  ;;  %1246 = vst.msk [vmem:[%s4894_s5 + $0xa8] sm:$0xff] %vm1224_vm1, %v1011_v27  ;;  %v1006_v47 = vadd.f32 %v1005_v12, %v621_v0  ;;  %v1448_v55 = vmul.f32 %v1011_v27, %v1011_v27  ;;  %v1331_v0 = vsel %vm1224_vm1, %v1011_v27, 0.0 }
 0x16e   :  { %v1527_v16 = vadd.f32 %v1526_v1, %v1525_v11  ;;  %v655_v19 = vpop.f32.mrf.mxu0  ;;  %v2155_v29 = vpop.f32.mrf.mxu1  ;;  %v1328_v13 = vadd.f32 %v1327_v25, %v1326_v8 }
 0x16f   :  { %1245 = vst.msk [vmem:[%s4894_s5 + $0xa0] sm:$0xff] %vm1224_vm1, %v1006_v47  ;;  %v1447_v23 = vmul.f32 %v1006_v47, %v1006_v47  ;;  %v1021_v60 = vadd.f32 %v2155_v29, %v636_v15  ;;  %v1329_v31 = vsel %vm1224_vm1, %v1006_v47, 0.0  ;;  %v656_v62 = vadd.f32 %v3192_v39, %v655_v19 }
 0x170   :  { %v657_v9 = vpop.f32.mrf.mxu0  ;;  %v1015_v28 = vpop.f32.mrf.mxu1  ;;  %v1529_v48 = vadd.f32 %v1528_v56, %v1527_v16  ;;  %v1330_v51 = vadd.f32 %v1329_v31, %v1328_v13  ;;  %v1532_v7 = vsel %vm1224_vm1, %v1448_v55, 0.0 }
 0x171   :  { %v1016_v35 = vadd.f32 %v1015_v28, %v631_v20  ;;  %1248 = vst.msk [vmem:[%s4894_s5 + $0xb8] sm:$0xff] %vm1224_vm1, %v1021_v60  ;;  %v1530_v46 = vsel %vm1224_vm1, %v1447_v23, 0.0  ;;  %v1450_v29 = vmul.f32 %v1021_v60, %v1021_v60  ;;  %v1335_v9 = vsel %vm1224_vm1, %v1021_v60, 0.0 }
 0x172   :  { %v660_v36 = vpop.f32.mrf.mxu0  ;;  %v2158_v42 = vpop.f32.mrf.mxu1  ;;  %v1531_v59 = vadd.f32 %v1530_v46, %v1529_v48  ;;  %v1332_v21 = vadd.f32 %v1331_v0, %v1330_v51 }
 0x173   :  { %1247 = vst.msk [vmem:[%s4894_s5 + $0xb0] sm:$0xff] %vm1224_vm1, %v1016_v35  ;;  %v3401_v32 = vadd.f32 %v2158_v42, %v646_v50  ;;  %v1449_v4 = vmul.f32 %v1016_v35, %v1016_v35  ;;  %v1333_v8 = vsel %vm1224_vm1, %v1016_v35, 0.0  ;;  %v661_v1 = vadd.f32 %v3192_v39, %v660_v36 }
 0x174   :  { %v662_v24 = vpop.f32.mrf.mxu0  ;;  %v1025_v54 = vpop.f32.mrf.mxu1  ;;  %v1533_v17 = vadd.f32 %v1532_v7, %v1531_v59  ;;  %v1334_v15 = vadd.f32 %v1333_v8, %v1332_v21  ;;  %v1536_v36 = vsel %vm1224_vm1, %v1450_v29, 0.0 }
 0x175   :  { %1250 = vst.msk [vmem:[%s4894_s5 + $0xc8] sm:$0xff] %vm1224_vm1, %v3401_v32  ;;  %v1026_v52 = vadd.f32 %v1025_v54, %v641_v43  ;;  %v1534_v63 = vsel %vm1224_vm1, %v1449_v4, 0.0  ;;  %v1339_v21 = vsel %vm1224_vm1, %v3401_v32, 0.0 }
 0x176   :  { %v665_v44 = vpop.f32.mrf.mxu0  ;;  %v2161_v37 = vpop.f32.mrf.mxu1  ;;  %v1535_v25 = vadd.f32 %v1534_v63, %v1533_v17  ;;  %v1336_v31 = vadd.f32 %v1335_v9, %v1334_v15 }
 0x177   :  { %1249 = vst.msk [vmem:[%s4894_s5 + $0xc0] sm:$0xff] %vm1224_vm1, %v1026_v52  ;;  %v3415_v33 = vadd.f32 %v2161_v37, %v656_v62  ;;  %v666_v11 = vadd.f32 %v3192_v39, %v665_v44  ;;  %v1451_v28 = vmul.f32 %v1026_v52, %v1026_v52  ;;  %v1337_v42 = vsel %vm1224_vm1, %v1026_v52, 0.0 }
 0x178   :  { %v667_v5 = vpop.f32.mrf.mxu0  ;;  %v1035_v58 = vpop.f32.mrf.mxu1  ;;  %v1537_v46 = vadd.f32 %v1536_v36, %v1535_v25  ;;  %v1338_v55 = vadd.f32 %v1337_v42, %v1336_v31  ;;  %v1452_v44 = vmul.f32 %v3401_v32, %v3401_v32 }
 0x179   :  { %v1036_v40 = vadd.f32 %v1035_v58, %v651_v3  ;;  %1252 = vst.msk [vmem:[%s4894_s5 + $0xd8] sm:$0xff] %vm1224_vm1, %v3415_v33  ;;  %v1538_v54 = vsel %vm1224_vm1, %v1451_v28, 0.0 }
 0x17a   :  { %v670_v27 = vpop.f32.mrf.mxu0  ;;  %v2164_v12 = vpop.f32.mrf.mxu1  ;;  %v1539_v37 = vadd.f32 %v1538_v54, %v1537_v46  ;;  %v1340_v7 = vadd.f32 %v1339_v21, %v1338_v55  ;;  %v1540_v17 = vsel %vm1224_vm1, %v1452_v44, 0.0 }
 0x17b   :  { %1251 = vst.msk [vmem:[%s4894_s5 + $0xd0] sm:$0xff] %vm1224_vm1, %v1036_v40  ;;  %v3431_v47 = vadd.f32 %v2164_v12, %v666_v11  ;;  %v671_v50 = vadd.f32 %v3192_v39, %v670_v27  ;;  %v1453_v5 = vmul.f32 %v1036_v40, %v1036_v40  ;;  %v1341_v27 = vsel %vm1224_vm1, %v1036_v40, 0.0 }
 0x17c   :  { %v672_v16 = vpop.f32.mrf.mxu0  ;;  %v1045_v19 = vpop.f32.mrf.mxu1  ;;  %v1541_v63 = vadd.f32 %v1540_v17, %v1539_v37  ;;  %v1454_v40 = vmul.f32 %v3415_v33, %v3415_v33 }
 0x17d   :  { %1254 = vst.msk [vmem:[%s4894_s5 + $0xe8] sm:$0xff] %vm1224_vm1, %v3431_v47  ;;  %v3438_v20 = vadd.f32 %v1045_v19, %v661_v1  ;;  %v1542_v15 = vsel %vm1224_vm1, %v1453_v5, 0.0  ;;  %v1342_v19 = vadd.f32 %v1341_v27, %v1340_v7  ;;  %v1347_v5 = vsel %vm1224_vm1, %v3431_v47, 0.0 }
 0x17e   :  { %v675_v23 = vpop.f32.mrf.mxu0  ;;  %v2167_v13 = vpop.f32.mrf.mxu1  ;;  %v1544_v42 = vsel %vm1224_vm1, %v1454_v40, 0.0 }
 0x17f   :  { %1253 = vst.msk [vmem:[%s4894_s5 + $0xe0] sm:$0xff] %vm1224_vm1, %v3438_v20  ;;  %v676_v56 = vadd.f32 %v3192_v39, %v675_v23  ;;  %v1345_v46 = vsel %vm1224_vm1, %v3438_v20, 0.0 }
 0x180   :  { %v677_v35 = vpop.f32.mrf.mxu0  ;;  %v1055_v48 = vpop.f32.mrf.mxu1 }
 0x181   :  { %v3450_v43 = vadd.f32 %v2167_v13, %v676_v56  ;;  %v3452_v60 = vadd.f32 %v1055_v48, %v671_v50  ;;  %v1543_v13 = vadd.f32 %v1542_v15, %v1541_v63  ;;  %v1343_v50 = vsel %vm1224_vm1, %v3415_v33, 0.0 }
 0x182   :  { %v680_v51 = vpop.f32.mrf.mxu0  ;;  %v2170_v24 = vpop.f32.mrf.mxu1  ;;  %v1455_v56 = vmul.f32 %v3438_v20, %v3438_v20  ;;  %v1344_v35 = vadd.f32 %v1343_v50, %v1342_v19  ;;  %v1456_v20 = vmul.f32 %v3431_v47, %v3431_v47 }
 0x183   :  { %1256 = vst.msk [vmem:[%s4894_s5 + $0xf8] sm:$0xff] %vm1224_vm1, %v3450_v43  ;;  %1255 = vst.msk [vmem:[%s4894_s5 + $0xf0] sm:$0xff] %vm1224_vm1, %v3452_v60  ;;  %v681_v52 = vadd.f32 %v3192_v39, %v680_v51  ;;  %v1545_v51 = vadd.f32 %v1544_v42, %v1543_v13  ;;  %v1349_v47 = vsel %vm1224_vm1, %v3452_v60, 0.0 }
 0x184   :  { %v682_v59 = vpop.f32.mrf.mxu0  ;;  %v1065_v62 = vpop.f32.mrf.mxu1  ;;  %v1546_v55 = vsel %vm1224_vm1, %v1455_v56, 0.0  ;;  %v1548_v27 = vsel %vm1224_vm1, %v1456_v20, 0.0 }
 0x185   :  { %v3468_v3 = vadd.f32 %v1065_v62, %v681_v52  ;;  %v1346_v59 = vadd.f32 %v1345_v46, %v1344_v35  ;;  %v1351_v35 = vsel %vm1224_vm1, %v3450_v43, 0.0 }
 0x186   :  { %v685_v0 = vpop.f32.mrf.mxu0  ;;  %v2173_v4 = vpop.f32.mrf.mxu1 }
 0x187   :  { %v686_v58 = vadd.f32 %v3192_v39, %v685_v0  ;;  %1257 = vst.msk [vmem:[%s4894_s5 + $0x100] sm:$0xff] %vm1224_vm1, %v3468_v3  ;;  %v1547_v0 = vadd.f32 %v1546_v55, %v1545_v51  ;;  %v1459_v50 = vmul.f32 %v3468_v3, %v3468_v3 }
 0x188   :  { %v687_v8 = vpop.f32.mrf.mxu0  ;;  %v1075_v11 = vpop.f32.mrf.mxu1 }
 0x189   :  { %v3480_v12 = vadd.f32 %v2170_v24, %v686_v58  ;;  %v1457_v58 = vmul.f32 %v3452_v60, %v3452_v60  ;;  %v1348_v8 = vadd.f32 %v1347_v5, %v1346_v59  ;;  %v1458_v60 = vmul.f32 %v3450_v43, %v3450_v43 }
 0x18a   :  { %v690_v32 = vpop.f32.mrf.mxu0  ;;  %v2176_v1 = vpop.f32.mrf.mxu1  ;;  %v1353_v43 = vsel %vm1224_vm1, %v3468_v3, 0.0  ;;  %v761_v5 = vadd.f32 %v3192_v39, %v3129_v41  ;;  %v776_v41 = vadd.f32 %v3192_v39, %v3139_v53 }
 0x18b   :  { %1258 = vst.msk [vmem:[%s4894_s5 + $0x108] sm:$0xff] %vm1224_vm1, %v3480_v12  ;;  %v691_v16 = vadd.f32 %v3192_v39, %v690_v32  ;;  %v1549_v32 = vadd.f32 %v1548_v27, %v1547_v0  ;;  %v1550_v19 = vsel %vm1224_vm1, %v1457_v58, 0.0  ;;  %v1460_v55 = vmul.f32 %v3480_v12, %v3480_v12 }
 0x18c   :  { %v692_v29 = vpop.f32.mrf.mxu0  ;;  %v1085_v25 = vpop.f32.mrf.mxu1 }
 0x18d   :  { %v3491_v23 = vadd.f32 %v1075_v11, %v691_v16 }
 0x18e   :  { %v695_v9 = vpop.f32.mrf.mxu0  ;;  %v2179_v28 = vpop.f32.mrf.mxu1 }
 0x18f   :  { %1259 = vst.msk [vmem:[%s4894_s5 + $0x110] sm:$0xff] %vm1224_vm1, %v3491_v23  ;;  %v696_v31 = vadd.f32 %v3192_v39, %v695_v9  ;;  %v1551_v9 = vadd.f32 %v1550_v19, %v1549_v32 }
 0x190   :  { %v697_v48 = vpop.f32.mrf.mxu0  ;;  %v1095_v36 = vpop.f32.mrf.mxu1 }
 0x191   :  { %v3506_v33 = vadd.f32 %v2173_v4, %v696_v31 }
 0x192   :  { %v700_v24 = vpop.f32.mrf.mxu0  ;;  %v3508_v54 = vpop.f32.mrf.mxu1 }
 0x193   :  { %1260 = vst.msk [vmem:[%s4894_s5 + $0x118] sm:$0xff] %vm1224_vm1, %v3506_v33  ;;  %v701_v52 = vadd.f32 %v3192_v39, %v700_v24  ;;  %v1552_v24 = vsel %vm1224_vm1, %v1458_v60, 0.0  ;;  %v1462_v27 = vmul.f32 %v3506_v33, %v3506_v33 }
 0x194   :  { %v702_v62 = vpop.f32.mrf.mxu0  ;;  %v1105_v44 = vpop.f32.mrf.mxu1  ;;  %v1553_v59 = vadd.f32 %v1552_v24, %v1551_v9  ;;  %v786_v24 = vadd.f32 %v3192_v39, %v3147_v61 }
 0x195   :  { %v3519_v37 = vadd.f32 %v1085_v25, %v701_v52  ;;  %v1350_v25 = vadd.f32 %v1349_v47, %v1348_v8  ;;  %v1554_v62 = vsel %vm1224_vm1, %v1459_v50, 0.0  ;;  %v1359_v50 = vsel %vm1224_vm1, %v3506_v33, 0.0 }
 0x196   :  { %v705_v4 = vpop.f32.mrf.mxu0  ;;  %v3521_v21 = vpop.f32.mrf.mxu1  ;;  %v1555_v32 = vadd.f32 %v1554_v62, %v1553_v59  ;;  %v781_v33 = vadd.f32 %v3192_v39, %v3143_v57  ;;  %v796_v62 = vadd.f32 %v3192_v39, %v3155_v6 }
 0x197   :  { %1261 = vst.msk [vmem:[%s4894_s5 + $0x120] sm:$0xff] %vm1224_vm1, %v3519_v37  ;;  %v706_v7 = vadd.f32 %v3192_v39, %v705_v4  ;;  %v1352_v42 = vadd.f32 %v1351_v35, %v1350_v25  ;;  %v1461_v4 = vmul.f32 %v3491_v23, %v3491_v23  ;;  %v771_v25 = vadd.f32 %v3192_v39, %v3135_v49 }
 0x198   :  { %v707_v11 = vpop.f32.mrf.mxu0  ;;  %v3533_v17 = vpop.f32.mrf.mxu1 }
 0x199   :  { %v3538_v63 = vadd.f32 %v2176_v1, %v706_v7  ;;  %v1354_v58 = vadd.f32 %v1353_v43, %v1352_v42  ;;  %v1357_v11 = vsel %vm1224_vm1, %v3491_v23, 0.0 }
 0x19a   :  { %v710_v15 = vpop.f32.mrf.mxu0  ;;  %v3540_v16 = vpop.f32.mrf.mxu1 }
 0x19b   :  { %1262 = vst.msk [vmem:[%s4894_s5 + $0x128] sm:$0xff] %vm1224_vm1, %v3538_v63  ;;  %v711_v29 = vadd.f32 %v3192_v39, %v710_v15  ;;  %v1363_v6 = vsel %vm1224_vm1, %v3538_v63, 0.0 }
 0x19c   :  { %v712_v40 = vpop.f32.mrf.mxu0  ;;  %v3549_v13 = vpop.f32.mrf.mxu1 }
 0x19d   :  { %v3553_v1 = vadd.f32 %v1095_v36, %v711_v29  ;;  %v766_v36 = vadd.f32 %v3192_v39, %v3131_v45  ;;  %v1355_v45 = vsel %vm1224_vm1, %v3480_v12, 0.0  ;;  %v1556_v12 = vsel %vm1224_vm1, %v1460_v55, 0.0 }
 0x19e   :  { %v715_v56 = vpop.f32.mrf.mxu0  ;;  %v3557_v31 = vpop.f32.mrf.mxu1  ;;  %v1356_v15 = vadd.f32 %v1355_v45, %v1354_v58  ;;  %v1463_v40 = vmul.f32 %v3519_v37, %v3519_v37  ;;  %v1557_v60 = vadd.f32 %v1556_v12, %v1555_v32  ;;  %v1361_v55 = vsel %vm1224_vm1, %v3519_v37, 0.0 }
 0x19f   :  { %1263 = vst.msk [vmem:[%s4894_s5 + $0x130] sm:$0xff] %vm1224_vm1, %v3553_v1  ;;  %v716_v48 = vadd.f32 %v3192_v39, %v715_v56  ;;  %v1465_v61 = vmul.f32 %v3553_v1, %v3553_v1 }
 0x1a0   :  { %v717_v46 = vpop.f32.mrf.mxu0  ;;  %v3569_v51 = vpop.f32.mrf.mxu1  ;;  %v1358_v9 = vadd.f32 %v1357_v11, %v1356_v15  ;;  %v1562_v57 = vsel %vm1224_vm1, %v1463_v40, 0.0  ;;  %v1365_v11 = vsel %vm1224_vm1, %v3553_v1, 0.0 }
 0x1a1   :  { %v3576_v52 = vadd.f32 %v2179_v28, %v716_v48  ;;  %v1560_v48 = vsel %vm1224_vm1, %v1462_v27, 0.0  ;;  %v1566_v15 = vsel %vm1224_vm1, %v1465_v61, 0.0 }
 0x1a2   :  { %v720_v20 = vpop.f32.mrf.mxu0  ;;  %v2194_v0 = vpop.f32.mrf.mxu1 }
 0x1a3   :  { %1264 = vst.msk [vmem:[%s4894_s5 + $0x138] sm:$0xff] %vm1224_vm1, %v3576_v52  ;;  %v721_v3 = vadd.f32 %v3192_v39, %v720_v20  ;;  %v3589_v28 = vadd.f32 %v2194_v0, %v766_v36  ;;  %v1464_v36 = vmul.f32 %v3538_v63, %v3538_v63  ;;  %v1360_v20 = vadd.f32 %v1359_v50, %v1358_v9 }
 0x1a4   :  { %v722_v7 = vpop.f32.mrf.mxu0  ;;  %v1145_v8 = vpop.f32.mrf.mxu1 }
 0x1a5   :  { %v3598_v47 = vadd.f32 %v1105_v44, %v721_v3  ;;  %1274 = vst.msk [vmem:[%s4894_s5 + $0x188] sm:$0xff] %vm1224_vm1, %v3589_v28  ;;  %v3607_v19 = vadd.f32 %v1145_v8, %v761_v5  ;;  %v1558_v44 = vsel %vm1224_vm1, %v1461_v4, 0.0  ;;  %v1362_v5 = vadd.f32 %v1361_v55, %v1360_v20 }
 0x1a6   :  { %v725_v29 = vpop.f32.mrf.mxu0  ;;  %v2197_v23 = vpop.f32.mrf.mxu1  ;;  %v1559_v43 = vadd.f32 %v1558_v44, %v1557_v60  ;;  %v1564_v58 = vsel %vm1224_vm1, %v1464_v36, 0.0  ;;  %v1466_v7 = vmul.f32 %v3576_v52, %v3576_v52 }
 0x1a7   :  { %1265 = vst.msk [vmem:[%s4894_s5 + $0x140] sm:$0xff] %vm1224_vm1, %v3598_v47  ;;  %v726_v53 = vadd.f32 %v3192_v39, %v725_v29  ;;  %1273 = vst.msk [vmem:[%s4894_s5 + $0x180] sm:$0xff] %vm1224_vm1, %v3607_v19  ;;  %v3627_v49 = vadd.f32 %v2197_v23, %v776_v41  ;;  %v1364_v32 = vadd.f32 %v1363_v6, %v1362_v5 }
 0x1a8   :  { %v727_v56 = vpop.f32.mrf.mxu0  ;;  %v1155_v35 = vpop.f32.mrf.mxu1  ;;  %v1561_v37 = vadd.f32 %v1560_v48, %v1559_v43  ;;  %v791_v29 = vadd.f32 %v3192_v39, %v3151_v2  ;;  %v1467_v44 = vmul.f32 %v3598_v47, %v3598_v47  ;;  %v1568_v9 = vsel %vm1224_vm1, %v1466_v7, 0.0 }
 0x1a9   :  { %v1111_v42 = vadd.f32 %v3508_v54, %v726_v53  ;;  %v3633_v46 = vadd.f32 %v1155_v35, %v771_v25  ;;  %1276 = vst.msk [vmem:[%s4894_s5 + $0x198] sm:$0xff] %vm1224_vm1, %v3627_v49  ;;  %v1367_v25 = vsel %vm1224_vm1, %v3576_v52, 0.0  ;;  %v1366_v60 = vadd.f32 %v1365_v11, %v1364_v32 }
 0x1aa   :  { %v730_v59 = vpop.f32.mrf.mxu0  ;;  %v2200_v54 = vpop.f32.mrf.mxu1  ;;  %v1563_v12 = vadd.f32 %v1562_v57, %v1561_v37  ;;  %v1369_v52 = vsel %vm1224_vm1, %v3598_v47, 0.0  ;;  %v1570_v55 = vsel %vm1224_vm1, %v1467_v44, 0.0  ;;  %v816_v5 = vadd.f32 %v3192_v39, %v3171_v22 }
 0x1ab   :  { %1266 = vst.msk [vmem:[%s4894_s5 + $0x148] sm:$0xff] %vm1224_vm1, %v1111_v42  ;;  %1275 = vst.msk [vmem:[%s4894_s5 + $0x190] sm:$0xff] %vm1224_vm1, %v3633_v46  ;;  %v731_v0 = vadd.f32 %v3192_v39, %v730_v59  ;;  %v3663_v45 = vadd.f32 %v2200_v54, %v786_v24  ;;  %v1468_v56 = vmul.f32 %v1111_v42, %v1111_v42  ;;  %v1371_v59 = vsel %vm1224_vm1, %v1111_v42, 0.0 }
 0x1ac   :  { %v732_v4 = vpop.f32.mrf.mxu0  ;;  %v1165_v3 = vpop.f32.mrf.mxu1  ;;  %v1565_v23 = vadd.f32 %v1564_v58, %v1563_v12  ;;  %v1368_v24 = vadd.f32 %v1367_v25, %v1366_v60 }
 0x1ad   :  { %v3668_v8 = vadd.f32 %v1165_v3, %v781_v33  ;;  %v1116_v63 = vadd.f32 %v3533_v17, %v731_v0  ;;  %1278 = vst.msk [vmem:[%s4894_s5 + $0x1a8] sm:$0xff] %vm1224_vm1, %v3663_v45  ;;  %v801_v33 = vadd.f32 %v3192_v39, %v3159_v10  ;;  %v1572_v37 = vsel %vm1224_vm1, %v1468_v56, 0.0 }
 0x1ae   :  { %v735_v27 = vpop.f32.mrf.mxu0  ;;  %v2203_v41 = vpop.f32.mrf.mxu1  ;;  %v1567_v2 = vadd.f32 %v1566_v15, %v1565_v23  ;;  %v811_v3 = vadd.f32 %v3192_v39, %v3167_v18 }
 0x1af   :  { %1277 = vst.msk [vmem:[%s4894_s5 + $0x1a0] sm:$0xff] %vm1224_vm1, %v3668_v8  ;;  %v736_v1 = vadd.f32 %v3192_v39, %v735_v27  ;;  %v3685_v17 = vadd.f32 %v2203_v41, %v796_v62  ;;  %1267 = vst.msk [vmem:[%s4894_s5 + $0x150] sm:$0xff] %vm1224_vm1, %v1116_v63  ;;  %v1469_v54 = vmul.f32 %v1116_v63, %v1116_v63  ;;  %v1373_v42 = vsel %vm1224_vm1, %v1116_v63, 0.0 }
 0x1b0   :  { %v737_v40 = vpop.f32.mrf.mxu0  ;;  %v1175_v53 = vpop.f32.mrf.mxu1  ;;  %v1569_v47 = vadd.f32 %v1568_v9, %v1567_v2  ;;  %v1370_v62 = vadd.f32 %v1369_v52, %v1368_v24 }
 0x1b1   :  { %v1121_v50 = vadd.f32 %v3521_v21, %v736_v1  ;;  %1280 = vst.msk [vmem:[%s4894_s5 + $0x1b8] sm:$0xff] %vm1224_vm1, %v3685_v17  ;;  %v3706_v35 = vadd.f32 %v1175_v53, %v791_v29  ;;  %v806_v21 = vadd.f32 %v3192_v39, %v3163_v14  ;;  %v1574_v18 = vsel %vm1224_vm1, %v1469_v54, 0.0  ;;  %v2283_v1 = vld [vmem:[%s4893_s2] ss:$0 sm:$0xff] }
 0x1b2   :  { %v740_v48 = vpop.f32.mrf.mxu0  ;;  %v2206_v36 = vpop.f32.mrf.mxu1  ;;  %v1571_v58 = vadd.f32 %v1570_v55, %v1569_v47  ;;  %v1372_v7 = vadd.f32 %v1371_v59, %v1370_v62  ;;  %v826_v29 = vadd.f32 %v2283_v1, %v3179_v30  ;;  %v821_v40 = vadd.f32 %v2283_v1, %v3175_v26 }
 0x1b3   :  { %1268 = vst.msk [vmem:[%s4894_s5 + $0x158] sm:$0xff] %vm1224_vm1, %v1121_v50  ;;  %v741_v43 = vadd.f32 %v3192_v39, %v740_v48  ;;  %1279 = vst.msk [vmem:[%s4894_s5 + $0x1b0] sm:$0xff] %vm1224_vm1, %v3706_v35  ;;  %v3725_v57 = vadd.f32 %v2206_v36, %v806_v21  ;;  %v1470_v6 = vmul.f32 %v1121_v50, %v1121_v50  ;;  %v1375_v22 = vsel %vm1224_vm1, %v1121_v50, 0.0 }
 0x1b4   :  { %v742_v10 = vpop.f32.mrf.mxu0  ;;  %v1185_v14 = vpop.f32.mrf.mxu1  ;;  %v1573_v27 = vadd.f32 %v1572_v37, %v1571_v58  ;;  %v1374_v41 = vadd.f32 %v1373_v42, %v1372_v7  ;;  %v831_v55 = vadd.f32 %v2283_v1, %v3183_v34 }
 0x1b5   :  { %v1126_v20 = vadd.f32 %v3549_v13, %v741_v43  ;;  %v3727_v61 = vadd.f32 %v1185_v14, %v801_v33  ;;  %1282 = vst.msk [vmem:[%s4894_s5 + $0x1c8] sm:$0xff] %vm1224_vm1, %v3725_v57  ;;  %v1576_v23 = vsel %vm1224_vm1, %v1470_v6, 0.0  ;;  %v836_v33 = vadd.f32 %v2283_v1, %v3187_v38 }
 0x1b6   :  { %v745_v0 = vpop.f32.mrf.mxu0  ;;  %v2209_v4 = vpop.f32.mrf.mxu1  ;;  %v1575_v53 = vadd.f32 %v1574_v18, %v1573_v27  ;;  %v1376_v60 = vadd.f32 %v1375_v22, %v1374_v41  ;;  %v1476_v18 = vmul.f32 %v3589_v28, %v3589_v28  ;;  %v1385_v22 = vsel %vm1224_vm1, %v3607_v19, 0.0 }
 0x1b7   :  { %1269 = vst.msk [vmem:[%s4894_s5 + $0x160] sm:$0xff] %vm1224_vm1, %v1126_v20  ;;  %1281 = vst.msk [vmem:[%s4894_s5 + $0x1c0] sm:$0xff] %vm1224_vm1, %v3727_v61  ;;  %v1471_v13 = vmul.f32 %v1126_v20, %v1126_v20  ;;  %v746_v12 = vadd.f32 %v3192_v39, %v745_v0  ;;  %v3752_v32 = vadd.f32 %v2209_v4, %v816_v5  ;;  %v1377_v9 = vsel %vm1224_vm1, %v1126_v20, 0.0 }
 0x1b8   :  { %v747_v11 = vpop.f32.mrf.mxu0  ;;  %v1195_v63 = vpop.f32.mrf.mxu1  ;;  %v1577_v56 = vadd.f32 %v1576_v23, %v1575_v53  ;;  %v1378_v21 = vadd.f32 %v1377_v9, %v1376_v60  ;;  %v1477_v41 = vmul.f32 %v3633_v46, %v3633_v46  ;;  %v1588_v23 = vsel %vm1224_vm1, %v1476_v18, 0.0 }
 0x1b9   :  { %v3754_v15 = vadd.f32 %v1195_v63, %v811_v3  ;;  %v1131_v25 = vadd.f32 %v3540_v16, %v746_v12  ;;  %1284 = vst.msk [vmem:[%s4894_s5 + $0x1d8] sm:$0xff] %vm1224_vm1, %v3752_v32  ;;  %v1578_v30 = vsel %vm1224_vm1, %v1471_v13, 0.0  ;;  %v1475_v3 = vmul.f32 %v3607_v19, %v3607_v19 }
 0x1ba   :  { %v750_v44 = vpop.f32.mrf.mxu0  ;;  %v2212_v39 = vpop.f32.mrf.mxu1  ;;  %v1579_v59 = vadd.f32 %v1578_v30, %v1577_v56  ;;  %v1387_v63 = vsel %vm1224_vm1, %v3589_v28, 0.0  ;;  %v1389_v19 = vsel %vm1224_vm1, %v3633_v46, 0.0  ;;  %v1391_v28 = vsel %vm1224_vm1, %v3627_v49, 0.0 }
 0x1bb   :  { %1283 = vst.msk [vmem:[%s4894_s5 + $0x1d0] sm:$0xff] %vm1224_vm1, %v3754_v15  ;;  %1270 = vst.msk [vmem:[%s4894_s5 + $0x168] sm:$0xff] %vm1224_vm1, %v1131_v25  ;;  %v1472_v26 = vmul.f32 %v1131_v25, %v1131_v25  ;;  %v751_v16 = vadd.f32 %v2283_v1, %v750_v44  ;;  %v3779_v50 = vadd.f32 %v2212_v39, %v826_v29  ;;  %v1379_v48 = vsel %vm1224_vm1, %v1131_v25, 0.0 }
 0x1bc   :  { %v752_v2 = vpop.f32.mrf.mxu0  ;;  %v1205_v52 = vpop.f32.mrf.mxu1  ;;  %v1586_v27 = vsel %vm1224_vm1, %v1475_v3, 0.0  ;;  %v1478_v25 = vmul.f32 %v3627_v49, %v3627_v49  ;;  %v1479_v53 = vmul.f32 %v3668_v8, %v3668_v8  ;;  %v1393_v46 = vsel %vm1224_vm1, %v3668_v8, 0.0 }
 0x1bd   :  { %v3782_v36 = vadd.f32 %v1205_v52, %v821_v40  ;;  %v1136_v24 = vadd.f32 %v3569_v51, %v751_v16  ;;  %1286 = vst.msk [vmem:[%s4894_s5 + $0x1e8] sm:$0xff] %vm1224_vm1, %v3779_v50  ;;  %v1580_v54 = vsel %vm1224_vm1, %v1472_v26, 0.0  ;;  %v1380_v51 = vadd.f32 %v1379_v48, %v1378_v21 }
 0x1be   :  { %v755_v43 = vpop.f32.mrf.mxu0  ;;  %v2215_v47 = vpop.f32.mrf.mxu1  ;;  %v1581_v6 = vadd.f32 %v1580_v54, %v1579_v59  ;;  %v1590_v40 = vsel %vm1224_vm1, %v1477_v41, 0.0  ;;  %v1592_v30 = vsel %vm1224_vm1, %v1478_v25, 0.0  ;;  %v1480_v26 = vmul.f32 %v3663_v45, %v3663_v45 }
 0x1bf   :  { %1285 = vst.msk [vmem:[%s4894_s5 + $0x1e0] sm:$0xff] %vm1224_vm1, %v3782_v36  ;;  %v756_v38 = vadd.f32 %v2283_v1, %v755_v43  ;;  %1271 = vst.msk [vmem:[%s4894_s5 + $0x170] sm:$0xff] %vm1224_vm1, %v1136_v24  ;;  %v1381_v10 = vsel %vm1224_vm1, %v1136_v24, 0.0  ;;  %v1473_v14 = vmul.f32 %v1136_v24, %v1136_v24  ;;  %v3803_v34 = vadd.f32 %v2215_v47, %v836_v33 }
 0x1c0   :  { %v757_v62 = vpop.f32.mrf.mxu0  ;;  %v1215_v20 = vpop.f32.mrf.mxu1  ;;  %v1382_v0 = vadd.f32 %v1381_v10, %v1380_v51  ;;  %v1395_v49 = vsel %vm1224_vm1, %v3663_v45, 0.0  ;;  %v1594_v52 = vsel %vm1224_vm1, %v1479_v53, 0.0  ;;  %v1481_v56 = vmul.f32 %v3706_v35, %v3706_v35 }
 0x1c1   :  { %v1141_v37 = vadd.f32 %v3557_v31, %v756_v38  ;;  %v3806_v42 = vadd.f32 %v1215_v20, %v831_v55  ;;  %v1582_v4 = vsel %vm1224_vm1, %v1473_v14, 0.0  ;;  %1288 = vst.msk [vmem:[%s4894_s5 + $0x1f8] sm:$0xff] %vm1224_vm1, %v3803_v34  ;;  %v1596_v21 = vsel %vm1224_vm1, %v1480_v26, 0.0 }
 0x1c2   :  { %v1583_v58 = vadd.f32 %v1582_v4, %v1581_v6  ;;  %v1482_v24 = vmul.f32 %v3685_v17, %v3685_v17  ;;  %v1397_v8 = vsel %vm1224_vm1, %v3706_v35, 0.0  ;;  %v1399_v45 = vsel %vm1224_vm1, %v3685_v17, 0.0 }
 0x1c3   :  { %1272 = vst.msk [vmem:[%s4894_s5 + $0x178] sm:$0xff] %vm1224_vm1, %v1141_v37  ;;  %v1383_v31 = vsel %vm1224_vm1, %v1141_v37, 0.0  ;;  %v1474_v5 = vmul.f32 %v1141_v37, %v1141_v37  ;;  %1287 = vst.msk [vmem:[%s4894_s5 + $0x1f0] sm:$0xff] %vm1224_vm1, %v3806_v42  ;;  %v1598_v55 = vsel %vm1224_vm1, %v1481_v56, 0.0  ;;  %v1483_v59 = vmul.f32 %v3727_v61, %v3727_v61  ;;  %v1289_v56 = vld [vmem:[#allocation2] sm:$0x1] }
 0x1c4   :  { %v1384_v7 = vadd.f32 %v1383_v31, %v1382_v0  ;;  %v1600_v51 = vsel %vm1224_vm1, %v1482_v24, 0.0  ;;  %v1484_v10 = vmul.f32 %v3725_v57, %v3725_v57  ;;  %v1401_v35 = vsel %vm1224_vm1, %v3727_v61, 0.0 }
 0x1c5   :  { %v1584_v13 = vsel %vm1224_vm1, %v1474_v5, 0.0  ;;  %v1403_v17 = vsel %vm1224_vm1, %v3725_v57, 0.0  ;;  %v1602_v20 = vsel %vm1224_vm1, %v1483_v59, 0.0  ;;  %v1485_v37 = vmul.f32 %v3754_v15, %v3754_v15 }
 0x1c6   :  { %v1386_v12 = vadd.f32 %v1385_v22, %v1384_v7  ;;  %v1585_v11 = vadd.f32 %v1584_v13, %v1583_v58  ;;  %v1604_v4 = vsel %vm1224_vm1, %v1484_v10, 0.0  ;;  %v1486_v3 = vmul.f32 %v3752_v32, %v3752_v32 }
 0x1c7   :  { %v1405_v61 = vsel %vm1224_vm1, %v3754_v15, 0.0  ;;  %v1407_v57 = vsel %vm1224_vm1, %v3752_v32, 0.0  ;;  %v1606_v58 = vsel %vm1224_vm1, %v1485_v37, 0.0  ;;  %v1487_v7 = vmul.f32 %v3782_v36, %v3782_v36  ;;  %v3914_v37 = vld [vmem:[%s4896_s4] sm:$0x1] }
 0x1c8   :  { %v1388_v1 = vadd.f32 %v1387_v63, %v1386_v12  ;;  %v1587_v29 = vadd.f32 %v1586_v27, %v1585_v11  ;;  %v1608_v13 = vsel %vm1224_vm1, %v1486_v3, 0.0  ;;  %v1488_v12 = vmul.f32 %v3779_v50, %v3779_v50  ;;  %v1643_v3 = vld [vmem:[%s4894_s5] sm:$0xff] }
 0x1c9   :  { %v1409_v15 = vsel %vm1224_vm1, %v3782_v36, 0.0  ;;  %v1411_v32 = vsel %vm1224_vm1, %v3779_v50, 0.0  ;;  %v1610_v27 = vsel %vm1224_vm1, %v1487_v7, 0.0  ;;  %v1489_v41 = vmul.f32 %v3806_v42, %v3806_v42  ;;  %v1649_v7 = vld [vmem:[%s4894_s5 + $0x30] sm:$0xff] }
 0x1ca   :  { %v1390_v44 = vadd.f32 %v1389_v19, %v1388_v1  ;;  %v1589_v39 = vadd.f32 %v1588_v23, %v1587_v29  ;;  %v1612_v23 = vsel %vm1224_vm1, %v1488_v12, 0.0  ;;  %v1490_v25 = vmul.f32 %v3803_v34, %v3803_v34  ;;  %v1653_v12 = vld [vmem:[%s4894_s5 + $0x50] sm:$0xff] }
 0x1cb   :  { %v1413_v36 = vsel %vm1224_vm1, %v3806_v42, 0.0  ;;  %v1415_v50 = vsel %vm1224_vm1, %v3803_v34, 0.0  ;;  %v1426_v34 = vld [vmem:[#allocation2 + $0x1] sm:$0x1]  ;;  %v1708_v10 = vlaneseq }
 0x1cc   :  { %v1392_v60 = vadd.f32 %v1391_v28, %v1390_v44  ;;  %v1591_v9 = vadd.f32 %v1590_v40, %v1589_v39  ;;  %v1614_v39 = vsel %vm1224_vm1, %v1489_v41, 0.0  ;;  %v1616_v53 = vsel %vm1224_vm1, %v1490_v25, 0.0  ;;  %v1657_v41 = vld [vmem:[%s4894_s5 + $0x70] sm:$0xff] }
 0x1ce   :  { %v1394_v16 = vadd.f32 %v1393_v46, %v1392_v60  ;;  %v1593_v2 = vadd.f32 %v1592_v30, %v1591_v9 }
 0x1d0   :  { %v1396_v48 = vadd.f32 %v1395_v49, %v1394_v16  ;;  %v1595_v33 = vadd.f32 %v1594_v52, %v1593_v2 }
 0x1d2   :  { %v1597_v43 = vadd.f32 %v1596_v21, %v1595_v33  ;;  %v1398_v47 = vadd.f32 %v1397_v8, %v1396_v48 }
 0x1d4   :  { %v1400_v54 = vadd.f32 %v1399_v45, %v1398_v47  ;;  %v1599_v38 = vadd.f32 %v1598_v55, %v1597_v43 }
 0x1d6   :  { %v1402_v14 = vadd.f32 %v1401_v35, %v1400_v54  ;;  %v1601_v62 = vadd.f32 %v1600_v51, %v1599_v38  ;;  %v3905_v35 = vshrl.u32 %v1708_v10, 7  ;;  %v1676_v10 = vld [vmem:[%s4894_s5 + $0x108] sm:$0xff] }
 0x1d8   :  { %v1404_v6 = vadd.f32 %v1403_v17, %v1402_v14  ;;  %v1603_v0 = vadd.f32 %v1602_v20, %v1601_v62  ;;  %v1636_v14 = vld [vmem:[%s4895_s3] sm:$0x1]  ;;  %v4897_v62 = vsub.s32 0, %v3905_v35 }
 0x1da   :  { %v1406_v31 = vadd.f32 %v1405_v61, %v1404_v6  ;;  %v1605_v5 = vadd.f32 %v1604_v4, %v1603_v0  ;;  %v1644_v4 = vld [vmem:[%s4894_s5 + $0x8] sm:$0xff]  ;;  %v1646_v61 = vld [vmem:[%s4894_s5 + $0x18] sm:$0xff] }
 0x1dc   :  { %v1408_v18 = vadd.f32 %v1407_v57, %v1406_v31  ;;  %v1607_v22 = vadd.f32 %v1606_v58, %v1605_v5  ;;  %v1645_v31 = vld [vmem:[%s4894_s5 + $0x10] sm:$0xff]  ;;  %v1648_v5 = vld [vmem:[%s4894_s5 + $0x28] sm:$0xff]  ;;  %v1647_v57 = vld [vmem:[%s4894_s5 + $0x20] sm:$0xff] }
 0x1dd   :  { %v1650_v58 = vld [vmem:[%s4894_s5 + $0x38] sm:$0xff] }
 0x1de   :  { %v1410_v11 = vadd.f32 %v1409_v15, %v1408_v18  ;;  %v1609_v63 = vadd.f32 %v1608_v13, %v1607_v22  ;;  %v1652_v18 = vld [vmem:[%s4894_s5 + $0x48] sm:$0xff]  ;;  %v1651_v22 = vld [vmem:[%s4894_s5 + $0x40] sm:$0xff]  ;;  %v1654_v13 = vld [vmem:[%s4894_s5 + $0x58] sm:$0xff] }
 0x1e0   :  { %v1412_v1 = vadd.f32 %v1411_v32, %v1410_v11  ;;  %v1611_v29 = vadd.f32 %v1610_v27, %v1609_v63  ;;  %v1656_v63 = vld [vmem:[%s4894_s5 + $0x68] sm:$0xff]  ;;  %v1655_v32 = vld [vmem:[%s4894_s5 + $0x60] sm:$0xff]  ;;  %v1658_v27 = vld [vmem:[%s4894_s5 + $0x78] sm:$0xff] }
 0x1e2   :  { %v1414_v19 = vadd.f32 %v1413_v36, %v1412_v1  ;;  %v1613_v44 = vadd.f32 %v1612_v23, %v1611_v29  ;;  %v1660_v36 = vld [vmem:[%s4894_s5 + $0x88] sm:$0xff] }
 0x1e4   :  { %v1416_v28 = vadd.f32 %v1415_v50, %v1414_v19  ;;  %v1615_v40 = vadd.f32 %v1614_v39, %v1613_v44  ;;  %v1659_v19 = vld [vmem:[%s4894_s5 + $0x80] sm:$0xff]  ;;  %v1662_v44 = vld [vmem:[%s4894_s5 + $0x98] sm:$0xff]  ;;  %v1661_v50 = vld [vmem:[%s4894_s5 + $0x90] sm:$0xff] }
 0x1e6   :  { %v1417_v60 = vrot.slane %v1416_v28, 4  ;;  %v1617_v9 = vadd.f32 %v1616_v53, %v1615_v40 }
 0x1e8   :  { %v1418_v30 = vadd.f32 %v1417_v60, %v1416_v28  ;;  %v1618_v26 = vrot.slane %v1617_v9, 4  ;;  %v1664_v60 = vld [vmem:[%s4894_s5 + $0xa8] sm:$0xff] }
 0x1ea   :  { %v1419_v46 = vrot.slane %v1418_v30, 2  ;;  %v1619_v16 = vadd.f32 %v1618_v26, %v1617_v9  ;;  %v1663_v9 = vld [vmem:[%s4894_s5 + $0xa0] sm:$0xff]  ;;  %v1665_v26 = vld [vmem:[%s4894_s5 + $0xb0] sm:$0xff] }
 0x1ec   :  { %v1420_v2 = vadd.f32 %v1419_v46, %v1418_v30  ;;  %v1620_v49 = vrot.slane %v1619_v16, 2  ;;  %v1666_v30 = vld [vmem:[%s4894_s5 + $0xb8] sm:$0xff] }
 0x1ee   :  { %v1421_v42 = vrot.slane %v1420_v2, 1  ;;  %v1621_v52 = vadd.f32 %v1620_v49, %v1619_v16 }
 0x1f0   :  { %v1422_v48 = vadd.f32 %v1421_v42, %v1420_v2  ;;  %v1622_v33 = vrot.slane %v1621_v52, 1  ;;  %v1668_v42 = vld [vmem:[%s4894_s5 + $0xc8] sm:$0xff] }
 0x1f2   :  { %v1423_v21 = vadd.f32 %v1422_v48, %v1289_v56  ;;  %v1623_v24 = vadd.f32 %v1622_v33, %v1621_v52  ;;  %v1667_v52 = vld [vmem:[%s4894_s5 + $0xc0] sm:$0xff]  ;;  %v1670_v56 = vld [vmem:[%s4894_s5 + $0xd8] sm:$0xff]  ;;  %v1669_v48 = vld [vmem:[%s4894_s5 + $0xd0] sm:$0xff] }
 0x1f4   :  { %1425 = vst.msk [vmem:[#allocation2] sm:$0x1] %vm1424_vm3, %v1423_v21  ;;  %v1624_v8 = vadd.f32 %v1623_v24, %v1426_v34 }
 0x1f6   :  { %1625 = vst.msk [vmem:[#allocation2 + $0x1] sm:$0x1] %vm1424_vm3, %v1624_v8  ;;  %v1672_v8 = vld [vmem:[%s4894_s5 + $0xe8] sm:$0xff] }
 0x1fb   :  { %v1629_v43 = vld [vmem:[#allocation2] sm:$0x1] }
 0x1fc   :  { %v1630_v47 = vmul.f32 0.001953125, %v1629_v43  ;;  %v1671_v43 = vld [vmem:[%s4894_s5 + $0xe0] sm:$0xff] }
 0x1fd   :  { %v1631_v45 = vld [vmem:[#allocation2 + $0x1] sm:$0x1] }
 0x1fe   :  { %v1632_v55 = vmul.f32 0.001953125, %v1631_v45  ;;  %v1633_v59 = vmul.f32 %v1630_v47, %v1630_v47 }
 0x200   :  { %v1634_v54 = vsub.f32 %v1632_v55, %v1633_v59 }
 0x202   :  { %v1635_v38 = vmax.f32 %v1634_v54, 0.0 }
 0x204   :  { %v1637_v51 = vadd.f32 1e-05, %v1635_v38  ;;  %v1673_v38 = vld [vmem:[%s4894_s5 + $0xf0] sm:$0xff] }
 0x206   :  { %2281 = vrsqrt.f32 %v1637_v51  ;;  %v1675_v51 = vld [vmem:[%s4894_s5 + $0x100] sm:$0xff] }
 0x213   :  { %v2282_v17 = vpop.eup %2281 }
 0x214   :  { %v1639_v20 = vmul.f32 %v2282_v17, %v1636_v14 }
 0x216   :  { %v3916_v6 = vmul.f32 %v1639_v20, %v1630_v47  ;;  %v3920_v0 = vrot.slane %v1639_v20, %v4897_v62  ;;  %v1674_v47 = vld [vmem:[%s4894_s5 + $0xf8] sm:$0xff]  ;;  %v1697_v62 = vld [vmem:[%s4894_s5 + $0x1b0] sm:$0xff] }
 0x218   :  { %v3961_v11 = vmul.f32 %v3920_v0, %v1643_v3  ;;  %v3976_v1 = vmul.f32 %v3920_v0, %v1644_v4  ;;  %v3979_v29 = vmul.f32 %v3920_v0, %v1645_v31  ;;  %v3982_v23 = vmul.f32 %v3920_v0, %v1646_v61  ;;  %v1677_v3 = vld [vmem:[%s4894_s5 + $0x110] sm:$0xff]  ;;  %v1678_v61 = vld [vmem:[%s4894_s5 + $0x118] sm:$0xff]  ;;  %v1679_v31 = vld [vmem:[%s4894_s5 + $0x120] sm:$0xff] }
 0x219   :  { %v3985_v25 = vmul.f32 %v3920_v0, %v1647_v57  ;;  %v4000_v39 = vmul.f32 %v3920_v0, %v1648_v5  ;;  %v4003_v28 = vmul.f32 %v3920_v0, %v1649_v7  ;;  %v4006_v40 = vmul.f32 %v3920_v0, %v1650_v58 }
 0x21a   :  { %v4009_v53 = vmul.f32 %v3920_v0, %v1651_v22  ;;  %v4024_v46 = vmul.f32 %v3920_v0, %v1652_v18  ;;  %v4027_v16 = vmul.f32 %v3920_v0, %v1653_v12  ;;  %v4030_v2 = vmul.f32 %v3920_v0, %v1654_v13  ;;  %v1680_v18 = vld [vmem:[%s4894_s5 + $0x128] sm:$0xff]  ;;  %v1681_v22 = vld [vmem:[%s4894_s5 + $0x130] sm:$0xff]  ;;  %v1682_v13 = vld [vmem:[%s4894_s5 + $0x138] sm:$0xff] }
 0x21b   :  { %v4033_v49 = vmul.f32 %v3920_v0, %v1655_v32  ;;  %v4048_v33 = vmul.f32 %v3920_v0, %v1656_v63  ;;  %v4051_v34 = vmul.f32 %v3920_v0, %v1657_v41  ;;  %v4054_v21 = vmul.f32 %v3920_v0, %v1658_v27  ;;  %v1683_v41 = vld [vmem:[%s4894_s5 + $0x140] sm:$0xff] }
 0x21c   :  { %v4057_v24 = vmul.f32 %v3920_v0, %v1659_v19  ;;  %v4069_v45 = vmul.f32 %v3920_v0, %v1660_v36  ;;  %v4072_v55 = vmul.f32 %v3920_v0, %v1661_v50  ;;  %v4075_v59 = vmul.f32 %v3920_v0, %v1662_v44  ;;  %v1691_v36 = vld [vmem:[%s4894_s5 + $0x180] sm:$0xff]  ;;  %v1684_v19 = vld [vmem:[%s4894_s5 + $0x148] sm:$0xff] }
 0x21d   :  { %v4078_v54 = vmul.f32 %v3920_v0, %v1663_v9  ;;  %v4090_v14 = vmul.f32 %v3920_v0, %v1664_v60  ;;  %v4093_v17 = vmul.f32 %v3920_v0, %v1665_v26  ;;  %v4096_v20 = vmul.f32 %v3920_v0, %v1666_v30  ;;  %v1692_v30 = vld [vmem:[%s4894_s5 + $0x188] sm:$0xff]  ;;  %v1694_v26 = vld [vmem:[%s4894_s5 + $0x198] sm:$0xff] }
 0x21e   :  { %v4099_v4 = vmul.f32 %v3920_v0, %v1667_v52  ;;  %v4111_v5 = vmul.f32 %v3920_v0, %v1668_v42  ;;  %v4114_v57 = vmul.f32 %v3920_v0, %v1669_v48  ;;  %v4117_v58 = vmul.f32 %v3920_v0, %v1670_v56  ;;  %v1693_v42 = vld [vmem:[%s4894_s5 + $0x190] sm:$0xff]  ;;  %v1686_v56 = vld [vmem:[%s4894_s5 + $0x158] sm:$0xff]  ;;  %v1687_v48 = vld [vmem:[%s4894_s5 + $0x160] sm:$0xff] }
 0x21f   :  { %v4120_v7 = vmul.f32 %v3920_v0, %v1671_v43  ;;  %v4132_v12 = vmul.f32 %v3920_v0, %v1672_v8  ;;  %v4135_v63 = vmul.f32 %v3920_v0, %v1673_v38  ;;  %v4138_v32 = vmul.f32 %v3920_v0, %v1674_v47  ;;  %v1685_v52 = vld [vmem:[%s4894_s5 + $0x150] sm:$0xff] }
 0x220   :  { %v4141_v27 = vmul.f32 %v3920_v0, %v1675_v51  ;;  %v4153_v44 = vmul.f32 %v3920_v0, %v1676_v10  ;;  %v4156_v50 = vmul.f32 %v3920_v0, %v1677_v3  ;;  %v4159_v60 = vmul.f32 %v3920_v0, %v1678_v61  ;;  %v1688_v51 = vld [vmem:[%s4894_s5 + $0x168] sm:$0xff]  ;;  %v1689_v10 = vld [vmem:[%s4894_s5 + $0x170] sm:$0xff]  ;;  %v1690_v3 = vld [vmem:[%s4894_s5 + $0x178] sm:$0xff] }
 0x221   :  { %v4162_v9 = vmul.f32 %v3920_v0, %v1679_v31  ;;  %v4183_v8 = vmul.f32 %v3920_v0, %v1680_v18  ;;  %v4186_v43 = vmul.f32 %v3920_v0, %v1681_v22  ;;  %v4189_v47 = vmul.f32 %v3920_v0, %v1682_v13  ;;  %v1696_v13 = vld [vmem:[%s4894_s5 + $0x1a8] sm:$0xff] }
 0x222   :  { %v4192_v38 = vmul.f32 %v3920_v0, %v1683_v41  ;;  %v4204_v61 = vmul.f32 %v3920_v0, %v1684_v19  ;;  %v4207_v31 = vmul.f32 %v3920_v0, %v1685_v52  ;;  %v4210_v18 = vmul.f32 %v3920_v0, %v1686_v56  ;;  %v1695_v41 = vld [vmem:[%s4894_s5 + $0x1a0] sm:$0xff]  ;;  %v1698_v19 = vld [vmem:[%s4894_s5 + $0x1b8] sm:$0xff] }
 0x223   :  { %v4213_v22 = vmul.f32 %v3920_v0, %v1687_v48  ;;  %v4225_v52 = vmul.f32 %v3920_v0, %v1688_v51  ;;  %v4228_v56 = vmul.f32 %v3920_v0, %v1689_v10  ;;  %v4231_v48 = vmul.f32 %v3920_v0, %v1690_v3  ;;  %v1699_v51 = vld [vmem:[%s4894_s5 + $0x1c0] sm:$0xff] }
 0x224   :  { %v4234_v15 = vmul.f32 %v3920_v0, %v1691_v36  ;;  %v4246_v10 = vmul.f32 %v3920_v0, %v1692_v30  ;;  %v4249_v3 = vmul.f32 %v3920_v0, %v1693_v42  ;;  %v4252_v36 = vmul.f32 %v3920_v0, %v1694_v26  ;;  %v1704_v30 = vld [vmem:[%s4894_s5 + $0x1e8] sm:$0xff] }
 0x225   :  { %4898 = vst [vmem:[#allocation3_spill] sm:$0xff] %v4213_v22  ;;  %4899 = vst [vmem:[#allocation4_spill] sm:$0xff] %v4228_v56  ;;  %v1700_v22 = vld [vmem:[%s4894_s5 + $0x1c8] sm:$0xff]  ;;  %v1701_v56 = vld [vmem:[%s4894_s5 + $0x1d0] sm:$0xff]  ;;  %v4267_v42 = vmul.f32 %v3920_v0, %v1696_v13  ;;  %v4270_v26 = vmul.f32 %v3920_v0, %v1697_v62 }
 0x226   :  { %4900 = vst [vmem:[#allocation5_spill] sm:$0xff] %v4231_v48  ;;  %4901 = vst [vmem:[#allocation6_spill] sm:$0xff] %v4234_v15  ;;  %v4255_v15 = vmul.f32 %v3920_v0, %v1695_v41  ;;  %v1702_v48 = vld [vmem:[%s4894_s5 + $0x1d8] sm:$0xff]  ;;  %v4273_v41 = vmul.f32 %v3920_v0, %v1698_v19  ;;  %v1705_v13 = vld [vmem:[%s4894_s5 + $0x1f0] sm:$0xff]  ;;  %v4288_v62 = vmul.f32 %v3920_v0, %v1700_v22 }
 0x227   :  { %4902 = vst [vmem:[#allocation7_spill] sm:$0xff] %v4246_v10  ;;  %4903 = vst [vmem:[#allocation8_spill] sm:$0xff] %v4249_v3  ;;  %v1706_v3 = vld [vmem:[%s4894_s5 + $0x1f8] sm:$0xff]  ;;  %v4291_v19 = vmul.f32 %v3920_v0, %v1701_v56  ;;  %v4307_v10 = vmul.f32 %v3920_v0, %v1704_v30  ;;  %v4310_v22 = vmul.f32 %v3920_v0, %v1705_v13 }
 0x228   :  { %4904 = vst [vmem:[#allocation9_spill] sm:$0xff] %v4252_v36  ;;  %4905 = vst [vmem:[#allocation10_spill] sm:$0xff] %v4255_v15  ;;  %v4276_v15 = vmul.f32 %v3920_v0, %v1699_v51  ;;  %v1703_v36 = vld [vmem:[%s4894_s5 + $0x1e0] sm:$0xff]  ;;  %v4294_v51 = vmul.f32 %v3920_v0, %v1702_v48  ;;  %v4313_v56 = vmul.f32 %v3920_v0, %v1706_v3 }
 0x229   :  { %4906 = vst [vmem:[#allocation11_spill] sm:$0xff] %v4267_v42  ;;  %4907 = vst [vmem:[#allocation12_spill] sm:$0xff] %v4270_v26  ;;  %v4304_v42 = vmul.f32 %v3920_v0, %v1703_v36 }
 0x22a   :  { %4908 = vst [vmem:[#allocation13_spill] sm:$0xff] %v4273_v41  ;;  %4909 = vst [vmem:[#allocation14_spill] sm:$0xff] %v4276_v15  ;;  %v4910_v15 = vsub.s32 0, %v3905_v35  ;;  %v4911_v41 = vsub.f32 %v3914_v37, %v3916_v6 }
 0x22c   :  { %v4301_v26 = vrot.slane %v4911_v41, %v4910_v15  ;;  %v4912_v48 = vld [vmem:[#allocation3_spill] sm:$0xff]  ;;  %v4914_v3 = vld [vmem:[#allocation4_spill] sm:$0xff] }
 0x22d   :  { %v4916_v36 = vld [vmem:[#allocation5_spill] sm:$0xff]  ;;  %v4918_v30 = vld [vmem:[#allocation6_spill] sm:$0xff] }
 0x22e   :  { %v4317_v35 = vadd.f32 %v4301_v26, %v3961_v11  ;;  %v4321_v37 = vadd.f32 %v4301_v26, %v3976_v1  ;;  %v4325_v6 = vadd.f32 %v4301_v26, %v3979_v29  ;;  %v4329_v15 = vadd.f32 %v4301_v26, %v3982_v23  ;;  %v4920_v41 = vld [vmem:[#allocation7_spill] sm:$0xff] }
 0x22f   :  { %v4333_v0 = vadd.f32 %v4301_v26, %v3985_v25  ;;  %v4337_v11 = vadd.f32 %v4301_v26, %v4000_v39  ;;  %v4341_v1 = vadd.f32 %v4301_v26, %v4003_v28  ;;  %v4345_v29 = vadd.f32 %v4301_v26, %v4006_v40 }
 0x230   :  { %v4349_v23 = vadd.f32 %v4301_v26, %v4009_v53  ;;  %v4353_v25 = vadd.f32 %v4301_v26, %v4024_v46  ;;  %v4357_v39 = vadd.f32 %v4301_v26, %v4027_v16  ;;  %v4361_v28 = vadd.f32 %v4301_v26, %v4030_v2 }
 0x231   :  { %v4365_v40 = vadd.f32 %v4301_v26, %v4033_v49  ;;  %v4369_v53 = vadd.f32 %v4301_v26, %v4048_v33  ;;  %v4373_v46 = vadd.f32 %v4301_v26, %v4051_v34  ;;  %v4377_v16 = vadd.f32 %v4301_v26, %v4054_v21 }
 0x232   :  { %v4381_v2 = vadd.f32 %v4301_v26, %v4057_v24  ;;  %v4385_v49 = vadd.f32 %v4301_v26, %v4069_v45  ;;  %v4389_v33 = vadd.f32 %v4301_v26, %v4072_v55  ;;  %v4393_v34 = vadd.f32 %v4301_v26, %v4075_v59 }
 0x233   :  { %v4397_v21 = vadd.f32 %v4301_v26, %v4078_v54  ;;  %v4401_v24 = vadd.f32 %v4301_v26, %v4090_v14  ;;  %v4405_v45 = vadd.f32 %v4301_v26, %v4093_v17  ;;  %v4409_v55 = vadd.f32 %v4301_v26, %v4096_v20 }
 0x234   :  { %v4413_v59 = vadd.f32 %v4301_v26, %v4099_v4  ;;  %v4417_v54 = vadd.f32 %v4301_v26, %v4111_v5  ;;  %v4421_v14 = vadd.f32 %v4301_v26, %v4114_v57  ;;  %v4425_v17 = vadd.f32 %v4301_v26, %v4117_v58 }
 0x235   :  { %v4429_v20 = vadd.f32 %v4301_v26, %v4120_v7  ;;  %v4433_v4 = vadd.f32 %v4301_v26, %v4132_v12  ;;  %v4437_v5 = vadd.f32 %v4301_v26, %v4135_v63  ;;  %v4441_v57 = vadd.f32 %v4301_v26, %v4138_v32 }
 0x236   :  { %v4445_v58 = vadd.f32 %v4301_v26, %v4141_v27  ;;  %v4449_v7 = vadd.f32 %v4301_v26, %v4153_v44  ;;  %v4453_v12 = vadd.f32 %v4301_v26, %v4156_v50  ;;  %v4457_v63 = vadd.f32 %v4301_v26, %v4159_v60 }
 0x237   :  { %v4461_v32 = vadd.f32 %v4301_v26, %v4162_v9  ;;  %v4465_v27 = vadd.f32 %v4301_v26, %v4183_v8  ;;  %v4469_v44 = vadd.f32 %v4301_v26, %v4186_v43  ;;  %v4473_v50 = vadd.f32 %v4301_v26, %v4189_v47 }
 0x238   :  { %v4477_v60 = vadd.f32 %v4301_v26, %v4192_v38  ;;  %v4481_v9 = vadd.f32 %v4301_v26, %v4204_v61  ;;  %v4485_v8 = vadd.f32 %v4301_v26, %v4207_v31  ;;  %v4489_v43 = vadd.f32 %v4301_v26, %v4210_v18 }
 0x239   :  { %v4493_v47 = vadd.f32 %v4301_v26, %v4912_v48  ;;  %v4497_v38 = vadd.f32 %v4301_v26, %v4225_v52  ;;  %v4501_v61 = vadd.f32 %v4301_v26, %v4914_v3  ;;  %v4505_v31 = vadd.f32 %v4301_v26, %v4916_v36  ;;  %v4922_v48 = vld [vmem:[#allocation8_spill] sm:$0xff] }
 0x23a   :  { %v4509_v18 = vadd.f32 %v4301_v26, %v4918_v30  ;;  %v4513_v13 = vadd.f32 %v4301_v26, %v4920_v41  ;;  %v4517_v52 = vadd.f32 %v4301_v26, %v4922_v48 }
 0x23b   :  { %4913 = vst [vmem:[#allocation3_spill] sm:$0xff] %v4497_v38  ;;  %4915 = vst [vmem:[#allocation4_spill] sm:$0xff] %v4501_v61  ;;  %v4924_v38 = vld [vmem:[#allocation9_spill] sm:$0xff]  ;;  %v4925_v61 = vld [vmem:[#allocation10_spill] sm:$0xff] }
 0x23c   :  { %4917 = vst [vmem:[#allocation5_spill] sm:$0xff] %v4505_v31  ;;  %4919 = vst [vmem:[#allocation6_spill] sm:$0xff] %v4509_v18  ;;  %v4521_v3 = vadd.f32 %v4301_v26, %v4924_v38  ;;  %v4525_v36 = vadd.f32 %v4301_v26, %v4925_v61  ;;  %v4926_v31 = vld [vmem:[#allocation11_spill] sm:$0xff]  ;;  %v4927_v18 = vld [vmem:[#allocation12_spill] sm:$0xff]  ;;  %v4545_v61 = vadd.f32 %v4301_v26, %v4288_v62 }
 0x23d   :  { %4921 = vst [vmem:[#allocation7_spill] sm:$0xff] %v4513_v13  ;;  %4923 = vst [vmem:[#allocation8_spill] sm:$0xff] %v4517_v52  ;;  %v4529_v30 = vadd.f32 %v4301_v26, %v4926_v31  ;;  %v4533_v41 = vadd.f32 %v4301_v26, %v4927_v18  ;;  %v4928_v13 = vld [vmem:[#allocation13_spill] sm:$0xff]  ;;  %v4929_v52 = vld [vmem:[#allocation14_spill] sm:$0xff]  ;;  %v4549_v31 = vadd.f32 %v4301_v26, %v4291_v19 }
 0x23e   :  { %v4537_v48 = vadd.f32 %v4301_v26, %v4928_v13  ;;  %v4541_v38 = vadd.f32 %v4301_v26, %v4929_v52  ;;  %v4553_v18 = vadd.f32 %v4301_v26, %v4294_v51  ;;  %v4557_v13 = vadd.f32 %v4301_v26, %v4304_v42 }
 0x23f   :  { %4930 = vst [vmem:[#allocation9_spill] sm:$0xff] %v4549_v31  ;;  %v4561_v52 = vadd.f32 %v4301_v26, %v4307_v10  ;;  %v4565_v62 = vadd.f32 %v4301_v26, %v4310_v22  ;;  %v4569_v19 = vadd.f32 %v4301_v26, %v4313_v56  ;;  %v1847_v31 = vmax.f32 %v4317_v35, 0.0 }
 0x240   :  { %4931 = vst [vmem:[#allocation10_spill] sm:$0xff] %v4553_v18  ;;  %4932 = vst [vmem:[#allocation11_spill] sm:$0xff] %v4557_v13  ;;  %v1848_v51 = vmax.f32 %v4321_v37, 0.0  ;;  %v1849_v18 = vmax.f32 %v4325_v6, 0.0  ;;  %v1850_v42 = vmax.f32 %v4329_v15, 0.0  ;;  %v1851_v13 = vmax.f32 %v4333_v0, 0.0 }
 0x241   :  { %4933 = vst [vmem:[#allocation12_spill] sm:$0xff] %v4561_v52  ;;  %4934 = vst [vmem:[#allocation13_spill] sm:$0xff] %v4565_v62  ;;  %v1852_v10 = vmax.f32 %v4337_v11, 0.0  ;;  %v1853_v52 = vmax.f32 %v4341_v1, 0.0  ;;  %v1854_v22 = vmax.f32 %v4345_v29, 0.0  ;;  %v1855_v62 = vmax.f32 %v4349_v23, 0.0 }
 0x242   :  { %v1856_v26 = vmax.f32 %v4353_v25, 0.0  ;;  %v1857_v56 = vmax.f32 %v4357_v39, 0.0  ;;  %v1858_v35 = vmax.f32 %v4361_v28, 0.0  ;;  %1911 = vst.msk [vmem:[%s4894_s5] sm:$0xff] %vm1224_vm1, %v1847_v31  ;;  %1912 = vst.msk [vmem:[%s4894_s5 + $0x8] sm:$0xff] %vm1224_vm1, %v1848_v51  ;;  %v1859_v37 = vmax.f32 %v4365_v40, 0.0 }
 0x243   :  { %1913 = vst.msk [vmem:[%s4894_s5 + $0x10] sm:$0xff] %vm1224_vm1, %v1849_v18  ;;  %1914 = vst.msk [vmem:[%s4894_s5 + $0x18] sm:$0xff] %vm1224_vm1, %v1850_v42  ;;  %v1860_v6 = vmax.f32 %v4369_v53, 0.0  ;;  %v1861_v15 = vmax.f32 %v4373_v46, 0.0  ;;  %v1862_v0 = vmax.f32 %v4377_v16, 0.0  ;;  %v1863_v11 = vmax.f32 %v4381_v2, 0.0 }
 0x244   :  { %1915 = vst.msk [vmem:[%s4894_s5 + $0x20] sm:$0xff] %vm1224_vm1, %v1851_v13  ;;  %1916 = vst.msk [vmem:[%s4894_s5 + $0x28] sm:$0xff] %vm1224_vm1, %v1852_v10  ;;  %v1864_v1 = vmax.f32 %v4385_v49, 0.0  ;;  %v1865_v29 = vmax.f32 %v4389_v33, 0.0  ;;  %v1866_v23 = vmax.f32 %v4393_v34, 0.0  ;;  %v1867_v25 = vmax.f32 %v4397_v21, 0.0 }
 0x245   :  { %1917 = vst.msk [vmem:[%s4894_s5 + $0x30] sm:$0xff] %vm1224_vm1, %v1853_v52  ;;  %1918 = vst.msk [vmem:[%s4894_s5 + $0x38] sm:$0xff] %vm1224_vm1, %v1854_v22  ;;  %v1868_v39 = vmax.f32 %v4401_v24, 0.0  ;;  %v1869_v28 = vmax.f32 %v4405_v45, 0.0  ;;  %v1870_v40 = vmax.f32 %v4409_v55, 0.0  ;;  %v1871_v53 = vmax.f32 %v4413_v59, 0.0 }
 0x246   :  { %1919 = vst.msk [vmem:[%s4894_s5 + $0x40] sm:$0xff] %vm1224_vm1, %v1855_v62  ;;  %1920 = vst.msk [vmem:[%s4894_s5 + $0x48] sm:$0xff] %vm1224_vm1, %v1856_v26  ;;  %v1872_v46 = vmax.f32 %v4417_v54, 0.0  ;;  %v1873_v16 = vmax.f32 %v4421_v14, 0.0  ;;  %v1874_v2 = vmax.f32 %v4425_v17, 0.0  ;;  %v1875_v49 = vmax.f32 %v4429_v20, 0.0 }
 0x247   :  { %1921 = vst.msk [vmem:[%s4894_s5 + $0x50] sm:$0xff] %vm1224_vm1, %v1857_v56  ;;  %1922 = vst.msk [vmem:[%s4894_s5 + $0x58] sm:$0xff] %vm1224_vm1, %v1858_v35  ;;  %v1876_v33 = vmax.f32 %v4433_v4, 0.0  ;;  %v1877_v34 = vmax.f32 %v4437_v5, 0.0  ;;  %v1878_v21 = vmax.f32 %v4441_v57, 0.0  ;;  %v1879_v24 = vmax.f32 %v4445_v58, 0.0 }
 0x248   :  { %1923 = vst.msk [vmem:[%s4894_s5 + $0x60] sm:$0xff] %vm1224_vm1, %v1859_v37  ;;  %1924 = vst.msk [vmem:[%s4894_s5 + $0x68] sm:$0xff] %vm1224_vm1, %v1860_v6  ;;  %v1880_v45 = vmax.f32 %v4449_v7, 0.0  ;;  %v1881_v55 = vmax.f32 %v4453_v12, 0.0  ;;  %v1882_v59 = vmax.f32 %v4457_v63, 0.0  ;;  %v1883_v54 = vmax.f32 %v4461_v32, 0.0 }
 0x249   :  { %1925 = vst.msk [vmem:[%s4894_s5 + $0x70] sm:$0xff] %vm1224_vm1, %v1861_v15  ;;  %1926 = vst.msk [vmem:[%s4894_s5 + $0x78] sm:$0xff] %vm1224_vm1, %v1862_v0  ;;  %v1884_v14 = vmax.f32 %v4465_v27, 0.0  ;;  %v1885_v17 = vmax.f32 %v4469_v44, 0.0  ;;  %v1886_v20 = vmax.f32 %v4473_v50, 0.0  ;;  %v1887_v4 = vmax.f32 %v4477_v60, 0.0 }
 0x24a   :  { %1927 = vst.msk [vmem:[%s4894_s5 + $0x80] sm:$0xff] %vm1224_vm1, %v1863_v11  ;;  %1928 = vst.msk [vmem:[%s4894_s5 + $0x88] sm:$0xff] %vm1224_vm1, %v1864_v1  ;;  %v1888_v5 = vmax.f32 %v4481_v9, 0.0  ;;  %v1889_v57 = vmax.f32 %v4485_v8, 0.0  ;;  %v1890_v58 = vmax.f32 %v4489_v43, 0.0  ;;  %v1891_v7 = vmax.f32 %v4493_v47, 0.0 }
 0x24b   :  { %1929 = vst.msk [vmem:[%s4894_s5 + $0x90] sm:$0xff] %vm1224_vm1, %v1865_v29  ;;  %1930 = vst.msk [vmem:[%s4894_s5 + $0x98] sm:$0xff] %vm1224_vm1, %v1866_v23  ;;  %v4935_v12 = vld [vmem:[#allocation3_spill] sm:$0xff]  ;;  %v4936_v32 = vld [vmem:[#allocation4_spill] sm:$0xff]  ;;  %v1898_v18 = vmax.f32 %v4521_v3, 0.0  ;;  %v1899_v3 = vmax.f32 %v4525_v36, 0.0 }
 0x24c   :  { %1931 = vst.msk [vmem:[%s4894_s5 + $0xa0] sm:$0xff] %vm1224_vm1, %v1867_v25  ;;  %1932 = vst.msk [vmem:[%s4894_s5 + $0xa8] sm:$0xff] %vm1224_vm1, %v1868_v39  ;;  %v1892_v63 = vmax.f32 %v4935_v12, 0.0  ;;  %v1893_v27 = vmax.f32 %v4936_v32, 0.0  ;;  %v4937_v44 = vld [vmem:[#allocation5_spill] sm:$0xff]  ;;  %v4938_v60 = vld [vmem:[#allocation6_spill] sm:$0xff] }
 0x24d   :  { %1933 = vst.msk [vmem:[%s4894_s5 + $0xb0] sm:$0xff] %vm1224_vm1, %v1869_v28  ;;  %1934 = vst.msk [vmem:[%s4894_s5 + $0xb8] sm:$0xff] %vm1224_vm1, %v1870_v40  ;;  %v1894_v50 = vmax.f32 %v4937_v44, 0.0  ;;  %v1895_v9 = vmax.f32 %v4938_v60, 0.0  ;;  %v4939_v8 = vld [vmem:[#allocation7_spill] sm:$0xff]  ;;  %v4940_v47 = vld [vmem:[#allocation8_spill] sm:$0xff] }
 0x24e   :  { %1935 = vst.msk [vmem:[%s4894_s5 + $0xc0] sm:$0xff] %vm1224_vm1, %v1871_v53  ;;  %1936 = vst.msk [vmem:[%s4894_s5 + $0xc8] sm:$0xff] %vm1224_vm1, %v1872_v46  ;;  %v1896_v43 = vmax.f32 %v4939_v8, 0.0  ;;  %v1897_v31 = vmax.f32 %v4940_v47, 0.0  ;;  %v1900_v13 = vmax.f32 %v4529_v30, 0.0  ;;  %v1901_v52 = vmax.f32 %v4533_v41, 0.0 }
 0x24f   :  { %1937 = vst.msk [vmem:[%s4894_s5 + $0xd0] sm:$0xff] %vm1224_vm1, %v1873_v16  ;;  %1938 = vst.msk [vmem:[%s4894_s5 + $0xd8] sm:$0xff] %vm1224_vm1, %v1874_v2  ;;  %v1902_v62 = vmax.f32 %v4537_v48, 0.0  ;;  %v1903_v36 = vmax.f32 %v4541_v38, 0.0  ;;  %v1904_v30 = vmax.f32 %v4545_v61, 0.0  ;;  %v4941_v41 = vld [vmem:[#allocation9_spill] sm:$0xff] }
 0x250   :  { %1939 = vst.msk [vmem:[%s4894_s5 + $0xe0] sm:$0xff] %vm1224_vm1, %v1875_v49  ;;  %1940 = vst.msk [vmem:[%s4894_s5 + $0xe8] sm:$0xff] %vm1224_vm1, %v1876_v33  ;;  %v1905_v48 = vmax.f32 %v4941_v41, 0.0  ;;  %v4942_v51 = vld [vmem:[#allocation10_spill] sm:$0xff]  ;;  %v4943_v38 = vld [vmem:[#allocation11_spill] sm:$0xff]  ;;  %v1910_v35 = vmax.f32 %v4569_v19, 0.0 }
 0x251   :  { %1941 = vst.msk [vmem:[%s4894_s5 + $0xf0] sm:$0xff] %vm1224_vm1, %v1877_v34  ;;  %1942 = vst.msk [vmem:[%s4894_s5 + $0xf8] sm:$0xff] %vm1224_vm1, %v1878_v21  ;;  %v1906_v42 = vmax.f32 %v4942_v51, 0.0  ;;  %v1907_v61 = vmax.f32 %v4943_v38, 0.0  ;;  %v4944_v10 = vld [vmem:[#allocation12_spill] sm:$0xff]  ;;  %v4945_v26 = vld [vmem:[#allocation13_spill] sm:$0xff] }
 0x252   :  { %1943 = vst.msk [vmem:[%s4894_s5 + $0x100] sm:$0xff] %vm1224_vm1, %v1879_v24  ;;  %1944 = vst.msk [vmem:[%s4894_s5 + $0x108] sm:$0xff] %vm1224_vm1, %v1880_v45  ;;  %v1908_v22 = vmax.f32 %v4944_v10, 0.0  ;;  %v1909_v56 = vmax.f32 %v4945_v26, 0.0 }
 0x253   :  { %1945 = vst.msk [vmem:[%s4894_s5 + $0x110] sm:$0xff] %vm1224_vm1, %v1881_v55  ;;  %1946 = vst.msk [vmem:[%s4894_s5 + $0x118] sm:$0xff] %vm1224_vm1, %v1882_v59 }
 0x254   :  { %1947 = vst.msk [vmem:[%s4894_s5 + $0x120] sm:$0xff] %vm1224_vm1, %v1883_v54  ;;  %1948 = vst.msk [vmem:[%s4894_s5 + $0x128] sm:$0xff] %vm1224_vm1, %v1884_v14 }
 0x255   :  { %1949 = vst.msk [vmem:[%s4894_s5 + $0x130] sm:$0xff] %vm1224_vm1, %v1885_v17  ;;  %1950 = vst.msk [vmem:[%s4894_s5 + $0x138] sm:$0xff] %vm1224_vm1, %v1886_v20 }
 0x256   :  { %1951 = vst.msk [vmem:[%s4894_s5 + $0x140] sm:$0xff] %vm1224_vm1, %v1887_v4  ;;  %1952 = vst.msk [vmem:[%s4894_s5 + $0x148] sm:$0xff] %vm1224_vm1, %v1888_v5 }
 0x257   :  { %1953 = vst.msk [vmem:[%s4894_s5 + $0x150] sm:$0xff] %vm1224_vm1, %v1889_v57  ;;  %1954 = vst.msk [vmem:[%s4894_s5 + $0x158] sm:$0xff] %vm1224_vm1, %v1890_v58 }
 0x258   :  { %1955 = vst.msk [vmem:[%s4894_s5 + $0x160] sm:$0xff] %vm1224_vm1, %v1891_v7  ;;  %1956 = vst.msk [vmem:[%s4894_s5 + $0x168] sm:$0xff] %vm1224_vm1, %v1892_v63 }
 0x259   :  { %1957 = vst.msk [vmem:[%s4894_s5 + $0x170] sm:$0xff] %vm1224_vm1, %v1893_v27  ;;  %1958 = vst.msk [vmem:[%s4894_s5 + $0x178] sm:$0xff] %vm1224_vm1, %v1894_v50 }
 0x25a   :  { %1959 = vst.msk [vmem:[%s4894_s5 + $0x180] sm:$0xff] %vm1224_vm1, %v1895_v9  ;;  %1960 = vst.msk [vmem:[%s4894_s5 + $0x188] sm:$0xff] %vm1224_vm1, %v1896_v43 }
 0x25b   :  { %1961 = vst.msk [vmem:[%s4894_s5 + $0x190] sm:$0xff] %vm1224_vm1, %v1897_v31  ;;  %1962 = vst.msk [vmem:[%s4894_s5 + $0x198] sm:$0xff] %vm1224_vm1, %v1898_v18 }
 0x25c   :  { %1963 = vst.msk [vmem:[%s4894_s5 + $0x1a0] sm:$0xff] %vm1224_vm1, %v1899_v3  ;;  %1964 = vst.msk [vmem:[%s4894_s5 + $0x1a8] sm:$0xff] %vm1224_vm1, %v1900_v13 }
 0x25d   :  { %1965 = vst.msk [vmem:[%s4894_s5 + $0x1b0] sm:$0xff] %vm1224_vm1, %v1901_v52  ;;  %1966 = vst.msk [vmem:[%s4894_s5 + $0x1b8] sm:$0xff] %vm1224_vm1, %v1902_v62 }
 0x25e   :  { %1967 = vst.msk [vmem:[%s4894_s5 + $0x1c0] sm:$0xff] %vm1224_vm1, %v1903_v36  ;;  %1968 = vst.msk [vmem:[%s4894_s5 + $0x1c8] sm:$0xff] %vm1224_vm1, %v1904_v30 }
 0x25f   :  { %1969 = vst.msk [vmem:[%s4894_s5 + $0x1d0] sm:$0xff] %vm1224_vm1, %v1905_v48  ;;  %1970 = vst.msk [vmem:[%s4894_s5 + $0x1d8] sm:$0xff] %vm1224_vm1, %v1906_v42 }
 0x260   :  { %1971 = vst.msk [vmem:[%s4894_s5 + $0x1e0] sm:$0xff] %vm1224_vm1, %v1907_v61  ;;  %1972 = vst.msk [vmem:[%s4894_s5 + $0x1e8] sm:$0xff] %vm1224_vm1, %v1908_v22 }
 0x261   :  { %1973 = vst.msk [vmem:[%s4894_s5 + $0x1f0] sm:$0xff] %vm1224_vm1, %v1909_v56  ;;  %1974 = vst.msk [vmem:[%s4894_s5 + $0x1f8] sm:$0xff] %vm1224_vm1, %v1910_v35 }

// kernel: mul.102
= control target key start
LH: loop header
LB: loop body
LE: loop exit
PB: predicated region body
PF: predicated region fallthrough
CT: control target
= control target key end

     0   :  { %s474_s0 = inlined_call_operand.vmem [shape: f32[2,16], index: 0, kind: input, shape index: {}]   ;;  %s475_s1 = inlined_call_operand.vmem [shape: f32[2,16,16,16], index: 1, kind: output, shape index: {}]  }
   0x1   :  { %v211_v0 = vld [vmem:[%s474_s0] ss:$0 sm:$0xff]  ;;  %v216_v1 = vld [vmem:[%s474_s0 + $0x1] ss:$0 sm:$0xff] }
   0x2   :  { %5 = vst [vmem:[%s475_s1] sm:$0xff] %v211_v0  ;;  %135 = vst [vmem:[%s475_s1 + $0x100] sm:$0xff] %v216_v1 }
   0x3   :  { %136 = vst [vmem:[%s475_s1 + $0x10] sm:$0xff] %v211_v0  ;;  %137 = vst [vmem:[%s475_s1 + $0x110] sm:$0xff] %v216_v1 }
   0x4   :  { %138 = vst [vmem:[%s475_s1 + $0x20] sm:$0xff] %v211_v0  ;;  %139 = vst [vmem:[%s475_s1 + $0x120] sm:$0xff] %v216_v1 }
   0x5   :  { %140 = vst [vmem:[%s475_s1 + $0x30] sm:$0xff] %v211_v0  ;;  %141 = vst [vmem:[%s475_s1 + $0x130] sm:$0xff] %v216_v1 }
   0x6   :  { %142 = vst [vmem:[%s475_s1 + $0x40] sm:$0xff] %v211_v0  ;;  %143 = vst [vmem:[%s475_s1 + $0x140] sm:$0xff] %v216_v1 }
   0x7   :  { %144 = vst [vmem:[%s475_s1 + $0x50] sm:$0xff] %v211_v0  ;;  %145 = vst [vmem:[%s475_s1 + $0x150] sm:$0xff] %v216_v1 }
   0x8   :  { %146 = vst [vmem:[%s475_s1 + $0x60] sm:$0xff] %v211_v0  ;;  %147 = vst [vmem:[%s475_s1 + $0x160] sm:$0xff] %v216_v1 }
   0x9   :  { %148 = vst [vmem:[%s475_s1 + $0x70] sm:$0xff] %v211_v0  ;;  %149 = vst [vmem:[%s475_s1 + $0x170] sm:$0xff] %v216_v1 }
   0xa   :  { %150 = vst [vmem:[%s475_s1 + $0x80] sm:$0xff] %v211_v0  ;;  %151 = vst [vmem:[%s475_s1 + $0x180] sm:$0xff] %v216_v1 }
   0xb   :  { %152 = vst [vmem:[%s475_s1 + $0x90] sm:$0xff] %v211_v0  ;;  %153 = vst [vmem:[%s475_s1 + $0x190] sm:$0xff] %v216_v1 }
   0xc   :  { %154 = vst [vmem:[%s475_s1 + $0xa0] sm:$0xff] %v211_v0  ;;  %155 = vst [vmem:[%s475_s1 + $0x1a0] sm:$0xff] %v216_v1 }
   0xd   :  { %156 = vst [vmem:[%s475_s1 + $0xb0] sm:$0xff] %v211_v0  ;;  %157 = vst [vmem:[%s475_s1 + $0x1b0] sm:$0xff] %v216_v1 }
   0xe   :  { %158 = vst [vmem:[%s475_s1 + $0xc0] sm:$0xff] %v211_v0  ;;  %159 = vst [vmem:[%s475_s1 + $0x1c0] sm:$0xff] %v216_v1 }
   0xf   :  { %160 = vst [vmem:[%s475_s1 + $0xd0] sm:$0xff] %v211_v0  ;;  %161 = vst [vmem:[%s475_s1 + $0x1d0] sm:$0xff] %v216_v1 }
  0x10   :  { %162 = vst [vmem:[%s475_s1 + $0xe0] sm:$0xff] %v211_v0  ;;  %163 = vst [vmem:[%s475_s1 + $0x1e0] sm:$0xff] %v216_v1 }
  0x11   :  { %164 = vst [vmem:[%s475_s1 + $0xf0] sm:$0xff] %v211_v0  ;;  %165 = vst [vmem:[%s475_s1 + $0x1f0] sm:$0xff] %v216_v1 }
  0x12   :  { %166 = vst [vmem:[%s475_s1 + $0x8] sm:$0xff] %v211_v0  ;;  %167 = vst [vmem:[%s475_s1 + $0x108] sm:$0xff] %v216_v1 }
  0x13   :  { %168 = vst [vmem:[%s475_s1 + $0x18] sm:$0xff] %v211_v0  ;;  %169 = vst [vmem:[%s475_s1 + $0x118] sm:$0xff] %v216_v1 }
  0x14   :  { %170 = vst [vmem:[%s475_s1 + $0x28] sm:$0xff] %v211_v0  ;;  %171 = vst [vmem:[%s475_s1 + $0x128] sm:$0xff] %v216_v1 }
  0x15   :  { %172 = vst [vmem:[%s475_s1 + $0x38] sm:$0xff] %v211_v0  ;;  %173 = vst [vmem:[%s475_s1 + $0x138] sm:$0xff] %v216_v1 }
  0x16   :  { %174 = vst [vmem:[%s475_s1 + $0x48] sm:$0xff] %v211_v0  ;;  %175 = vst [vmem:[%s475_s1 + $0x148] sm:$0xff] %v216_v1 }
  0x17   :  { %176 = vst [vmem:[%s475_s1 + $0x58] sm:$0xff] %v211_v0  ;;  %177 = vst [vmem:[%s475_s1 + $0x158] sm:$0xff] %v216_v1 }
  0x18   :  { %178 = vst [vmem:[%s475_s1 + $0x68] sm:$0xff] %v211_v0  ;;  %179 = vst [vmem:[%s475_s1 + $0x168] sm:$0xff] %v216_v1 }
  0x19   :  { %180 = vst [vmem:[%s475_s1 + $0x78] sm:$0xff] %v211_v0  ;;  %181 = vst [vmem:[%s475_s1 + $0x178] sm:$0xff] %v216_v1 }
  0x1a   :  { %182 = vst [vmem:[%s475_s1 + $0x88] sm:$0xff] %v211_v0  ;;  %183 = vst [vmem:[%s475_s1 + $0x188] sm:$0xff] %v216_v1 }
  0x1b   :  { %184 = vst [vmem:[%s475_s1 + $0x98] sm:$0xff] %v211_v0  ;;  %185 = vst [vmem:[%s475_s1 + $0x198] sm:$0xff] %v216_v1 }
  0x1c   :  { %186 = vst [vmem:[%s475_s1 + $0xa8] sm:$0xff] %v211_v0  ;;  %187 = vst [vmem:[%s475_s1 + $0x1a8] sm:$0xff] %v216_v1 }
  0x1d   :  { %188 = vst [vmem:[%s475_s1 + $0xb8] sm:$0xff] %v211_v0  ;;  %189 = vst [vmem:[%s475_s1 + $0x1b8] sm:$0xff] %v216_v1 }
  0x1e   :  { %190 = vst [vmem:[%s475_s1 + $0xc8] sm:$0xff] %v211_v0  ;;  %191 = vst [vmem:[%s475_s1 + $0x1c8] sm:$0xff] %v216_v1 }
  0x1f   :  { %192 = vst [vmem:[%s475_s1 + $0xd8] sm:$0xff] %v211_v0  ;;  %193 = vst [vmem:[%s475_s1 + $0x1d8] sm:$0xff] %v216_v1 }
  0x20   :  { %194 = vst [vmem:[%s475_s1 + $0xe8] sm:$0xff] %v211_v0  ;;  %195 = vst [vmem:[%s475_s1 + $0x1e8] sm:$0xff] %v216_v1 }
  0x21   :  { %196 = vst [vmem:[%s475_s1 + $0xf8] sm:$0xff] %v211_v0  ;;  %197 = vst [vmem:[%s475_s1 + $0x1f8] sm:$0xff] %v216_v1 }

// kernel: contrast_module_deep.8
= control target key start
LH: loop header
LB: loop body
LE: loop exit
PB: predicated region body
PF: predicated region fallthrough
CT: control target
= control target key end

     0   :  { %v6756_v0 = vmov 0.0   ;;  %vm330_vm0 = vcmask 130048   ;;  %vm36_vm1 = vcmask 123904   ;;  %vm2542_vm2 = vcmask 122880   ;;  %s6746_s3 = inlined_call_operand.vmem [shape: f32[144,16], index: 3, kind: input, shape index: {}]   ;;  %s6747_s2 = inlined_call_operand.vmem [shape: f32[512,144], index: 2, kind: input, shape index: {}]   ;;  %s6748_s1 = inlined_call_operand.vmem [shape: f32[144,16], index: 1, kind: input, shape index: {}]   ;;  %s6749_s5 = inlined_call_operand.vmem [shape: f32[144,16], index: 5, kind: input, shape index: {}]   ;;  %s6750_s0 = inlined_call_operand.vmem [shape: f32[512,144], index: 0, kind: input, shape index: {}]   ;;  %s6751_s4 = inlined_call_operand.vmem [shape: f32[512,144], index: 4, kind: input, shape index: {}]   ;;  %s6752_s6 = inlined_call_operand.vmem [shape: f32[1,16], index: 6, kind: input, shape index: {}]   ;;  %s6753_s9 = inlined_call_operand.vmem [shape: f32[512,16], index: 9, kind: output, shape index: {}]   ;;  %s6754_s7 = inlined_call_operand.vmem [shape: f32[1,16], index: 7, kind: input, shape index: {}]   ;;  %s6755_s8 = inlined_call_operand.vmem [shape: f32[1,16], index: 8, kind: input, shape index: {}]  }
   0x1   :  { %3290 = vmatprep.subr.mxu1 %v6756_v0  ;;  %523 = vmatprep.subr.mxu0 %v6756_v0  ;;  %v327_v1 = vld [vmem:[%s6746_s3 + $0x78] sm:$0xff]  ;;  %v326_v2 = vld [vmem:[%s6746_s3 + $0x70] sm:$0xff]  ;;  %v325_v3 = vld [vmem:[%s6746_s3 + $0x68] sm:$0xff] }
   0x2   :  { %3308 = vmatpush1.msra.mxu1 %v327_v1  ;;  %524 = vmatpush1.msra.mxu0 %v327_v1  ;;  %v324_v4 = vld [vmem:[%s6746_s3 + $0x60] sm:$0xff]  ;;  %v323_v5 = vld [vmem:[%s6746_s3 + $0x58] sm:$0xff]  ;;  %v322_v6 = vld [vmem:[%s6746_s3 + $0x50] sm:$0xff] }
   0x3   :  { %3291 = vmatprep.subr.mxu1 %v6756_v0  ;;  %525 = vmatprep.subr.mxu0 %v6756_v0  ;;  %v321_v7 = vld [vmem:[%s6746_s3 + $0x48] sm:$0xff]  ;;  %v320_v8 = vld [vmem:[%s6746_s3 + $0x40] sm:$0xff]  ;;  %v319_v9 = vld [vmem:[%s6746_s3 + $0x38] sm:$0xff] }
   0x4   :  { %3309 = vmatpush1.msra.mxu1 %v326_v2  ;;  %526 = vmatpush1.msra.mxu0 %v326_v2  ;;  %v318_v10 = vld [vmem:[%s6746_s3 + $0x30] sm:$0xff]  ;;  %v317_v11 = vld [vmem:[%s6746_s3 + $0x28] sm:$0xff]  ;;  %v316_v12 = vld [vmem:[%s6746_s3 + $0x20] sm:$0xff] }
   0x5   :  { %3292 = vmatprep.subr.mxu1 %v6756_v0  ;;  %527 = vmatprep.subr.mxu0 %v6756_v0  ;;  %v315_v13 = vld [vmem:[%s6746_s3 + $0x18] sm:$0xff]  ;;  %v314_v14 = vld [vmem:[%s6746_s3 + $0x10] sm:$0xff]  ;;  %v313_v15 = vld [vmem:[%s6746_s3 + $0x8] sm:$0xff] }
   0x6   :  { %3310 = vmatpush1.msra.mxu1 %v325_v3  ;;  %528 = vmatpush1.msra.mxu0 %v325_v3  ;;  %v312_v16 = vld [vmem:[%s6746_s3] sm:$0xff]  ;;  %v329_v17 = vld [vmem:[%s6746_s3 + $0x88] sm:$0xff]  ;;  %v181_v23 = vld [vmem:[%s6748_s1 + $0x78] sm:$0xff] }
   0x7   :  { %3293 = vmatprep.subr.mxu1 %v6756_v0  ;;  %529 = vmatprep.subr.mxu0 %v6756_v0  ;;  %v328_v18 = vld [vmem:[%s6746_s3 + $0x80] sm:$0xff]  ;;  %v249_v19 = vld [vmem:[%s6747_s2 + $0x208] sm:$0xff]  ;;  %v251_v24 = vld [vmem:[%s6747_s2 + $0x218] sm:$0xff] }
   0x8   :  { %3311 = vmatpush1.msra.mxu1 %v324_v4  ;;  %530 = vmatpush1.msra.mxu0 %v324_v4  ;;  %v185_v20 = vld [vmem:[%s6747_s2 + $0x8] sm:$0xff]  ;;  %v248_v21 = vld [vmem:[%s6747_s2 + $0x200] sm:$0xff]  ;;  %v1628_v25 = vld [vmem:[%s6749_s5 + $0x78] sm:$0xff] }
   0x9   :  { %3294 = vmatprep.subr.mxu1 %v6756_v0  ;;  %531 = vmatprep.subr.mxu0 %v6756_v0  ;;  %v184_v22 = vld [vmem:[%s6747_s2] sm:$0xff]  ;;  %v187_v26 = vld [vmem:[%s6747_s2 + $0x18] sm:$0xff]  ;;  %v250_v27 = vld [vmem:[%s6747_s2 + $0x210] sm:$0xff] }
   0xa   :  { %3312 = vmatpush1.msra.mxu1 %v323_v5  ;;  %532 = vmatpush1.msra.mxu0 %v323_v5  ;;  %v186_v28 = vld [vmem:[%s6747_s2 + $0x10] sm:$0xff]  ;;  %v253_v29 = vld [vmem:[%s6747_s2 + $0x228] sm:$0xff]  ;;  %v252_v32 = vld [vmem:[%s6747_s2 + $0x220] sm:$0xff] }
   0xb   :  { %3295 = vmatprep.subr.mxu1 %v6756_v0  ;;  %533 = vmatprep.subr.mxu0 %v6756_v0  ;;  %v189_v30 = vld [vmem:[%s6747_s2 + $0x28] sm:$0xff]  ;;  %v180_v31 = vld [vmem:[%s6748_s1 + $0x70] sm:$0xff]  ;;  %v188_v34 = vld [vmem:[%s6747_s2 + $0x20] sm:$0xff] }
   0xc   :  { %3313 = vmatpush1.msra.mxu1 %v322_v6  ;;  %534 = vmatpush1.msra.mxu0 %v322_v6  ;;  %v1627_v33 = vld [vmem:[%s6749_s5 + $0x70] sm:$0xff]  ;;  %v255_v35 = vld [vmem:[%s6747_s2 + $0x238] sm:$0xff]  ;;  %v179_v37 = vld [vmem:[%s6748_s1 + $0x68] sm:$0xff] }
   0xd   :  { %3296 = vmatprep.subr.mxu1 %v6756_v0  ;;  %535 = vmatprep.subr.mxu0 %v6756_v0  ;;  %v191_v36 = vld [vmem:[%s6747_s2 + $0x38] sm:$0xff]  ;;  %v254_v38 = vld [vmem:[%s6747_s2 + $0x230] sm:$0xff]  ;;  %v1626_v39 = vld [vmem:[%s6749_s5 + $0x68] sm:$0xff] }
   0xe   :  { %3314 = vmatpush1.msra.mxu1 %v321_v7  ;;  %536 = vmatpush1.msra.mxu0 %v321_v7  ;;  %v190_v40 = vld [vmem:[%s6747_s2 + $0x30] sm:$0xff]  ;;  %v257_v41 = vld [vmem:[%s6747_s2 + $0x248] sm:$0xff]  ;;  %v178_v43 = vld [vmem:[%s6748_s1 + $0x60] sm:$0xff] }
   0xf   :  { %3297 = vmatprep.subr.mxu1 %v6756_v0  ;;  %537 = vmatprep.subr.mxu0 %v6756_v0  ;;  %v193_v42 = vld [vmem:[%s6747_s2 + $0x48] sm:$0xff]  ;;  %v256_v44 = vld [vmem:[%s6747_s2 + $0x240] sm:$0xff]  ;;  %v259_v47 = vld [vmem:[%s6747_s2 + $0x258] sm:$0xff] }
  0x10   :  { %3315 = vmatpush1.msra.mxu1 %v320_v8  ;;  %538 = vmatpush1.msra.mxu0 %v320_v8  ;;  %v1625_v45 = vld [vmem:[%s6749_s5 + $0x60] sm:$0xff]  ;;  %v195_v48 = vld [vmem:[%s6747_s2 + $0x58] sm:$0xff]  ;;  %v258_v50 = vld [vmem:[%s6747_s2 + $0x250] sm:$0xff] }
  0x11   :  { %3298 = vmatprep.subr.mxu1 %v6756_v0  ;;  %539 = vmatprep.subr.mxu0 %v6756_v0  ;;  %v192_v46 = vld [vmem:[%s6747_s2 + $0x40] sm:$0xff]  ;;  %v177_v49 = vld [vmem:[%s6748_s1 + $0x58] sm:$0xff]  ;;  %v194_v52 = vld [vmem:[%s6747_s2 + $0x50] sm:$0xff] }
  0x12   :  { %3316 = vmatpush1.msra.mxu1 %v319_v9  ;;  %540 = vmatpush1.msra.mxu0 %v319_v9  ;;  %v1624_v51 = vld [vmem:[%s6749_s5 + $0x58] sm:$0xff]  ;;  %v261_v53 = vld [vmem:[%s6747_s2 + $0x268] sm:$0xff]  ;;  %v176_v55 = vld [vmem:[%s6748_s1 + $0x50] sm:$0xff] }
  0x13   :  { %3299 = vmatprep.subr.mxu1 %v6756_v0  ;;  %541 = vmatprep.subr.mxu0 %v6756_v0  ;;  %v197_v54 = vld [vmem:[%s6747_s2 + $0x68] sm:$0xff]  ;;  %v260_v56 = vld [vmem:[%s6747_s2 + $0x260] sm:$0xff]  ;;  %v1623_v57 = vld [vmem:[%s6749_s5 + $0x50] sm:$0xff] }
  0x14   :  { %3317 = vmatpush1.msra.mxu1 %v318_v10  ;;  %542 = vmatpush1.msra.mxu0 %v318_v10  ;;  %v196_v58 = vld [vmem:[%s6747_s2 + $0x60] sm:$0xff]  ;;  %v263_v59 = vld [vmem:[%s6747_s2 + $0x278] sm:$0xff]  ;;  %v175_v61 = vld [vmem:[%s6748_s1 + $0x48] sm:$0xff] }
  0x15   :  { %3300 = vmatprep.subr.mxu1 %v6756_v0  ;;  %543 = vmatprep.subr.mxu0 %v6756_v0  ;;  %v199_v60 = vld [vmem:[%s6747_s2 + $0x78] sm:$0xff]  ;;  %v262_v62 = vld [vmem:[%s6747_s2 + $0x270] sm:$0xff]  ;;  %v1622_v63 = vld [vmem:[%s6749_s5 + $0x48] sm:$0xff] }
  0x16   :  { %3318 = vmatpush1.msra.mxu1 %v317_v11  ;;  %544 = vmatpush1.msra.mxu0 %v317_v11  ;;  %v198_v1 = vld [vmem:[%s6747_s2 + $0x70] sm:$0xff]  ;;  %v265_v2 = vld [vmem:[%s6747_s2 + $0x288] sm:$0xff]  ;;  %v174_v4 = vld [vmem:[%s6748_s1 + $0x40] sm:$0xff] }
  0x17   :  { %3301 = vmatprep.subr.mxu1 %v6756_v0  ;;  %545 = vmatprep.subr.mxu0 %v6756_v0  ;;  %v201_v3 = vld [vmem:[%s6747_s2 + $0x88] sm:$0xff]  ;;  %v264_v5 = vld [vmem:[%s6747_s2 + $0x280] sm:$0xff]  ;;  %v267_v8 = vld [vmem:[%s6747_s2 + $0x298] sm:$0xff] }
  0x18   :  { %3319 = vmatpush1.msra.mxu1 %v316_v12  ;;  %546 = vmatpush1.msra.mxu0 %v316_v12  ;;  %v1621_v6 = vld [vmem:[%s6749_s5 + $0x40] sm:$0xff]  ;;  %v203_v9 = vld [vmem:[%s6747_s2 + $0x98] sm:$0xff]  ;;  %v266_v11 = vld [vmem:[%s6747_s2 + $0x290] sm:$0xff] }
  0x19   :  { %3302 = vmatprep.subr.mxu1 %v6756_v0  ;;  %547 = vmatprep.subr.mxu0 %v6756_v0  ;;  %v200_v7 = vld [vmem:[%s6747_s2 + $0x80] sm:$0xff]  ;;  %v173_v10 = vld [vmem:[%s6748_s1 + $0x38] sm:$0xff] }
  0x1a   :  { %3320 = vmatpush1.msra.mxu1 %v315_v13  ;;  %548 = vmatpush1.msra.mxu0 %v315_v13  ;;  %v1620_v12 = vld [vmem:[%s6749_s5 + $0x38] sm:$0xff]  ;;  %v202_v13 = vld [vmem:[%s6747_s2 + $0x90] sm:$0xff] }
  0x1b   :  { %3303 = vmatprep.subr.mxu1 %v6756_v0  ;;  %549 = vmatprep.subr.mxu0 %v6756_v0 }
  0x1c   :  { %3321 = vmatpush1.msra.mxu1 %v314_v14  ;;  %550 = vmatpush1.msra.mxu0 %v314_v14  ;;  %v269_v14 = vld [vmem:[%s6747_s2 + $0x2a8] sm:$0xff] }
  0x1d   :  { %3304 = vmatprep.subr.mxu1 %v6756_v0  ;;  %551 = vmatprep.subr.mxu0 %v6756_v0 }
  0x1e   :  { %3322 = vmatpush1.msra.mxu1 %v313_v15  ;;  %552 = vmatpush1.msra.mxu0 %v313_v15  ;;  %v205_v15 = vld [vmem:[%s6747_s2 + $0xa8] sm:$0xff] }
  0x1f   :  { %3305 = vmatprep.subr.mxu1 %v6756_v0  ;;  %553 = vmatprep.subr.mxu0 %v6756_v0 }
  0x20   :  { %3323 = vmatpush1.msra.mxu1 %v312_v16  ;;  %554 = vmatpush1.msra.mxu0 %v312_v16  ;;  %v172_v16 = vld [vmem:[%s6748_s1 + $0x30] sm:$0xff] }
  0x21   :  { %3306 = vmatprep.subr.mxu1 %v6756_v0  ;;  %583 = vmatprep.subr.mxu0 %v6756_v0 }
  0x22   :  { %3324 = vmatpush2.msra.mxu1 %v329_v17  ;;  %584 = vmatpush2.msra.mxu0 %v329_v17  ;;  %v268_v17 = vld [vmem:[%s6747_s2 + $0x2a0] sm:$0xff] }
  0x23   :  { %3307 = vmatprep.subr.mxu1 %v6756_v0  ;;  %585 = vmatprep.subr.mxu0 %v6756_v0 }
  0x24   :  { %3325 = vmatpush2.msra.mxu1 %v328_v18  ;;  %3129 = vmatprep.mubr.msk.f32.mxu1 %vm330_vm0, %v249_v19  ;;  %v204_v19 = vld [vmem:[%s6747_s2 + $0xa0] sm:$0xff] }
  0x25   :  { %586 = vmatpush2.msra.mxu0 %v328_v18  ;;  %3097 = vmatprep.mubr.msk.f32.mxu0 %vm330_vm0, %v185_v20  ;;  %v1619_v18 = vld [vmem:[%s6749_s5 + $0x30] sm:$0xff]  ;;  %v271_v20 = vld [vmem:[%s6747_s2 + $0x2b8] sm:$0xff] }
  0x26   :  { %748 = vmatmul.mubr.f32.vlgmr.msra.gmra.mxu1 %v248_v21  ;;  %1100 = vmatprep.subr.mxu1 %v6756_v0  ;;  %v207_v21 = vld [vmem:[%s6747_s2 + $0xb8] sm:$0xff] }
  0x27   :  { %588 = vmatmul.mubr.f32.vlgmr.msra.gmra.mxu0 %v184_v22  ;;  %1101 = vmatpush1.msra.mxu1 %v181_v23  ;;  %v171_v22 = vld [vmem:[%s6748_s1 + $0x28] sm:$0xff]  ;;  %v270_v23 = vld [vmem:[%s6747_s2 + $0x2b0] sm:$0xff] }
  0x28   :  { %1823 = vmatprep.subr.mxu0 %v6756_v0  ;;  %3130 = vmatprep.mubr.msk.f32.mxu1 %vm330_vm0, %v251_v24  ;;  %v1618_v24 = vld [vmem:[%s6749_s5 + $0x28] sm:$0xff] }
  0x29   :  { %1824 = vmatpush1.msra.mxu0 %v1628_v25  ;;  %3098 = vmatprep.mubr.msk.f32.mxu0 %vm330_vm0, %v187_v26  ;;  %v206_v25 = vld [vmem:[%s6747_s2 + $0xb0] sm:$0xff]  ;;  %v273_v26 = vld [vmem:[%s6747_s2 + $0x2c8] sm:$0xff] }
  0x2a   :  { %753 = vmatmul.mubr.f32.gmra.mxu1 %v250_v27  ;;  %1102 = vmatprep.subr.mxu1 %v6756_v0  ;;  %v209_v27 = vld [vmem:[%s6747_s2 + $0xc8] sm:$0xff] }
  0x2b   :  { %593 = vmatmul.mubr.f32.gmra.mxu0 %v186_v28  ;;  %3131 = vmatprep.mubr.msk.f32.mxu1 %vm330_vm0, %v253_v29  ;;  %v170_v28 = vld [vmem:[%s6748_s1 + $0x20] sm:$0xff] }
  0x2c   :  { %3099 = vmatprep.mubr.msk.f32.mxu0 %vm330_vm0, %v189_v30  ;;  %1103 = vmatpush1.msra.mxu1 %v180_v31  ;;  %v272_v29 = vld [vmem:[%s6747_s2 + $0x2c0] sm:$0xff] }
  0x2d   :  { %1825 = vmatprep.subr.mxu0 %v6756_v0  ;;  %1104 = vmatprep.subr.mxu1 %v6756_v0  ;;  %v1617_v30 = vld [vmem:[%s6749_s5 + $0x20] sm:$0xff] }
  0x2e   :  { %758 = vmatmul.mubr.f32.gmra.mxu1 %v252_v32  ;;  %1826 = vmatpush1.msra.mxu0 %v1627_v33  ;;  %v208_v31 = vld [vmem:[%s6747_s2 + $0xc0] sm:$0xff]  ;;  %v275_v32 = vld [vmem:[%s6747_s2 + $0x2d8] sm:$0xff] }
  0x2f   :  { %598 = vmatmul.mubr.f32.gmra.mxu0 %v188_v34  ;;  %3132 = vmatprep.mubr.msk.f32.mxu1 %vm330_vm0, %v255_v35  ;;  %v211_v33 = vld [vmem:[%s6747_s2 + $0xd8] sm:$0xff]  ;;  %v274_v35 = vld [vmem:[%s6747_s2 + $0x2d0] sm:$0xff] }
  0x30   :  { %3100 = vmatprep.mubr.msk.f32.mxu0 %vm330_vm0, %v191_v36  ;;  %1105 = vmatpush1.msra.mxu1 %v179_v37  ;;  %v169_v34 = vld [vmem:[%s6748_s1 + $0x18] sm:$0xff]  ;;  %v210_v37 = vld [vmem:[%s6747_s2 + $0xd0] sm:$0xff] }
  0x31   :  { %1827 = vmatprep.subr.mxu0 %v6756_v0  ;;  %1106 = vmatprep.subr.mxu1 %v6756_v0  ;;  %v1616_v36 = vld [vmem:[%s6749_s5 + $0x18] sm:$0xff] }
  0x32   :  { %763 = vmatmul.mubr.f32.gmra.mxu1 %v254_v38  ;;  %1828 = vmatpush1.msra.mxu0 %v1626_v39  ;;  %v277_v38 = vld [vmem:[%s6747_s2 + $0x2e8] sm:$0xff] }
  0x33   :  { %603 = vmatmul.mubr.f32.gmra.mxu0 %v190_v40  ;;  %3133 = vmatprep.mubr.msk.f32.mxu1 %vm330_vm0, %v257_v41  ;;  %v213_v39 = vld [vmem:[%s6747_s2 + $0xe8] sm:$0xff]  ;;  %v168_v40 = vld [vmem:[%s6748_s1 + $0x10] sm:$0xff]  ;;  %v276_v41 = vld [vmem:[%s6747_s2 + $0x2e0] sm:$0xff] }
  0x34   :  { %3101 = vmatprep.mubr.msk.f32.mxu0 %vm330_vm0, %v193_v42  ;;  %1107 = vmatpush1.msra.mxu1 %v178_v43  ;;  %v1615_v42 = vld [vmem:[%s6749_s5 + $0x10] sm:$0xff]  ;;  %v212_v43 = vld [vmem:[%s6747_s2 + $0xe0] sm:$0xff] }
  0x35   :  { %1829 = vmatprep.subr.mxu0 %v6756_v0  ;;  %1108 = vmatprep.subr.mxu1 %v6756_v0 }
  0x36   :  { %768 = vmatmul.mubr.f32.gmra.mxu1 %v256_v44  ;;  %1830 = vmatpush1.msra.mxu0 %v1625_v45  ;;  %v279_v44 = vld [vmem:[%s6747_s2 + $0x2f8] sm:$0xff] }
  0x37   :  { %608 = vmatmul.mubr.f32.gmra.mxu0 %v192_v46  ;;  %3134 = vmatprep.mubr.msk.f32.mxu1 %vm330_vm0, %v259_v47  ;;  %v215_v45 = vld [vmem:[%s6747_s2 + $0xf8] sm:$0xff]  ;;  %v167_v46 = vld [vmem:[%s6748_s1 + $0x8] sm:$0xff]  ;;  %v278_v47 = vld [vmem:[%s6747_s2 + $0x2f0] sm:$0xff] }
  0x38   :  { %3102 = vmatprep.mubr.msk.f32.mxu0 %vm330_vm0, %v195_v48  ;;  %1109 = vmatpush1.msra.mxu1 %v177_v49  ;;  %v1614_v48 = vld [vmem:[%s6749_s5 + $0x8] sm:$0xff]  ;;  %v214_v49 = vld [vmem:[%s6747_s2 + $0xf0] sm:$0xff] }
  0x39   :  { %1831 = vmatprep.subr.mxu0 %v6756_v0  ;;  %1110 = vmatprep.subr.mxu1 %v6756_v0 }
  0x3a   :  { %773 = vmatmul.mubr.f32.gmra.mxu1 %v258_v50  ;;  %1832 = vmatpush1.msra.mxu0 %v1624_v51  ;;  %v281_v50 = vld [vmem:[%s6747_s2 + $0x308] sm:$0xff] }
  0x3b   :  { %613 = vmatmul.mubr.f32.gmra.mxu0 %v194_v52  ;;  %3135 = vmatprep.mubr.msk.f32.mxu1 %vm330_vm0, %v261_v53  ;;  %v217_v51 = vld [vmem:[%s6747_s2 + $0x108] sm:$0xff]  ;;  %v166_v52 = vld [vmem:[%s6748_s1] sm:$0xff] }
  0x3c   :  { %3103 = vmatprep.mubr.msk.f32.mxu0 %vm330_vm0, %v197_v54  ;;  %1111 = vmatpush1.msra.mxu1 %v176_v55  ;;  %v280_v53 = vld [vmem:[%s6747_s2 + $0x300] sm:$0xff] }
  0x3d   :  { %1833 = vmatprep.subr.mxu0 %v6756_v0  ;;  %1112 = vmatprep.subr.mxu1 %v6756_v0  ;;  %v1613_v54 = vld [vmem:[%s6749_s5] sm:$0xff] }
  0x3e   :  { %778 = vmatmul.mubr.f32.gmra.mxu1 %v260_v56  ;;  %1834 = vmatpush1.msra.mxu0 %v1623_v57  ;;  %v216_v55 = vld [vmem:[%s6747_s2 + $0x100] sm:$0xff]  ;;  %v283_v56 = vld [vmem:[%s6747_s2 + $0x318] sm:$0xff] }
  0x3f   :  { %618 = vmatmul.mubr.f32.gmra.mxu0 %v196_v58  ;;  %3136 = vmatprep.mubr.msk.f32.mxu1 %vm330_vm0, %v263_v59  ;;  %v219_v57 = vld [vmem:[%s6747_s2 + $0x118] sm:$0xff]  ;;  %v183_v58 = vld [vmem:[%s6748_s1 + $0x88] sm:$0xff]  ;;  %v282_v59 = vld [vmem:[%s6747_s2 + $0x310] sm:$0xff] }
  0x40   :  { %3104 = vmatprep.mubr.msk.f32.mxu0 %vm330_vm0, %v199_v60  ;;  %1113 = vmatpush1.msra.mxu1 %v175_v61  ;;  %v1630_v60 = vld [vmem:[%s6749_s5 + $0x88] sm:$0xff]  ;;  %v218_v61 = vld [vmem:[%s6747_s2 + $0x110] sm:$0xff] }
  0x41   :  { %1835 = vmatprep.subr.mxu0 %v6756_v0  ;;  %1114 = vmatprep.subr.mxu1 %v6756_v0 }
  0x42   :  { %783 = vmatmul.mubr.f32.gmra.mxu1 %v262_v62  ;;  %1836 = vmatpush1.msra.mxu0 %v1622_v63  ;;  %v285_v62 = vld [vmem:[%s6747_s2 + $0x328] sm:$0xff] }
  0x43   :  { %623 = vmatmul.mubr.f32.gmra.mxu0 %v198_v1  ;;  %3137 = vmatprep.mubr.msk.f32.mxu1 %vm330_vm0, %v265_v2  ;;  %v221_v63 = vld [vmem:[%s6747_s2 + $0x128] sm:$0xff]  ;;  %v182_v1 = vld [vmem:[%s6748_s1 + $0x80] sm:$0xff] }
  0x44   :  { %3105 = vmatprep.mubr.msk.f32.mxu0 %vm330_vm0, %v201_v3  ;;  %1115 = vmatpush1.msra.mxu1 %v174_v4  ;;  %v284_v2 = vld [vmem:[%s6747_s2 + $0x320] sm:$0xff] }
  0x45   :  { %1837 = vmatprep.subr.mxu0 %v6756_v0  ;;  %1116 = vmatprep.subr.mxu1 %v6756_v0  ;;  %v1629_v3 = vld [vmem:[%s6749_s5 + $0x80] sm:$0xff] }
  0x46   :  { %788 = vmatmul.mubr.f32.gmra.mxu1 %v264_v5  ;;  %1838 = vmatpush1.msra.mxu0 %v1621_v6  ;;  %v220_v4 = vld [vmem:[%s6747_s2 + $0x120] sm:$0xff]  ;;  %v287_v5 = vld [vmem:[%s6747_s2 + $0x338] sm:$0xff] }
  0x47   :  { %628 = vmatmul.mubr.f32.gmra.mxu0 %v200_v7  ;;  %3138 = vmatprep.mubr.msk.f32.mxu1 %vm330_vm0, %v267_v8  ;;  %v223_v6 = vld [vmem:[%s6747_s2 + $0x138] sm:$0xff]  ;;  %v286_v7 = vld [vmem:[%s6747_s2 + $0x330] sm:$0xff] }
  0x48   :  { %3106 = vmatprep.mubr.msk.f32.mxu0 %vm330_vm0, %v203_v9  ;;  %1117 = vmatpush1.msra.mxu1 %v173_v10  ;;  %v222_v8 = vld [vmem:[%s6747_s2 + $0x130] sm:$0xff]  ;;  %v289_v9 = vld [vmem:[%s6747_s2 + $0x348] sm:$0xff] }
  0x49   :  { %1839 = vmatprep.subr.mxu0 %v6756_v0  ;;  %1118 = vmatprep.subr.mxu1 %v6756_v0  ;;  %v225_v10 = vld [vmem:[%s6747_s2 + $0x148] sm:$0xff] }
  0x4a   :  { %793 = vmatmul.mubr.f32.gmra.mxu1 %v266_v11  ;;  %1840 = vmatpush1.msra.mxu0 %v1620_v12  ;;  %v288_v11 = vld [vmem:[%s6747_s2 + $0x340] sm:$0xff] }
  0x4b   :  { %633 = vmatmul.mubr.f32.gmra.mxu0 %v202_v13  ;;  %3139 = vmatprep.mubr.msk.f32.mxu1 %vm330_vm0, %v269_v14  ;;  %v224_v12 = vld [vmem:[%s6747_s2 + $0x140] sm:$0xff]  ;;  %v291_v13 = vld [vmem:[%s6747_s2 + $0x358] sm:$0xff] }
  0x4c   :  { %3107 = vmatprep.mubr.msk.f32.mxu0 %vm330_vm0, %v205_v15  ;;  %1119 = vmatpush1.msra.mxu1 %v172_v16  ;;  %v227_v14 = vld [vmem:[%s6747_s2 + $0x158] sm:$0xff]  ;;  %v290_v15 = vld [vmem:[%s6747_s2 + $0x350] sm:$0xff] }
  0x4d   :  { %1841 = vmatprep.subr.mxu0 %v6756_v0  ;;  %1120 = vmatprep.subr.mxu1 %v6756_v0  ;;  %v226_v16 = vld [vmem:[%s6747_s2 + $0x150] sm:$0xff] }
  0x4e   :  { %798 = vmatmul.mubr.f32.gmra.mxu1 %v268_v17  ;;  %1842 = vmatpush1.msra.mxu0 %v1619_v18  ;;  %v293_v17 = vld [vmem:[%s6747_s2 + $0x368] sm:$0xff] }
  0x4f   :  { %638 = vmatmul.mubr.f32.gmra.mxu0 %v204_v19  ;;  %3140 = vmatprep.mubr.msk.f32.mxu1 %vm330_vm0, %v271_v20  ;;  %v229_v18 = vld [vmem:[%s6747_s2 + $0x168] sm:$0xff]  ;;  %v292_v19 = vld [vmem:[%s6747_s2 + $0x360] sm:$0xff] }
  0x50   :  { %3108 = vmatprep.mubr.msk.f32.mxu0 %vm330_vm0, %v207_v21  ;;  %1121 = vmatpush1.msra.mxu1 %v171_v22  ;;  %v228_v20 = vld [vmem:[%s6747_s2 + $0x160] sm:$0xff]  ;;  %v295_v21 = vld [vmem:[%s6747_s2 + $0x378] sm:$0xff] }
  0x51   :  { %1843 = vmatprep.subr.mxu0 %v6756_v0  ;;  %1122 = vmatprep.subr.mxu1 %v6756_v0  ;;  %v231_v22 = vld [vmem:[%s6747_s2 + $0x178] sm:$0xff] }
  0x52   :  { %803 = vmatmul.mubr.f32.gmra.mxu1 %v270_v23  ;;  %1844 = vmatpush1.msra.mxu0 %v1618_v24  ;;  %v294_v23 = vld [vmem:[%s6747_s2 + $0x370] sm:$0xff] }
  0x53   :  { %643 = vmatmul.mubr.f32.gmra.mxu0 %v206_v25  ;;  %3141 = vmatprep.mubr.msk.f32.mxu1 %vm330_vm0, %v273_v26  ;;  %v230_v24 = vld [vmem:[%s6747_s2 + $0x170] sm:$0xff]  ;;  %v297_v25 = vld [vmem:[%s6747_s2 + $0x388] sm:$0xff] }
  0x54   :  { %3109 = vmatprep.mubr.msk.f32.mxu0 %vm330_vm0, %v209_v27  ;;  %1123 = vmatpush1.msra.mxu1 %v170_v28  ;;  %v233_v26 = vld [vmem:[%s6747_s2 + $0x188] sm:$0xff]  ;;  %v296_v27 = vld [vmem:[%s6747_s2 + $0x380] sm:$0xff] }
  0x55   :  { %1845 = vmatprep.subr.mxu0 %v6756_v0  ;;  %1124 = vmatprep.subr.mxu1 %v6756_v0  ;;  %v232_v28 = vld [vmem:[%s6747_s2 + $0x180] sm:$0xff] }
  0x56   :  { %808 = vmatmul.mubr.f32.gmra.mxu1 %v272_v29  ;;  %1846 = vmatpush1.msra.mxu0 %v1617_v30  ;;  %v299_v29 = vld [vmem:[%s6747_s2 + $0x398] sm:$0xff] }
  0x57   :  { %648 = vmatmul.mubr.f32.gmra.mxu0 %v208_v31  ;;  %3142 = vmatprep.mubr.msk.f32.mxu1 %vm330_vm0, %v275_v32  ;;  %v235_v30 = vld [vmem:[%s6747_s2 + $0x198] sm:$0xff]  ;;  %v298_v31 = vld [vmem:[%s6747_s2 + $0x390] sm:$0xff] }
  0x58   :  { %3110 = vmatprep.mubr.msk.f32.mxu0 %vm330_vm0, %v211_v33  ;;  %1125 = vmatpush1.msra.mxu1 %v169_v34  ;;  %v234_v32 = vld [vmem:[%s6747_s2 + $0x190] sm:$0xff]  ;;  %v301_v33 = vld [vmem:[%s6747_s2 + $0x3a8] sm:$0xff] }
  0x59   :  { %1847 = vmatprep.subr.mxu0 %v6756_v0  ;;  %1126 = vmatprep.subr.mxu1 %v6756_v0  ;;  %v237_v34 = vld [vmem:[%s6747_s2 + $0x1a8] sm:$0xff] }
  0x5a   :  { %813 = vmatmul.mubr.f32.gmra.mxu1 %v274_v35  ;;  %1848 = vmatpush1.msra.mxu0 %v1616_v36  ;;  %v300_v35 = vld [vmem:[%s6747_s2 + $0x3a0] sm:$0xff] }
  0x5b   :  { %653 = vmatmul.mubr.f32.gmra.mxu0 %v210_v37  ;;  %3143 = vmatprep.mubr.msk.f32.mxu1 %vm330_vm0, %v277_v38  ;;  %v236_v36 = vld [vmem:[%s6747_s2 + $0x1a0] sm:$0xff]  ;;  %v303_v37 = vld [vmem:[%s6747_s2 + $0x3b8] sm:$0xff] }
  0x5c   :  { %3111 = vmatprep.mubr.msk.f32.mxu0 %vm330_vm0, %v213_v39  ;;  %1127 = vmatpush1.msra.mxu1 %v168_v40  ;;  %v239_v38 = vld [vmem:[%s6747_s2 + $0x1b8] sm:$0xff]  ;;  %v302_v39 = vld [vmem:[%s6747_s2 + $0x3b0] sm:$0xff] }
  0x5d   :  { %1849 = vmatprep.subr.mxu0 %v6756_v0  ;;  %1128 = vmatprep.subr.mxu1 %v6756_v0  ;;  %v238_v40 = vld [vmem:[%s6747_s2 + $0x1b0] sm:$0xff] }
  0x5e   :  { %818 = vmatmul.mubr.f32.gmra.mxu1 %v276_v41  ;;  %1850 = vmatpush1.msra.mxu0 %v1615_v42  ;;  %v305_v41 = vld [vmem:[%s6747_s2 + $0x3c8] sm:$0xff] }
  0x5f   :  { %658 = vmatmul.mubr.f32.gmra.mxu0 %v212_v43  ;;  %3144 = vmatprep.mubr.msk.f32.mxu1 %vm330_vm0, %v279_v44  ;;  %v241_v42 = vld [vmem:[%s6747_s2 + $0x1c8] sm:$0xff]  ;;  %v304_v43 = vld [vmem:[%s6747_s2 + $0x3c0] sm:$0xff] }
  0x60   :  { %3112 = vmatprep.mubr.msk.f32.mxu0 %vm330_vm0, %v215_v45  ;;  %1129 = vmatpush1.msra.mxu1 %v167_v46  ;;  %v240_v44 = vld [vmem:[%s6747_s2 + $0x1c0] sm:$0xff]  ;;  %v307_v45 = vld [vmem:[%s6747_s2 + $0x3d8] sm:$0xff] }
  0x61   :  { %1851 = vmatprep.subr.mxu0 %v6756_v0  ;;  %1130 = vmatprep.subr.mxu1 %v6756_v0  ;;  %v243_v46 = vld [vmem:[%s6747_s2 + $0x1d8] sm:$0xff] }
  0x62   :  { %823 = vmatmul.mubr.f32.gmra.mxu1 %v278_v47  ;;  %1852 = vmatpush1.msra.mxu0 %v1614_v48  ;;  %v306_v47 = vld [vmem:[%s6747_s2 + $0x3d0] sm:$0xff] }
  0x63   :  { %663 = vmatmul.mubr.f32.gmra.mxu0 %v214_v49  ;;  %3145 = vmatprep.mubr.msk.f32.mxu1 %vm330_vm0, %v281_v50  ;;  %v242_v48 = vld [vmem:[%s6747_s2 + $0x1d0] sm:$0xff]  ;;  %v309_v49 = vld [vmem:[%s6747_s2 + $0x3e8] sm:$0xff] }
  0x64   :  { %3113 = vmatprep.mubr.msk.f32.mxu0 %vm330_vm0, %v217_v51  ;;  %1131 = vmatpush1.msra.mxu1 %v166_v52  ;;  %v245_v50 = vld [vmem:[%s6747_s2 + $0x1e8] sm:$0xff]  ;;  %v308_v51 = vld [vmem:[%s6747_s2 + $0x3e0] sm:$0xff] }
  0x65   :  { %1853 = vmatprep.subr.mxu0 %v6756_v0  ;;  %1160 = vmatprep.subr.mxu1 %v6756_v0  ;;  %v244_v52 = vld [vmem:[%s6747_s2 + $0x1e0] sm:$0xff] }
  0x66   :  { %828 = vmatmul.mubr.f32.gmra.mxu1 %v280_v53  ;;  %1854 = vmatpush1.msra.mxu0 %v1613_v54  ;;  %v311_v53 = vld [vmem:[%s6747_s2 + $0x3f8] sm:$0xff] }
  0x67   :  { %668 = vmatmul.mubr.f32.gmra.mxu0 %v216_v55  ;;  %3146 = vmatprep.mubr.msk.f32.mxu1 %vm330_vm0, %v283_v56  ;;  %v247_v54 = vld [vmem:[%s6747_s2 + $0x1f8] sm:$0xff]  ;;  %v310_v55 = vld [vmem:[%s6747_s2 + $0x3f0] sm:$0xff] }
  0x68   :  { %3114 = vmatprep.mubr.msk.f32.mxu0 %vm330_vm0, %v219_v57  ;;  %1161 = vmatpush2.msra.mxu1 %v183_v58  ;;  %v246_v56 = vld [vmem:[%s6747_s2 + $0x1f0] sm:$0xff]  ;;  %v39_v57 = vld [vmem:[%s6750_s0 + $0x8] sm:$0xff] }
  0x69   :  { %1883 = vmatprep.subr.mxu0 %v6756_v0  ;;  %1162 = vmatprep.subr.mxu1 %v6756_v0  ;;  %v1486_v58 = vld [vmem:[%s6751_s4 + $0x8] sm:$0xff] }
  0x6a   :  { %833 = vmatmul.mubr.f32.gmra.mxu1 %v282_v59  ;;  %1884 = vmatpush2.msra.mxu0 %v1630_v60  ;;  %v38_v59 = vld [vmem:[%s6750_s0] sm:$0xff] }
  0x6b   :  { %673 = vmatmul.mubr.f32.gmra.mxu0 %v218_v61  ;;  %3147 = vmatprep.mubr.msk.f32.mxu1 %vm330_vm0, %v285_v62  ;;  %v1485_v60 = vld [vmem:[%s6751_s4] sm:$0xff]  ;;  %v41_v61 = vld [vmem:[%s6750_s0 + $0x18] sm:$0xff] }
  0x6c   :  { %3115 = vmatprep.mubr.msk.f32.mxu0 %vm330_vm0, %v221_v63  ;;  %1163 = vmatpush2.msra.mxu1 %v182_v1  ;;  %v1488_v62 = vld [vmem:[%s6751_s4 + $0x18] sm:$0xff]  ;;  %v40_v63 = vld [vmem:[%s6750_s0 + $0x10] sm:$0xff] }
  0x6d   :  { %1885 = vmatprep.subr.mxu0 %v6756_v0  ;;  %v1487_v1 = vld [vmem:[%s6751_s4 + $0x10] sm:$0xff] }
  0x6e   :  { %838 = vmatmul.mubr.f32.gmra.mxu1 %v284_v2  ;;  %1886 = vmatpush2.msra.mxu0 %v1629_v3  ;;  %v43_v2 = vld [vmem:[%s6750_s0 + $0x28] sm:$0xff] }
  0x6f   :  { %678 = vmatmul.mubr.f32.gmra.mxu0 %v220_v4  ;;  %3148 = vmatprep.mubr.msk.f32.mxu1 %vm330_vm0, %v287_v5  ;;  %v1490_v3 = vld [vmem:[%s6751_s4 + $0x28] sm:$0xff]  ;;  %v42_v4 = vld [vmem:[%s6750_s0 + $0x20] sm:$0xff] }
  0x70   :  { %3116 = vmatprep.mubr.msk.f32.mxu0 %vm330_vm0, %v223_v6  ;;  %v1489_v5 = vld [vmem:[%s6751_s4 + $0x20] sm:$0xff]  ;;  %v45_v6 = vld [vmem:[%s6750_s0 + $0x38] sm:$0xff] }
  0x72   :  { %843 = vmatmul.mubr.f32.gmra.mxu1 %v286_v7  ;;  %v1492_v7 = vld [vmem:[%s6751_s4 + $0x38] sm:$0xff] }
  0x73   :  { %683 = vmatmul.mubr.f32.gmra.mxu0 %v222_v8  ;;  %3149 = vmatprep.mubr.msk.f32.mxu1 %vm330_vm0, %v289_v9  ;;  %v44_v8 = vld [vmem:[%s6750_s0 + $0x30] sm:$0xff] }
  0x74   :  { %3117 = vmatprep.mubr.msk.f32.mxu0 %vm330_vm0, %v225_v10  ;;  %v1491_v9 = vld [vmem:[%s6751_s4 + $0x30] sm:$0xff]  ;;  %v47_v10 = vld [vmem:[%s6750_s0 + $0x48] sm:$0xff] }
  0x76   :  { %848 = vmatmul.mubr.f32.gmra.mxu1 %v288_v11  ;;  %v1494_v11 = vld [vmem:[%s6751_s4 + $0x48] sm:$0xff] }
  0x77   :  { %688 = vmatmul.mubr.f32.gmra.mxu0 %v224_v12  ;;  %3150 = vmatprep.mubr.msk.f32.mxu1 %vm330_vm0, %v291_v13  ;;  %v46_v12 = vld [vmem:[%s6750_s0 + $0x40] sm:$0xff] }
  0x78   :  { %3118 = vmatprep.mubr.msk.f32.mxu0 %vm330_vm0, %v227_v14  ;;  %v1493_v13 = vld [vmem:[%s6751_s4 + $0x40] sm:$0xff]  ;;  %v49_v14 = vld [vmem:[%s6750_s0 + $0x58] sm:$0xff] }
  0x7a   :  { %853 = vmatmul.mubr.f32.gmra.mxu1 %v290_v15  ;;  %v1496_v15 = vld [vmem:[%s6751_s4 + $0x58] sm:$0xff] }
  0x7b   :  { %693 = vmatmul.mubr.f32.gmra.mxu0 %v226_v16  ;;  %3151 = vmatprep.mubr.msk.f32.mxu1 %vm330_vm0, %v293_v17  ;;  %v48_v16 = vld [vmem:[%s6750_s0 + $0x50] sm:$0xff] }
  0x7c   :  { %3119 = vmatprep.mubr.msk.f32.mxu0 %vm330_vm0, %v229_v18  ;;  %v1495_v17 = vld [vmem:[%s6751_s4 + $0x50] sm:$0xff]  ;;  %v51_v18 = vld [vmem:[%s6750_s0 + $0x68] sm:$0xff] }
  0x7e   :  { %858 = vmatmul.mubr.f32.gmra.mxu1 %v292_v19  ;;  %v1498_v19 = vld [vmem:[%s6751_s4 + $0x68] sm:$0xff] }
  0x7f   :  { %698 = vmatmul.mubr.f32.gmra.mxu0 %v228_v20  ;;  %3152 = vmatprep.mubr.msk.f32.mxu1 %vm330_vm0, %v295_v21  ;;  %v50_v20 = vld [vmem:[%s6750_s0 + $0x60] sm:$0xff] }
  0x80   :  { %3120 = vmatprep.mubr.msk.f32.mxu0 %vm330_vm0, %v231_v22  ;;  %v1497_v21 = vld [vmem:[%s6751_s4 + $0x60] sm:$0xff]  ;;  %v53_v22 = vld [vmem:[%s6750_s0 + $0x78] sm:$0xff] }
  0x82   :  { %863 = vmatmul.mubr.f32.gmra.mxu1 %v294_v23  ;;  %v1500_v23 = vld [vmem:[%s6751_s4 + $0x78] sm:$0xff] }
  0x83   :  { %703 = vmatmul.mubr.f32.gmra.mxu0 %v230_v24  ;;  %3153 = vmatprep.mubr.msk.f32.mxu1 %vm330_vm0, %v297_v25  ;;  %v52_v24 = vld [vmem:[%s6750_s0 + $0x70] sm:$0xff] }
  0x84   :  { %3121 = vmatprep.mubr.msk.f32.mxu0 %vm330_vm0, %v233_v26  ;;  %v1499_v25 = vld [vmem:[%s6751_s4 + $0x70] sm:$0xff]  ;;  %v55_v26 = vld [vmem:[%s6750_s0 + $0x88] sm:$0xff] }
  0x86   :  { %868 = vmatmul.mubr.f32.gmra.mxu1 %v296_v27  ;;  %v1502_v27 = vld [vmem:[%s6751_s4 + $0x88] sm:$0xff] }
  0x87   :  { %708 = vmatmul.mubr.f32.gmra.mxu0 %v232_v28  ;;  %3154 = vmatprep.mubr.msk.f32.mxu1 %vm330_vm0, %v299_v29  ;;  %v54_v28 = vld [vmem:[%s6750_s0 + $0x80] sm:$0xff] }
  0x88   :  { %3122 = vmatprep.mubr.msk.f32.mxu0 %vm330_vm0, %v235_v30  ;;  %v1501_v29 = vld [vmem:[%s6751_s4 + $0x80] sm:$0xff]  ;;  %v57_v30 = vld [vmem:[%s6750_s0 + $0x98] sm:$0xff] }
  0x8a   :  { %873 = vmatmul.mubr.f32.gmra.mxu1 %v298_v31  ;;  %v1504_v31 = vld [vmem:[%s6751_s4 + $0x98] sm:$0xff] }
  0x8b   :  { %713 = vmatmul.mubr.f32.gmra.mxu0 %v234_v32  ;;  %3155 = vmatprep.mubr.msk.f32.mxu1 %vm330_vm0, %v301_v33  ;;  %v56_v32 = vld [vmem:[%s6750_s0 + $0x90] sm:$0xff] }
  0x8c   :  { %3123 = vmatprep.mubr.msk.f32.mxu0 %vm330_vm0, %v237_v34  ;;  %v1503_v33 = vld [vmem:[%s6751_s4 + $0x90] sm:$0xff]  ;;  %v59_v34 = vld [vmem:[%s6750_s0 + $0xa8] sm:$0xff] }
  0x8e   :  { %878 = vmatmul.mubr.f32.gmra.mxu1 %v300_v35  ;;  %v1506_v35 = vld [vmem:[%s6751_s4 + $0xa8] sm:$0xff] }
  0x8f   :  { %718 = vmatmul.mubr.f32.gmra.mxu0 %v236_v36  ;;  %3156 = vmatprep.mubr.msk.f32.mxu1 %vm330_vm0, %v303_v37  ;;  %v58_v36 = vld [vmem:[%s6750_s0 + $0xa0] sm:$0xff] }
  0x90   :  { %3124 = vmatprep.mubr.msk.f32.mxu0 %vm330_vm0, %v239_v38  ;;  %v1505_v37 = vld [vmem:[%s6751_s4 + $0xa0] sm:$0xff]  ;;  %v61_v38 = vld [vmem:[%s6750_s0 + $0xb8] sm:$0xff] }
  0x92   :  { %883 = vmatmul.mubr.f32.gmra.mxu1 %v302_v39  ;;  %v1508_v39 = vld [vmem:[%s6751_s4 + $0xb8] sm:$0xff] }
  0x93   :  { %723 = vmatmul.mubr.f32.gmra.mxu0 %v238_v40  ;;  %3157 = vmatprep.mubr.msk.f32.mxu1 %vm330_vm0, %v305_v41  ;;  %v60_v40 = vld [vmem:[%s6750_s0 + $0xb0] sm:$0xff] }
  0x94   :  { %3125 = vmatprep.mubr.msk.f32.mxu0 %vm330_vm0, %v241_v42  ;;  %v1507_v41 = vld [vmem:[%s6751_s4 + $0xb0] sm:$0xff]  ;;  %v63_v42 = vld [vmem:[%s6750_s0 + $0xc8] sm:$0xff] }
  0x96   :  { %888 = vmatmul.mubr.f32.gmra.mxu1 %v304_v43  ;;  %v1510_v43 = vld [vmem:[%s6751_s4 + $0xc8] sm:$0xff] }
  0x97   :  { %728 = vmatmul.mubr.f32.gmra.mxu0 %v240_v44  ;;  %3158 = vmatprep.mubr.msk.f32.mxu1 %vm330_vm0, %v307_v45  ;;  %v62_v44 = vld [vmem:[%s6750_s0 + $0xc0] sm:$0xff] }
  0x98   :  { %3126 = vmatprep.mubr.msk.f32.mxu0 %vm330_vm0, %v243_v46  ;;  %v1509_v45 = vld [vmem:[%s6751_s4 + $0xc0] sm:$0xff]  ;;  %v65_v46 = vld [vmem:[%s6750_s0 + $0xd8] sm:$0xff] }
  0x9a   :  { %893 = vmatmul.mubr.f32.gmra.mxu1 %v306_v47  ;;  %v1512_v47 = vld [vmem:[%s6751_s4 + $0xd8] sm:$0xff] }
  0x9b   :  { %733 = vmatmul.mubr.f32.gmra.mxu0 %v242_v48  ;;  %3159 = vmatprep.mubr.msk.f32.mxu1 %vm330_vm0, %v309_v49  ;;  %v64_v48 = vld [vmem:[%s6750_s0 + $0xd0] sm:$0xff] }
  0x9c   :  { %3127 = vmatprep.mubr.msk.f32.mxu0 %vm330_vm0, %v245_v50  ;;  %v1511_v49 = vld [vmem:[%s6751_s4 + $0xd0] sm:$0xff]  ;;  %v67_v50 = vld [vmem:[%s6750_s0 + $0xe8] sm:$0xff] }
  0x9e   :  { %898 = vmatmul.mubr.f32.gmra.mxu1 %v308_v51  ;;  %v1514_v51 = vld [vmem:[%s6751_s4 + $0xe8] sm:$0xff] }
  0x9f   :  { %738 = vmatmul.mubr.f32.gmra.mxu0 %v244_v52  ;;  %3160 = vmatprep.mubr.msk.f32.mxu1 %vm330_vm0, %v311_v53  ;;  %v66_v52 = vld [vmem:[%s6750_s0 + $0xe0] sm:$0xff] }
  0xa0   :  { %3128 = vmatprep.mubr.msk.f32.mxu0 %vm330_vm0, %v247_v54  ;;  %v1513_v53 = vld [vmem:[%s6751_s4 + $0xe0] sm:$0xff]  ;;  %v69_v54 = vld [vmem:[%s6750_s0 + $0xf8] sm:$0xff] }
  0xa2   :  { %903 = vmatmul.mubr.f32.gmra.mxu1 %v310_v55  ;;  %v1516_v55 = vld [vmem:[%s6751_s4 + $0xf8] sm:$0xff] }
  0xa3   :  { %743 = vmatmul.mubr.f32.gmra.mxu0 %v246_v56  ;;  %3161 = vmatprep.mubr.msk.f32.mxu1 %vm330_vm0, %v39_v57  ;;  %v68_v56 = vld [vmem:[%s6750_s0 + $0xf0] sm:$0xff] }
  0xa4   :  { %3225 = vmatprep.mubr.msk.f32.mxu0 %vm330_vm0, %v1486_v58  ;;  %v1515_v57 = vld [vmem:[%s6751_s4 + $0xf0] sm:$0xff]  ;;  %v71_v58 = vld [vmem:[%s6750_s0 + $0x108] sm:$0xff] }
  0xa6   :  { %1165 = vmatmul.mubr.f32.vlgmr.msra.gmra.mxu1 %v38_v59  ;;  %v1518_v59 = vld [vmem:[%s6751_s4 + $0x108] sm:$0xff] }
  0xa7   :  { %1888 = vmatmul.mubr.f32.vlgmr.msra.gmra.mxu0 %v1485_v60  ;;  %3162 = vmatprep.mubr.msk.f32.mxu1 %vm330_vm0, %v41_v61  ;;  %v70_v60 = vld [vmem:[%s6750_s0 + $0x100] sm:$0xff] }
  0xa8   :  { %3226 = vmatprep.mubr.msk.f32.mxu0 %vm330_vm0, %v1488_v62  ;;  %v1517_v61 = vld [vmem:[%s6751_s4 + $0x100] sm:$0xff]  ;;  %v73_v62 = vld [vmem:[%s6750_s0 + $0x118] sm:$0xff] }
  0xaa   :  { %1170 = vmatmul.mubr.f32.gmra.mxu1 %v40_v63  ;;  %v1520_v63 = vld [vmem:[%s6751_s4 + $0x118] sm:$0xff] }
  0xab   :  { %1893 = vmatmul.mubr.f32.gmra.mxu0 %v1487_v1  ;;  %3163 = vmatprep.mubr.msk.f32.mxu1 %vm330_vm0, %v43_v2 }
  0xac   :  { %3227 = vmatprep.mubr.msk.f32.mxu0 %vm330_vm0, %v1490_v3  ;;  %v72_v3 = vld [vmem:[%s6750_s0 + $0x110] sm:$0xff] }
  0xae   :  { %1175 = vmatmul.mubr.f32.gmra.mxu1 %v42_v4 }
  0xaf   :  { %1898 = vmatmul.mubr.f32.gmra.mxu0 %v1489_v5  ;;  %3164 = vmatprep.mubr.msk.f32.mxu1 %vm330_vm0, %v45_v6  ;;  %v1519_v5 = vld [vmem:[%s6751_s4 + $0x110] sm:$0xff]  ;;  %v75_v6 = vld [vmem:[%s6750_s0 + $0x128] sm:$0xff] }
  0xb0   :  { %3228 = vmatprep.mubr.msk.f32.mxu0 %vm330_vm0, %v1492_v7 }
  0xb2   :  { %1180 = vmatmul.mubr.f32.gmra.mxu1 %v44_v8  ;;  %v1522_v8 = vld [vmem:[%s6751_s4 + $0x128] sm:$0xff] }
  0xb3   :  { %1903 = vmatmul.mubr.f32.gmra.mxu0 %v1491_v9  ;;  %3165 = vmatprep.mubr.msk.f32.mxu1 %vm330_vm0, %v47_v10 }
  0xb4   :  { %3229 = vmatprep.mubr.msk.f32.mxu0 %vm330_vm0, %v1494_v11  ;;  %v74_v11 = vld [vmem:[%s6750_s0 + $0x120] sm:$0xff] }
  0xb6   :  { %1185 = vmatmul.mubr.f32.gmra.mxu1 %v46_v12 }
  0xb7   :  { %1908 = vmatmul.mubr.f32.gmra.mxu0 %v1493_v13  ;;  %3166 = vmatprep.mubr.msk.f32.mxu1 %vm330_vm0, %v49_v14  ;;  %v1521_v13 = vld [vmem:[%s6751_s4 + $0x120] sm:$0xff]  ;;  %v77_v14 = vld [vmem:[%s6750_s0 + $0x138] sm:$0xff] }
  0xb8   :  { %3230 = vmatprep.mubr.msk.f32.mxu0 %vm330_vm0, %v1496_v15 }
  0xba   :  { %1190 = vmatmul.mubr.f32.gmra.mxu1 %v48_v16  ;;  %v1524_v16 = vld [vmem:[%s6751_s4 + $0x138] sm:$0xff] }
  0xbb   :  { %1913 = vmatmul.mubr.f32.gmra.mxu0 %v1495_v17  ;;  %3167 = vmatprep.mubr.msk.f32.mxu1 %vm330_vm0, %v51_v18 }
  0xbc   :  { %3231 = vmatprep.mubr.msk.f32.mxu0 %vm330_vm0, %v1498_v19  ;;  %v76_v19 = vld [vmem:[%s6750_s0 + $0x130] sm:$0xff] }
  0xbe   :  { %1195 = vmatmul.mubr.f32.gmra.mxu1 %v50_v20 }
  0xbf   :  { %1918 = vmatmul.mubr.f32.gmra.mxu0 %v1497_v21  ;;  %3168 = vmatprep.mubr.msk.f32.mxu1 %vm330_vm0, %v53_v22  ;;  %v1523_v21 = vld [vmem:[%s6751_s4 + $0x130] sm:$0xff]  ;;  %v79_v22 = vld [vmem:[%s6750_s0 + $0x148] sm:$0xff] }
  0xc0   :  { %3232 = vmatprep.mubr.msk.f32.mxu0 %vm330_vm0, %v1500_v23 }
  0xc2   :  { %1200 = vmatmul.mubr.f32.gmra.mxu1 %v52_v24  ;;  %v1526_v24 = vld [vmem:[%s6751_s4 + $0x148] sm:$0xff] }
  0xc3   :  { %1923 = vmatmul.mubr.f32.gmra.mxu0 %v1499_v25  ;;  %3169 = vmatprep.mubr.msk.f32.mxu1 %vm330_vm0, %v55_v26 }
  0xc4   :  { %3233 = vmatprep.mubr.msk.f32.mxu0 %vm330_vm0, %v1502_v27  ;;  %v78_v27 = vld [vmem:[%s6750_s0 + $0x140] sm:$0xff] }
  0xc6   :  { %1205 = vmatmul.mubr.f32.gmra.mxu1 %v54_v28 }
  0xc7   :  { %1928 = vmatmul.mubr.f32.gmra.mxu0 %v1501_v29  ;;  %3170 = vmatprep.mubr.msk.f32.mxu1 %vm330_vm0, %v57_v30  ;;  %v1525_v29 = vld [vmem:[%s6751_s4 + $0x140] sm:$0xff]  ;;  %v81_v30 = vld [vmem:[%s6750_s0 + $0x158] sm:$0xff] }
  0xc8   :  { %3234 = vmatprep.mubr.msk.f32.mxu0 %vm330_vm0, %v1504_v31 }
  0xca   :  { %1210 = vmatmul.mubr.f32.gmra.mxu1 %v56_v32  ;;  %v1528_v32 = vld [vmem:[%s6751_s4 + $0x158] sm:$0xff] }
  0xcb   :  { %1933 = vmatmul.mubr.f32.gmra.mxu0 %v1503_v33  ;;  %3171 = vmatprep.mubr.msk.f32.mxu1 %vm330_vm0, %v59_v34 }
  0xcc   :  { %3235 = vmatprep.mubr.msk.f32.mxu0 %vm330_vm0, %v1506_v35  ;;  %v80_v35 = vld [vmem:[%s6750_s0 + $0x150] sm:$0xff] }
  0xce   :  { %1215 = vmatmul.mubr.f32.gmra.mxu1 %v58_v36 }
  0xcf   :  { %1938 = vmatmul.mubr.f32.gmra.mxu0 %v1505_v37  ;;  %3172 = vmatprep.mubr.msk.f32.mxu1 %vm330_vm0, %v61_v38  ;;  %v1527_v37 = vld [vmem:[%s6751_s4 + $0x150] sm:$0xff]  ;;  %v83_v38 = vld [vmem:[%s6750_s0 + $0x168] sm:$0xff] }
  0xd0   :  { %3236 = vmatprep.mubr.msk.f32.mxu0 %vm330_vm0, %v1508_v39 }
  0xd2   :  { %1220 = vmatmul.mubr.f32.gmra.mxu1 %v60_v40  ;;  %v1530_v40 = vld [vmem:[%s6751_s4 + $0x168] sm:$0xff] }
  0xd3   :  { %1943 = vmatmul.mubr.f32.gmra.mxu0 %v1507_v41  ;;  %3173 = vmatprep.mubr.msk.f32.mxu1 %vm330_vm0, %v63_v42 }
  0xd4   :  { %3237 = vmatprep.mubr.msk.f32.mxu0 %vm330_vm0, %v1510_v43  ;;  %v82_v43 = vld [vmem:[%s6750_s0 + $0x160] sm:$0xff] }
  0xd6   :  { %1225 = vmatmul.mubr.f32.gmra.mxu1 %v62_v44 }
  0xd7   :  { %1948 = vmatmul.mubr.f32.gmra.mxu0 %v1509_v45  ;;  %3174 = vmatprep.mubr.msk.f32.mxu1 %vm330_vm0, %v65_v46  ;;  %v1529_v45 = vld [vmem:[%s6751_s4 + $0x160] sm:$0xff]  ;;  %v85_v46 = vld [vmem:[%s6750_s0 + $0x178] sm:$0xff] }
  0xd8   :  { %3238 = vmatprep.mubr.msk.f32.mxu0 %vm330_vm0, %v1512_v47 }
  0xda   :  { %1230 = vmatmul.mubr.f32.gmra.mxu1 %v64_v48  ;;  %v1532_v48 = vld [vmem:[%s6751_s4 + $0x178] sm:$0xff] }
  0xdb   :  { %1953 = vmatmul.mubr.f32.gmra.mxu0 %v1511_v49  ;;  %3175 = vmatprep.mubr.msk.f32.mxu1 %vm330_vm0, %v67_v50 }
  0xdc   :  { %3239 = vmatprep.mubr.msk.f32.mxu0 %vm330_vm0, %v1514_v51  ;;  %v84_v51 = vld [vmem:[%s6750_s0 + $0x170] sm:$0xff] }
  0xde   :  { %1235 = vmatmul.mubr.f32.gmra.mxu1 %v66_v52 }
  0xdf   :  { %1958 = vmatmul.mubr.f32.gmra.mxu0 %v1513_v53  ;;  %3176 = vmatprep.mubr.msk.f32.mxu1 %vm330_vm0, %v69_v54  ;;  %v1531_v53 = vld [vmem:[%s6751_s4 + $0x170] sm:$0xff]  ;;  %v87_v54 = vld [vmem:[%s6750_s0 + $0x188] sm:$0xff] }
  0xe0   :  { %3240 = vmatprep.mubr.msk.f32.mxu0 %vm330_vm0, %v1516_v55 }
  0xe2   :  { %1240 = vmatmul.mubr.f32.gmra.mxu1 %v68_v56  ;;  %v1534_v56 = vld [vmem:[%s6751_s4 + $0x188] sm:$0xff] }
  0xe3   :  { %1963 = vmatmul.mubr.f32.gmra.mxu0 %v1515_v57  ;;  %3177 = vmatprep.mubr.msk.f32.mxu1 %vm330_vm0, %v71_v58 }
  0xe4   :  { %3241 = vmatprep.mubr.msk.f32.mxu0 %vm330_vm0, %v1518_v59  ;;  %v86_v59 = vld [vmem:[%s6750_s0 + $0x180] sm:$0xff] }
  0xe6   :  { %v4307_v1 = vpop.f32.mrf.mxu1  ;;  %1245 = vmatmul.mubr.f32.gmra.mxu1 %v70_v60 }
  0xe7   :  { %v4309_v2 = vpop.f32.mrf.mxu0  ;;  %1968 = vmatmul.mubr.f32.gmra.mxu0 %v1517_v61  ;;  %3178 = vmatprep.mubr.msk.f32.mxu1 %vm330_vm0, %v73_v62  ;;  %v1533_v61 = vld [vmem:[%s6751_s4 + $0x180] sm:$0xff]  ;;  %v89_v62 = vld [vmem:[%s6750_s0 + $0x198] sm:$0xff] }
  0xe8   :  { %v751_v4 = vpop.f32.mrf.mxu1  ;;  %3242 = vmatprep.mubr.msk.f32.mxu0 %vm330_vm0, %v1520_v63 }
  0xe9   :  { %v591_v7 = vpop.f32.mrf.mxu0 }
  0xea   :  { %v4325_v9 = vpop.f32.mrf.mxu1  ;;  %1250 = vmatmul.mubr.f32.gmra.mxu1 %v72_v3  ;;  %v1536_v3 = vld [vmem:[%s6751_s4 + $0x198] sm:$0xff] }
  0xeb   :  { %v4327_v10 = vpop.f32.mrf.mxu0  ;;  %1973 = vmatmul.mubr.f32.gmra.mxu0 %v1519_v5  ;;  %3179 = vmatprep.mubr.msk.f32.mxu1 %vm330_vm0, %v75_v6  ;;  %v88_v6 = vld [vmem:[%s6750_s0 + $0x190] sm:$0xff] }
  0xec   :  { %v756_v12 = vpop.f32.mrf.mxu1  ;;  %3243 = vmatprep.mubr.msk.f32.mxu0 %vm330_vm0, %v1522_v8  ;;  %v1535_v8 = vld [vmem:[%s6751_s4 + $0x190] sm:$0xff] }
  0xed   :  { %v596_v15 = vpop.f32.mrf.mxu0 }
  0xee   :  { %v4343_v17 = vpop.f32.mrf.mxu1  ;;  %1255 = vmatmul.mubr.f32.gmra.mxu1 %v74_v11  ;;  %v91_v11 = vld [vmem:[%s6750_s0 + $0x1a8] sm:$0xff] }
  0xef   :  { %v4345_v18 = vpop.f32.mrf.mxu0  ;;  %1978 = vmatmul.mubr.f32.gmra.mxu0 %v1521_v13  ;;  %3180 = vmatprep.mubr.msk.f32.mxu1 %vm330_vm0, %v77_v14  ;;  %v1538_v13 = vld [vmem:[%s6751_s4 + $0x1a8] sm:$0xff] }
  0xf0   :  { %v761_v20 = vpop.f32.mrf.mxu1  ;;  %3244 = vmatprep.mubr.msk.f32.mxu0 %vm330_vm0, %v1524_v16  ;;  %v90_v16 = vld [vmem:[%s6750_s0 + $0x1a0] sm:$0xff] }
  0xf1   :  { %v601_v23 = vpop.f32.mrf.mxu0  ;;  %v1537_v20 = vld [vmem:[%s6751_s4 + $0x1a0] sm:$0xff] }
  0xf2   :  { %v4361_v25 = vpop.f32.mrf.mxu1  ;;  %1260 = vmatmul.mubr.f32.gmra.mxu1 %v76_v19  ;;  %v1540_v23 = vld [vmem:[%s6751_s4 + $0x1b8] sm:$0xff] }
  0xf3   :  { %v4363_v26 = vpop.f32.mrf.mxu0  ;;  %1983 = vmatmul.mubr.f32.gmra.mxu0 %v1523_v21  ;;  %3181 = vmatprep.mubr.msk.f32.mxu1 %vm330_vm0, %v79_v22  ;;  %v93_v21 = vld [vmem:[%s6750_s0 + $0x1b8] sm:$0xff] }
  0xf4   :  { %v766_v28 = vpop.f32.mrf.mxu1  ;;  %3245 = vmatprep.mubr.msk.f32.mxu0 %vm330_vm0, %v1526_v24 }
  0xf5   :  { %v606_v31 = vpop.f32.mrf.mxu0  ;;  %v92_v28 = vld [vmem:[%s6750_s0 + $0x1b0] sm:$0xff] }
  0xf6   :  { %v4379_v33 = vpop.f32.mrf.mxu1  ;;  %1265 = vmatmul.mubr.f32.gmra.mxu1 %v78_v27  ;;  %v95_v31 = vld [vmem:[%s6750_s0 + $0x1c8] sm:$0xff] }
  0xf7   :  { %v4381_v34 = vpop.f32.mrf.mxu0  ;;  %1988 = vmatmul.mubr.f32.gmra.mxu0 %v1525_v29  ;;  %3182 = vmatprep.mubr.msk.f32.mxu1 %vm330_vm0, %v81_v30  ;;  %v1539_v30 = vld [vmem:[%s6751_s4 + $0x1b0] sm:$0xff] }
  0xf8   :  { %v771_v36 = vpop.f32.mrf.mxu1  ;;  %3246 = vmatprep.mubr.msk.f32.mxu0 %vm330_vm0, %v1528_v32 }
  0xf9   :  { %v611_v39 = vpop.f32.mrf.mxu0 }
  0xfa   :  { %v4397_v41 = vpop.f32.mrf.mxu1  ;;  %1270 = vmatmul.mubr.f32.gmra.mxu1 %v80_v35  ;;  %v1542_v35 = vld [vmem:[%s6751_s4 + $0x1c8] sm:$0xff] }
  0xfb   :  { %v4399_v42 = vpop.f32.mrf.mxu0  ;;  %1993 = vmatmul.mubr.f32.gmra.mxu0 %v1527_v37  ;;  %3183 = vmatprep.mubr.msk.f32.mxu1 %vm330_vm0, %v83_v38  ;;  %v94_v38 = vld [vmem:[%s6750_s0 + $0x1c0] sm:$0xff] }
  0xfc   :  { %v776_v44 = vpop.f32.mrf.mxu1  ;;  %3247 = vmatprep.mubr.msk.f32.mxu0 %vm330_vm0, %v1530_v40  ;;  %v1541_v40 = vld [vmem:[%s6751_s4 + $0x1c0] sm:$0xff] }
  0xfd   :  { %v616_v47 = vpop.f32.mrf.mxu0 }
  0xfe   :  { %v4415_v49 = vpop.f32.mrf.mxu1  ;;  %1275 = vmatmul.mubr.f32.gmra.mxu1 %v82_v43  ;;  %v97_v43 = vld [vmem:[%s6750_s0 + $0x1d8] sm:$0xff] }
  0xff   :  { %v4417_v50 = vpop.f32.mrf.mxu0  ;;  %1998 = vmatmul.mubr.f32.gmra.mxu0 %v1529_v45  ;;  %3184 = vmatprep.mubr.msk.f32.mxu1 %vm330_vm0, %v85_v46  ;;  %v1544_v45 = vld [vmem:[%s6751_s4 + $0x1d8] sm:$0xff] }
 0x100   :  { %v781_v52 = vpop.f32.mrf.mxu1  ;;  %3248 = vmatprep.mubr.msk.f32.mxu0 %vm330_vm0, %v1532_v48  ;;  %v96_v48 = vld [vmem:[%s6750_s0 + $0x1d0] sm:$0xff] }
 0x101   :  { %v621_v55 = vpop.f32.mrf.mxu0  ;;  %v1543_v52 = vld [vmem:[%s6751_s4 + $0x1d0] sm:$0xff] }
 0x102   :  { %v4433_v57 = vpop.f32.mrf.mxu1  ;;  %1280 = vmatmul.mubr.f32.gmra.mxu1 %v84_v51  ;;  %v1546_v55 = vld [vmem:[%s6751_s4 + $0x1e8] sm:$0xff] }
 0x103   :  { %v4435_v58 = vpop.f32.mrf.mxu0  ;;  %2003 = vmatmul.mubr.f32.gmra.mxu0 %v1531_v53  ;;  %3185 = vmatprep.mubr.msk.f32.mxu1 %vm330_vm0, %v87_v54  ;;  %v99_v53 = vld [vmem:[%s6750_s0 + $0x1e8] sm:$0xff] }
 0x104   :  { %v786_v60 = vpop.f32.mrf.mxu1  ;;  %3249 = vmatprep.mubr.msk.f32.mxu0 %vm330_vm0, %v1534_v56 }
 0x105   :  { %v626_v63 = vpop.f32.mrf.mxu0  ;;  %v98_v60 = vld [vmem:[%s6750_s0 + $0x1e0] sm:$0xff] }
 0x106   :  { %v4451_v4 = vpop.f32.mrf.mxu1  ;;  %1285 = vmatmul.mubr.f32.gmra.mxu1 %v86_v59  ;;  %v101_v63 = vld [vmem:[%s6750_s0 + $0x1f8] sm:$0xff] }
 0x107   :  { %v4453_v5 = vpop.f32.mrf.mxu0  ;;  %2008 = vmatmul.mubr.f32.gmra.mxu0 %v1533_v61  ;;  %3186 = vmatprep.mubr.msk.f32.mxu1 %vm330_vm0, %v89_v62  ;;  %v1545_v62 = vld [vmem:[%s6751_s4 + $0x1e0] sm:$0xff] }
 0x108   :  { %v791_v7 = vpop.f32.mrf.mxu1  ;;  %3250 = vmatprep.mubr.msk.f32.mxu0 %vm330_vm0, %v1536_v3 }
 0x109   :  { %v631_v12 = vpop.f32.mrf.mxu0 }
 0x10a   :  { %v4469_v14 = vpop.f32.mrf.mxu1  ;;  %1290 = vmatmul.mubr.f32.gmra.mxu1 %v88_v6  ;;  %v1548_v6 = vld [vmem:[%s6751_s4 + $0x1f8] sm:$0xff] }
 0x10b   :  { %v4471_v15 = vpop.f32.mrf.mxu0  ;;  %2013 = vmatmul.mubr.f32.gmra.mxu0 %v1535_v8  ;;  %3187 = vmatprep.mubr.msk.f32.mxu1 %vm330_vm0, %v91_v11  ;;  %v100_v11 = vld [vmem:[%s6750_s0 + $0x1f0] sm:$0xff] }
 0x10c   :  { %v796_v19 = vpop.f32.mrf.mxu1  ;;  %3251 = vmatprep.mubr.msk.f32.mxu0 %vm330_vm0, %v1538_v13  ;;  %v1547_v13 = vld [vmem:[%s6751_s4 + $0x1f0] sm:$0xff] }
 0x10d   :  { %v636_v22 = vpop.f32.mrf.mxu0 }
 0x10e   :  { %v4487_v24 = vpop.f32.mrf.mxu1  ;;  %1295 = vmatmul.mubr.f32.gmra.mxu1 %v90_v16  ;;  %v103_v16 = vld [vmem:[%s6750_s0 + $0x208] sm:$0xff] }
 0x10f   :  { %v4489_v27 = vpop.f32.mrf.mxu0  ;;  %2018 = vmatmul.mubr.f32.gmra.mxu0 %v1537_v20  ;;  %3188 = vmatprep.mubr.msk.f32.mxu1 %vm330_vm0, %v93_v21  ;;  %v1550_v20 = vld [vmem:[%s6751_s4 + $0x208] sm:$0xff] }
 0x110   :  { %v801_v29 = vpop.f32.mrf.mxu1  ;;  %3252 = vmatprep.mubr.msk.f32.mxu0 %vm330_vm0, %v1540_v23  ;;  %v102_v23 = vld [vmem:[%s6750_s0 + $0x200] sm:$0xff] }
 0x111   :  { %v641_v32 = vpop.f32.mrf.mxu0  ;;  %v1549_v29 = vld [vmem:[%s6751_s4 + $0x200] sm:$0xff] }
 0x112   :  { %v4505_v36 = vpop.f32.mrf.mxu1  ;;  %1300 = vmatmul.mubr.f32.gmra.mxu1 %v92_v28  ;;  %v1552_v32 = vld [vmem:[%s6751_s4 + $0x218] sm:$0xff] }
 0x113   :  { %v4507_v37 = vpop.f32.mrf.mxu0  ;;  %2023 = vmatmul.mubr.f32.gmra.mxu0 %v1539_v30  ;;  %3189 = vmatprep.mubr.msk.f32.mxu1 %vm330_vm0, %v95_v31  ;;  %v105_v30 = vld [vmem:[%s6750_s0 + $0x218] sm:$0xff] }
 0x114   :  { %v806_v39 = vpop.f32.mrf.mxu1  ;;  %3253 = vmatprep.mubr.msk.f32.mxu0 %vm330_vm0, %v1542_v35 }
 0x115   :  { %v646_v44 = vpop.f32.mrf.mxu0  ;;  %v104_v39 = vld [vmem:[%s6750_s0 + $0x210] sm:$0xff] }
 0x116   :  { %v4523_v46 = vpop.f32.mrf.mxu1  ;;  %1305 = vmatmul.mubr.f32.gmra.mxu1 %v94_v38  ;;  %v107_v44 = vld [vmem:[%s6750_s0 + $0x228] sm:$0xff] }
 0x117   :  { %v4525_v47 = vpop.f32.mrf.mxu0  ;;  %2028 = vmatmul.mubr.f32.gmra.mxu0 %v1541_v40  ;;  %3190 = vmatprep.mubr.msk.f32.mxu1 %vm330_vm0, %v97_v43  ;;  %v1551_v43 = vld [vmem:[%s6751_s4 + $0x210] sm:$0xff] }
 0x118   :  { %v811_v51 = vpop.f32.mrf.mxu1  ;;  %3254 = vmatprep.mubr.msk.f32.mxu0 %vm330_vm0, %v1544_v45 }
 0x119   :  { %v651_v54 = vpop.f32.mrf.mxu0 }
 0x11a   :  { %v4541_v56 = vpop.f32.mrf.mxu1  ;;  %1310 = vmatmul.mubr.f32.gmra.mxu1 %v96_v48  ;;  %v1554_v48 = vld [vmem:[%s6751_s4 + $0x228] sm:$0xff] }
 0x11b   :  { %v4543_v59 = vpop.f32.mrf.mxu0  ;;  %2033 = vmatmul.mubr.f32.gmra.mxu0 %v1543_v52  ;;  %3191 = vmatprep.mubr.msk.f32.mxu1 %vm330_vm0, %v99_v53  ;;  %v106_v53 = vld [vmem:[%s6750_s0 + $0x220] sm:$0xff] }
 0x11c   :  { %v816_v61 = vpop.f32.mrf.mxu1  ;;  %3255 = vmatprep.mubr.msk.f32.mxu0 %vm330_vm0, %v1546_v55  ;;  %v1553_v55 = vld [vmem:[%s6751_s4 + $0x220] sm:$0xff] }
 0x11d   :  { %v656_v3 = vpop.f32.mrf.mxu0 }
 0x11e   :  { %v4559_v7 = vpop.f32.mrf.mxu1  ;;  %1315 = vmatmul.mubr.f32.gmra.mxu1 %v98_v60  ;;  %v109_v60 = vld [vmem:[%s6750_s0 + $0x238] sm:$0xff] }
 0x11f   :  { %6758 = vst [vmem:[#allocation3_spill] sm:$0xff] %v4559_v7  ;;  %v4561_v8 = vpop.f32.mrf.mxu0  ;;  %2038 = vmatmul.mubr.f32.gmra.mxu0 %v1545_v62  ;;  %3192 = vmatprep.mubr.msk.f32.mxu1 %vm330_vm0, %v101_v63  ;;  %v1556_v62 = vld [vmem:[%s6751_s4 + $0x238] sm:$0xff] }
 0x120   :  { %v821_v12 = vpop.f32.mrf.mxu1  ;;  %3256 = vmatprep.mubr.msk.f32.mxu0 %vm330_vm0, %v1548_v6  ;;  %v108_v6 = vld [vmem:[%s6750_s0 + $0x230] sm:$0xff] }
 0x121   :  { %v661_v19 = vpop.f32.mrf.mxu0  ;;  %v1555_v12 = vld [vmem:[%s6751_s4 + $0x230] sm:$0xff] }
 0x122   :  { %v4577_v21 = vpop.f32.mrf.mxu1  ;;  %1320 = vmatmul.mubr.f32.gmra.mxu1 %v100_v11  ;;  %v1558_v19 = vld [vmem:[%s6751_s4 + $0x248] sm:$0xff] }
 0x123   :  { %6759 = vst [vmem:[#allocation4_spill] sm:$0xff] %v4577_v21  ;;  %v4579_v22 = vpop.f32.mrf.mxu0  ;;  %2043 = vmatmul.mubr.f32.gmra.mxu0 %v1547_v13  ;;  %3193 = vmatprep.mubr.msk.f32.mxu1 %vm330_vm0, %v103_v16  ;;  %v111_v13 = vld [vmem:[%s6750_s0 + $0x248] sm:$0xff] }
 0x124   :  { %v826_v28 = vpop.f32.mrf.mxu1  ;;  %3257 = vmatprep.mubr.msk.f32.mxu0 %vm330_vm0, %v1550_v20 }
 0x125   :  { %v666_v31 = vpop.f32.mrf.mxu0  ;;  %v110_v28 = vld [vmem:[%s6750_s0 + $0x240] sm:$0xff] }
 0x126   :  { %v4595_v35 = vpop.f32.mrf.mxu1  ;;  %1325 = vmatmul.mubr.f32.gmra.mxu1 %v102_v23  ;;  %v113_v31 = vld [vmem:[%s6750_s0 + $0x258] sm:$0xff] }
 0x127   :  { %6760 = vst [vmem:[#allocation5_spill] sm:$0xff] %v4595_v35  ;;  %v4597_v38 = vpop.f32.mrf.mxu0  ;;  %2048 = vmatmul.mubr.f32.gmra.mxu0 %v1549_v29  ;;  %3194 = vmatprep.mubr.msk.f32.mxu1 %vm330_vm0, %v105_v30  ;;  %v1557_v30 = vld [vmem:[%s6751_s4 + $0x240] sm:$0xff] }
 0x128   :  { %v831_v40 = vpop.f32.mrf.mxu1  ;;  %3258 = vmatprep.mubr.msk.f32.mxu0 %vm330_vm0, %v1552_v32 }
 0x129   :  { %v671_v45 = vpop.f32.mrf.mxu0 }
 0x12a   :  { %v4613_v51 = vpop.f32.mrf.mxu1  ;;  %1330 = vmatmul.mubr.f32.gmra.mxu1 %v104_v39  ;;  %v1560_v39 = vld [vmem:[%s6751_s4 + $0x258] sm:$0xff] }
 0x12b   :  { %6761 = vst [vmem:[#allocation6_spill] sm:$0xff] %v4613_v51  ;;  %v4615_v52 = vpop.f32.mrf.mxu0  ;;  %2053 = vmatmul.mubr.f32.gmra.mxu0 %v1551_v43  ;;  %3195 = vmatprep.mubr.msk.f32.mxu1 %vm330_vm0, %v107_v44  ;;  %v112_v44 = vld [vmem:[%s6750_s0 + $0x250] sm:$0xff] }
 0x12c   :  { %v836_v54 = vpop.f32.mrf.mxu1  ;;  %3259 = vmatprep.mubr.msk.f32.mxu0 %vm330_vm0, %v1554_v48  ;;  %v1559_v48 = vld [vmem:[%s6751_s4 + $0x250] sm:$0xff] }
 0x12d   :  { %v676_v61 = vpop.f32.mrf.mxu0 }
 0x12e   :  { %v4631_v63 = vpop.f32.mrf.mxu1  ;;  %1335 = vmatmul.mubr.f32.gmra.mxu1 %v106_v53  ;;  %v115_v53 = vld [vmem:[%s6750_s0 + $0x268] sm:$0xff] }
 0x12f   :  { %6762 = vst [vmem:[#allocation7_spill] sm:$0xff] %v4631_v63  ;;  %v4633_v3 = vpop.f32.mrf.mxu0  ;;  %2058 = vmatmul.mubr.f32.gmra.mxu0 %v1553_v55  ;;  %3196 = vmatprep.mubr.msk.f32.mxu1 %vm330_vm0, %v109_v60  ;;  %v1562_v55 = vld [vmem:[%s6751_s4 + $0x268] sm:$0xff] }
 0x130   :  { %v841_v11 = vpop.f32.mrf.mxu1  ;;  %3260 = vmatprep.mubr.msk.f32.mxu0 %vm330_vm0, %v1556_v62  ;;  %v114_v62 = vld [vmem:[%s6750_s0 + $0x260] sm:$0xff] }
 0x131   :  { %v681_v16 = vpop.f32.mrf.mxu0  ;;  %v1561_v11 = vld [vmem:[%s6751_s4 + $0x260] sm:$0xff] }
 0x132   :  { %v4649_v20 = vpop.f32.mrf.mxu1  ;;  %1340 = vmatmul.mubr.f32.gmra.mxu1 %v108_v6  ;;  %v1564_v16 = vld [vmem:[%s6751_s4 + $0x278] sm:$0xff] }
 0x133   :  { %6763 = vst [vmem:[#allocation8_spill] sm:$0xff] %v4649_v20  ;;  %v4651_v23 = vpop.f32.mrf.mxu0  ;;  %2063 = vmatmul.mubr.f32.gmra.mxu0 %v1555_v12  ;;  %3197 = vmatprep.mubr.msk.f32.mxu1 %vm330_vm0, %v111_v13  ;;  %v117_v12 = vld [vmem:[%s6750_s0 + $0x278] sm:$0xff]  ;;  %v138_v20 = vld [vmem:[%s6750_s0 + $0x320] sm:$0xff] }
 0x134   :  { %v846_v29 = vpop.f32.mrf.mxu1  ;;  %3261 = vmatprep.mubr.msk.f32.mxu0 %vm330_vm0, %v1558_v19 }
 0x135   :  { %v686_v32 = vpop.f32.mrf.mxu0  ;;  %v116_v29 = vld [vmem:[%s6750_s0 + $0x270] sm:$0xff] }
 0x136   :  { %v4667_v40 = vpop.f32.mrf.mxu1  ;;  %1345 = vmatmul.mubr.f32.gmra.mxu1 %v110_v28  ;;  %v119_v32 = vld [vmem:[%s6750_s0 + $0x288] sm:$0xff] }
 0x137   :  { %6764 = vst [vmem:[#allocation9_spill] sm:$0xff] %v4667_v40  ;;  %v4669_v43 = vpop.f32.mrf.mxu0  ;;  %2068 = vmatmul.mubr.f32.gmra.mxu0 %v1557_v30  ;;  %3198 = vmatprep.mubr.msk.f32.mxu1 %vm330_vm0, %v113_v31  ;;  %v1563_v31 = vld [vmem:[%s6751_s4 + $0x270] sm:$0xff] }
 0x138   :  { %v851_v45 = vpop.f32.mrf.mxu1  ;;  %3262 = vmatprep.mubr.msk.f32.mxu0 %vm330_vm0, %v1560_v39 }
 0x139   :  { %v691_v54 = vpop.f32.mrf.mxu0 }
 0x13a   :  { %v4685_v60 = vpop.f32.mrf.mxu1  ;;  %1350 = vmatmul.mubr.f32.gmra.mxu1 %v112_v44  ;;  %v1566_v44 = vld [vmem:[%s6751_s4 + $0x288] sm:$0xff] }
 0x13b   :  { %6765 = vst [vmem:[#allocation10_spill] sm:$0xff] %v4685_v60  ;;  %v4687_v61 = vpop.f32.mrf.mxu0  ;;  %2073 = vmatmul.mubr.f32.gmra.mxu0 %v1559_v48  ;;  %3199 = vmatprep.mubr.msk.f32.mxu1 %vm330_vm0, %v115_v53  ;;  %v118_v53 = vld [vmem:[%s6750_s0 + $0x280] sm:$0xff] }
 0x13c   :  { %v856_v6 = vpop.f32.mrf.mxu1  ;;  %3263 = vmatprep.mubr.msk.f32.mxu0 %vm330_vm0, %v1562_v55  ;;  %v1565_v55 = vld [vmem:[%s6751_s4 + $0x280] sm:$0xff] }
 0x13d   :  { %v696_v13 = vpop.f32.mrf.mxu0 }
 0x13e   :  { %v4703_v19 = vpop.f32.mrf.mxu1  ;;  %1355 = vmatmul.mubr.f32.gmra.mxu1 %v114_v62  ;;  %v121_v62 = vld [vmem:[%s6750_s0 + $0x298] sm:$0xff] }
 0x13f   :  { %6766 = vst [vmem:[#allocation11_spill] sm:$0xff] %v4703_v19  ;;  %v4705_v28 = vpop.f32.mrf.mxu0  ;;  %2078 = vmatmul.mubr.f32.gmra.mxu0 %v1561_v11  ;;  %3200 = vmatprep.mubr.msk.f32.mxu1 %vm330_vm0, %v117_v12  ;;  %v1568_v11 = vld [vmem:[%s6751_s4 + $0x298] sm:$0xff] }
 0x140   :  { %v861_v30 = vpop.f32.mrf.mxu1  ;;  %3264 = vmatprep.mubr.msk.f32.mxu0 %vm330_vm0, %v1564_v16  ;;  %v120_v16 = vld [vmem:[%s6750_s0 + $0x290] sm:$0xff] }
 0x141   :  { %v701_v39 = vpop.f32.mrf.mxu0  ;;  %v1567_v30 = vld [vmem:[%s6751_s4 + $0x290] sm:$0xff] }
 0x142   :  { %v4721_v45 = vpop.f32.mrf.mxu1  ;;  %1360 = vmatmul.mubr.f32.gmra.mxu1 %v116_v29  ;;  %v1570_v39 = vld [vmem:[%s6751_s4 + $0x2a8] sm:$0xff] }
 0x143   :  { %6767 = vst [vmem:[#allocation12_spill] sm:$0xff] %v4721_v45  ;;  %v4723_v48 = vpop.f32.mrf.mxu0  ;;  %2083 = vmatmul.mubr.f32.gmra.mxu0 %v1563_v31  ;;  %3201 = vmatprep.mubr.msk.f32.mxu1 %vm330_vm0, %v119_v32  ;;  %v123_v31 = vld [vmem:[%s6750_s0 + $0x2a8] sm:$0xff] }
 0x144   :  { %v866_v54 = vpop.f32.mrf.mxu1  ;;  %3265 = vmatprep.mubr.msk.f32.mxu0 %vm330_vm0, %v1566_v44 }
 0x145   :  { %v706_v6 = vpop.f32.mrf.mxu0  ;;  %v122_v54 = vld [vmem:[%s6750_s0 + $0x2a0] sm:$0xff] }
 0x146   :  { %v4739_v12 = vpop.f32.mrf.mxu1  ;;  %1365 = vmatmul.mubr.f32.gmra.mxu1 %v118_v53  ;;  %v125_v6 = vld [vmem:[%s6750_s0 + $0x2b8] sm:$0xff] }
 0x147   :  { %6768 = vst [vmem:[#allocation13_spill] sm:$0xff] %v4739_v12  ;;  %v4741_v13 = vpop.f32.mrf.mxu0  ;;  %2088 = vmatmul.mubr.f32.gmra.mxu0 %v1565_v55  ;;  %3202 = vmatprep.mubr.msk.f32.mxu1 %vm330_vm0, %v121_v62  ;;  %v1569_v62 = vld [vmem:[%s6751_s4 + $0x2a0] sm:$0xff] }
 0x148   :  { %v871_v29 = vpop.f32.mrf.mxu1  ;;  %3266 = vmatprep.mubr.msk.f32.mxu0 %vm330_vm0, %v1568_v11 }
 0x149   :  { %v711_v32 = vpop.f32.mrf.mxu0 }
 0x14a   :  { %v4757_v44 = vpop.f32.mrf.mxu1  ;;  %1370 = vmatmul.mubr.f32.gmra.mxu1 %v120_v16  ;;  %v1572_v16 = vld [vmem:[%s6751_s4 + $0x2b8] sm:$0xff] }
 0x14b   :  { %6769 = vst [vmem:[#allocation14_spill] sm:$0xff] %v4757_v44  ;;  %v4759_v53 = vpop.f32.mrf.mxu0  ;;  %2093 = vmatmul.mubr.f32.gmra.mxu0 %v1567_v30  ;;  %3203 = vmatprep.mubr.msk.f32.mxu1 %vm330_vm0, %v123_v31  ;;  %v124_v31 = vld [vmem:[%s6750_s0 + $0x2b0] sm:$0xff] }
 0x14c   :  { %v876_v55 = vpop.f32.mrf.mxu1  ;;  %3267 = vmatprep.mubr.msk.f32.mxu0 %vm330_vm0, %v1570_v39  ;;  %v1571_v39 = vld [vmem:[%s6751_s4 + $0x2b0] sm:$0xff] }
 0x14d   :  { %v716_v11 = vpop.f32.mrf.mxu0 }
 0x14e   :  { %v4775_v29 = vpop.f32.mrf.mxu1  ;;  %1375 = vmatmul.mubr.f32.gmra.mxu1 %v122_v54  ;;  %v127_v54 = vld [vmem:[%s6750_s0 + $0x2c8] sm:$0xff] }
 0x14f   :  { %6770 = vst [vmem:[#allocation15_spill] sm:$0xff] %v4775_v29  ;;  %v4777_v30 = vpop.f32.mrf.mxu0  ;;  %2098 = vmatmul.mubr.f32.gmra.mxu0 %v1569_v62  ;;  %3204 = vmatprep.mubr.msk.f32.mxu1 %vm330_vm0, %v125_v6  ;;  %v1574_v62 = vld [vmem:[%s6751_s4 + $0x2c8] sm:$0xff] }
 0x150   :  { %v881_v32 = vpop.f32.mrf.mxu1  ;;  %3268 = vmatprep.mubr.msk.f32.mxu0 %vm330_vm0, %v1572_v16  ;;  %v126_v16 = vld [vmem:[%s6750_s0 + $0x2c0] sm:$0xff] }
 0x151   :  { %v721_v55 = vpop.f32.mrf.mxu0 }
 0x152   :  { %v4793_v6 = vpop.f32.mrf.mxu1  ;;  %1380 = vmatmul.mubr.f32.gmra.mxu1 %v124_v31  ;;  %v1573_v55 = vld [vmem:[%s6751_s4 + $0x2c0] sm:$0xff]  ;;  %v129_v31 = vld [vmem:[%s6750_s0 + $0x2d8] sm:$0xff] }
 0x153   :  { %6771 = vst [vmem:[#allocation16_spill] sm:$0xff] %v4793_v6  ;;  %v4795_v11 = vpop.f32.mrf.mxu0  ;;  %2103 = vmatmul.mubr.f32.gmra.mxu0 %v1571_v39  ;;  %3205 = vmatprep.mubr.msk.f32.mxu1 %vm330_vm0, %v127_v54  ;;  %v1576_v39 = vld [vmem:[%s6751_s4 + $0x2d8] sm:$0xff] }
 0x154   :  { %v886_v32 = vpop.f32.mrf.mxu1  ;;  %3269 = vmatprep.mubr.msk.f32.mxu0 %vm330_vm0, %v1574_v62  ;;  %v128_v62 = vld [vmem:[%s6750_s0 + $0x2d0] sm:$0xff] }
 0x155   :  { %v726_v0 = vpop.f32.mrf.mxu0 }
 0x156   :  { %v4811_v54 = vpop.f32.mrf.mxu1  ;;  %1385 = vmatmul.mubr.f32.gmra.mxu1 %v126_v16  ;;  %v1575_v0 = vld [vmem:[%s6751_s4 + $0x2d0] sm:$0xff]  ;;  %v131_v16 = vld [vmem:[%s6750_s0 + $0x2e8] sm:$0xff] }
 0x157   :  { %6772 = vst [vmem:[#allocation17_spill] sm:$0xff] %v4811_v54  ;;  %v4813_v6 = vpop.f32.mrf.mxu0  ;;  %2108 = vmatmul.mubr.f32.gmra.mxu0 %v1573_v55  ;;  %3206 = vmatprep.mubr.msk.f32.mxu1 %vm330_vm0, %v129_v31  ;;  %v1578_v55 = vld [vmem:[%s6751_s4 + $0x2e8] sm:$0xff] }
 0x158   :  { %v891_v32 = vpop.f32.mrf.mxu1  ;;  %3270 = vmatprep.mubr.msk.f32.mxu0 %vm330_vm0, %v1576_v39  ;;  %v130_v39 = vld [vmem:[%s6750_s0 + $0x2e0] sm:$0xff] }
 0x159   :  { %v731_v54 = vpop.f32.mrf.mxu0 }
 0x15a   :  { %v4829_v31 = vpop.f32.mrf.mxu1  ;;  %1390 = vmatmul.mubr.f32.gmra.mxu1 %v128_v62  ;;  %v1577_v54 = vld [vmem:[%s6751_s4 + $0x2e0] sm:$0xff]  ;;  %v133_v62 = vld [vmem:[%s6750_s0 + $0x2f8] sm:$0xff] }
 0x15b   :  { %6773 = vst [vmem:[#allocation18_spill] sm:$0xff] %v4829_v31  ;;  %v4831_v29 = vpop.f32.mrf.mxu0  ;;  %2113 = vmatmul.mubr.f32.gmra.mxu0 %v1575_v0  ;;  %3207 = vmatprep.mubr.msk.f32.mxu1 %vm330_vm0, %v131_v16  ;;  %v1580_v0 = vld [vmem:[%s6751_s4 + $0x2f8] sm:$0xff] }
 0x15c   :  { %v896_v32 = vpop.f32.mrf.mxu1  ;;  %3271 = vmatprep.mubr.msk.f32.mxu0 %vm330_vm0, %v1578_v55  ;;  %v132_v55 = vld [vmem:[%s6750_s0 + $0x2f0] sm:$0xff] }
 0x15d   :  { %v736_v31 = vpop.f32.mrf.mxu0 }
 0x15e   :  { %v4847_v16 = vpop.f32.mrf.mxu1  ;;  %1395 = vmatmul.mubr.f32.gmra.mxu1 %v130_v39  ;;  %v1579_v31 = vld [vmem:[%s6751_s4 + $0x2f0] sm:$0xff]  ;;  %v135_v39 = vld [vmem:[%s6750_s0 + $0x308] sm:$0xff] }
 0x15f   :  { %6774 = vst [vmem:[#allocation19_spill] sm:$0xff] %v4847_v16  ;;  %v4849_v44 = vpop.f32.mrf.mxu0  ;;  %2118 = vmatmul.mubr.f32.gmra.mxu0 %v1577_v54  ;;  %3208 = vmatprep.mubr.msk.f32.mxu1 %vm330_vm0, %v133_v62  ;;  %v1582_v54 = vld [vmem:[%s6751_s4 + $0x308] sm:$0xff] }
 0x160   :  { %v901_v32 = vpop.f32.mrf.mxu1  ;;  %3272 = vmatprep.mubr.msk.f32.mxu0 %vm330_vm0, %v1580_v0  ;;  %v134_v0 = vld [vmem:[%s6750_s0 + $0x300] sm:$0xff] }
 0x161   :  { %v741_v16 = vpop.f32.mrf.mxu0 }
 0x162   :  { %v4865_v62 = vpop.f32.mrf.mxu1  ;;  %1400 = vmatmul.mubr.f32.gmra.mxu1 %v132_v55  ;;  %v1581_v16 = vld [vmem:[%s6751_s4 + $0x300] sm:$0xff]  ;;  %v137_v55 = vld [vmem:[%s6750_s0 + $0x318] sm:$0xff] }
 0x163   :  { %6775 = vst [vmem:[#allocation20_spill] sm:$0xff] %v4865_v62  ;;  %v4867_v12 = vpop.f32.mrf.mxu0  ;;  %2123 = vmatmul.mubr.f32.gmra.mxu0 %v1579_v31  ;;  %3209 = vmatprep.mubr.msk.f32.mxu1 %vm330_vm0, %v135_v39  ;;  %v1584_v31 = vld [vmem:[%s6751_s4 + $0x318] sm:$0xff] }
 0x164   :  { %v906_v32 = vpop.f32.mrf.mxu1  ;;  %3273 = vmatprep.mubr.msk.f32.mxu0 %vm330_vm0, %v1582_v54  ;;  %v136_v54 = vld [vmem:[%s6750_s0 + $0x310] sm:$0xff] }
 0x165   :  { %v746_v62 = vpop.f32.mrf.mxu0 }
 0x166   :  { %v1166_v39 = vpop.f32.mrf.mxu1  ;;  %1405 = vmatmul.mubr.f32.gmra.mxu1 %v134_v0  ;;  %v4891_v62 = vld [vmem:[%s6752_s6] ss:$0 sm:$0xff]  ;;  %v139_v0 = vld [vmem:[%s6750_s0 + $0x328] sm:$0xff] }
 0x167   :  { %v1167_v45 = vadd.f32 %v1166_v39, %v4309_v2  ;;  %v1889_v32 = vpop.f32.mrf.mxu0  ;;  %2128 = vmatmul.mubr.f32.gmra.mxu0 %v1581_v16  ;;  %3210 = vmatprep.mubr.msk.f32.mxu1 %vm330_vm0, %v137_v55  ;;  %v1583_v2 = vld [vmem:[%s6751_s4 + $0x310] sm:$0xff]  ;;  %v1586_v39 = vld [vmem:[%s6751_s4 + $0x328] sm:$0xff] }
 0x168   :  { %v1168_v19 = vpop.f32.mrf.mxu1  ;;  %3274 = vmatprep.mubr.msk.f32.mxu0 %vm330_vm0, %v1584_v31 }
 0x169   :  { %v2208_v16 = vadd.f32 %v1889_v32, %v1167_v45  ;;  %v1891_v55 = vpop.f32.mrf.mxu0  ;;  %v1585_v32 = vld [vmem:[%s6751_s4 + $0x320] sm:$0xff] }
 0x16a   :  { %v1171_v60 = vpop.f32.mrf.mxu1  ;;  %1410 = vmatmul.mubr.f32.gmra.mxu1 %v136_v54  ;;  %v141_v54 = vld [vmem:[%s6750_s0 + $0x338] sm:$0xff] }
 0x16b   :  { %v2279_v19 = vadd.f32 %v4891_v62, %v2208_v16  ;;  %v1172_v31 = vadd.f32 %v1171_v60, %v4327_v10  ;;  %v1894_v40 = vpop.f32.mrf.mxu0  ;;  %2133 = vmatmul.mubr.f32.gmra.mxu0 %v1583_v2  ;;  %3211 = vmatprep.mubr.msk.f32.mxu1 %vm330_vm0, %v139_v0  ;;  %v1588_v2 = vld [vmem:[%s6751_s4 + $0x338] sm:$0xff] }
 0x16c   :  { %v1173_v45 = vpop.f32.mrf.mxu1  ;;  %3275 = vmatprep.mubr.msk.f32.mxu0 %vm330_vm0, %v1586_v39 }
 0x16d   :  { %2343 = vst.msk [vmem:[%s6753_s9] sm:$0xff] %vm330_vm0, %v2279_v19  ;;  %v2209_v10 = vadd.f32 %v1894_v40, %v1172_v31  ;;  %v1896_v60 = vpop.f32.mrf.mxu0  ;;  %v2545_v16 = vmul.f32 %v2279_v19, %v2279_v19  ;;  %v140_v40 = vld [vmem:[%s6750_s0 + $0x330] sm:$0xff] }
 0x16e   :  { %v1176_v0 = vpop.f32.mrf.mxu1  ;;  %1415 = vmatmul.mubr.f32.gmra.mxu1 %v138_v20  ;;  %v1587_v20 = vld [vmem:[%s6751_s4 + $0x330] sm:$0xff] }
 0x16f   :  { %v2280_v55 = vadd.f32 %v4891_v62, %v2209_v10  ;;  %v1177_v39 = vadd.f32 %v1176_v0, %v4345_v18  ;;  %v1899_v45 = vpop.f32.mrf.mxu0  ;;  %2138 = vmatmul.mubr.f32.gmra.mxu0 %v1585_v32  ;;  %3212 = vmatprep.mubr.msk.f32.mxu1 %vm330_vm0, %v141_v54  ;;  %v143_v10 = vld [vmem:[%s6750_s0 + $0x348] sm:$0xff]  ;;  %v2408_v18 = vsel %vm330_vm0, %v2279_v19, 0.0  ;;  %v2609_v51 = vsel %vm330_vm0, %v2545_v16, 0.0  ;;  %v1589_v16 = vld [vmem:[%s6751_s4 + $0x340] sm:$0xff] }
 0x170   :  { %v1178_v31 = vpop.f32.mrf.mxu1  ;;  %3276 = vmatprep.mubr.msk.f32.mxu0 %vm330_vm0, %v1588_v2  ;;  %v1590_v0 = vld [vmem:[%s6751_s4 + $0x348] sm:$0xff] }
 0x171   :  { %2344 = vst.msk [vmem:[%s6753_s9 + $0x8] sm:$0xff] %vm330_vm0, %v2280_v55  ;;  %v2409_v32 = vsel %vm330_vm0, %v2280_v55, 0.0  ;;  %v2546_v54 = vmul.f32 %v2280_v55, %v2280_v55  ;;  %v2210_v60 = vadd.f32 %v1899_v45, %v1177_v39  ;;  %v1901_v2 = vpop.f32.mrf.mxu0  ;;  %v142_v55 = vld [vmem:[%s6750_s0 + $0x340] sm:$0xff] }
 0x172   :  { %v2410_v31 = vadd.f32 %v2409_v32, %v2408_v18  ;;  %v1181_v63 = vpop.f32.mrf.mxu1  ;;  %1420 = vmatmul.mubr.f32.gmra.mxu1 %v140_v40 }
 0x173   :  { %v2610_v19 = vsel %vm330_vm0, %v2546_v54, 0.0  ;;  %v2281_v35 = vadd.f32 %v4891_v62, %v2210_v60  ;;  %v1182_v21 = vadd.f32 %v1181_v63, %v4363_v26  ;;  %v1904_v7 = vpop.f32.mrf.mxu0  ;;  %2143 = vmatmul.mubr.f32.gmra.mxu0 %v1587_v20  ;;  %3213 = vmatprep.mubr.msk.f32.mxu1 %vm330_vm0, %v143_v10  ;;  %v145_v26 = vld [vmem:[%s6750_s0 + $0x358] sm:$0xff] }
 0x174   :  { %v2611_v39 = vadd.f32 %v2610_v19, %v2609_v51  ;;  %v1183_v45 = vpop.f32.mrf.mxu1  ;;  %3277 = vmatprep.mubr.msk.f32.mxu0 %vm330_vm0, %v1590_v0  ;;  %v1592_v10 = vld [vmem:[%s6751_s4 + $0x358] sm:$0xff] }
 0x175   :  { %2345 = vst.msk [vmem:[%s6753_s9 + $0x10] sm:$0xff] %vm330_vm0, %v2281_v35  ;;  %v2411_v63 = vsel %vm330_vm0, %v2281_v35, 0.0  ;;  %v2547_v40 = vmul.f32 %v2281_v35, %v2281_v35  ;;  %v2211_v51 = vadd.f32 %v1904_v7, %v1182_v21  ;;  %v1906_v20 = vpop.f32.mrf.mxu0  ;;  %v144_v7 = vld [vmem:[%s6750_s0 + $0x350] sm:$0xff] }
 0x176   :  { %v2412_v18 = vadd.f32 %v2411_v63, %v2410_v31  ;;  %v1186_v32 = vpop.f32.mrf.mxu1  ;;  %1425 = vmatmul.mubr.f32.gmra.mxu1 %v142_v55  ;;  %v1591_v31 = vld [vmem:[%s6751_s4 + $0x350] sm:$0xff] }
 0x177   :  { %v2612_v54 = vsel %vm330_vm0, %v2547_v40, 0.0  ;;  %v2282_v60 = vadd.f32 %v4891_v62, %v2211_v51  ;;  %v1187_v2 = vadd.f32 %v1186_v32, %v4381_v34  ;;  %v1909_v0 = vpop.f32.mrf.mxu0  ;;  %2148 = vmatmul.mubr.f32.gmra.mxu0 %v1589_v16  ;;  %3214 = vmatprep.mubr.msk.f32.mxu1 %vm330_vm0, %v145_v26  ;;  %v147_v34 = vld [vmem:[%s6750_s0 + $0x368] sm:$0xff]  ;;  %v146_v32 = vld [vmem:[%s6750_s0 + $0x360] sm:$0xff] }
 0x178   :  { %v2613_v21 = vadd.f32 %v2612_v54, %v2611_v39  ;;  %v1188_v35 = vpop.f32.mrf.mxu1  ;;  %3278 = vmatprep.mubr.msk.f32.mxu0 %vm330_vm0, %v1592_v10  ;;  %v1594_v16 = vld [vmem:[%s6751_s4 + $0x368] sm:$0xff] }
 0x179   :  { %2346 = vst.msk [vmem:[%s6753_s9 + $0x18] sm:$0xff] %vm330_vm0, %v2282_v60  ;;  %v2413_v19 = vsel %vm330_vm0, %v2282_v60, 0.0  ;;  %v2548_v55 = vmul.f32 %v2282_v60, %v2282_v60  ;;  %v2212_v39 = vadd.f32 %v1909_v0, %v1187_v2  ;;  %v1911_v45 = vpop.f32.mrf.mxu0  ;;  %v1596_v35 = vld [vmem:[%s6751_s4 + $0x378] sm:$0xff] }
 0x17a   :  { %v2414_v26 = vadd.f32 %v2413_v19, %v2412_v18  ;;  %v1191_v63 = vpop.f32.mrf.mxu1  ;;  %1430 = vmatmul.mubr.f32.gmra.mxu1 %v144_v7  ;;  %v1593_v18 = vld [vmem:[%s6751_s4 + $0x360] sm:$0xff] }
 0x17b   :  { %v2614_v40 = vsel %vm330_vm0, %v2548_v55, 0.0  ;;  %v2283_v51 = vadd.f32 %v4891_v62, %v2212_v39  ;;  %v1192_v20 = vadd.f32 %v1191_v63, %v4399_v42  ;;  %v1914_v10 = vpop.f32.mrf.mxu0  ;;  %2153 = vmatmul.mubr.f32.gmra.mxu0 %v1591_v31  ;;  %3215 = vmatprep.mubr.msk.f32.mxu1 %vm330_vm0, %v147_v34  ;;  %v149_v42 = vld [vmem:[%s6750_s0 + $0x378] sm:$0xff] }
 0x17c   :  { %v2615_v54 = vadd.f32 %v2614_v40, %v2613_v21  ;;  %v1193_v60 = vpop.f32.mrf.mxu1  ;;  %3279 = vmatprep.mubr.msk.f32.mxu0 %vm330_vm0, %v1594_v16  ;;  %v148_v16 = vld [vmem:[%s6750_s0 + $0x370] sm:$0xff] }
 0x17d   :  { %2347 = vst.msk [vmem:[%s6753_s9 + $0x20] sm:$0xff] %vm330_vm0, %v2283_v51  ;;  %v2415_v2 = vsel %vm330_vm0, %v2283_v51, 0.0  ;;  %v2549_v0 = vmul.f32 %v2283_v51, %v2283_v51  ;;  %v2213_v7 = vadd.f32 %v1914_v10, %v1192_v20  ;;  %v1916_v21 = vpop.f32.mrf.mxu0 }
 0x17e   :  { %v2416_v31 = vadd.f32 %v2415_v2, %v2414_v26  ;;  %v1196_v34 = vpop.f32.mrf.mxu1  ;;  %1435 = vmatmul.mubr.f32.gmra.mxu1 %v146_v32  ;;  %v1595_v26 = vld [vmem:[%s6751_s4 + $0x370] sm:$0xff]  ;;  %v150_v21 = vld [vmem:[%s6750_s0 + $0x380] sm:$0xff] }
 0x17f   :  { %v2616_v19 = vsel %vm330_vm0, %v2549_v0, 0.0  ;;  %v2284_v55 = vadd.f32 %v4891_v62, %v2213_v7  ;;  %v1197_v39 = vadd.f32 %v1196_v34, %v4417_v50  ;;  %v1919_v45 = vpop.f32.mrf.mxu0  ;;  %2158 = vmatmul.mubr.f32.gmra.mxu0 %v1593_v18  ;;  %3216 = vmatprep.mubr.msk.f32.mxu1 %vm330_vm0, %v149_v42  ;;  %v151_v50 = vld [vmem:[%s6750_s0 + $0x388] sm:$0xff] }
 0x180   :  { %v2617_v63 = vadd.f32 %v2616_v19, %v2615_v54  ;;  %v1198_v40 = vpop.f32.mrf.mxu1  ;;  %3280 = vmatprep.mubr.msk.f32.mxu0 %vm330_vm0, %v1596_v35  ;;  %v1598_v54 = vld [vmem:[%s6751_s4 + $0x388] sm:$0xff] }
 0x181   :  { %2348 = vst.msk [vmem:[%s6753_s9 + $0x28] sm:$0xff] %vm330_vm0, %v2284_v55  ;;  %v2417_v51 = vsel %vm330_vm0, %v2284_v55, 0.0  ;;  %v2550_v20 = vmul.f32 %v2284_v55, %v2284_v55  ;;  %v2214_v10 = vadd.f32 %v1919_v45, %v1197_v39  ;;  %v1921_v32 = vpop.f32.mrf.mxu0 }
 0x182   :  { %v2418_v60 = vadd.f32 %v2417_v51, %v2416_v31  ;;  %v1201_v18 = vpop.f32.mrf.mxu1  ;;  %1440 = vmatmul.mubr.f32.gmra.mxu1 %v148_v16  ;;  %v1597_v31 = vld [vmem:[%s6751_s4 + $0x380] sm:$0xff]  ;;  %v1600_v16 = vld [vmem:[%s6751_s4 + $0x398] sm:$0xff] }
 0x183   :  { %v2618_v42 = vsel %vm330_vm0, %v2550_v20, 0.0  ;;  %v2285_v2 = vadd.f32 %v4891_v62, %v2214_v10  ;;  %v1202_v0 = vadd.f32 %v1201_v18, %v4435_v58  ;;  %v1924_v7 = vpop.f32.mrf.mxu0  ;;  %2163 = vmatmul.mubr.f32.gmra.mxu0 %v1595_v26  ;;  %3217 = vmatprep.mubr.msk.f32.mxu1 %vm330_vm0, %v151_v50  ;;  %v153_v58 = vld [vmem:[%s6750_s0 + $0x398] sm:$0xff]  ;;  %v152_v10 = vld [vmem:[%s6750_s0 + $0x390] sm:$0xff] }
 0x184   :  { %v2619_v35 = vadd.f32 %v2618_v42, %v2617_v63  ;;  %v1203_v34 = vpop.f32.mrf.mxu1  ;;  %3281 = vmatprep.mubr.msk.f32.mxu0 %vm330_vm0, %v1598_v54 }
 0x185   :  { %2349 = vst.msk [vmem:[%s6753_s9 + $0x30] sm:$0xff] %vm330_vm0, %v2285_v2  ;;  %v2419_v19 = vsel %vm330_vm0, %v2285_v2, 0.0  ;;  %v2551_v55 = vmul.f32 %v2285_v2, %v2285_v2  ;;  %v2215_v39 = vadd.f32 %v1924_v7, %v1202_v0  ;;  %v1926_v45 = vpop.f32.mrf.mxu0  ;;  %v1602_v7 = vld [vmem:[%s6751_s4 + $0x3a8] sm:$0xff] }
 0x186   :  { %v2420_v63 = vadd.f32 %v2419_v19, %v2418_v60  ;;  %v1206_v40 = vpop.f32.mrf.mxu1  ;;  %1445 = vmatmul.mubr.f32.gmra.mxu1 %v150_v21  ;;  %v1599_v60 = vld [vmem:[%s6751_s4 + $0x390] sm:$0xff] }
 0x187   :  { %v2620_v26 = vsel %vm330_vm0, %v2551_v55, 0.0  ;;  %v2286_v50 = vadd.f32 %v4891_v62, %v2215_v39  ;;  %v1207_v51 = vadd.f32 %v1206_v40, %v4453_v5  ;;  %v1929_v20 = vpop.f32.mrf.mxu0  ;;  %2168 = vmatmul.mubr.f32.gmra.mxu0 %v1597_v31  ;;  %3218 = vmatprep.mubr.msk.f32.mxu1 %vm330_vm0, %v153_v58  ;;  %v155_v5 = vld [vmem:[%s6750_s0 + $0x3a8] sm:$0xff]  ;;  %v154_v55 = vld [vmem:[%s6750_s0 + $0x3a0] sm:$0xff] }
 0x188   :  { %v2621_v32 = vadd.f32 %v2620_v26, %v2619_v35  ;;  %v1208_v54 = vpop.f32.mrf.mxu1  ;;  %3282 = vmatprep.mubr.msk.f32.mxu0 %vm330_vm0, %v1600_v16  ;;  %v1601_v16 = vld [vmem:[%s6751_s4 + $0x3a0] sm:$0xff] }
 0x189   :  { %2350 = vst.msk [vmem:[%s6753_s9 + $0x38] sm:$0xff] %vm330_vm0, %v2286_v50  ;;  %v2421_v18 = vsel %vm330_vm0, %v2286_v50, 0.0  ;;  %v2552_v42 = vmul.f32 %v2286_v50, %v2286_v50  ;;  %v2216_v2 = vadd.f32 %v1929_v20, %v1207_v51  ;;  %v1931_v0 = vpop.f32.mrf.mxu0  ;;  %v1604_v51 = vld [vmem:[%s6751_s4 + $0x3b8] sm:$0xff] }
 0x18a   :  { %v2422_v21 = vadd.f32 %v2421_v18, %v2420_v63  ;;  %v1211_v35 = vpop.f32.mrf.mxu1  ;;  %1450 = vmatmul.mubr.f32.gmra.mxu1 %v152_v10  ;;  %v156_v18 = vld [vmem:[%s6750_s0 + $0x3b0] sm:$0xff] }
 0x18b   :  { %v2622_v34 = vsel %vm330_vm0, %v2552_v42, 0.0  ;;  %v2287_v31 = vadd.f32 %v4891_v62, %v2216_v2  ;;  %v1212_v58 = vadd.f32 %v1211_v35, %v4471_v15  ;;  %v1934_v19 = vpop.f32.mrf.mxu0  ;;  %2173 = vmatmul.mubr.f32.gmra.mxu0 %v1599_v60  ;;  %3219 = vmatprep.mubr.msk.f32.mxu1 %vm330_vm0, %v155_v5  ;;  %v157_v15 = vld [vmem:[%s6750_s0 + $0x3b8] sm:$0xff]  ;;  %v1603_v0 = vld [vmem:[%s6751_s4 + $0x3b0] sm:$0xff] }
 0x18c   :  { %v2623_v39 = vadd.f32 %v2622_v34, %v2621_v32  ;;  %v1213_v45 = vpop.f32.mrf.mxu1  ;;  %3283 = vmatprep.mubr.msk.f32.mxu0 %vm330_vm0, %v1602_v7 }
 0x18d   :  { %2351 = vst.msk [vmem:[%s6753_s9 + $0x40] sm:$0xff] %vm330_vm0, %v2287_v31  ;;  %v2423_v63 = vsel %vm330_vm0, %v2287_v31, 0.0  ;;  %v2553_v40 = vmul.f32 %v2287_v31, %v2287_v31  ;;  %v2217_v26 = vadd.f32 %v1934_v19, %v1212_v58  ;;  %v1936_v50 = vpop.f32.mrf.mxu0  ;;  %v1606_v31 = vld [vmem:[%s6751_s4 + $0x3c8] sm:$0xff] }
 0x18e   :  { %v2424_v20 = vadd.f32 %v2423_v63, %v2422_v21  ;;  %v1216_v10 = vpop.f32.mrf.mxu1  ;;  %1455 = vmatmul.mubr.f32.gmra.mxu1 %v154_v55 }
 0x18f   :  { %v2624_v32 = vsel %vm330_vm0, %v2553_v40, 0.0  ;;  %v2288_v54 = vadd.f32 %v4891_v62, %v2217_v26  ;;  %v1217_v60 = vadd.f32 %v1216_v10, %v4489_v27  ;;  %v1939_v5 = vpop.f32.mrf.mxu0  ;;  %2178 = vmatmul.mubr.f32.gmra.mxu0 %v1601_v16  ;;  %3220 = vmatprep.mubr.msk.f32.mxu1 %vm330_vm0, %v157_v15  ;;  %v159_v27 = vld [vmem:[%s6750_s0 + $0x3c8] sm:$0xff]  ;;  %v158_v15 = vld [vmem:[%s6750_s0 + $0x3c0] sm:$0xff] }
 0x190   :  { %v2625_v42 = vadd.f32 %v2624_v32, %v2623_v39  ;;  %v1218_v2 = vpop.f32.mrf.mxu1  ;;  %3284 = vmatprep.mubr.msk.f32.mxu0 %vm330_vm0, %v1604_v51  ;;  %v1605_v26 = vld [vmem:[%s6751_s4 + $0x3c0] sm:$0xff]  ;;  %v1608_v32 = vld [vmem:[%s6751_s4 + $0x3d8] sm:$0xff] }
 0x191   :  { %2352 = vst.msk [vmem:[%s6753_s9 + $0x48] sm:$0xff] %vm330_vm0, %v2288_v54  ;;  %v2425_v7 = vsel %vm330_vm0, %v2288_v54, 0.0  ;;  %v2554_v21 = vmul.f32 %v2288_v54, %v2288_v54  ;;  %v2218_v35 = vadd.f32 %v1939_v5, %v1217_v60  ;;  %v1941_v34 = vpop.f32.mrf.mxu0 }
 0x192   :  { %v2426_v58 = vadd.f32 %v2425_v7, %v2424_v20  ;;  %v1221_v19 = vpop.f32.mrf.mxu1  ;;  %1460 = vmatmul.mubr.f32.gmra.mxu1 %v156_v18 }
 0x193   :  { %v2626_v55 = vsel %vm330_vm0, %v2554_v21, 0.0  ;;  %v2289_v39 = vadd.f32 %v4891_v62, %v2218_v35  ;;  %v1222_v45 = vadd.f32 %v1221_v19, %v4507_v37  ;;  %v1944_v16 = vpop.f32.mrf.mxu0  ;;  %2183 = vmatmul.mubr.f32.gmra.mxu0 %v1603_v0  ;;  %3221 = vmatprep.mubr.msk.f32.mxu1 %vm330_vm0, %v159_v27  ;;  %v161_v37 = vld [vmem:[%s6750_s0 + $0x3d8] sm:$0xff]  ;;  %v160_v0 = vld [vmem:[%s6750_s0 + $0x3d0] sm:$0xff]  ;;  %v1610_v19 = vld [vmem:[%s6751_s4 + $0x3e8] sm:$0xff] }
 0x194   :  { %v2627_v63 = vadd.f32 %v2626_v55, %v2625_v42  ;;  %v1223_v40 = vpop.f32.mrf.mxu1  ;;  %3285 = vmatprep.mubr.msk.f32.mxu0 %vm330_vm0, %v1606_v31  ;;  %v1607_v21 = vld [vmem:[%s6751_s4 + $0x3d0] sm:$0xff] }
 0x195   :  { %2353 = vst.msk [vmem:[%s6753_s9 + $0x50] sm:$0xff] %vm330_vm0, %v2289_v39  ;;  %v2427_v50 = vsel %vm330_vm0, %v2289_v39, 0.0  ;;  %v2555_v51 = vmul.f32 %v2289_v39, %v2289_v39  ;;  %v2219_v20 = vadd.f32 %v1944_v16, %v1222_v45  ;;  %v1946_v10 = vpop.f32.mrf.mxu0  ;;  %v162_v40 = vld [vmem:[%s6750_s0 + $0x3e0] sm:$0xff] }
 0x196   :  { %v2428_v54 = vadd.f32 %v2427_v50, %v2426_v58  ;;  %v1226_v60 = vpop.f32.mrf.mxu1  ;;  %1465 = vmatmul.mubr.f32.gmra.mxu1 %v158_v15  ;;  %v1609_v50 = vld [vmem:[%s6751_s4 + $0x3e0] sm:$0xff] }
 0x197   :  { %v2628_v5 = vsel %vm330_vm0, %v2555_v51, 0.0  ;;  %v2290_v18 = vadd.f32 %v4891_v62, %v2219_v20  ;;  %v1227_v42 = vadd.f32 %v1226_v60, %v4525_v47  ;;  %v1949_v2 = vpop.f32.mrf.mxu0  ;;  %2188 = vmatmul.mubr.f32.gmra.mxu0 %v1605_v26  ;;  %3222 = vmatprep.mubr.msk.f32.mxu1 %vm330_vm0, %v161_v37  ;;  %v163_v47 = vld [vmem:[%s6750_s0 + $0x3e8] sm:$0xff] }
 0x198   :  { %v2629_v27 = vadd.f32 %v2628_v5, %v2627_v63  ;;  %v1228_v7 = vpop.f32.mrf.mxu1  ;;  %3286 = vmatprep.mubr.msk.f32.mxu0 %vm330_vm0, %v1608_v32 }
 0x199   :  { %2354 = vst.msk [vmem:[%s6753_s9 + $0x58] sm:$0xff] %vm330_vm0, %v2290_v18  ;;  %v2429_v35 = vsel %vm330_vm0, %v2290_v18, 0.0  ;;  %v2556_v34 = vmul.f32 %v2290_v18, %v2290_v18  ;;  %v2220_v31 = vadd.f32 %v1949_v2, %v1227_v42  ;;  %v1951_v58 = vpop.f32.mrf.mxu0 }
 0x19a   :  { %v2430_v55 = vadd.f32 %v2429_v35, %v2428_v54  ;;  %v1231_v39 = vpop.f32.mrf.mxu1  ;;  %1470 = vmatmul.mubr.f32.gmra.mxu1 %v160_v0  ;;  %v1612_v54 = vld [vmem:[%s6751_s4 + $0x3f8] sm:$0xff] }
 0x19b   :  { %v2630_v45 = vsel %vm330_vm0, %v2556_v34, 0.0  ;;  %v2291_v16 = vadd.f32 %v4891_v62, %v2220_v31  ;;  %v1232_v15 = vadd.f32 %v1231_v39, %v4543_v59  ;;  %v1954_v63 = vpop.f32.mrf.mxu0  ;;  %2193 = vmatmul.mubr.f32.gmra.mxu0 %v1607_v21  ;;  %3223 = vmatprep.mubr.msk.f32.mxu1 %vm330_vm0, %v163_v47  ;;  %v165_v59 = vld [vmem:[%s6750_s0 + $0x3f8] sm:$0xff]  ;;  %v1611_v47 = vld [vmem:[%s6751_s4 + $0x3f0] sm:$0xff] }
 0x19c   :  { %v2631_v26 = vadd.f32 %v2630_v45, %v2629_v27  ;;  %v1233_v37 = vpop.f32.mrf.mxu1  ;;  %3287 = vmatprep.mubr.msk.f32.mxu0 %vm330_vm0, %v1610_v19  ;;  %v164_v27 = vld [vmem:[%s6750_s0 + $0x3f0] sm:$0xff] }
 0x19d   :  { %2355 = vst.msk [vmem:[%s6753_s9 + $0x60] sm:$0xff] %vm330_vm0, %v2291_v16  ;;  %v2431_v51 = vsel %vm330_vm0, %v2291_v16, 0.0  ;;  %v2557_v20 = vmul.f32 %v2291_v16, %v2291_v16  ;;  %v2221_v10 = vadd.f32 %v1954_v63, %v1232_v15  ;;  %v1956_v32 = vpop.f32.mrf.mxu0 }
 0x19e   :  { %v2432_v60 = vadd.f32 %v2431_v51, %v2430_v55  ;;  %v1236_v5 = vpop.f32.mrf.mxu1  ;;  %1475 = vmatmul.mubr.f32.gmra.mxu1 %v162_v40 }
 0x19f   :  { %v2632_v18 = vsel %vm330_vm0, %v2557_v20, 0.0  ;;  %v2292_v42 = vadd.f32 %v4891_v62, %v2221_v10  ;;  %v1237_v2 = vadd.f32 %v1236_v5, %v4561_v8  ;;  %v1959_v0 = vpop.f32.mrf.mxu0  ;;  %2198 = vmatmul.mubr.f32.gmra.mxu0 %v1609_v50  ;;  %3224 = vmatprep.mubr.msk.f32.mxu1 %vm330_vm0, %v165_v59 }
 0x1a0   :  { %v2633_v7 = vadd.f32 %v2632_v18, %v2631_v26  ;;  %v1238_v21 = vpop.f32.mrf.mxu1  ;;  %3288 = vmatprep.mubr.msk.f32.mxu0 %vm330_vm0, %v1612_v54 }
 0x1a1   :  { %2356 = vst.msk [vmem:[%s6753_s9 + $0x68] sm:$0xff] %vm330_vm0, %v2292_v42  ;;  %v2433_v8 = vsel %vm330_vm0, %v2292_v42, 0.0  ;;  %v2558_v35 = vmul.f32 %v2292_v42, %v2292_v42  ;;  %v2222_v34 = vadd.f32 %v1959_v0, %v1237_v2  ;;  %v1961_v31 = vpop.f32.mrf.mxu0 }
 0x1a2   :  { %v2434_v58 = vadd.f32 %v2433_v8, %v2432_v60  ;;  %v1241_v19 = vpop.f32.mrf.mxu1  ;;  %1480 = vmatmul.mubr.f32.gmra.mxu1 %v164_v27 }
 0x1a3   :  { %v2634_v55 = vsel %vm330_vm0, %v2558_v35, 0.0  ;;  %v2293_v39 = vadd.f32 %v4891_v62, %v2222_v34  ;;  %v1242_v45 = vadd.f32 %v1241_v19, %v4579_v22  ;;  %v1964_v16 = vpop.f32.mrf.mxu0  ;;  %2203 = vmatmul.mubr.f32.gmra.mxu0 %v1611_v47 }
 0x1a4   :  { %v2635_v15 = vadd.f32 %v2634_v55, %v2633_v7  ;;  %v1243_v63 = vpop.f32.mrf.mxu1 }
 0x1a5   :  { %2357 = vst.msk [vmem:[%s6753_s9 + $0x70] sm:$0xff] %vm330_vm0, %v2293_v39  ;;  %v2435_v40 = vsel %vm330_vm0, %v2293_v39, 0.0  ;;  %v2559_v26 = vmul.f32 %v2293_v39, %v2293_v39  ;;  %v2223_v37 = vadd.f32 %v1964_v16, %v1242_v45  ;;  %v1966_v50 = vpop.f32.mrf.mxu0 }
 0x1a6   :  { %v2436_v59 = vadd.f32 %v2435_v40, %v2434_v58  ;;  %v1246_v51 = vpop.f32.mrf.mxu1 }
 0x1a7   :  { %v2636_v20 = vsel %vm330_vm0, %v2559_v26, 0.0  ;;  %v2294_v22 = vadd.f32 %v4891_v62, %v2223_v37  ;;  %v1247_v10 = vadd.f32 %v1246_v51, %v4597_v38  ;;  %v1969_v32 = vpop.f32.mrf.mxu0 }
 0x1a8   :  { %v2637_v54 = vadd.f32 %v2636_v20, %v2635_v15  ;;  %v1248_v60 = vpop.f32.mrf.mxu1 }
 0x1a9   :  { %2358 = vst.msk [vmem:[%s6753_s9 + $0x78] sm:$0xff] %vm330_vm0, %v2294_v22  ;;  %v2437_v5 = vsel %vm330_vm0, %v2294_v22, 0.0  ;;  %v2560_v18 = vmul.f32 %v2294_v22, %v2294_v22  ;;  %v2224_v42 = vadd.f32 %v1969_v32, %v1247_v10  ;;  %v1971_v2 = vpop.f32.mrf.mxu0 }
 0x1aa   :  { %v2438_v0 = vadd.f32 %v2437_v5, %v2436_v59  ;;  %v1251_v27 = vpop.f32.mrf.mxu1 }
 0x1ab   :  { %v2638_v7 = vsel %vm330_vm0, %v2560_v18, 0.0  ;;  %v2295_v21 = vadd.f32 %v4891_v62, %v2224_v42  ;;  %v1252_v38 = vadd.f32 %v1251_v27, %v4615_v52  ;;  %v1974_v47 = vpop.f32.mrf.mxu0 }
 0x1ac   :  { %v2639_v8 = vadd.f32 %v2638_v7, %v2637_v54  ;;  %v1253_v35 = vpop.f32.mrf.mxu1 }
 0x1ad   :  { %2359 = vst.msk [vmem:[%s6753_s9 + $0x80] sm:$0xff] %vm330_vm0, %v2295_v21  ;;  %v2439_v34 = vsel %vm330_vm0, %v2295_v21, 0.0  ;;  %v2561_v31 = vmul.f32 %v2295_v21, %v2295_v21  ;;  %v2225_v58 = vadd.f32 %v1974_v47, %v1252_v38  ;;  %v1976_v19 = vpop.f32.mrf.mxu0 }
 0x1ae   :  { %v2440_v55 = vadd.f32 %v2439_v34, %v2438_v0  ;;  %v1256_v39 = vpop.f32.mrf.mxu1 }
 0x1af   :  { %v2640_v45 = vsel %vm330_vm0, %v2561_v31, 0.0  ;;  %v2296_v16 = vadd.f32 %v4891_v62, %v2225_v58  ;;  %v1257_v52 = vadd.f32 %v1256_v39, %v4633_v3  ;;  %v1979_v15 = vpop.f32.mrf.mxu0 }
 0x1b0   :  { %v2641_v63 = vadd.f32 %v2640_v45, %v2639_v8  ;;  %v1258_v40 = vpop.f32.mrf.mxu1 }
 0x1b1   :  { %2360 = vst.msk [vmem:[%s6753_s9 + $0x88] sm:$0xff] %vm330_vm0, %v2296_v16  ;;  %v2441_v26 = vsel %vm330_vm0, %v2296_v16, 0.0  ;;  %v2562_v37 = vmul.f32 %v2296_v16, %v2296_v16  ;;  %v2226_v50 = vadd.f32 %v1979_v15, %v1257_v52  ;;  %v1981_v59 = vpop.f32.mrf.mxu0 }
 0x1b2   :  { %v2442_v51 = vadd.f32 %v2441_v26, %v2440_v55  ;;  %v1261_v20 = vpop.f32.mrf.mxu1 }
 0x1b3   :  { %v2642_v22 = vsel %vm330_vm0, %v2562_v37, 0.0  ;;  %v2297_v10 = vadd.f32 %v4891_v62, %v2226_v50  ;;  %v1262_v3 = vadd.f32 %v1261_v20, %v4651_v23  ;;  %v1984_v32 = vpop.f32.mrf.mxu0 }
 0x1b4   :  { %v2643_v54 = vadd.f32 %v2642_v22, %v2641_v63  ;;  %v1263_v60 = vpop.f32.mrf.mxu1 }
 0x1b5   :  { %2361 = vst.msk [vmem:[%s6753_s9 + $0x90] sm:$0xff] %vm330_vm0, %v2297_v10  ;;  %v2443_v5 = vsel %vm330_vm0, %v2297_v10, 0.0  ;;  %v2563_v18 = vmul.f32 %v2297_v10, %v2297_v10  ;;  %v2227_v42 = vadd.f32 %v1984_v32, %v1262_v3  ;;  %v1986_v2 = vpop.f32.mrf.mxu0 }
 0x1b6   :  { %v2444_v0 = vadd.f32 %v2443_v5, %v2442_v51  ;;  %v1266_v27 = vpop.f32.mrf.mxu1 }
 0x1b7   :  { %v2644_v7 = vsel %vm330_vm0, %v2563_v18, 0.0  ;;  %v2298_v21 = vadd.f32 %v4891_v62, %v2227_v42  ;;  %v1267_v23 = vadd.f32 %v1266_v27, %v4669_v43  ;;  %v1989_v38 = vpop.f32.mrf.mxu0 }
 0x1b8   :  { %v2645_v47 = vadd.f32 %v2644_v7, %v2643_v54  ;;  %v1268_v8 = vpop.f32.mrf.mxu1 }
 0x1b9   :  { %2362 = vst.msk [vmem:[%s6753_s9 + $0x98] sm:$0xff] %vm330_vm0, %v2298_v21  ;;  %v2445_v35 = vsel %vm330_vm0, %v2298_v21, 0.0  ;;  %v2564_v34 = vmul.f32 %v2298_v21, %v2298_v21  ;;  %v2228_v31 = vadd.f32 %v1989_v38, %v1267_v23  ;;  %v1991_v58 = vpop.f32.mrf.mxu0 }
 0x1ba   :  { %v2446_v19 = vadd.f32 %v2445_v35, %v2444_v0  ;;  %v1271_v55 = vpop.f32.mrf.mxu1 }
 0x1bb   :  { %v2646_v39 = vsel %vm330_vm0, %v2564_v34, 0.0  ;;  %v2299_v45 = vadd.f32 %v4891_v62, %v2228_v31  ;;  %v1272_v43 = vadd.f32 %v1271_v55, %v4687_v61  ;;  %v1994_v16 = vpop.f32.mrf.mxu0 }
 0x1bc   :  { %v2647_v52 = vadd.f32 %v2646_v39, %v2645_v47  ;;  %v1273_v15 = vpop.f32.mrf.mxu1 }
 0x1bd   :  { %2363 = vst.msk [vmem:[%s6753_s9 + $0xa0] sm:$0xff] %vm330_vm0, %v2299_v45  ;;  %v2447_v63 = vsel %vm330_vm0, %v2299_v45, 0.0  ;;  %v2565_v40 = vmul.f32 %v2299_v45, %v2299_v45  ;;  %v2229_v26 = vadd.f32 %v1994_v16, %v1272_v43  ;;  %v1996_v37 = vpop.f32.mrf.mxu0 }
 0x1be   :  { %v2448_v50 = vadd.f32 %v2447_v63, %v2446_v19  ;;  %v1276_v59 = vpop.f32.mrf.mxu1 }
 0x1bf   :  { %v2648_v51 = vsel %vm330_vm0, %v2565_v40, 0.0  ;;  %v2300_v20 = vadd.f32 %v4891_v62, %v2229_v26  ;;  %v1277_v61 = vadd.f32 %v1276_v59, %v4705_v28  ;;  %v1999_v22 = vpop.f32.mrf.mxu0 }
 0x1c0   :  { %v2649_v10 = vadd.f32 %v2648_v51, %v2647_v52  ;;  %v1278_v3 = vpop.f32.mrf.mxu1 }
 0x1c1   :  { %2364 = vst.msk [vmem:[%s6753_s9 + $0xa8] sm:$0xff] %vm330_vm0, %v2300_v20  ;;  %v2449_v32 = vsel %vm330_vm0, %v2300_v20, 0.0  ;;  %v2566_v54 = vmul.f32 %v2300_v20, %v2300_v20  ;;  %v2230_v60 = vadd.f32 %v1999_v22, %v1277_v61  ;;  %v2001_v5 = vpop.f32.mrf.mxu0 }
 0x1c2   :  { %v2450_v18 = vadd.f32 %v2449_v32, %v2448_v50  ;;  %v1281_v42 = vpop.f32.mrf.mxu1 }
 0x1c3   :  { %v2650_v2 = vsel %vm330_vm0, %v2566_v54, 0.0  ;;  %v2301_v0 = vadd.f32 %v4891_v62, %v2230_v60  ;;  %v1282_v28 = vadd.f32 %v1281_v42, %v4723_v48  ;;  %v2004_v27 = vpop.f32.mrf.mxu0 }
 0x1c4   :  { %v2651_v7 = vadd.f32 %v2650_v2, %v2649_v10  ;;  %v1283_v21 = vpop.f32.mrf.mxu1 }
 0x1c5   :  { %2365 = vst.msk [vmem:[%s6753_s9 + $0xb0] sm:$0xff] %vm330_vm0, %v2301_v0  ;;  %v2451_v23 = vsel %vm330_vm0, %v2301_v0, 0.0  ;;  %v2567_v38 = vmul.f32 %v2301_v0, %v2301_v0  ;;  %v2231_v47 = vadd.f32 %v2004_v27, %v1282_v28  ;;  %v2006_v8 = vpop.f32.mrf.mxu0 }
 0x1c6   :  { %v2452_v35 = vadd.f32 %v2451_v23, %v2450_v18  ;;  %v1286_v34 = vpop.f32.mrf.mxu1 }
 0x1c7   :  { %v2652_v31 = vsel %vm330_vm0, %v2567_v38, 0.0  ;;  %v2302_v58 = vadd.f32 %v4891_v62, %v2231_v47  ;;  %v1287_v48 = vadd.f32 %v1286_v34, %v4741_v13  ;;  %v2009_v19 = vpop.f32.mrf.mxu0 }
 0x1c8   :  { %v2653_v55 = vadd.f32 %v2652_v31, %v2651_v7  ;;  %v1288_v39 = vpop.f32.mrf.mxu1 }
 0x1c9   :  { %2366 = vst.msk [vmem:[%s6753_s9 + $0xb8] sm:$0xff] %vm330_vm0, %v2302_v58  ;;  %v2453_v45 = vsel %vm330_vm0, %v2302_v58, 0.0  ;;  %v2568_v43 = vmul.f32 %v2302_v58, %v2302_v58  ;;  %v2232_v16 = vadd.f32 %v2009_v19, %v1287_v48  ;;  %v2011_v52 = vpop.f32.mrf.mxu0 }
 0x1ca   :  { %v2454_v15 = vadd.f32 %v2453_v45, %v2452_v35  ;;  %v1291_v63 = vpop.f32.mrf.mxu1 }
 0x1cb   :  { %v2654_v40 = vsel %vm330_vm0, %v2568_v43, 0.0  ;;  %v2303_v26 = vadd.f32 %v4891_v62, %v2232_v16  ;;  %v1292_v13 = vadd.f32 %v1291_v63, %v4759_v53  ;;  %v2014_v37 = vpop.f32.mrf.mxu0 }
 0x1cc   :  { %v2655_v50 = vadd.f32 %v2654_v40, %v2653_v55  ;;  %v1293_v59 = vpop.f32.mrf.mxu1 }
 0x1cd   :  { %2367 = vst.msk [vmem:[%s6753_s9 + $0xc0] sm:$0xff] %vm330_vm0, %v2303_v26  ;;  %v2455_v51 = vsel %vm330_vm0, %v2303_v26, 0.0  ;;  %v2569_v20 = vmul.f32 %v2303_v26, %v2303_v26  ;;  %v2233_v61 = vadd.f32 %v2014_v37, %v1292_v13  ;;  %v2016_v22 = vpop.f32.mrf.mxu0 }
 0x1ce   :  { %v2456_v10 = vadd.f32 %v2455_v51, %v2454_v15  ;;  %v1296_v3 = vpop.f32.mrf.mxu1 }
 0x1cf   :  { %v2656_v32 = vsel %vm330_vm0, %v2569_v20, 0.0  ;;  %v2304_v54 = vadd.f32 %v4891_v62, %v2233_v61  ;;  %v1297_v53 = vadd.f32 %v1296_v3, %v4777_v30  ;;  %v2019_v60 = vpop.f32.mrf.mxu0 }
 0x1d0   :  { %v2657_v5 = vadd.f32 %v2656_v32, %v2655_v50  ;;  %v1298_v18 = vpop.f32.mrf.mxu1 }
 0x1d1   :  { %2368 = vst.msk [vmem:[%s6753_s9 + $0xc8] sm:$0xff] %vm330_vm0, %v2304_v54  ;;  %v2457_v42 = vsel %vm330_vm0, %v2304_v54, 0.0  ;;  %v2570_v2 = vmul.f32 %v2304_v54, %v2304_v54  ;;  %v2234_v0 = vadd.f32 %v2019_v60, %v1297_v53  ;;  %v2021_v28 = vpop.f32.mrf.mxu0 }
 0x1d2   :  { %v2458_v27 = vadd.f32 %v2457_v42, %v2456_v10  ;;  %v1301_v7 = vpop.f32.mrf.mxu1 }
 0x1d3   :  { %v2658_v21 = vsel %vm330_vm0, %v2570_v2, 0.0  ;;  %v2305_v23 = vadd.f32 %v4891_v62, %v2234_v0  ;;  %v1302_v30 = vadd.f32 %v1301_v7, %v4795_v11  ;;  %v2024_v38 = vpop.f32.mrf.mxu0 }
 0x1d4   :  { %v2659_v47 = vadd.f32 %v2658_v21, %v2657_v5  ;;  %v1303_v8 = vpop.f32.mrf.mxu1 }
 0x1d5   :  { %2369 = vst.msk [vmem:[%s6753_s9 + $0xd0] sm:$0xff] %vm330_vm0, %v2305_v23  ;;  %v2459_v35 = vsel %vm330_vm0, %v2305_v23, 0.0  ;;  %v2571_v34 = vmul.f32 %v2305_v23, %v2305_v23  ;;  %v2235_v31 = vadd.f32 %v2024_v38, %v1302_v30  ;;  %v2026_v58 = vpop.f32.mrf.mxu0 }
 0x1d6   :  { %v2460_v48 = vadd.f32 %v2459_v35, %v2458_v27  ;;  %v1306_v19 = vpop.f32.mrf.mxu1 }
 0x1d7   :  { %v2660_v55 = vsel %vm330_vm0, %v2571_v34, 0.0  ;;  %v2306_v39 = vadd.f32 %v4891_v62, %v2235_v31  ;;  %v1307_v11 = vadd.f32 %v1306_v19, %v4813_v6  ;;  %v2029_v45 = vpop.f32.mrf.mxu0 }
 0x1d8   :  { %v2661_v43 = vadd.f32 %v2660_v55, %v2659_v47  ;;  %v1308_v16 = vpop.f32.mrf.mxu1 }
 0x1d9   :  { %2370 = vst.msk [vmem:[%s6753_s9 + $0xd8] sm:$0xff] %vm330_vm0, %v2306_v39  ;;  %v2461_v52 = vsel %vm330_vm0, %v2306_v39, 0.0  ;;  %v2572_v15 = vmul.f32 %v2306_v39, %v2306_v39  ;;  %v2236_v63 = vadd.f32 %v2029_v45, %v1307_v11  ;;  %v2031_v40 = vpop.f32.mrf.mxu0 }
 0x1da   :  { %v2462_v26 = vadd.f32 %v2461_v52, %v2460_v48  ;;  %v1311_v13 = vpop.f32.mrf.mxu1 }
 0x1db   :  { %v2662_v37 = vsel %vm330_vm0, %v2572_v15, 0.0  ;;  %v2307_v50 = vadd.f32 %v4891_v62, %v2236_v63  ;;  %v1312_v6 = vadd.f32 %v1311_v13, %v4831_v29  ;;  %v2034_v59 = vpop.f32.mrf.mxu0 }
 0x1dc   :  { %v2663_v51 = vadd.f32 %v2662_v37, %v2661_v43  ;;  %v1313_v20 = vpop.f32.mrf.mxu1 }
 0x1dd   :  { %2371 = vst.msk [vmem:[%s6753_s9 + $0xe0] sm:$0xff] %vm330_vm0, %v2307_v50  ;;  %v2463_v61 = vsel %vm330_vm0, %v2307_v50, 0.0  ;;  %v2573_v22 = vmul.f32 %v2307_v50, %v2307_v50  ;;  %v2237_v10 = vadd.f32 %v2034_v59, %v1312_v6  ;;  %v2036_v3 = vpop.f32.mrf.mxu0 }
 0x1de   :  { %v2464_v32 = vadd.f32 %v2463_v61, %v2462_v26  ;;  %v1316_v54 = vpop.f32.mrf.mxu1  ;;  %v6776_v61 = vmov 0.0  }
 0x1df   :  { %v2664_v53 = vsel %vm330_vm0, %v2573_v22, 0.0  ;;  %v2308_v60 = vadd.f32 %v4891_v62, %v2237_v10  ;;  %v1317_v29 = vadd.f32 %v1316_v54, %v4849_v44  ;;  %v2039_v5 = vpop.f32.mrf.mxu0  ;;  %37 = vst.msk [vmem:[#allocation2] sm:$0x3] %vm36_vm1, %v6776_v61 }
 0x1e0   :  { %v2665_v18 = vadd.f32 %v2664_v53, %v2663_v51  ;;  %v1318_v42 = vpop.f32.mrf.mxu1 }
 0x1e1   :  { %2372 = vst.msk [vmem:[%s6753_s9 + $0xe8] sm:$0xff] %vm330_vm0, %v2308_v60  ;;  %v2465_v2 = vsel %vm330_vm0, %v2308_v60, 0.0  ;;  %v2574_v0 = vmul.f32 %v2308_v60, %v2308_v60  ;;  %v2238_v28 = vadd.f32 %v2039_v5, %v1317_v29  ;;  %v2041_v27 = vpop.f32.mrf.mxu0 }
 0x1e2   :  { %v2466_v7 = vadd.f32 %v2465_v2, %v2464_v32  ;;  %v1321_v21 = vpop.f32.mrf.mxu1 }
 0x1e3   :  { %v2666_v23 = vsel %vm330_vm0, %v2574_v0, 0.0  ;;  %v2309_v30 = vadd.f32 %v4891_v62, %v2238_v28  ;;  %v1322_v44 = vadd.f32 %v1321_v21, %v4867_v12  ;;  %v2044_v38 = vpop.f32.mrf.mxu0  ;;  %v5344_v12 = vld [vmem:[%s6752_s6] ss:$0 sm:$0xff] }
 0x1e4   :  { %v2667_v47 = vadd.f32 %v2666_v23, %v2665_v18  ;;  %v1323_v8 = vpop.f32.mrf.mxu1 }
 0x1e5   :  { %2373 = vst.msk [vmem:[%s6753_s9 + $0xf0] sm:$0xff] %vm330_vm0, %v2309_v30  ;;  %v2467_v35 = vsel %vm330_vm0, %v2309_v30, 0.0  ;;  %v2575_v34 = vmul.f32 %v2309_v30, %v2309_v30  ;;  %v2239_v31 = vadd.f32 %v2044_v38, %v1322_v44  ;;  %v2046_v58 = vpop.f32.mrf.mxu0 }
 0x1e6   :  { %v2468_v48 = vadd.f32 %v2467_v35, %v2466_v7  ;;  %v1326_v19 = vpop.f32.mrf.mxu1 }
 0x1e7   :  { %v2668_v55 = vsel %vm330_vm0, %v2575_v34, 0.0  ;;  %v2310_v62 = vadd.f32 %v5344_v12, %v2239_v31  ;;  %v1327_v39 = vadd.f32 %v1326_v19, %v4307_v1  ;;  %v2049_v11 = vpop.f32.mrf.mxu0 }
 0x1e8   :  { %v2669_v45 = vadd.f32 %v2668_v55, %v2667_v47  ;;  %v1328_v43 = vpop.f32.mrf.mxu1 }
 0x1e9   :  { %2374 = vst.msk [vmem:[%s6753_s9 + $0xf8] sm:$0xff] %vm330_vm0, %v2310_v62  ;;  %v2469_v16 = vsel %vm330_vm0, %v2310_v62, 0.0  ;;  %v2576_v52 = vmul.f32 %v2310_v62, %v2310_v62  ;;  %v2240_v15 = vadd.f32 %v2049_v11, %v1327_v39  ;;  %v2051_v63 = vpop.f32.mrf.mxu0 }
 0x1ea   :  { %v5353_v40 = vadd.f32 %v2469_v16, %v2468_v48  ;;  %v1331_v26 = vpop.f32.mrf.mxu1 }
 0x1eb   :  { %v2670_v13 = vsel %vm330_vm0, %v2576_v52, 0.0  ;;  %v5357_v1 = vadd.f32 %v5344_v12, %v2240_v15  ;;  %v1332_v37 = vadd.f32 %v1331_v26, %v4325_v9  ;;  %v2054_v50 = vpop.f32.mrf.mxu0 }
 0x1ec   :  { %v5360_v6 = vadd.f32 %v2670_v13, %v2669_v45  ;;  %v1333_v59 = vpop.f32.mrf.mxu1 }
 0x1ed   :  { %2375 = vst.msk [vmem:[%s6753_s9 + $0x100] sm:$0xff] %vm330_vm0, %v5357_v1  ;;  %v2241_v51 = vadd.f32 %v2054_v50, %v1332_v37  ;;  %v2056_v20 = vpop.f32.mrf.mxu0 }
 0x1ee   :  { %v1336_v22 = vpop.f32.mrf.mxu1 }
 0x1ef   :  { %v5369_v10 = vadd.f32 %v5344_v12, %v2241_v51  ;;  %v1337_v9 = vadd.f32 %v1336_v22, %v4343_v17  ;;  %v2059_v3 = vpop.f32.mrf.mxu0 }
 0x1f0   :  { %v1338_v32 = vpop.f32.mrf.mxu1 }
 0x1f1   :  { %2376 = vst.msk [vmem:[%s6753_s9 + $0x108] sm:$0xff] %vm330_vm0, %v5369_v10  ;;  %v2242_v54 = vadd.f32 %v2059_v3, %v1337_v9  ;;  %v2061_v53 = vpop.f32.mrf.mxu0 }
 0x1f2   :  { %v1341_v60 = vpop.f32.mrf.mxu1 }
 0x1f3   :  { %v5378_v29 = vadd.f32 %v5344_v12, %v2242_v54  ;;  %v1342_v5 = vadd.f32 %v1341_v60, %v4361_v25  ;;  %v2064_v18 = vpop.f32.mrf.mxu0 }
 0x1f4   :  { %v1343_v42 = vpop.f32.mrf.mxu1 }
 0x1f5   :  { %2377 = vst.msk [vmem:[%s6753_s9 + $0x110] sm:$0xff] %vm330_vm0, %v5378_v29  ;;  %v2243_v17 = vadd.f32 %v2064_v18, %v1342_v5  ;;  %v2066_v2 = vpop.f32.mrf.mxu0 }
 0x1f6   :  { %v1346_v0 = vpop.f32.mrf.mxu1 }
 0x1f7   :  { %v5387_v28 = vadd.f32 %v5344_v12, %v2243_v17  ;;  %v1347_v27 = vadd.f32 %v1346_v0, %v4379_v33  ;;  %v2069_v7 = vpop.f32.mrf.mxu0 }
 0x1f8   :  { %v1348_v21 = vpop.f32.mrf.mxu1 }
 0x1f9   :  { %2378 = vst.msk [vmem:[%s6753_s9 + $0x118] sm:$0xff] %vm330_vm0, %v5387_v28  ;;  %v2244_v25 = vadd.f32 %v2069_v7, %v1347_v27  ;;  %v2071_v23 = vpop.f32.mrf.mxu0 }
 0x1fa   :  { %v1351_v30 = vpop.f32.mrf.mxu1 }
 0x1fb   :  { %v5396_v44 = vadd.f32 %v5344_v12, %v2244_v25  ;;  %v1352_v38 = vadd.f32 %v1351_v30, %v4397_v41  ;;  %v2074_v47 = vpop.f32.mrf.mxu0 }
 0x1fc   :  { %v1353_v8 = vpop.f32.mrf.mxu1 }
 0x1fd   :  { %2379 = vst.msk [vmem:[%s6753_s9 + $0x120] sm:$0xff] %vm330_vm0, %v5396_v44  ;;  %v2245_v33 = vadd.f32 %v2074_v47, %v1352_v38  ;;  %v2076_v35 = vpop.f32.mrf.mxu0 }
 0x1fe   :  { %v1356_v34 = vpop.f32.mrf.mxu1 }
 0x1ff   :  { %v5405_v31 = vadd.f32 %v5344_v12, %v2245_v33  ;;  %v1357_v58 = vadd.f32 %v1356_v34, %v4415_v49  ;;  %v2079_v48 = vpop.f32.mrf.mxu0 }
 0x200   :  { %v1358_v19 = vpop.f32.mrf.mxu1 }
 0x201   :  { %2380 = vst.msk [vmem:[%s6753_s9 + $0x128] sm:$0xff] %vm330_vm0, %v5405_v31  ;;  %v2246_v41 = vadd.f32 %v2079_v48, %v1357_v58  ;;  %v2081_v55 = vpop.f32.mrf.mxu0  ;;  %v6777_v19 = vld [vmem:[#allocation3_spill] sm:$0xff] }
 0x202   :  { %v1361_v62 = vpop.f32.mrf.mxu1 }
 0x203   :  { %v5414_v39 = vadd.f32 %v5344_v12, %v2246_v41  ;;  %v1362_v11 = vadd.f32 %v1361_v62, %v4433_v57  ;;  %v2084_v45 = vpop.f32.mrf.mxu0 }
 0x204   :  { %v1363_v43 = vpop.f32.mrf.mxu1 }
 0x205   :  { %2381 = vst.msk [vmem:[%s6753_s9 + $0x130] sm:$0xff] %vm330_vm0, %v5414_v39  ;;  %v2247_v49 = vadd.f32 %v2084_v45, %v1362_v11  ;;  %v2086_v16 = vpop.f32.mrf.mxu0 }
 0x206   :  { %v1366_v52 = vpop.f32.mrf.mxu1 }
 0x207   :  { %v5423_v15 = vadd.f32 %v5344_v12, %v2247_v49  ;;  %v1367_v63 = vadd.f32 %v1366_v52, %v4451_v4  ;;  %v2089_v26 = vpop.f32.mrf.mxu0  ;;  %v6778_v49 = vld [vmem:[#allocation4_spill] sm:$0xff] }
 0x208   :  { %v1368_v13 = vpop.f32.mrf.mxu1 }
 0x209   :  { %2382 = vst.msk [vmem:[%s6753_s9 + $0x138] sm:$0xff] %vm330_vm0, %v5423_v15  ;;  %v2248_v57 = vadd.f32 %v2089_v26, %v1367_v63  ;;  %v2091_v37 = vpop.f32.mrf.mxu0 }
 0x20a   :  { %v1371_v50 = vpop.f32.mrf.mxu1  ;;  %v2577_v37 = vmul.f32 %v5357_v1, %v5357_v1 }
 0x20b   :  { %v5432_v59 = vadd.f32 %v5344_v12, %v2248_v57  ;;  %v1372_v51 = vadd.f32 %v1371_v50, %v4469_v14  ;;  %v2094_v20 = vpop.f32.mrf.mxu0 }
 0x20c   :  { %v1373_v61 = vpop.f32.mrf.mxu1 }
 0x20d   :  { %2383 = vst.msk [vmem:[%s6753_s9 + $0x140] sm:$0xff] %vm330_vm0, %v5432_v59  ;;  %v2249_v4 = vadd.f32 %v2094_v20, %v1372_v51  ;;  %v2096_v22 = vpop.f32.mrf.mxu0  ;;  %v6779_v51 = vld [vmem:[#allocation5_spill] sm:$0xff] }
 0x20e   :  { %v1376_v9 = vpop.f32.mrf.mxu1  ;;  %v2471_v22 = vsel %vm330_vm0, %v5357_v1, 0.0  ;;  %v2473_v1 = vsel %vm330_vm0, %v5369_v10, 0.0 }
 0x20f   :  { %v5441_v3 = vadd.f32 %v5344_v12, %v2249_v4  ;;  %v1377_v32 = vadd.f32 %v1376_v9, %v4487_v24  ;;  %v2099_v54 = vpop.f32.mrf.mxu0  ;;  %v2578_v9 = vmul.f32 %v5369_v10, %v5369_v10 }
 0x210   :  { %v1378_v53 = vpop.f32.mrf.mxu1 }
 0x211   :  { %2384 = vst.msk [vmem:[%s6753_s9 + $0x148] sm:$0xff] %vm330_vm0, %v5441_v3  ;;  %v2250_v14 = vadd.f32 %v2099_v54, %v1377_v32  ;;  %v2101_v60 = vpop.f32.mrf.mxu0  ;;  %v2579_v53 = vmul.f32 %v5378_v29, %v5378_v29 }
 0x212   :  { %v1381_v5 = vpop.f32.mrf.mxu1  ;;  %v2672_v60 = vsel %vm330_vm0, %v2577_v37, 0.0 }
 0x213   :  { %v5450_v18 = vadd.f32 %v5344_v12, %v2250_v14  ;;  %v1382_v42 = vadd.f32 %v1381_v5, %v4505_v36  ;;  %v2104_v17 = vpop.f32.mrf.mxu0 }
 0x214   :  { %v1383_v2 = vpop.f32.mrf.mxu1 }
 0x215   :  { %2385 = vst.msk [vmem:[%s6753_s9 + $0x150] sm:$0xff] %vm330_vm0, %v5450_v18  ;;  %v2251_v24 = vadd.f32 %v2104_v17, %v1382_v42  ;;  %v2106_v0 = vpop.f32.mrf.mxu0  ;;  %v6780_v42 = vld [vmem:[#allocation6_spill] sm:$0xff] }
 0x216   :  { %v1386_v27 = vpop.f32.mrf.mxu1 }
 0x217   :  { %v5459_v7 = vadd.f32 %v5344_v12, %v2251_v24  ;;  %v1387_v21 = vadd.f32 %v1386_v27, %v4523_v46  ;;  %v2109_v25 = vpop.f32.mrf.mxu0  ;;  %v2472_v24 = vadd.f32 %v2471_v22, %v5353_v40  ;;  %v2674_v27 = vsel %vm330_vm0, %v2578_v9, 0.0 }
 0x218   :  { %v1388_v23 = vpop.f32.mrf.mxu1  ;;  %v2584_v22 = vmul.f32 %v5423_v15, %v5423_v15 }
 0x219   :  { %2386 = vst.msk [vmem:[%s6753_s9 + $0x158] sm:$0xff] %vm330_vm0, %v5459_v7  ;;  %v2252_v36 = vadd.f32 %v2109_v25, %v1387_v21  ;;  %v2111_v30 = vpop.f32.mrf.mxu0  ;;  %v2475_v21 = vsel %vm330_vm0, %v5378_v29, 0.0  ;;  %v2580_v25 = vmul.f32 %v5387_v28, %v5387_v28  ;;  %v2474_v40 = vadd.f32 %v2473_v1, %v2472_v24 }
 0x21a   :  { %v1391_v38 = vpop.f32.mrf.mxu1  ;;  %v2676_v30 = vsel %vm330_vm0, %v2579_v53, 0.0  ;;  %v2477_v29 = vsel %vm330_vm0, %v5387_v28, 0.0  ;;  %v2582_v28 = vmul.f32 %v5405_v31, %v5405_v31 }
 0x21b   :  { %v5468_v47 = vadd.f32 %v5344_v12, %v2252_v36  ;;  %v1392_v8 = vadd.f32 %v1391_v38, %v4541_v56  ;;  %v2114_v33 = vpop.f32.mrf.mxu0  ;;  %v2673_v36 = vadd.f32 %v2672_v60, %v5360_v6  ;;  %v2678_v6 = vsel %vm330_vm0, %v2580_v25, 0.0 }
 0x21c   :  { %v1393_v35 = vpop.f32.mrf.mxu1  ;;  %v2485_v60 = vsel %vm330_vm0, %v5423_v15, 0.0  ;;  %v2487_v25 = vsel %vm330_vm0, %v5432_v59, 0.0  ;;  %v2586_v15 = vmul.f32 %v5441_v3, %v5441_v3 }
 0x21d   :  { %2387 = vst.msk [vmem:[%s6753_s9 + $0x160] sm:$0xff] %vm330_vm0, %v5468_v47  ;;  %v2253_v46 = vadd.f32 %v2114_v33, %v1392_v8  ;;  %v2116_v34 = vpop.f32.mrf.mxu0  ;;  %v2581_v8 = vmul.f32 %v5396_v44, %v5396_v44  ;;  %v6781_v35 = vld [vmem:[#allocation7_spill] sm:$0xff] }
 0x21e   :  { %v1396_v58 = vpop.f32.mrf.mxu1 }
 0x21f   :  { %v5477_v48 = vadd.f32 %v5344_v12, %v2253_v46  ;;  %v1397_v41 = vadd.f32 %v1396_v58, %v6777_v19  ;;  %v2119_v55 = vpop.f32.mrf.mxu0  ;;  %v2675_v58 = vadd.f32 %v2674_v27, %v2673_v36  ;;  %v2476_v19 = vadd.f32 %v2475_v21, %v2474_v40 }
 0x220   :  { %v1398_v62 = vpop.f32.mrf.mxu1  ;;  %v2686_v21 = vsel %vm330_vm0, %v2584_v22, 0.0 }
 0x221   :  { %2388 = vst.msk [vmem:[%s6753_s9 + $0x168] sm:$0xff] %vm330_vm0, %v5477_v48  ;;  %v2254_v56 = vadd.f32 %v2119_v55, %v1397_v41  ;;  %v2121_v11 = vpop.f32.mrf.mxu0  ;;  %v2479_v55 = vsel %vm330_vm0, %v5396_v44, 0.0  ;;  %v2481_v44 = vsel %vm330_vm0, %v5405_v31, 0.0 }
 0x222   :  { %v1401_v45 = vpop.f32.mrf.mxu1  ;;  %v2677_v11 = vadd.f32 %v2676_v30, %v2675_v58  ;;  %v2587_v30 = vmul.f32 %v5450_v18, %v5450_v18 }
 0x223   :  { %v5486_v43 = vadd.f32 %v5344_v12, %v2254_v56  ;;  %v1402_v16 = vadd.f32 %v1401_v45, %v6778_v49  ;;  %v2124_v52 = vpop.f32.mrf.mxu0  ;;  %v2478_v45 = vadd.f32 %v2477_v29, %v2476_v19  ;;  %v2583_v49 = vmul.f32 %v5414_v39, %v5414_v39 }
 0x224   :  { %v1403_v63 = vpop.f32.mrf.mxu1  ;;  %v2679_v37 = vadd.f32 %v2678_v6, %v2677_v11  ;;  %v2690_v6 = vsel %vm330_vm0, %v2586_v15, 0.0 }
 0x225   :  { %2389 = vst.msk [vmem:[%s6753_s9 + $0x170] sm:$0xff] %vm330_vm0, %v5486_v43  ;;  %v2255_v26 = vadd.f32 %v2124_v52, %v1402_v16  ;;  %v2126_v13 = vpop.f32.mrf.mxu0  ;;  %v2680_v52 = vsel %vm330_vm0, %v2581_v8, 0.0  ;;  %v2684_v53 = vsel %vm330_vm0, %v2583_v49, 0.0 }
 0x226   :  { %v1406_v57 = vpop.f32.mrf.mxu1 }
 0x227   :  { %v5497_v50 = vadd.f32 %v5344_v12, %v2255_v26  ;;  %v1407_v20 = vadd.f32 %v1406_v57, %v6779_v51  ;;  %v2129_v61 = vpop.f32.mrf.mxu0  ;;  %v6782_v26 = vld [vmem:[#allocation8_spill] sm:$0xff]  ;;  %v2480_v51 = vadd.f32 %v2479_v55, %v2478_v45  ;;  %v2491_v55 = vsel %vm330_vm0, %v5450_v18, 0.0 }
 0x228   :  { %v1408_v4 = vpop.f32.mrf.mxu1  ;;  %v2692_v45 = vsel %vm330_vm0, %v2587_v30, 0.0  ;;  %v2589_v18 = vmul.f32 %v5468_v47, %v5468_v47 }
 0x229   :  { %2390 = vst.msk [vmem:[%s6753_s9 + $0x178] sm:$0xff] %vm330_vm0, %v5497_v50  ;;  %v2256_v32 = vadd.f32 %v2129_v61, %v1407_v20  ;;  %v2131_v54 = vpop.f32.mrf.mxu0  ;;  %v2682_v61 = vsel %vm330_vm0, %v2582_v28, 0.0  ;;  %v2483_v4 = vsel %vm330_vm0, %v5414_v39, 0.0  ;;  %v2585_v39 = vmul.f32 %v5432_v59, %v5432_v59 }
 0x22a   :  { %v1411_v14 = vpop.f32.mrf.mxu1  ;;  %v2482_v54 = vadd.f32 %v2481_v44, %v2480_v51  ;;  %v2489_v59 = vsel %vm330_vm0, %v5441_v3, 0.0  ;;  %v2588_v28 = vmul.f32 %v5459_v7, %v5459_v7  ;;  %v6785_v44 = vld [vmem:[#allocation11_spill] sm:$0xff] }
 0x22b   :  { %v5515_v5 = vadd.f32 %v5344_v12, %v2256_v32  ;;  %v1412_v17 = vadd.f32 %v1411_v14, %v6780_v42  ;;  %v2134_v2 = vpop.f32.mrf.mxu0  ;;  %v2681_v32 = vadd.f32 %v2680_v52, %v2679_v37  ;;  %v6783_v42 = vld [vmem:[#allocation9_spill] sm:$0xff]  ;;  %v2688_v29 = vsel %vm330_vm0, %v2585_v39, 0.0 }
 0x22c   :  { %v1413_v0 = vpop.f32.mrf.mxu1 }
 0x22d   :  { %2391 = vst.msk [vmem:[%s6753_s9 + $0x180] sm:$0xff] %vm330_vm0, %v5515_v5  ;;  %v2257_v10 = vadd.f32 %v2134_v2, %v1412_v17  ;;  %v2136_v23 = vpop.f32.mrf.mxu0  ;;  %v2683_v24 = vadd.f32 %v2682_v61, %v2681_v32  ;;  %v2484_v0 = vadd.f32 %v2483_v4, %v2482_v54  ;;  %v2495_v61 = vsel %vm330_vm0, %v5468_v47, 0.0 }
 0x22e   :  { %v1416_v38 = vpop.f32.mrf.mxu1  ;;  %v2591_v32 = vmul.f32 %v5486_v43, %v5486_v43  ;;  %v2497_v47 = vsel %vm330_vm0, %v5477_v48, 0.0 }
 0x22f   :  { %v5536_v33 = vadd.f32 %v5344_v12, %v2257_v10  ;;  %v1417_v46 = vadd.f32 %v1416_v38, %v6781_v35  ;;  %v2139_v34 = vpop.f32.mrf.mxu0  ;;  %v2685_v36 = vadd.f32 %v2684_v53, %v2683_v24  ;;  %v2486_v40 = vadd.f32 %v2485_v60, %v2484_v0  ;;  %v6784_v35 = vld [vmem:[#allocation10_spill] sm:$0xff]  ;;  %v6786_v60 = vld [vmem:[#allocation12_spill] sm:$0xff] }
 0x230   :  { %v1418_v41 = vpop.f32.mrf.mxu1  ;;  %v2696_v53 = vsel %vm330_vm0, %v2589_v18, 0.0 }
 0x231   :  { %2392 = vst.msk [vmem:[%s6753_s9 + $0x188] sm:$0xff] %vm330_vm0, %v5536_v33  ;;  %v2258_v62 = vadd.f32 %v2139_v34, %v1417_v46  ;;  %v2141_v56 = vpop.f32.mrf.mxu0  ;;  %v2687_v58 = vadd.f32 %v2686_v21, %v2685_v36  ;;  %v2488_v19 = vadd.f32 %v2487_v25, %v2486_v40  ;;  %v2592_v21 = vmul.f32 %v5497_v50, %v5497_v50 }
 0x232   :  { %v1421_v16 = vpop.f32.mrf.mxu1  ;;  %v2501_v40 = vsel %vm330_vm0, %v5497_v50, 0.0  ;;  %v2594_v50 = vmul.f32 %v5536_v33, %v5536_v33 }
 0x233   :  { %v5555_v63 = vadd.f32 %v5344_v12, %v2258_v62  ;;  %v1422_v13 = vadd.f32 %v1421_v16, %v6782_v26  ;;  %v2144_v57 = vpop.f32.mrf.mxu0  ;;  %v2689_v56 = vadd.f32 %v2688_v29, %v2687_v58  ;;  %v2490_v11 = vadd.f32 %v2489_v59, %v2488_v19 }
 0x234   :  { %v1423_v20 = vpop.f32.mrf.mxu1  ;;  %v2493_v16 = vsel %vm330_vm0, %v5459_v7, 0.0  ;;  %v2590_v7 = vmul.f32 %v5477_v48, %v5477_v48  ;;  %v2702_v58 = vsel %vm330_vm0, %v2592_v21, 0.0  ;;  %v2503_v19 = vsel %vm330_vm0, %v5515_v5, 0.0 }
 0x235   :  { %2393 = vst.msk [vmem:[%s6753_s9 + $0x190] sm:$0xff] %vm330_vm0, %v5555_v63  ;;  %v2259_v31 = vadd.f32 %v2144_v57, %v1422_v13  ;;  %v2146_v9 = vpop.f32.mrf.mxu0  ;;  %v2691_v57 = vadd.f32 %v2690_v6, %v2689_v56  ;;  %v2492_v37 = vadd.f32 %v2491_v55, %v2490_v11  ;;  %v2694_v20 = vsel %vm330_vm0, %v2588_v28, 0.0 }
 0x236   :  { %v1426_v14 = vpop.f32.mrf.mxu1  ;;  %v2698_v0 = vsel %vm330_vm0, %v2590_v7, 0.0 }
 0x237   :  { %v5574_v1 = vadd.f32 %v5344_v12, %v2259_v31  ;;  %v1427_v17 = vadd.f32 %v1426_v14, %v6783_v42  ;;  %v2149_v2 = vpop.f32.mrf.mxu0  ;;  %v2693_v31 = vadd.f32 %v2692_v45, %v2691_v57  ;;  %v2494_v9 = vadd.f32 %v2493_v16, %v2492_v37  ;;  %v6788_v45 = vld [vmem:[#allocation14_spill] sm:$0xff] }
 0x238   :  { %v1428_v27 = vpop.f32.mrf.mxu1  ;;  %v2507_v57 = vsel %vm330_vm0, %v5555_v63, 0.0 }
 0x239   :  { %2394 = vst.msk [vmem:[%s6753_s9 + $0x198] sm:$0xff] %vm330_vm0, %v5574_v1  ;;  %v2260_v10 = vadd.f32 %v2149_v2, %v1427_v17  ;;  %v2151_v23 = vpop.f32.mrf.mxu0  ;;  %v2695_v17 = vadd.f32 %v2694_v20, %v2693_v31  ;;  %v2496_v2 = vadd.f32 %v2495_v61, %v2494_v9  ;;  %v2499_v27 = vsel %vm330_vm0, %v5486_v43, 0.0  ;;  %v6789_v9 = vld [vmem:[#allocation15_spill] sm:$0xff] }
 0x23a   :  { %v1431_v38 = vpop.f32.mrf.mxu1  ;;  %v2700_v23 = vsel %vm330_vm0, %v2591_v32, 0.0  ;;  %v2593_v43 = vmul.f32 %v5515_v5, %v5515_v5  ;;  %v2505_v5 = vsel %vm330_vm0, %v5536_v33, 0.0  ;;  %v2596_v37 = vmul.f32 %v5574_v1, %v5574_v1 }
 0x23b   :  { %v5593_v8 = vadd.f32 %v5344_v12, %v2260_v10  ;;  %v1432_v46 = vadd.f32 %v1431_v38, %v6784_v35  ;;  %v2154_v34 = vpop.f32.mrf.mxu0  ;;  %v2697_v15 = vadd.f32 %v2696_v53, %v2695_v17  ;;  %v2498_v10 = vadd.f32 %v2497_v47, %v2496_v2  ;;  %v6787_v38 = vld [vmem:[#allocation13_spill] sm:$0xff] }
 0x23c   :  { %v1433_v41 = vpop.f32.mrf.mxu1  ;;  %v2704_v56 = vsel %vm330_vm0, %v2593_v43, 0.0 }
 0x23d   :  { %2395 = vst.msk [vmem:[%s6753_s9 + $0x1a0] sm:$0xff] %vm330_vm0, %v5593_v8  ;;  %v2261_v3 = vadd.f32 %v2154_v34, %v1432_v46  ;;  %v2156_v62 = vpop.f32.mrf.mxu0  ;;  %v2699_v35 = vadd.f32 %v2698_v0, %v2697_v15  ;;  %v2500_v46 = vadd.f32 %v2499_v27, %v2498_v10  ;;  %v6790_v15 = vld [vmem:[#allocation16_spill] sm:$0xff] }
 0x23e   :  { %v1436_v49 = vpop.f32.mrf.mxu1 }
 0x23f   :  { %v5612_v52 = vadd.f32 %v5344_v12, %v2261_v3  ;;  %v1437_v26 = vadd.f32 %v1436_v49, %v6785_v44  ;;  %v2159_v13 = vpop.f32.mrf.mxu0  ;;  %v2701_v55 = vadd.f32 %v2700_v23, %v2699_v35  ;;  %v2502_v28 = vadd.f32 %v2501_v40, %v2500_v46 }
 0x240   :  { %v1438_v51 = vpop.f32.mrf.mxu1  ;;  %v2595_v3 = vmul.f32 %v5555_v63, %v5555_v63  ;;  %v2597_v63 = vmul.f32 %v5593_v8, %v5593_v8 }
 0x241   :  { %2396 = vst.msk [vmem:[%s6753_s9 + $0x1a8] sm:$0xff] %vm330_vm0, %v5612_v52  ;;  %v2262_v4 = vadd.f32 %v2159_v13, %v1437_v26  ;;  %v2161_v22 = vpop.f32.mrf.mxu0  ;;  %v2703_v18 = vadd.f32 %v2702_v58, %v2701_v55  ;;  %v2504_v44 = vadd.f32 %v2503_v19, %v2502_v28  ;;  %v2706_v13 = vsel %vm330_vm0, %v2594_v50, 0.0 }
 0x242   :  { %v1441_v54 = vpop.f32.mrf.mxu1  ;;  %v2708_v7 = vsel %vm330_vm0, %v2595_v3, 0.0  ;;  %v2509_v22 = vsel %vm330_vm0, %v5574_v1, 0.0  ;;  %v2598_v17 = vmul.f32 %v5612_v52, %v5612_v52 }
 0x243   :  { %v5631_v14 = vadd.f32 %v5344_v12, %v2262_v4  ;;  %v1442_v39 = vadd.f32 %v1441_v54, %v6786_v60  ;;  %v2164_v42 = vpop.f32.mrf.mxu0  ;;  %v2705_v20 = vadd.f32 %v2704_v56, %v2703_v18  ;;  %v2506_v61 = vadd.f32 %v2505_v5, %v2504_v44 }
 0x244   :  { %v1443_v24 = vpop.f32.mrf.mxu1 }
 0x245   :  { %2397 = vst.msk [vmem:[%s6753_s9 + $0x1b0] sm:$0xff] %vm330_vm0, %v5631_v14  ;;  %v2263_v48 = vadd.f32 %v2164_v42, %v1442_v39  ;;  %v2166_v25 = vpop.f32.mrf.mxu0  ;;  %v2707_v53 = vadd.f32 %v2706_v13, %v2705_v20  ;;  %v2508_v47 = vadd.f32 %v2507_v57, %v2506_v61  ;;  %v2710_v39 = vsel %vm330_vm0, %v2596_v37, 0.0 }
 0x246   :  { %v1446_v36 = vpop.f32.mrf.mxu1  ;;  %v2511_v42 = vsel %vm330_vm0, %v5593_v8, 0.0  ;;  %v2599_v27 = vmul.f32 %v5631_v14, %v5631_v14  ;;  %v2513_v8 = vsel %vm330_vm0, %v5612_v52, 0.0 }
 0x247   :  { %v5650_v30 = vadd.f32 %v5344_v12, %v2263_v48  ;;  %v1447_v29 = vadd.f32 %v1446_v36, %v6787_v38  ;;  %v2169_v59 = vpop.f32.mrf.mxu0  ;;  %v2709_v24 = vadd.f32 %v2708_v7, %v2707_v53  ;;  %v2510_v0 = vadd.f32 %v2509_v22, %v2508_v47 }
 0x248   :  { %v1448_v34 = vpop.f32.mrf.mxu1  ;;  %v2712_v48 = vsel %vm330_vm0, %v2597_v63, 0.0  ;;  %v2714_v38 = vsel %vm330_vm0, %v2598_v17, 0.0  ;;  %v2716_v58 = vsel %vm330_vm0, %v2599_v27, 0.0 }
 0x249   :  { %2398 = vst.msk [vmem:[%s6753_s9 + $0x1b8] sm:$0xff] %vm330_vm0, %v5650_v30  ;;  %v2264_v41 = vadd.f32 %v2169_v59, %v1447_v29  ;;  %v2171_v6 = vpop.f32.mrf.mxu0  ;;  %v2711_v36 = vadd.f32 %v2710_v39, %v2709_v24  ;;  %v2512_v40 = vadd.f32 %v2511_v42, %v2510_v0  ;;  %v2515_v29 = vsel %vm330_vm0, %v5631_v14, 0.0 }
 0x24a   :  { %v1451_v62 = vpop.f32.mrf.mxu1  ;;  %v2600_v59 = vmul.f32 %v5650_v30, %v5650_v30  ;;  %v2517_v50 = vsel %vm330_vm0, %v5650_v30, 0.0  ;;  %v6791_v6 = vld [vmem:[#allocation17_spill] sm:$0xff] }
 0x24b   :  { %v2335_v11 = vadd.f32 %v5344_v12, %v2264_v41  ;;  %v1452_v49 = vadd.f32 %v1451_v62, %v6788_v45  ;;  %v2174_v16 = vpop.f32.mrf.mxu0  ;;  %v2713_v46 = vadd.f32 %v2712_v48, %v2711_v36  ;;  %v2514_v34 = vadd.f32 %v2513_v8, %v2512_v40 }
 0x24c   :  { %v1453_v26 = vpop.f32.mrf.mxu1  ;;  %v2718_v5 = vsel %vm330_vm0, %v2600_v59, 0.0  ;;  %v6794_v59 = vld [vmem:[#allocation20_spill] sm:$0xff] }
 0x24d   :  { %2399 = vst.msk [vmem:[%s6753_s9 + $0x1c0] sm:$0xff] %vm330_vm0, %v2335_v11  ;;  %v2265_v33 = vadd.f32 %v2174_v16, %v1452_v49  ;;  %v2176_v51 = vpop.f32.mrf.mxu0  ;;  %v2601_v41 = vmul.f32 %v2335_v11, %v2335_v11  ;;  %v2715_v3 = vadd.f32 %v2714_v38, %v2713_v46  ;;  %v2516_v62 = vadd.f32 %v2515_v29, %v2514_v34 }
 0x24e   :  { %v1456_v4 = vpop.f32.mrf.mxu1  ;;  %v2519_v45 = vsel %vm330_vm0, %v2335_v11, 0.0  ;;  %v6792_v51 = vld [vmem:[#allocation18_spill] sm:$0xff] }
 0x24f   :  { %v2336_v31 = vadd.f32 %v5344_v12, %v2265_v33  ;;  %v1457_v32 = vadd.f32 %v1456_v4, %v6789_v9  ;;  %v2179_v54 = vpop.f32.mrf.mxu0  ;;  %v2717_v18 = vadd.f32 %v2716_v58, %v2715_v3  ;;  %v2518_v44 = vadd.f32 %v2517_v50, %v2516_v62 }
 0x250   :  { %v1458_v60 = vpop.f32.mrf.mxu1  ;;  %v2720_v57 = vsel %vm330_vm0, %v2601_v41, 0.0 }
 0x251   :  { %2400 = vst.msk [vmem:[%s6753_s9 + $0x1c8] sm:$0xff] %vm330_vm0, %v2336_v31  ;;  %v2266_v1 = vadd.f32 %v2179_v54, %v1457_v32  ;;  %v2181_v2 = vpop.f32.mrf.mxu0  ;;  %v2602_v49 = vmul.f32 %v2336_v31, %v2336_v31  ;;  %v2521_v37 = vsel %vm330_vm0, %v2336_v31, 0.0  ;;  %v2719_v61 = vadd.f32 %v2718_v5, %v2717_v18 }
 0x252   :  { %v1461_v21 = vpop.f32.mrf.mxu1  ;;  %v2520_v7 = vadd.f32 %v2519_v45, %v2518_v44 }
 0x253   :  { %v2337_v25 = vadd.f32 %v5344_v12, %v2266_v1  ;;  %v1462_v10 = vadd.f32 %v1461_v21, %v6790_v15  ;;  %v2184_v23 = vpop.f32.mrf.mxu0  ;;  %v2722_v22 = vsel %vm330_vm0, %v2602_v49, 0.0  ;;  %v2721_v54 = vadd.f32 %v2720_v57, %v2719_v61  ;;  %v6793_v1 = vld [vmem:[#allocation19_spill] sm:$0xff]  ;;  %v2407_v61 = vld [vmem:[#allocation2] sm:$0x1] }
 0x254   :  { %v1463_v43 = vpop.f32.mrf.mxu1  ;;  %v2522_v53 = vadd.f32 %v2521_v37, %v2520_v7 }
 0x255   :  { %2401 = vst.msk [vmem:[%s6753_s9 + $0x1d0] sm:$0xff] %vm330_vm0, %v2337_v25  ;;  %v2267_v52 = vadd.f32 %v2184_v23, %v1462_v10  ;;  %v2186_v35 = vpop.f32.mrf.mxu0  ;;  %v2603_v26 = vmul.f32 %v2337_v25, %v2337_v25  ;;  %v2523_v63 = vsel %vm330_vm0, %v2337_v25, 0.0  ;;  %v2723_v0 = vadd.f32 %v2722_v22, %v2721_v54  ;;  %v2544_v22 = vld [vmem:[#allocation2 + $0x1] sm:$0x1] }
 0x256   :  { %v1466_v19 = vpop.f32.mrf.mxu1  ;;  %v2524_v27 = vadd.f32 %v2523_v63, %v2522_v53 }
 0x257   :  { %v2338_v14 = vadd.f32 %v5344_v12, %v2267_v52  ;;  %v1467_v55 = vadd.f32 %v1466_v19, %v6791_v6  ;;  %v2189_v28 = vpop.f32.mrf.mxu0  ;;  %v2724_v47 = vsel %vm330_vm0, %v2603_v26, 0.0 }
 0x258   :  { %v1468_v56 = vpop.f32.mrf.mxu1  ;;  %v2725_v23 = vadd.f32 %v2724_v47, %v2723_v0 }
 0x259   :  { %2402 = vst.msk [vmem:[%s6753_s9 + $0x1d8] sm:$0xff] %vm330_vm0, %v2338_v14  ;;  %v2268_v30 = vadd.f32 %v2189_v28, %v1467_v55  ;;  %v2191_v16 = vpop.f32.mrf.mxu0  ;;  %v2604_v9 = vmul.f32 %v2338_v14, %v2338_v14  ;;  %v2525_v39 = vsel %vm330_vm0, %v2338_v14, 0.0 }
 0x25a   :  { %v1471_v13 = vpop.f32.mrf.mxu1  ;;  %v2526_v36 = vadd.f32 %v2525_v39, %v2524_v27 }
 0x25b   :  { %v2339_v33 = vadd.f32 %v5344_v12, %v2268_v30  ;;  %v1472_v11 = vadd.f32 %v1471_v13, %v6792_v51  ;;  %v2194_v20 = vpop.f32.mrf.mxu0  ;;  %v2726_v48 = vsel %vm330_vm0, %v2604_v9, 0.0 }
 0x25c   :  { %v1473_v4 = vpop.f32.mrf.mxu1  ;;  %v2727_v46 = vadd.f32 %v2726_v48, %v2725_v23  ;;  %v2761_v48 = vld [vmem:[%s6753_s9] sm:$0xff]  ;;  %v2763_v23 = vld [vmem:[%s6753_s9 + $0x10] sm:$0xff] }
 0x25d   :  { %2403 = vst.msk [vmem:[%s6753_s9 + $0x1e0] sm:$0xff] %vm330_vm0, %v2339_v33  ;;  %v2269_v32 = vadd.f32 %v2194_v20, %v1472_v11  ;;  %v2196_v31 = vpop.f32.mrf.mxu0  ;;  %v2605_v42 = vmul.f32 %v2339_v33, %v2339_v33  ;;  %v2527_v8 = vsel %vm330_vm0, %v2339_v33, 0.0 }
 0x25e   :  { %v1476_v60 = vpop.f32.mrf.mxu1  ;;  %v2528_v34 = vadd.f32 %v2527_v8, %v2526_v36  ;;  %v5772_v8 = vld [vmem:[%s6755_s8] sm:$0x1]  ;;  %v2764_v36 = vld [vmem:[%s6753_s9 + $0x18] sm:$0xff] }
 0x25f   :  { %v2340_v17 = vadd.f32 %v5344_v12, %v2269_v32  ;;  %v1477_v2 = vadd.f32 %v1476_v60, %v6793_v1  ;;  %v2199_v24 = vpop.f32.mrf.mxu0  ;;  %v2728_v43 = vsel %vm330_vm0, %v2605_v42, 0.0  ;;  %v2826_v1 = vlaneseq }
 0x260   :  { %v1478_v21 = vpop.f32.mrf.mxu1  ;;  %v2729_v55 = vadd.f32 %v2728_v43, %v2727_v46  ;;  %v2766_v43 = vld [vmem:[%s6753_s9 + $0x28] sm:$0xff]  ;;  %v2772_v46 = vld [vmem:[%s6753_s9 + $0x58] sm:$0xff] }
 0x261   :  { %2404 = vst.msk [vmem:[%s6753_s9 + $0x1e8] sm:$0xff] %vm330_vm0, %v2340_v17  ;;  %v2606_v25 = vmul.f32 %v2340_v17, %v2340_v17  ;;  %v2270_v15 = vadd.f32 %v2199_v24, %v1477_v2  ;;  %v2201_v10 = vpop.f32.mrf.mxu0  ;;  %v2529_v38 = vsel %vm330_vm0, %v2340_v17, 0.0  ;;  %v5760_v2 = vshrl.u32 %v2826_v1, 7  ;;  %v2754_v24 = vld [vmem:[%s6754_s7] sm:$0x1]  ;;  %v2794_v1 = vld [vmem:[%s6753_s9 + $0x108] sm:$0xff] }
 0x262   :  { %v1481_v40 = vpop.f32.mrf.mxu1  ;;  %v2530_v28 = vadd.f32 %v2529_v38, %v2528_v34  ;;  %v2762_v10 = vld [vmem:[%s6753_s9 + $0x8] sm:$0xff]  ;;  %v2767_v38 = vld [vmem:[%s6753_s9 + $0x30] sm:$0xff]  ;;  %v2773_v34 = vld [vmem:[%s6753_s9 + $0x60] sm:$0xff] }
 0x263   :  { %v2341_v29 = vadd.f32 %v5344_v12, %v2270_v15  ;;  %v1482_v52 = vadd.f32 %v1481_v40, %v6794_v59  ;;  %v2204_v35 = vpop.f32.mrf.mxu0  ;;  %v2730_v19 = vsel %vm330_vm0, %v2606_v25, 0.0  ;;  %v6757_v0 = vsub.s32 0, %v5760_v2  ;;  %v2765_v40 = vld [vmem:[%s6753_s9 + $0x20] sm:$0xff] }
 0x264   :  { %v1483_v58 = vpop.f32.mrf.mxu1  ;;  %v2731_v56 = vadd.f32 %v2730_v19, %v2729_v55  ;;  %v2769_v59 = vld [vmem:[%s6753_s9 + $0x40] sm:$0xff] }
 0x265   :  { %2405 = vst.msk [vmem:[%s6753_s9 + $0x1f0] sm:$0xff] %vm330_vm0, %v2341_v29  ;;  %v2531_v50 = vsel %vm330_vm0, %v2341_v29, 0.0  ;;  %v2607_v41 = vmul.f32 %v2341_v29, %v2341_v29  ;;  %v2271_v14 = vadd.f32 %v2204_v35, %v1482_v52  ;;  %v2206_v6 = vpop.f32.mrf.mxu0  ;;  %v2768_v29 = vld [vmem:[%s6753_s9 + $0x38] sm:$0xff]  ;;  %v2770_v52 = vld [vmem:[%s6753_s9 + $0x48] sm:$0xff]  ;;  %v2771_v35 = vld [vmem:[%s6753_s9 + $0x50] sm:$0xff] }
 0x266   :  { %v2532_v5 = vadd.f32 %v2531_v50, %v2530_v28  ;;  %v2774_v50 = vld [vmem:[%s6753_s9 + $0x68] sm:$0xff]  ;;  %v2777_v6 = vld [vmem:[%s6753_s9 + $0x80] sm:$0xff] }
 0x267   :  { %v2732_v3 = vsel %vm330_vm0, %v2607_v41, 0.0  ;;  %v2342_v62 = vadd.f32 %v5344_v12, %v2271_v14  ;;  %v2775_v41 = vld [vmem:[%s6753_s9 + $0x70] sm:$0xff]  ;;  %v2776_v14 = vld [vmem:[%s6753_s9 + $0x78] sm:$0xff] }
 0x268   :  { %v2733_v30 = vadd.f32 %v2732_v3, %v2731_v56  ;;  %v2778_v56 = vld [vmem:[%s6753_s9 + $0x88] sm:$0xff] }
 0x269   :  { %2406 = vst.msk [vmem:[%s6753_s9 + $0x1f8] sm:$0xff] %vm330_vm0, %v2342_v62  ;;  %v2533_v45 = vsel %vm330_vm0, %v2342_v62, 0.0  ;;  %v2608_v49 = vmul.f32 %v2342_v62, %v2342_v62 }
 0x26a   :  { %v2534_v16 = vadd.f32 %v2533_v45, %v2532_v5  ;;  %v2779_v5 = vld [vmem:[%s6753_s9 + $0x90] sm:$0xff]  ;;  %v2780_v45 = vld [vmem:[%s6753_s9 + $0x98] sm:$0xff] }
 0x26b   :  { %v2734_v18 = vsel %vm330_vm0, %v2608_v49, 0.0  ;;  %v2781_v49 = vld [vmem:[%s6753_s9 + $0xa0] sm:$0xff] }
 0x26c   :  { %v2535_v44 = vrot.slane %v2534_v16, 4  ;;  %v2735_v26 = vadd.f32 %v2734_v18, %v2733_v30 }
 0x26e   :  { %v2536_v13 = vadd.f32 %v2535_v44, %v2534_v16  ;;  %v2736_v57 = vrot.slane %v2735_v26, 4 }
 0x270   :  { %v2537_v37 = vrot.slane %v2536_v13, 2  ;;  %v2737_v12 = vadd.f32 %v2736_v57, %v2735_v26  ;;  %v2782_v26 = vld [vmem:[%s6753_s9 + $0xa8] sm:$0xff]  ;;  %v2784_v57 = vld [vmem:[%s6753_s9 + $0xb8] sm:$0xff] }
 0x272   :  { %v2538_v33 = vadd.f32 %v2537_v37, %v2536_v13  ;;  %v2738_v51 = vrot.slane %v2737_v12, 2  ;;  %v2783_v13 = vld [vmem:[%s6753_s9 + $0xb0] sm:$0xff]  ;;  %v2785_v37 = vld [vmem:[%s6753_s9 + $0xc0] sm:$0xff] }
 0x274   :  { %v2539_v11 = vrot.slane %v2538_v33, 1  ;;  %v2739_v20 = vadd.f32 %v2738_v51, %v2737_v12 }
 0x276   :  { %v2540_v7 = vadd.f32 %v2539_v11, %v2538_v33  ;;  %v2740_v4 = vrot.slane %v2739_v20, 1 }
 0x278   :  { %v2541_v63 = vadd.f32 %v2540_v7, %v2407_v61  ;;  %v2741_v9 = vadd.f32 %v2740_v4, %v2739_v20  ;;  %v2786_v20 = vld [vmem:[%s6753_s9 + $0xc8] sm:$0xff]  ;;  %v2787_v61 = vld [vmem:[%s6753_s9 + $0xd0] sm:$0xff]  ;;  %v2788_v7 = vld [vmem:[%s6753_s9 + $0xd8] sm:$0xff] }
 0x279   :  { %v2789_v4 = vld [vmem:[%s6753_s9 + $0xe0] sm:$0xff] }
 0x27a   :  { %2543 = vst.msk [vmem:[#allocation2] sm:$0x1] %vm2542_vm2, %v2541_v63  ;;  %v2742_v32 = vadd.f32 %v2741_v9, %v2544_v22 }
 0x27c   :  { %2743 = vst.msk [vmem:[#allocation2 + $0x1] sm:$0x1] %vm2542_vm2, %v2742_v32 }
 0x281   :  { %v2747_v31 = vld [vmem:[#allocation2] sm:$0x1] }
 0x282   :  { %v2748_v54 = vmul.f32 0.001953125, %v2747_v31  ;;  %v2790_v31 = vld [vmem:[%s6753_s9 + $0xe8] sm:$0xff] }
 0x283   :  { %v2749_v53 = vld [vmem:[#allocation2 + $0x1] sm:$0x1] }
 0x284   :  { %v2750_v47 = vmul.f32 0.001953125, %v2749_v53  ;;  %v2751_v60 = vmul.f32 %v2748_v54, %v2748_v54  ;;  %v2792_v53 = vld [vmem:[%s6753_s9 + $0xf8] sm:$0xff] }
 0x286   :  { %v2752_v39 = vsub.f32 %v2750_v47, %v2751_v60  ;;  %v2793_v47 = vld [vmem:[%s6753_s9 + $0x100] sm:$0xff] }
 0x288   :  { %v2753_v42 = vmax.f32 %v2752_v39, 0.0 }
 0x28a   :  { %v2755_v17 = vadd.f32 1e-05, %v2753_v42 }
 0x28c   :  { %3327 = vrsqrt.f32 %v2755_v17 }
 0x299   :  { %v3328_v27 = vpop.eup %3327 }
 0x29a   :  { %v2757_v21 = vmul.f32 %v3328_v27, %v2754_v24  ;;  %v2795_v24 = vld [vmem:[%s6753_s9 + $0x110] sm:$0xff]  ;;  %v2796_v27 = vld [vmem:[%s6753_s9 + $0x118] sm:$0xff] }
 0x29c   :  { %v5774_v25 = vmul.f32 %v2757_v21, %v2748_v54  ;;  %v5778_v15 = vrot.slane %v2757_v21, %v6757_v0  ;;  %v2791_v54 = vld [vmem:[%s6753_s9 + $0xf0] sm:$0xff]  ;;  %v2797_v21 = vld [vmem:[%s6753_s9 + $0x120] sm:$0xff]  ;;  %v2816_v0 = vld [vmem:[%s6753_s9 + $0x1b8] sm:$0xff] }
 0x29e   :  { %v5819_v19 = vmul.f32 %v5778_v15, %v2761_v48  ;;  %v5834_v55 = vmul.f32 %v5778_v15, %v2762_v10  ;;  %v5837_v28 = vmul.f32 %v5778_v15, %v2763_v23  ;;  %v5840_v3 = vmul.f32 %v5778_v15, %v2764_v36 }
 0x29f   :  { %v5843_v62 = vmul.f32 %v5778_v15, %v2765_v40  ;;  %v5858_v30 = vmul.f32 %v5778_v15, %v2766_v43  ;;  %v5861_v16 = vmul.f32 %v5778_v15, %v2767_v38  ;;  %v5864_v18 = vmul.f32 %v5778_v15, %v2768_v29  ;;  %v2798_v40 = vld [vmem:[%s6753_s9 + $0x128] sm:$0xff]  ;;  %v2799_v43 = vld [vmem:[%s6753_s9 + $0x130] sm:$0xff]  ;;  %v2800_v38 = vld [vmem:[%s6753_s9 + $0x138] sm:$0xff] }
 0x2a0   :  { %v5867_v44 = vmul.f32 %v5778_v15, %v2769_v59  ;;  %v5882_v12 = vmul.f32 %v5778_v15, %v2770_v52  ;;  %v5885_v33 = vmul.f32 %v5778_v15, %v2771_v35  ;;  %v5888_v51 = vmul.f32 %v5778_v15, %v2772_v46  ;;  %v2801_v46 = vld [vmem:[%s6753_s9 + $0x140] sm:$0xff] }
 0x2a1   :  { %v5891_v11 = vmul.f32 %v5778_v15, %v2773_v34  ;;  %v5906_v22 = vmul.f32 %v5778_v15, %v2774_v50  ;;  %v5909_v63 = vmul.f32 %v5778_v15, %v2775_v41  ;;  %v5912_v9 = vmul.f32 %v5778_v15, %v2776_v14  ;;  %v2802_v34 = vld [vmem:[%s6753_s9 + $0x148] sm:$0xff]  ;;  %v2803_v50 = vld [vmem:[%s6753_s9 + $0x150] sm:$0xff] }
 0x2a2   :  { %v5915_v32 = vmul.f32 %v5778_v15, %v2777_v6  ;;  %v5930_v60 = vmul.f32 %v5778_v15, %v2778_v56  ;;  %v5933_v39 = vmul.f32 %v5778_v15, %v2779_v5  ;;  %v5936_v42 = vmul.f32 %v5778_v15, %v2780_v45  ;;  %v2804_v5 = vld [vmem:[%s6753_s9 + $0x158] sm:$0xff]  ;;  %v2805_v45 = vld [vmem:[%s6753_s9 + $0x160] sm:$0xff] }
 0x2a3   :  { %v5939_v17 = vmul.f32 %v5778_v15, %v2781_v49  ;;  %v5954_v48 = vmul.f32 %v5778_v15, %v2782_v26  ;;  %v5957_v10 = vmul.f32 %v5778_v15, %v2783_v13  ;;  %v5960_v23 = vmul.f32 %v5778_v15, %v2784_v57  ;;  %v2806_v49 = vld [vmem:[%s6753_s9 + $0x168] sm:$0xff] }
 0x2a4   :  { %v5963_v36 = vmul.f32 %v5778_v15, %v2785_v37  ;;  %v5975_v29 = vmul.f32 %v5778_v15, %v2786_v20  ;;  %v5978_v59 = vmul.f32 %v5778_v15, %v2787_v61  ;;  %v5981_v52 = vmul.f32 %v5778_v15, %v2788_v7  ;;  %v2807_v20 = vld [vmem:[%s6753_s9 + $0x170] sm:$0xff]  ;;  %v2808_v61 = vld [vmem:[%s6753_s9 + $0x178] sm:$0xff]  ;;  %v2809_v7 = vld [vmem:[%s6753_s9 + $0x180] sm:$0xff] }
 0x2a5   :  { %v5984_v35 = vmul.f32 %v5778_v15, %v2789_v4  ;;  %v5996_v41 = vmul.f32 %v5778_v15, %v2790_v31  ;;  %v5999_v14 = vmul.f32 %v5778_v15, %v2791_v54  ;;  %v6002_v6 = vmul.f32 %v5778_v15, %v2792_v53 }
 0x2a6   :  { %v6005_v56 = vmul.f32 %v5778_v15, %v2793_v47  ;;  %v6017_v26 = vmul.f32 %v5778_v15, %v2794_v1  ;;  %v6020_v13 = vmul.f32 %v5778_v15, %v2795_v24  ;;  %v6023_v57 = vmul.f32 %v5778_v15, %v2796_v27  ;;  %v2810_v47 = vld [vmem:[%s6753_s9 + $0x188] sm:$0xff]  ;;  %v2811_v1 = vld [vmem:[%s6753_s9 + $0x190] sm:$0xff]  ;;  %v2812_v24 = vld [vmem:[%s6753_s9 + $0x198] sm:$0xff] }
 0x2a7   :  { %v6026_v37 = vmul.f32 %v5778_v15, %v2797_v21  ;;  %v6038_v4 = vmul.f32 %v5778_v15, %v2798_v40  ;;  %v6041_v31 = vmul.f32 %v5778_v15, %v2799_v43  ;;  %v6044_v54 = vmul.f32 %v5778_v15, %v2800_v38  ;;  %v2813_v38 = vld [vmem:[%s6753_s9 + $0x1a0] sm:$0xff] }
 0x2a8   :  { %v6047_v53 = vmul.f32 %v5778_v15, %v2801_v46  ;;  %v6059_v27 = vmul.f32 %v5778_v15, %v2802_v34  ;;  %v6062_v21 = vmul.f32 %v5778_v15, %v2803_v50  ;;  %v6065_v40 = vmul.f32 %v5778_v15, %v2804_v5  ;;  %v2814_v46 = vld [vmem:[%s6753_s9 + $0x1a8] sm:$0xff]  ;;  %v2815_v34 = vld [vmem:[%s6753_s9 + $0x1b0] sm:$0xff] }
 0x2a9   :  { %v6068_v43 = vmul.f32 %v5778_v15, %v2805_v45  ;;  %v6080_v50 = vmul.f32 %v5778_v15, %v2806_v49  ;;  %v6083_v5 = vmul.f32 %v5778_v15, %v2807_v20  ;;  %v6086_v45 = vmul.f32 %v5778_v15, %v2808_v61  ;;  %v2818_v49 = vld [vmem:[%s6753_s9 + $0x1c8] sm:$0xff] }
 0x2aa   :  { %v6089_v58 = vmul.f32 %v5778_v15, %v2809_v7  ;;  %v6101_v20 = vmul.f32 %v5778_v15, %v2810_v47  ;;  %v6104_v61 = vmul.f32 %v5778_v15, %v2811_v1  ;;  %v6107_v7 = vmul.f32 %v5778_v15, %v2812_v24  ;;  %v2821_v47 = vld [vmem:[%s6753_s9 + $0x1e0] sm:$0xff] }
 0x2ab   :  { %6795 = vst [vmem:[#allocation3_spill] sm:$0xff] %v6068_v43  ;;  %6796 = vst [vmem:[#allocation4_spill] sm:$0xff] %v6083_v5  ;;  %v2817_v43 = vld [vmem:[%s6753_s9 + $0x1c0] sm:$0xff]  ;;  %v2820_v5 = vld [vmem:[%s6753_s9 + $0x1d8] sm:$0xff]  ;;  %v6122_v1 = vmul.f32 %v5778_v15, %v2814_v46  ;;  %v6125_v24 = vmul.f32 %v5778_v15, %v2815_v34  ;;  %v6143_v34 = vmul.f32 %v5778_v15, %v2818_v49 }
 0x2ac   :  { %6797 = vst [vmem:[#allocation5_spill] sm:$0xff] %v6086_v45  ;;  %6798 = vst [vmem:[#allocation6_spill] sm:$0xff] %v6089_v58  ;;  %v6110_v58 = vmul.f32 %v5778_v15, %v2813_v38  ;;  %v2819_v45 = vld [vmem:[%s6753_s9 + $0x1d0] sm:$0xff]  ;;  %v6128_v38 = vmul.f32 %v5778_v15, %v2816_v0  ;;  %v2824_v46 = vld [vmem:[%s6753_s9 + $0x1f8] sm:$0xff] }
 0x2ad   :  { %6799 = vst [vmem:[#allocation7_spill] sm:$0xff] %v6101_v20  ;;  %6800 = vst [vmem:[#allocation8_spill] sm:$0xff] %v6104_v61  ;;  %v2823_v61 = vld [vmem:[%s6753_s9 + $0x1f0] sm:$0xff]  ;;  %v6146_v0 = vmul.f32 %v5778_v15, %v2819_v45  ;;  %v6168_v45 = vmul.f32 %v5778_v15, %v2824_v46 }
 0x2ae   :  { %6801 = vst [vmem:[#allocation9_spill] sm:$0xff] %v6107_v7  ;;  %6802 = vst [vmem:[#allocation10_spill] sm:$0xff] %v6110_v58  ;;  %v6131_v58 = vmul.f32 %v5778_v15, %v2817_v43  ;;  %v2822_v7 = vld [vmem:[%s6753_s9 + $0x1e8] sm:$0xff]  ;;  %v6149_v43 = vmul.f32 %v5778_v15, %v2820_v5  ;;  %v6165_v49 = vmul.f32 %v5778_v15, %v2823_v61 }
 0x2af   :  { %6803 = vst [vmem:[#allocation11_spill] sm:$0xff] %v6122_v1  ;;  %6804 = vst [vmem:[#allocation12_spill] sm:$0xff] %v6125_v24  ;;  %v6159_v1 = vmul.f32 %v5778_v15, %v2821_v47  ;;  %v6162_v20 = vmul.f32 %v5778_v15, %v2822_v7 }
 0x2b0   :  { %6805 = vst [vmem:[#allocation13_spill] sm:$0xff] %v6128_v38  ;;  %6806 = vst [vmem:[#allocation14_spill] sm:$0xff] %v6131_v58  ;;  %v6807_v58 = vsub.s32 0, %v5760_v2  ;;  %v6808_v38 = vsub.f32 %v5772_v8, %v5774_v25 }
 0x2b2   :  { %v6156_v24 = vrot.slane %v6808_v38, %v6807_v58  ;;  %v6809_v5 = vld [vmem:[#allocation3_spill] sm:$0xff]  ;;  %v6811_v61 = vld [vmem:[#allocation4_spill] sm:$0xff] }
 0x2b3   :  { %v6813_v7 = vld [vmem:[#allocation5_spill] sm:$0xff]  ;;  %v6815_v47 = vld [vmem:[#allocation6_spill] sm:$0xff] }
 0x2b4   :  { %v6172_v2 = vadd.f32 %v6156_v24, %v5819_v19  ;;  %v6176_v8 = vadd.f32 %v6156_v24, %v5834_v55  ;;  %v6180_v25 = vadd.f32 %v6156_v24, %v5837_v28  ;;  %v6184_v58 = vadd.f32 %v6156_v24, %v5840_v3  ;;  %v6817_v38 = vld [vmem:[#allocation7_spill] sm:$0xff] }
 0x2b5   :  { %v6188_v15 = vadd.f32 %v6156_v24, %v5843_v62  ;;  %v6192_v19 = vadd.f32 %v6156_v24, %v5858_v30  ;;  %v6196_v55 = vadd.f32 %v6156_v24, %v5861_v16  ;;  %v6200_v28 = vadd.f32 %v6156_v24, %v5864_v18 }
 0x2b6   :  { %v6204_v3 = vadd.f32 %v6156_v24, %v5867_v44  ;;  %v6208_v62 = vadd.f32 %v6156_v24, %v5882_v12  ;;  %v6212_v30 = vadd.f32 %v6156_v24, %v5885_v33  ;;  %v6216_v16 = vadd.f32 %v6156_v24, %v5888_v51 }
 0x2b7   :  { %v6220_v18 = vadd.f32 %v6156_v24, %v5891_v11  ;;  %v6224_v44 = vadd.f32 %v6156_v24, %v5906_v22  ;;  %v6228_v12 = vadd.f32 %v6156_v24, %v5909_v63  ;;  %v6232_v33 = vadd.f32 %v6156_v24, %v5912_v9 }
 0x2b8   :  { %v6236_v51 = vadd.f32 %v6156_v24, %v5915_v32  ;;  %v6240_v11 = vadd.f32 %v6156_v24, %v5930_v60  ;;  %v6244_v22 = vadd.f32 %v6156_v24, %v5933_v39  ;;  %v6248_v63 = vadd.f32 %v6156_v24, %v5936_v42 }
 0x2b9   :  { %v6252_v9 = vadd.f32 %v6156_v24, %v5939_v17  ;;  %v6256_v32 = vadd.f32 %v6156_v24, %v5954_v48  ;;  %v6260_v60 = vadd.f32 %v6156_v24, %v5957_v10  ;;  %v6264_v39 = vadd.f32 %v6156_v24, %v5960_v23 }
 0x2ba   :  { %v6268_v42 = vadd.f32 %v6156_v24, %v5963_v36  ;;  %v6272_v17 = vadd.f32 %v6156_v24, %v5975_v29  ;;  %v6276_v48 = vadd.f32 %v6156_v24, %v5978_v59  ;;  %v6280_v10 = vadd.f32 %v6156_v24, %v5981_v52 }
 0x2bb   :  { %v6284_v23 = vadd.f32 %v6156_v24, %v5984_v35  ;;  %v6288_v36 = vadd.f32 %v6156_v24, %v5996_v41  ;;  %v6292_v29 = vadd.f32 %v6156_v24, %v5999_v14  ;;  %v6296_v59 = vadd.f32 %v6156_v24, %v6002_v6 }
 0x2bc   :  { %v6300_v52 = vadd.f32 %v6156_v24, %v6005_v56  ;;  %v6304_v35 = vadd.f32 %v6156_v24, %v6017_v26  ;;  %v6308_v41 = vadd.f32 %v6156_v24, %v6020_v13  ;;  %v6312_v14 = vadd.f32 %v6156_v24, %v6023_v57 }
 0x2bd   :  { %v6316_v6 = vadd.f32 %v6156_v24, %v6026_v37  ;;  %v6320_v56 = vadd.f32 %v6156_v24, %v6038_v4  ;;  %v6324_v26 = vadd.f32 %v6156_v24, %v6041_v31  ;;  %v6328_v13 = vadd.f32 %v6156_v24, %v6044_v54 }
 0x2be   :  { %v6332_v57 = vadd.f32 %v6156_v24, %v6047_v53  ;;  %v6336_v37 = vadd.f32 %v6156_v24, %v6059_v27  ;;  %v6340_v4 = vadd.f32 %v6156_v24, %v6062_v21  ;;  %v6344_v31 = vadd.f32 %v6156_v24, %v6065_v40 }
 0x2bf   :  { %v6348_v54 = vadd.f32 %v6156_v24, %v6809_v5  ;;  %v6352_v53 = vadd.f32 %v6156_v24, %v6080_v50  ;;  %v6356_v27 = vadd.f32 %v6156_v24, %v6811_v61  ;;  %v6360_v21 = vadd.f32 %v6156_v24, %v6813_v7  ;;  %v6819_v5 = vld [vmem:[#allocation8_spill] sm:$0xff] }
 0x2c0   :  { %v6364_v40 = vadd.f32 %v6156_v24, %v6815_v47  ;;  %v6368_v46 = vadd.f32 %v6156_v24, %v6817_v38  ;;  %v6372_v50 = vadd.f32 %v6156_v24, %v6819_v5 }
 0x2c1   :  { %6810 = vst [vmem:[#allocation15_spill] sm:$0xff] %v6352_v53  ;;  %6812 = vst [vmem:[#allocation16_spill] sm:$0xff] %v6356_v27  ;;  %v6821_v53 = vld [vmem:[#allocation9_spill] sm:$0xff]  ;;  %v6822_v27 = vld [vmem:[#allocation10_spill] sm:$0xff] }
 0x2c2   :  { %6814 = vst [vmem:[#allocation17_spill] sm:$0xff] %v6360_v21  ;;  %6816 = vst [vmem:[#allocation18_spill] sm:$0xff] %v6364_v40  ;;  %v6376_v61 = vadd.f32 %v6156_v24, %v6821_v53  ;;  %v6380_v7 = vadd.f32 %v6156_v24, %v6822_v27  ;;  %v6823_v21 = vld [vmem:[#allocation11_spill] sm:$0xff]  ;;  %v6824_v40 = vld [vmem:[#allocation12_spill] sm:$0xff]  ;;  %v6400_v27 = vadd.f32 %v6156_v24, %v6143_v34 }
 0x2c3   :  { %6818 = vst [vmem:[#allocation19_spill] sm:$0xff] %v6368_v46  ;;  %6820 = vst [vmem:[#allocation20_spill] sm:$0xff] %v6372_v50  ;;  %v6384_v47 = vadd.f32 %v6156_v24, %v6823_v21  ;;  %v6388_v38 = vadd.f32 %v6156_v24, %v6824_v40  ;;  %v6825_v46 = vld [vmem:[#allocation13_spill] sm:$0xff]  ;;  %v6826_v50 = vld [vmem:[#allocation14_spill] sm:$0xff]  ;;  %v6404_v21 = vadd.f32 %v6156_v24, %v6146_v0 }
 0x2c4   :  { %v6392_v5 = vadd.f32 %v6156_v24, %v6825_v46  ;;  %v6396_v53 = vadd.f32 %v6156_v24, %v6826_v50  ;;  %v6408_v40 = vadd.f32 %v6156_v24, %v6149_v43  ;;  %v6412_v46 = vadd.f32 %v6156_v24, %v6159_v1 }
 0x2c5   :  { %6827 = vst [vmem:[#allocation3_spill] sm:$0xff] %v6404_v21  ;;  %v6416_v50 = vadd.f32 %v6156_v24, %v6162_v20  ;;  %v6420_v34 = vadd.f32 %v6156_v24, %v6165_v49  ;;  %v6424_v0 = vadd.f32 %v6156_v24, %v6168_v45  ;;  %v2965_v21 = vmax.f32 %v6172_v2, 0.0 }
 0x2c6   :  { %6828 = vst [vmem:[#allocation4_spill] sm:$0xff] %v6408_v40  ;;  %6829 = vst [vmem:[#allocation5_spill] sm:$0xff] %v6412_v46  ;;  %v2966_v43 = vmax.f32 %v6176_v8, 0.0  ;;  %v2967_v40 = vmax.f32 %v6180_v25, 0.0  ;;  %v2968_v1 = vmax.f32 %v6184_v58, 0.0  ;;  %v2969_v46 = vmax.f32 %v6188_v15, 0.0 }
 0x2c7   :  { %6830 = vst [vmem:[#allocation6_spill] sm:$0xff] %v6416_v50  ;;  %6831 = vst [vmem:[#allocation7_spill] sm:$0xff] %v6420_v34  ;;  %v2970_v20 = vmax.f32 %v6192_v19, 0.0  ;;  %v2971_v50 = vmax.f32 %v6196_v55, 0.0  ;;  %v2972_v49 = vmax.f32 %v6200_v28, 0.0  ;;  %v2973_v34 = vmax.f32 %v6204_v3, 0.0 }
 0x2c8   :  { %v2974_v24 = vmax.f32 %v6208_v62, 0.0  ;;  %v2975_v45 = vmax.f32 %v6212_v30, 0.0  ;;  %v2976_v2 = vmax.f32 %v6216_v16, 0.0  ;;  %3029 = vst.msk [vmem:[%s6753_s9] sm:$0xff] %vm330_vm0, %v2965_v21  ;;  %3030 = vst.msk [vmem:[%s6753_s9 + $0x8] sm:$0xff] %vm330_vm0, %v2966_v43  ;;  %v2977_v8 = vmax.f32 %v6220_v18, 0.0 }
 0x2c9   :  { %3031 = vst.msk [vmem:[%s6753_s9 + $0x10] sm:$0xff] %vm330_vm0, %v2967_v40  ;;  %3032 = vst.msk [vmem:[%s6753_s9 + $0x18] sm:$0xff] %vm330_vm0, %v2968_v1  ;;  %v2978_v25 = vmax.f32 %v6224_v44, 0.0  ;;  %v2979_v58 = vmax.f32 %v6228_v12, 0.0  ;;  %v2980_v15 = vmax.f32 %v6232_v33, 0.0  ;;  %v2981_v19 = vmax.f32 %v6236_v51, 0.0 }
 0x2ca   :  { %3033 = vst.msk [vmem:[%s6753_s9 + $0x20] sm:$0xff] %vm330_vm0, %v2969_v46  ;;  %3034 = vst.msk [vmem:[%s6753_s9 + $0x28] sm:$0xff] %vm330_vm0, %v2970_v20  ;;  %v2982_v55 = vmax.f32 %v6240_v11, 0.0  ;;  %v2983_v28 = vmax.f32 %v6244_v22, 0.0  ;;  %v2984_v3 = vmax.f32 %v6248_v63, 0.0  ;;  %v2985_v62 = vmax.f32 %v6252_v9, 0.0 }
 0x2cb   :  { %3035 = vst.msk [vmem:[%s6753_s9 + $0x30] sm:$0xff] %vm330_vm0, %v2971_v50  ;;  %3036 = vst.msk [vmem:[%s6753_s9 + $0x38] sm:$0xff] %vm330_vm0, %v2972_v49  ;;  %v2986_v30 = vmax.f32 %v6256_v32, 0.0  ;;  %v2987_v16 = vmax.f32 %v6260_v60, 0.0  ;;  %v2988_v18 = vmax.f32 %v6264_v39, 0.0  ;;  %v2989_v44 = vmax.f32 %v6268_v42, 0.0 }
 0x2cc   :  { %3037 = vst.msk [vmem:[%s6753_s9 + $0x40] sm:$0xff] %vm330_vm0, %v2973_v34  ;;  %3038 = vst.msk [vmem:[%s6753_s9 + $0x48] sm:$0xff] %vm330_vm0, %v2974_v24  ;;  %v2990_v12 = vmax.f32 %v6272_v17, 0.0  ;;  %v2991_v33 = vmax.f32 %v6276_v48, 0.0  ;;  %v2992_v51 = vmax.f32 %v6280_v10, 0.0  ;;  %v2993_v11 = vmax.f32 %v6284_v23, 0.0 }
 0x2cd   :  { %3039 = vst.msk [vmem:[%s6753_s9 + $0x50] sm:$0xff] %vm330_vm0, %v2975_v45  ;;  %3040 = vst.msk [vmem:[%s6753_s9 + $0x58] sm:$0xff] %vm330_vm0, %v2976_v2  ;;  %v2994_v22 = vmax.f32 %v6288_v36, 0.0  ;;  %v2995_v63 = vmax.f32 %v6292_v29, 0.0  ;;  %v2996_v9 = vmax.f32 %v6296_v59, 0.0  ;;  %v2997_v32 = vmax.f32 %v6300_v52, 0.0 }
 0x2ce   :  { %3041 = vst.msk [vmem:[%s6753_s9 + $0x60] sm:$0xff] %vm330_vm0, %v2977_v8  ;;  %3042 = vst.msk [vmem:[%s6753_s9 + $0x68] sm:$0xff] %vm330_vm0, %v2978_v25  ;;  %v2998_v60 = vmax.f32 %v6304_v35, 0.0  ;;  %v2999_v39 = vmax.f32 %v6308_v41, 0.0  ;;  %v3000_v42 = vmax.f32 %v6312_v14, 0.0  ;;  %v3001_v17 = vmax.f32 %v6316_v6, 0.0 }
 0x2cf   :  { %3043 = vst.msk [vmem:[%s6753_s9 + $0x70] sm:$0xff] %vm330_vm0, %v2979_v58  ;;  %3044 = vst.msk [vmem:[%s6753_s9 + $0x78] sm:$0xff] %vm330_vm0, %v2980_v15  ;;  %v3002_v48 = vmax.f32 %v6320_v56, 0.0  ;;  %v3003_v10 = vmax.f32 %v6324_v26, 0.0  ;;  %v3004_v23 = vmax.f32 %v6328_v13, 0.0  ;;  %v3005_v36 = vmax.f32 %v6332_v57, 0.0 }
 0x2d0   :  { %3045 = vst.msk [vmem:[%s6753_s9 + $0x80] sm:$0xff] %vm330_vm0, %v2981_v19  ;;  %3046 = vst.msk [vmem:[%s6753_s9 + $0x88] sm:$0xff] %vm330_vm0, %v2982_v55  ;;  %v3006_v29 = vmax.f32 %v6336_v37, 0.0  ;;  %v3007_v59 = vmax.f32 %v6340_v4, 0.0  ;;  %v3008_v52 = vmax.f32 %v6344_v31, 0.0  ;;  %v3009_v35 = vmax.f32 %v6348_v54, 0.0 }
 0x2d1   :  { %3047 = vst.msk [vmem:[%s6753_s9 + $0x90] sm:$0xff] %vm330_vm0, %v2983_v28  ;;  %3048 = vst.msk [vmem:[%s6753_s9 + $0x98] sm:$0xff] %vm330_vm0, %v2984_v3  ;;  %v6832_v41 = vld [vmem:[#allocation15_spill] sm:$0xff]  ;;  %v6833_v6 = vld [vmem:[#allocation16_spill] sm:$0xff]  ;;  %v3016_v40 = vmax.f32 %v6376_v61, 0.0  ;;  %v3017_v61 = vmax.f32 %v6380_v7, 0.0 }
 0x2d2   :  { %3049 = vst.msk [vmem:[%s6753_s9 + $0xa0] sm:$0xff] %vm330_vm0, %v2985_v62  ;;  %3050 = vst.msk [vmem:[%s6753_s9 + $0xa8] sm:$0xff] %vm330_vm0, %v2986_v30  ;;  %v3010_v14 = vmax.f32 %v6832_v41, 0.0  ;;  %v3011_v56 = vmax.f32 %v6833_v6, 0.0  ;;  %v6834_v26 = vld [vmem:[#allocation17_spill] sm:$0xff]  ;;  %v6835_v57 = vld [vmem:[#allocation18_spill] sm:$0xff] }
 0x2d3   :  { %3051 = vst.msk [vmem:[%s6753_s9 + $0xb0] sm:$0xff] %vm330_vm0, %v2987_v16  ;;  %3052 = vst.msk [vmem:[%s6753_s9 + $0xb8] sm:$0xff] %vm330_vm0, %v2988_v18  ;;  %v3012_v13 = vmax.f32 %v6834_v26, 0.0  ;;  %v3013_v37 = vmax.f32 %v6835_v57, 0.0  ;;  %v6836_v4 = vld [vmem:[#allocation19_spill] sm:$0xff]  ;;  %v6837_v54 = vld [vmem:[#allocation20_spill] sm:$0xff] }
 0x2d4   :  { %3053 = vst.msk [vmem:[%s6753_s9 + $0xc0] sm:$0xff] %vm330_vm0, %v2989_v44  ;;  %3054 = vst.msk [vmem:[%s6753_s9 + $0xc8] sm:$0xff] %vm330_vm0, %v2990_v12  ;;  %v3014_v31 = vmax.f32 %v6836_v4, 0.0  ;;  %v3015_v21 = vmax.f32 %v6837_v54, 0.0  ;;  %v3018_v46 = vmax.f32 %v6384_v47, 0.0  ;;  %v3019_v50 = vmax.f32 %v6388_v38, 0.0 }
 0x2d5   :  { %3055 = vst.msk [vmem:[%s6753_s9 + $0xd0] sm:$0xff] %vm330_vm0, %v2991_v33  ;;  %3056 = vst.msk [vmem:[%s6753_s9 + $0xd8] sm:$0xff] %vm330_vm0, %v2992_v51  ;;  %v3020_v34 = vmax.f32 %v6392_v5, 0.0  ;;  %v3021_v7 = vmax.f32 %v6396_v53, 0.0  ;;  %v3022_v47 = vmax.f32 %v6400_v27, 0.0  ;;  %v6838_v38 = vld [vmem:[#allocation3_spill] sm:$0xff] }
 0x2d6   :  { %3057 = vst.msk [vmem:[%s6753_s9 + $0xe0] sm:$0xff] %vm330_vm0, %v2993_v11  ;;  %3058 = vst.msk [vmem:[%s6753_s9 + $0xe8] sm:$0xff] %vm330_vm0, %v2994_v22  ;;  %v3023_v5 = vmax.f32 %v6838_v38, 0.0  ;;  %v6839_v43 = vld [vmem:[#allocation4_spill] sm:$0xff]  ;;  %v6840_v53 = vld [vmem:[#allocation5_spill] sm:$0xff]  ;;  %v3028_v2 = vmax.f32 %v6424_v0, 0.0 }
 0x2d7   :  { %3059 = vst.msk [vmem:[%s6753_s9 + $0xf0] sm:$0xff] %vm330_vm0, %v2995_v63  ;;  %3060 = vst.msk [vmem:[%s6753_s9 + $0xf8] sm:$0xff] %vm330_vm0, %v2996_v9  ;;  %v3024_v1 = vmax.f32 %v6839_v43, 0.0  ;;  %v3025_v27 = vmax.f32 %v6840_v53, 0.0  ;;  %v6841_v20 = vld [vmem:[#allocation6_spill] sm:$0xff]  ;;  %v6842_v24 = vld [vmem:[#allocation7_spill] sm:$0xff] }
 0x2d8   :  { %3061 = vst.msk [vmem:[%s6753_s9 + $0x100] sm:$0xff] %vm330_vm0, %v2997_v32  ;;  %3062 = vst.msk [vmem:[%s6753_s9 + $0x108] sm:$0xff] %vm330_vm0, %v2998_v60  ;;  %v3026_v49 = vmax.f32 %v6841_v20, 0.0  ;;  %v3027_v45 = vmax.f32 %v6842_v24, 0.0 }
 0x2d9   :  { %3063 = vst.msk [vmem:[%s6753_s9 + $0x110] sm:$0xff] %vm330_vm0, %v2999_v39  ;;  %3064 = vst.msk [vmem:[%s6753_s9 + $0x118] sm:$0xff] %vm330_vm0, %v3000_v42 }
 0x2da   :  { %3065 = vst.msk [vmem:[%s6753_s9 + $0x120] sm:$0xff] %vm330_vm0, %v3001_v17  ;;  %3066 = vst.msk [vmem:[%s6753_s9 + $0x128] sm:$0xff] %vm330_vm0, %v3002_v48 }
 0x2db   :  { %3067 = vst.msk [vmem:[%s6753_s9 + $0x130] sm:$0xff] %vm330_vm0, %v3003_v10  ;;  %3068 = vst.msk [vmem:[%s6753_s9 + $0x138] sm:$0xff] %vm330_vm0, %v3004_v23 }
 0x2dc   :  { %3069 = vst.msk [vmem:[%s6753_s9 + $0x140] sm:$0xff] %vm330_vm0, %v3005_v36  ;;  %3070 = vst.msk [vmem:[%s6753_s9 + $0x148] sm:$0xff] %vm330_vm0, %v3006_v29 }
 0x2dd   :  { %3071 = vst.msk [vmem:[%s6753_s9 + $0x150] sm:$0xff] %vm330_vm0, %v3007_v59  ;;  %3072 = vst.msk [vmem:[%s6753_s9 + $0x158] sm:$0xff] %vm330_vm0, %v3008_v52 }
 0x2de   :  { %3073 = vst.msk [vmem:[%s6753_s9 + $0x160] sm:$0xff] %vm330_vm0, %v3009_v35  ;;  %3074 = vst.msk [vmem:[%s6753_s9 + $0x168] sm:$0xff] %vm330_vm0, %v3010_v14 }
 0x2df   :  { %3075 = vst.msk [vmem:[%s6753_s9 + $0x170] sm:$0xff] %vm330_vm0, %v3011_v56  ;;  %3076 = vst.msk [vmem:[%s6753_s9 + $0x178] sm:$0xff] %vm330_vm0, %v3012_v13 }
 0x2e0   :  { %3077 = vst.msk [vmem:[%s6753_s9 + $0x180] sm:$0xff] %vm330_vm0, %v3013_v37  ;;  %3078 = vst.msk [vmem:[%s6753_s9 + $0x188] sm:$0xff] %vm330_vm0, %v3014_v31 }
 0x2e1   :  { %3079 = vst.msk [vmem:[%s6753_s9 + $0x190] sm:$0xff] %vm330_vm0, %v3015_v21  ;;  %3080 = vst.msk [vmem:[%s6753_s9 + $0x198] sm:$0xff] %vm330_vm0, %v3016_v40 }
 0x2e2   :  { %3081 = vst.msk [vmem:[%s6753_s9 + $0x1a0] sm:$0xff] %vm330_vm0, %v3017_v61  ;;  %3082 = vst.msk [vmem:[%s6753_s9 + $0x1a8] sm:$0xff] %vm330_vm0, %v3018_v46 }
 0x2e3   :  { %3083 = vst.msk [vmem:[%s6753_s9 + $0x1b0] sm:$0xff] %vm330_vm0, %v3019_v50  ;;  %3084 = vst.msk [vmem:[%s6753_s9 + $0x1b8] sm:$0xff] %vm330_vm0, %v3020_v34 }
 0x2e4   :  { %3085 = vst.msk [vmem:[%s6753_s9 + $0x1c0] sm:$0xff] %vm330_vm0, %v3021_v7  ;;  %3086 = vst.msk [vmem:[%s6753_s9 + $0x1c8] sm:$0xff] %vm330_vm0, %v3022_v47 }
 0x2e5   :  { %3087 = vst.msk [vmem:[%s6753_s9 + $0x1d0] sm:$0xff] %vm330_vm0, %v3023_v5  ;;  %3088 = vst.msk [vmem:[%s6753_s9 + $0x1d8] sm:$0xff] %vm330_vm0, %v3024_v1 }
 0x2e6   :  { %3089 = vst.msk [vmem:[%s6753_s9 + $0x1e0] sm:$0xff] %vm330_vm0, %v3025_v27  ;;  %3090 = vst.msk [vmem:[%s6753_s9 + $0x1e8] sm:$0xff] %vm330_vm0, %v3026_v49 }
 0x2e7   :  { %3091 = vst.msk [vmem:[%s6753_s9 + $0x1f0] sm:$0xff] %vm330_vm0, %v3027_v45  ;;  %3092 = vst.msk [vmem:[%s6753_s9 + $0x1f8] sm:$0xff] %vm330_vm0, %v3028_v2 }

</bundles_post_ra>
